<compile_context>
chip_gen: v6e
topology: v6e:2x2x1
jax: 0.10.0
libtpu: 0.0.40
codegen_flags: <defaults>
</compile_context>

<pallas_src>
import functools

import numpy as np

import jax
import jax.numpy as jnp
from jax.experimental import pallas as pl
from jax.experimental.pallas import tpu as pltpu


# --------------------------------- kernel ------------------------------------
def _boundary_dice_kernel(pred_ref, mask_ref,
                          inter_ref, inarea_ref, tgtarea_ref,
                          inter_acc, inarea_acc, tgtarea_acc,
                          *, k, level, num_class, cdtype):
    _, _, _, H, W = pred_ref.shape          # block = (1, C, Dt, H, W)
    z = pl.program_id(1)

    @pl.when(z == 0)
    def _init():
        inter_acc[...] = jnp.zeros_like(inter_acc)
        inarea_acc[...] = jnp.zeros_like(inarea_acc)
        tgtarea_acc[...] = jnp.zeros_like(tgtarea_acc)

    labels = mask_ref[0]                    # (Dt, H, W) integer class labels

    # ---- roll-based neighbour shifts with hoisted boundary masks ----------
    row = jax.lax.broadcasted_iota(jnp.int32, (H, W), 0)
    col = jax.lax.broadcasted_iota(jnp.int32, (H, W), 1)

    def _shift_fns(n, axis3, pos, axis2):
        # Returns the two +/-1 neighbour fetchers along `axis3` of a
        # (Dt, H, W) array, zero-filled at the image border.  Masks are built
        # from rolled index maps so the pairing is direction-proof.
        if n == 1:
            zf = lambda x: jnp.zeros_like(x)
            return zf, zf
        if n == 2:
            va, vb = pos >= 1, pos <= 0     # both rolls coincide for n == 2
        else:
            va = jnp.abs(pltpu.roll(pos, 1, axis2) - pos) == 1
            vb = jnp.abs(pltpu.roll(pos, n - 1, axis2) - pos) == 1
        fa = lambda x: jnp.where(va, pltpu.roll(x, 1, axis3), 0)
        fb = lambda x: jnp.where(vb, pltpu.roll(x, n - 1, axis3), 0)
        return fa, fb

    shift_h_a, shift_h_b = _shift_fns(H, 1, row, 0)
    shift_w_a, shift_w_b = _shift_fns(W, 2, col, 1)

    def dilate3x3(x):
        # max over a 3x3 window; out-of-image treated as 0 (== -inf padding
        # of MaxPool for a binary {0,1} image).  Separable in H / W.
        y = jnp.maximum(x, jnp.maximum(shift_h_a(x), shift_h_b(x)))
        return jnp.maximum(y, jnp.maximum(shift_w_a(y), shift_w_b(y)))

    big_l = float(level + 2)                # == len(max_pool) + 1 in cal_dist

    for c in range(num_class):
        is_c = labels == c
        mf = is_c.astype(jnp.float32)                       # (Dt, H, W)
        m = mf if cdtype == jnp.float32 else is_c.astype(cdtype)

        # edge = (conv(m, -laplacian/4, padding=1) > 0): interior boundary
        # pixels of the binary mask (4-connectivity in the H/W plane).
        nsum = shift_h_a(m) + shift_h_b(m) + shift_w_a(m) + shift_w_b(m)
        edge = ((m - 0.25 * nsum) > 0).astype(cdtype)

        # dist = (L - sum_{j=0..level} maxpool_{(2j+1)}(edge)) / L.  All
        # intermediates are small exact integers (safe in bf16 too).
        acc = edge
        cur = edge
        for _ in range(level):
            cur = dilate3x3(cur)
            acc = acc + cur
        dist = (big_l - acc.astype(jnp.float32)) / big_l

        # sigmoid_weight(k, d) = 2 / (1 + exp(k d)) == 1 - tanh(k d / 2)
        weight = 1.0 - jnp.tanh((0.5 * k) * dist)

        o = pred_ref[0, c].astype(jnp.float32)              # (Dt, H, W)
        ow = o * weight
        # reduce over the depth axis only (vreg-wise adds, no XLU), then
        # accumulate elementwise into the (H, W) plane accumulators.
        inter_acc[c] += jnp.sum(ow * mf, axis=0)
        inarea_acc[c] += jnp.sum(ow, axis=0)
        tgtarea_acc[c] += jnp.sum(mf * weight, axis=0)

    @pl.when(z == pl.num_programs(1) - 1)
    def _finalize():
        # one H (sublane) reduction per quantity at the very end; the W sum
        # of the tiny lane-dense (B, C, W) result is done outside the kernel.
        inter_ref[0] = jnp.sum(inter_acc[...], axis=1)      # (C, W)
        inarea_ref[0] = jnp.sum(inarea_acc[...], axis=1)
        tgtarea_ref[0] = jnp.sum(tgtarea_acc[...], axis=1)


# ------------------------------ sizing helpers --------------------------------
def _default_vmem_limit_bytes():
    # v5e / v6e TensorCores have 128 MiB of VMEM, v7x has 64 MiB; the default
    # scoped limit is lower on all of them, so set it explicitly and leave
    # headroom for Mosaic's own scratch.
    try:
        kind = jax.devices()[0].device_kind.lower()
    except Exception:
        kind = ""
    cap_mib = 128 if ("v5" in kind or "v6" in kind) else 64
    return (cap_mib * 3 // 4) * 1024 * 1024


def _pick_depth_block(D, C, H, W, *, pred_bytes, chain_bytes, budget_bytes):
    """Largest depth block Dt (a divisor of D) whose working set fits the VMEM
    budget: double-buffered prediction + mask blocks plus the live temporaries
    of the dilation chain (one class live at a time), on top of the fixed
    (C, H, W) float32 accumulators."""
    hp = -(-H // 8) * 8
    wp = -(-W // 128) * 128
    plane = hp * wp
    fixed = 3 * C * plane * 4                                # accumulators
    per_slice = (2 * (C * plane * pred_bytes + plane * 4)    # pipelined I/O
                 + 8 * plane * max(chain_bytes, 4))          # chain temporaries
    avail = max(budget_bytes - fixed, per_slice)
    dt = int(max(1, min(D, avail // per_slice)))
    while D % dt:
        dt -= 1
    return dt


# --------------------------------- wrapper ------------------------------------
def boundary_soft_dice(outputs, masks, class_weights, *, k=10.0, level=20,
                       depth_block=None, dilation_dtype=None,
                       vmem_limit_bytes=None):
    """Forward pass of BoundarySoftDice (dim=3, dist recomputed per class).

    dilation_dtype: dtype of the edge/dilation chain.  float32 (default) is
    safe on every TPU generation; jnp.bfloat16 is bit-exact for this chain
    (small integers only) and doubles VALU throughput on v6e / v7x.
    """
    B, C, D, H, W = outputs.shape
    if masks.ndim == outputs.ndim:               # PyTorch-style (B,1,D,H,W)
        assert masks.shape[1] == 1
        masks = jnp.squeeze(masks, axis=1)
    assert masks.shape == (B, D, H, W)
    assert jnp.issubdtype(masks.dtype, jnp.integer)

    cdtype = (jnp.dtype(jnp.float32) if dilation_dtype is None
              else jnp.dtype(dilation_dtype))
    vmem_limit = (_default_vmem_limit_bytes() if vmem_limit_bytes is None
                  else int(vmem_limit_bytes))

    dt = _pick_depth_block(D, C, H, W,
                           pred_bytes=jnp.dtype(outputs.dtype).itemsize,
                           chain_bytes=cdtype.itemsize,
                           budget_bytes=vmem_limit // 2)
    if depth_block is not None:
        dt = max(1, min(int(depth_block), D))
    while D % dt:
        dt -= 1
    num_z = D // dt

    kernel = functools.partial(
        _boundary_dice_kernel, k=float(k), level=int(level),
        num_class=int(C), cdtype=cdtype)

    out_shape = [jax.ShapeDtypeStruct((B, C, W), jnp.float32)] * 3

    grid_spec = pltpu.PrefetchScalarGridSpec(
        num_scalar_prefetch=0,
        # B stays a parallel axis so both v7x TensorCores are used when B>=2.
        grid=(B, num_z),
        in_specs=[
            pl.BlockSpec((1, C, dt, H, W), lambda b, z: (b, 0, z, 0, 0)),
            pl.BlockSpec((1, dt, H, W), lambda b, z: (b, z, 0, 0)),
        ],
        out_specs=[
            pl.BlockSpec((1, C, W), lambda b, z: (b, 0, 0)),
            pl.BlockSpec((1, C, W), lambda b, z: (b, 0, 0)),
            pl.BlockSpec((1, C, W), lambda b, z: (b, 0, 0)),
        ],
        scratch_shapes=[
            pltpu.VMEM((C, H, W), jnp.float32),
            pltpu.VMEM((C, H, W), jnp.float32),
            pltpu.VMEM((C, H, W), jnp.float32),
        ],
    )

    inter_w, inarea_w, tgt_w = pl.pallas_call(
        kernel,
        out_shape=out_shape,
        grid_spec=grid_spec,
        compiler_params=pltpu.CompilerParams(
            dimension_semantics=("parallel", "arbitrary"),
            vmem_limit_bytes=vmem_limit),
    )(outputs, masks)

    # Tiny (B, C) tail of BinaryBoundarySoftDice -> plain-JAX glue.
    inter = jnp.sum(inter_w, axis=-1)        # (B, C)
    inarea = jnp.sum(inarea_w, axis=-1)      # (B, C)
    tgtarea = jnp.sum(tgt_w, axis=-1)        # (B, C)

    eps = 1e-6
    loss_bc = 1.0 - 2.0 * inter / (inarea + tgtarea + 2.0 * eps)
    # Exact-zero test is valid: target_area is a sum of non-negative terms
    # that are all zero iff the class is absent from that batch element.
    loss_bc = jnp.where(tgtarea == 0.0, 0.0, loss_bc)
    dice_losses = jnp.mean(loss_bc, axis=0)                  # (C,)
    wn = jnp.asarray(class_weights, jnp.float32)
    wn = wn / jnp.sum(wn)
    weight_dice_loss = jnp.sum(dice_losses * wn)
    # TODO(synk): PyTorch returns per-class losses via .item() (host floats);
    # here they are returned as a JAX array.
    return weight_dice_loss, dice_losses


# --------------------------- pure-JAX reference --------------------------------
def _reference_boundary_soft_dice(outputs, masks, class_weights, *, k, level):
    B, C, D, H, W = outputs.shape
    outputs = outputs.astype(jnp.float32)
    cls = jnp.arange(C, dtype=masks.dtype).reshape(1, C, 1, 1, 1)
    m = (masks[:, None] == cls).astype(jnp.float32)          # (B, C, D, H, W)

    pad = ((0, 0), (0, 0), (0, 0), (1, 1), (1, 1))
    p = jnp.pad(m, pad)
    nsum = (p[..., :-2, 1:-1] + p[..., 2:, 1:-1]
            + p[..., 1:-1, :-2] + p[..., 1:-1, 2:])
    edge = ((m - 0.25 * nsum) > 0).astype(jnp.float32)

    acc = jnp.zeros_like(edge)
    for kk in range(level + 1):
        if kk == 0:
            acc = acc + edge
        else:
            acc = acc + jax.lax.reduce_window(
                edge, -jnp.inf, jax.lax.max,
                window_dimensions=(1, 1, 1, 2 * kk + 1, 2 * kk + 1),
                window_strides=(1, 1, 1, 1, 1),
                padding=((0, 0), (0, 0), (0, 0), (kk, kk), (kk, kk)))
    big_l = float(level + 2)
    dist = (big_l - acc) / big_l
    weight = 2.0 / (1.0 + jnp.exp(k * dist))

    ow = outputs * weight
    inter = jnp.sum(ow * m, axis=(2, 3, 4))                  # (B, C)
    inarea = jnp.sum(ow, axis=(2, 3, 4))
    tgt = jnp.sum(m * weight, axis=(2, 3, 4))
    eps = 1e-6
    loss = 1.0 - 2.0 * inter / (inarea + tgt + 2.0 * eps)
    loss = jnp.where(tgt == 0.0, 0.0, loss)
    dice = jnp.mean(loss, axis=0)
    wn = class_weights.astype(jnp.float32)
    wn = wn / jnp.sum(wn)
    return jnp.sum(dice * wn), dice


# ----------------------------------- main --------------------------------------
if __name__ == "__main__":
    key = jax.random.PRNGKey(0)
    k_out, k_mask = jax.random.split(key)

    B, C, D, H, W = 2, 3, 4, 16, 16     # batch, num_class, depth, height, width
    LEVEL = 4                           # pooling level (constructor arg)
    K_PARAM = 10.0                      # sigmoid-weight sharpness k

    outputs = jax.nn.softmax(
        jax.random.normal(k_out, (B, C, D, H, W), dtype=jnp.float32), axis=1)
    masks = jax.random.randint(k_mask, (B, D, H, W), 0, C, dtype=jnp.int32)
    class_weights = jnp.array([1.0, 2.0, 3.0], dtype=jnp.float32)

    total_loss, per_class = boundary_soft_dice(
        outputs, masks, class_weights, k=K_PARAM, level=LEVEL)
    jax.block_until_ready((total_loss, per_class))

    ref_total, ref_per_class = _reference_boundary_soft_dice(
        outputs, masks, class_weights, k=K_PARAM, level=LEVEL)
    np.testing.assert_allclose(np.asarray(total_loss), np.asarray(ref_total),
                               rtol=5e-4, atol=5e-5)
    np.testing.assert_allclose(np.asarray(per_class), np.asarray(ref_per_class),
                               rtol=5e-4, atol=5e-5)

    print("KERNEL_OK")
</pallas_src>

<mosaic_0001>
module attributes {stable_mosaic.version = 11 : i64} {
  func.func @_boundary_dice_kernel(%arg0: i32, %arg1: i32, %arg2: memref<1x3x4x16x16xf32, #tpu.memory_space<vmem>>, %arg3: memref<1x4x16x16xi32, #tpu.memory_space<vmem>>, %arg4: memref<1x3x16xf32, #tpu.memory_space<vmem>>, %arg5: memref<1x3x16xf32, #tpu.memory_space<vmem>>, %arg6: memref<1x3x16xf32, #tpu.memory_space<vmem>>, %arg7: memref<3x16x16xf32, #tpu.memory_space<vmem>>, %arg8: memref<3x16x16xf32, #tpu.memory_space<vmem>>, %arg9: memref<3x16x16xf32, #tpu.memory_space<vmem>>) attributes {dimension_semantics = [#tpu.dimension_semantics<parallel>, #tpu.dimension_semantics<arbitrary>], iteration_bounds = array<i64: 2, 1>, scalar_prefetch = 0 : i64, scratch_operands = 3 : i64, tpu.core_type = #tpu.core_type<tc>, window_params = [{transform_indices = @transform_0, window_bounds = array<i64: 1, 3, 4, 16, 16>}, {transform_indices = @transform_1, window_bounds = array<i64: 1, 4, 16, 16>}, {transform_indices = @transform_2, window_bounds = array<i64: 1, 3, 16>}, {transform_indices = @transform_3, window_bounds = array<i64: 1, 3, 16>}, {transform_indices = @transform_4, window_bounds = array<i64: 1, 3, 16>}]} {
    %c0_i32 = arith.constant 0 : i32
    %0 = arith.cmpi eq, %arg1, %c0_i32 : i32
    %1 = arith.extui %0 : i1 to i32
    %c0_i32_0 = arith.constant 0 : i32
    %2 = arith.cmpi ne, %1, %c0_i32_0 : i32
    scf.if %2 {
      %cst_227 = arith.constant 0.000000e+00 : f32
      %597 = vector.broadcast %cst_227 : f32 to vector<3x16x16xf32>
      %c0_228 = arith.constant 0 : index
      %c0_229 = arith.constant 0 : index
      %c0_230 = arith.constant 0 : index
      %598 = vector.load %arg7[%c0_228, %c0_229, %c0_230] : memref<3x16x16xf32, #tpu.memory_space<vmem>>, vector<3x16x16xf32>
      tpu.vector_store %arg7[%c0_228, %c0_229, %c0_230], %597 {strides = array<i32>} : memref<3x16x16xf32, #tpu.memory_space<vmem>>, vector<3x16x16xf32>,
      %cst_231 = arith.constant 0.000000e+00 : f32
      %599 = vector.broadcast %cst_231 : f32 to vector<3x16x16xf32>
      %c0_232 = arith.constant 0 : index
      %c0_233 = arith.constant 0 : index
      %c0_234 = arith.constant 0 : index
      %600 = vector.load %arg8[%c0_232, %c0_233, %c0_234] : memref<3x16x16xf32, #tpu.memory_space<vmem>>, vector<3x16x16xf32>
      tpu.vector_store %arg8[%c0_232, %c0_233, %c0_234], %599 {strides = array<i32>} : memref<3x16x16xf32, #tpu.memory_space<vmem>>, vector<3x16x16xf32>,
      %cst_235 = arith.constant 0.000000e+00 : f32
      %601 = vector.broadcast %cst_235 : f32 to vector<3x16x16xf32>
      %c0_236 = arith.constant 0 : index
      %c0_237 = arith.constant 0 : index
      %c0_238 = arith.constant 0 : index
      %602 = vector.load %arg9[%c0_236, %c0_237, %c0_238] : memref<3x16x16xf32, #tpu.memory_space<vmem>>, vector<3x16x16xf32>
      tpu.vector_store %arg9[%c0_236, %c0_237, %c0_238], %601 {strides = array<i32>} : memref<3x16x16xf32, #tpu.memory_space<vmem>>, vector<3x16x16xf32>,
    } else {
    }
    %c0 = arith.constant 0 : index
    %c0_1 = arith.constant 0 : index
    %c0_2 = arith.constant 0 : index
    %c0_3 = arith.constant 0 : index
    %3 = vector.load %arg3[%c0, %c0_1, %c0_2, %c0_3] : memref<1x4x16x16xi32, #tpu.memory_space<vmem>>, vector<1x4x16x16xi32>
    %4 = vector.shape_cast %3 : vector<1x4x16x16xi32> to vector<4x16x16xi32>
    %5 = tpu.iota {dimensions = array<i32: 0>} : vector<16x16xi32>
    %6 = tpu.iota {dimensions = array<i32: 1>} : vector<16x16xi32>
    %c1_i32 = arith.constant 1 : i32
    %7 = tpu.dynamic_rotate %5 by %c1_i32 dim 0 : vector<16x16xi32>, i32 -> vector<16x16xi32>
    %8 = arith.subi %7, %5 : vector<16x16xi32>
    %9 = math.absi %8 : vector<16x16xi32>
    %c1_i32_4 = arith.constant 1 : i32
    %10 = vector.broadcast %c1_i32_4 : i32 to vector<16x16xi32>
    %11 = arith.cmpi eq, %9, %10 : vector<16x16xi32>
    %c15_i32 = arith.constant 15 : i32
    %12 = tpu.dynamic_rotate %5 by %c15_i32 dim 0 : vector<16x16xi32>, i32 -> vector<16x16xi32>
    %13 = arith.subi %12, %5 : vector<16x16xi32>
    %14 = math.absi %13 : vector<16x16xi32>
    %c1_i32_5 = arith.constant 1 : i32
    %15 = vector.broadcast %c1_i32_5 : i32 to vector<16x16xi32>
    %16 = arith.cmpi eq, %14, %15 : vector<16x16xi32>
    %c1_i32_6 = arith.constant 1 : i32
    %17 = tpu.dynamic_rotate %6 by %c1_i32_6 dim 1 : vector<16x16xi32>, i32 -> vector<16x16xi32>
    %18 = arith.subi %17, %6 : vector<16x16xi32>
    %19 = math.absi %18 : vector<16x16xi32>
    %c1_i32_7 = arith.constant 1 : i32
    %20 = vector.broadcast %c1_i32_7 : i32 to vector<16x16xi32>
    %21 = arith.cmpi eq, %19, %20 : vector<16x16xi32>
    %c15_i32_8 = arith.constant 15 : i32
    %22 = tpu.dynamic_rotate %6 by %c15_i32_8 dim 1 : vector<16x16xi32>, i32 -> vector<16x16xi32>
    %23 = arith.subi %22, %6 : vector<16x16xi32>
    %24 = math.absi %23 : vector<16x16xi32>
    %c1_i32_9 = arith.constant 1 : i32
    %25 = vector.broadcast %c1_i32_9 : i32 to vector<16x16xi32>
    %26 = arith.cmpi eq, %24, %25 : vector<16x16xi32>
    %c0_i32_10 = arith.constant 0 : i32
    %27 = vector.broadcast %c0_i32_10 : i32 to vector<4x16x16xi32>
    %28 = arith.cmpi eq, %4, %27 : vector<4x16x16xi32>
    %29 = arith.extui %28 : vector<4x16x16xi1> to vector<4x16x16xi32>
    %30 = arith.sitofp %29 : vector<4x16x16xi32> to vector<4x16x16xf32>
    %c1_i32_11 = arith.constant 1 : i32
    %31 = tpu.dynamic_rotate %30 by %c1_i32_11 dim 1 : vector<4x16x16xf32>, i32 -> vector<4x16x16xf32>
    %c0_i32_12 = arith.constant 0 : i32
    %32 = arith.sitofp %c0_i32_12 : i32 to f32
    %33 = vector.shape_cast %11 : vector<16x16xi1> to vector<1x16x16xi1>
    %34 = vector.broadcast %33 : vector<1x16x16xi1> to vector<4x16x16xi1>
    %35 = vector.broadcast %32 : f32 to vector<4x16x16xf32>
    %36 = arith.select %34, %31, %35 : vector<4x16x16xi1>, vector<4x16x16xf32>
    %c15_i32_13 = arith.constant 15 : i32
    %37 = tpu.dynamic_rotate %30 by %c15_i32_13 dim 1 : vector<4x16x16xf32>, i32 -> vector<4x16x16xf32>
    %c0_i32_14 = arith.constant 0 : i32
    %38 = arith.sitofp %c0_i32_14 : i32 to f32
    %39 = vector.shape_cast %16 : vector<16x16xi1> to vector<1x16x16xi1>
    %40 = vector.broadcast %39 : vector<1x16x16xi1> to vector<4x16x16xi1>
    %41 = vector.broadcast %38 : f32 to vector<4x16x16xf32>
    %42 = arith.select %40, %37, %41 : vector<4x16x16xi1>, vector<4x16x16xf32>
    %43 = arith.addf %36, %42 : vector<4x16x16xf32>
    %c1_i32_15 = arith.constant 1 : i32
    %44 = tpu.dynamic_rotate %30 by %c1_i32_15 dim 2 : vector<4x16x16xf32>, i32 -> vector<4x16x16xf32>
    %c0_i32_16 = arith.constant 0 : i32
    %45 = arith.sitofp %c0_i32_16 : i32 to f32
    %46 = vector.shape_cast %21 : vector<16x16xi1> to vector<1x16x16xi1>
    %47 = vector.broadcast %46 : vector<1x16x16xi1> to vector<4x16x16xi1>
    %48 = vector.broadcast %45 : f32 to vector<4x16x16xf32>
    %49 = arith.select %47, %44, %48 : vector<4x16x16xi1>, vector<4x16x16xf32>
    %50 = arith.addf %43, %49 : vector<4x16x16xf32>
    %c15_i32_17 = arith.constant 15 : i32
    %51 = tpu.dynamic_rotate %30 by %c15_i32_17 dim 2 : vector<4x16x16xf32>, i32 -> vector<4x16x16xf32>
    %c0_i32_18 = arith.constant 0 : i32
    %52 = arith.sitofp %c0_i32_18 : i32 to f32
    %53 = vector.shape_cast %26 : vector<16x16xi1> to vector<1x16x16xi1>
    %54 = vector.broadcast %53 : vector<1x16x16xi1> to vector<4x16x16xi1>
    %55 = vector.broadcast %52 : f32 to vector<4x16x16xf32>
    %56 = arith.select %54, %51, %55 : vector<4x16x16xi1>, vector<4x16x16xf32>
    %57 = arith.addf %50, %56 : vector<4x16x16xf32>
    %cst = arith.constant 2.500000e-01 : f32
    %58 = vector.broadcast %cst : f32 to vector<4x16x16xf32>
    %59 = arith.mulf %58, %57 : vector<4x16x16xf32>
    %60 = arith.subf %30, %59 : vector<4x16x16xf32>
    %cst_19 = arith.constant 0.000000e+00 : f32
    %61 = vector.broadcast %cst_19 : f32 to vector<4x16x16xf32>
    %62 = arith.cmpf ogt, %60, %61 : vector<4x16x16xf32>
    %63 = arith.extui %62 : vector<4x16x16xi1> to vector<4x16x16xi32>
    %64 = arith.sitofp %63 : vector<4x16x16xi32> to vector<4x16x16xf32>
    %c1_i32_20 = arith.constant 1 : i32
    %65 = tpu.dynamic_rotate %64 by %c1_i32_20 dim 1 : vector<4x16x16xf32>, i32 -> vector<4x16x16xf32>
    %c0_i32_21 = arith.constant 0 : i32
    %66 = arith.sitofp %c0_i32_21 : i32 to f32
    %67 = vector.shape_cast %11 : vector<16x16xi1> to vector<1x16x16xi1>
    %68 = vector.broadcast %67 : vector<1x16x16xi1> to vector<4x16x16xi1>
    %69 = vector.broadcast %66 : f32 to vector<4x16x16xf32>
    %70 = arith.select %68, %65, %69 : vector<4x16x16xi1>, vector<4x16x16xf32>
    %c15_i32_22 = arith.constant 15 : i32
    %71 = tpu.dynamic_rotate %64 by %c15_i32_22 dim 1 : vector<4x16x16xf32>, i32 -> vector<4x16x16xf32>
    %c0_i32_23 = arith.constant 0 : i32
    %72 = arith.sitofp %c0_i32_23 : i32 to f32
    %73 = vector.shape_cast %16 : vector<16x16xi1> to vector<1x16x16xi1>
    %74 = vector.broadcast %73 : vector<1x16x16xi1> to vector<4x16x16xi1>
    %75 = vector.broadcast %72 : f32 to vector<4x16x16xf32>
    %76 = arith.select %74, %71, %75 : vector<4x16x16xi1>, vector<4x16x16xf32>
    %77 = arith.maximumf %70, %76 : vector<4x16x16xf32>
    %78 = arith.maximumf %64, %77 : vector<4x16x16xf32>
    %c1_i32_24 = arith.constant 1 : i32
    %79 = tpu.dynamic_rotate %78 by %c1_i32_24 dim 2 : vector<4x16x16xf32>, i32 -> vector<4x16x16xf32>
    %c0_i32_25 = arith.constant 0 : i32
    %80 = arith.sitofp %c0_i32_25 : i32 to f32
    %81 = vector.shape_cast %21 : vector<16x16xi1> to vector<1x16x16xi1>
    %82 = vector.broadcast %81 : vector<1x16x16xi1> to vector<4x16x16xi1>
    %83 = vector.broadcast %80 : f32 to vector<4x16x16xf32>
    %84 = arith.select %82, %79, %83 : vector<4x16x16xi1>, vector<4x16x16xf32>
    %c15_i32_26 = arith.constant 15 : i32
    %85 = tpu.dynamic_rotate %78 by %c15_i32_26 dim 2 : vector<4x16x16xf32>, i32 -> vector<4x16x16xf32>
    %c0_i32_27 = arith.constant 0 : i32
    %86 = arith.sitofp %c0_i32_27 : i32 to f32
    %87 = vector.shape_cast %26 : vector<16x16xi1> to vector<1x16x16xi1>
    %88 = vector.broadcast %87 : vector<1x16x16xi1> to vector<4x16x16xi1>
    %89 = vector.broadcast %86 : f32 to vector<4x16x16xf32>
    %90 = arith.select %88, %85, %89 : vector<4x16x16xi1>, vector<4x16x16xf32>
    %91 = arith.maximumf %84, %90 : vector<4x16x16xf32>
    %92 = arith.maximumf %78, %91 : vector<4x16x16xf32>
    %93 = arith.addf %64, %92 : vector<4x16x16xf32>
    %c1_i32_28 = arith.constant 1 : i32
    %94 = tpu.dynamic_rotate %92 by %c1_i32_28 dim 1 : vector<4x16x16xf32>, i32 -> vector<4x16x16xf32>
    %c0_i32_29 = arith.constant 0 : i32
    %95 = arith.sitofp %c0_i32_29 : i32 to f32
    %96 = vector.shape_cast %11 : vector<16x16xi1> to vector<1x16x16xi1>
    %97 = vector.broadcast %96 : vector<1x16x16xi1> to vector<4x16x16xi1>
    %98 = vector.broadcast %95 : f32 to vector<4x16x16xf32>
    %99 = arith.select %97, %94, %98 : vector<4x16x16xi1>, vector<4x16x16xf32>
    %c15_i32_30 = arith.constant 15 : i32
    %100 = tpu.dynamic_rotate %92 by %c15_i32_30 dim 1 : vector<4x16x16xf32>, i32 -> vector<4x16x16xf32>
    %c0_i32_31 = arith.constant 0 : i32
    %101 = arith.sitofp %c0_i32_31 : i32 to f32
    %102 = vector.shape_cast %16 : vector<16x16xi1> to vector<1x16x16xi1>
    %103 = vector.broadcast %102 : vector<1x16x16xi1> to vector<4x16x16xi1>
    %104 = vector.broadcast %101 : f32 to vector<4x16x16xf32>
    %105 = arith.select %103, %100, %104 : vector<4x16x16xi1>, vector<4x16x16xf32>
    %106 = arith.maximumf %99, %105 : vector<4x16x16xf32>
    %107 = arith.maximumf %92, %106 : vector<4x16x16xf32>
    %c1_i32_32 = arith.constant 1 : i32
    %108 = tpu.dynamic_rotate %107 by %c1_i32_32 dim 2 : vector<4x16x16xf32>, i32 -> vector<4x16x16xf32>
    %c0_i32_33 = arith.constant 0 : i32
    %109 = arith.sitofp %c0_i32_33 : i32 to f32
    %110 = vector.shape_cast %21 : vector<16x16xi1> to vector<1x16x16xi1>
    %111 = vector.broadcast %110 : vector<1x16x16xi1> to vector<4x16x16xi1>
    %112 = vector.broadcast %109 : f32 to vector<4x16x16xf32>
    %113 = arith.select %111, %108, %112 : vector<4x16x16xi1>, vector<4x16x16xf32>
    %c15_i32_34 = arith.constant 15 : i32
    %114 = tpu.dynamic_rotate %107 by %c15_i32_34 dim 2 : vector<4x16x16xf32>, i32 -> vector<4x16x16xf32>
    %c0_i32_35 = arith.constant 0 : i32
    %115 = arith.sitofp %c0_i32_35 : i32 to f32
    %116 = vector.shape_cast %26 : vector<16x16xi1> to vector<1x16x16xi1>
    %117 = vector.broadcast %116 : vector<1x16x16xi1> to vector<4x16x16xi1>
    %118 = vector.broadcast %115 : f32 to vector<4x16x16xf32>
    %119 = arith.select %117, %114, %118 : vector<4x16x16xi1>, vector<4x16x16xf32>
    %120 = arith.maximumf %113, %119 : vector<4x16x16xf32>
    %121 = arith.maximumf %107, %120 : vector<4x16x16xf32>
    %122 = arith.addf %93, %121 : vector<4x16x16xf32>
    %c1_i32_36 = arith.constant 1 : i32
    %123 = tpu.dynamic_rotate %121 by %c1_i32_36 dim 1 : vector<4x16x16xf32>, i32 -> vector<4x16x16xf32>
    %c0_i32_37 = arith.constant 0 : i32
    %124 = arith.sitofp %c0_i32_37 : i32 to f32
    %125 = vector.shape_cast %11 : vector<16x16xi1> to vector<1x16x16xi1>
    %126 = vector.broadcast %125 : vector<1x16x16xi1> to vector<4x16x16xi1>
    %127 = vector.broadcast %124 : f32 to vector<4x16x16xf32>
    %128 = arith.select %126, %123, %127 : vector<4x16x16xi1>, vector<4x16x16xf32>
    %c15_i32_38 = arith.constant 15 : i32
    %129 = tpu.dynamic_rotate %121 by %c15_i32_38 dim 1 : vector<4x16x16xf32>, i32 -> vector<4x16x16xf32>
    %c0_i32_39 = arith.constant 0 : i32
    %130 = arith.sitofp %c0_i32_39 : i32 to f32
    %131 = vector.shape_cast %16 : vector<16x16xi1> to vector<1x16x16xi1>
    %132 = vector.broadcast %131 : vector<1x16x16xi1> to vector<4x16x16xi1>
    %133 = vector.broadcast %130 : f32 to vector<4x16x16xf32>
    %134 = arith.select %132, %129, %133 : vector<4x16x16xi1>, vector<4x16x16xf32>
    %135 = arith.maximumf %128, %134 : vector<4x16x16xf32>
    %136 = arith.maximumf %121, %135 : vector<4x16x16xf32>
    %c1_i32_40 = arith.constant 1 : i32
    %137 = tpu.dynamic_rotate %136 by %c1_i32_40 dim 2 : vector<4x16x16xf32>, i32 -> vector<4x16x16xf32>
    %c0_i32_41 = arith.constant 0 : i32
    %138 = arith.sitofp %c0_i32_41 : i32 to f32
    %139 = vector.shape_cast %21 : vector<16x16xi1> to vector<1x16x16xi1>
    %140 = vector.broadcast %139 : vector<1x16x16xi1> to vector<4x16x16xi1>
    %141 = vector.broadcast %138 : f32 to vector<4x16x16xf32>
    %142 = arith.select %140, %137, %141 : vector<4x16x16xi1>, vector<4x16x16xf32>
    %c15_i32_42 = arith.constant 15 : i32
    %143 = tpu.dynamic_rotate %136 by %c15_i32_42 dim 2 : vector<4x16x16xf32>, i32 -> vector<4x16x16xf32>
    %c0_i32_43 = arith.constant 0 : i32
    %144 = arith.sitofp %c0_i32_43 : i32 to f32
    %145 = vector.shape_cast %26 : vector<16x16xi1> to vector<1x16x16xi1>
    %146 = vector.broadcast %145 : vector<1x16x16xi1> to vector<4x16x16xi1>
    %147 = vector.broadcast %144 : f32 to vector<4x16x16xf32>
    %148 = arith.select %146, %143, %147 : vector<4x16x16xi1>, vector<4x16x16xf32>
    %149 = arith.maximumf %142, %148 : vector<4x16x16xf32>
    %150 = arith.maximumf %136, %149 : vector<4x16x16xf32>
    %151 = arith.addf %122, %150 : vector<4x16x16xf32>
    %c1_i32_44 = arith.constant 1 : i32
    %152 = tpu.dynamic_rotate %150 by %c1_i32_44 dim 1 : vector<4x16x16xf32>, i32 -> vector<4x16x16xf32>
    %c0_i32_45 = arith.constant 0 : i32
    %153 = arith.sitofp %c0_i32_45 : i32 to f32
    %154 = vector.shape_cast %11 : vector<16x16xi1> to vector<1x16x16xi1>
    %155 = vector.broadcast %154 : vector<1x16x16xi1> to vector<4x16x16xi1>
    %156 = vector.broadcast %153 : f32 to vector<4x16x16xf32>
    %157 = arith.select %155, %152, %156 : vector<4x16x16xi1>, vector<4x16x16xf32>
    %c15_i32_46 = arith.constant 15 : i32
    %158 = tpu.dynamic_rotate %150 by %c15_i32_46 dim 1 : vector<4x16x16xf32>, i32 -> vector<4x16x16xf32>
    %c0_i32_47 = arith.constant 0 : i32
    %159 = arith.sitofp %c0_i32_47 : i32 to f32
    %160 = vector.shape_cast %16 : vector<16x16xi1> to vector<1x16x16xi1>
    %161 = vector.broadcast %160 : vector<1x16x16xi1> to vector<4x16x16xi1>
    %162 = vector.broadcast %159 : f32 to vector<4x16x16xf32>
    %163 = arith.select %161, %158, %162 : vector<4x16x16xi1>, vector<4x16x16xf32>
    %164 = arith.maximumf %157, %163 : vector<4x16x16xf32>
    %165 = arith.maximumf %150, %164 : vector<4x16x16xf32>
    %c1_i32_48 = arith.constant 1 : i32
    %166 = tpu.dynamic_rotate %165 by %c1_i32_48 dim 2 : vector<4x16x16xf32>, i32 -> vector<4x16x16xf32>
    %c0_i32_49 = arith.constant 0 : i32
    %167 = arith.sitofp %c0_i32_49 : i32 to f32
    %168 = vector.shape_cast %21 : vector<16x16xi1> to vector<1x16x16xi1>
    %169 = vector.broadcast %168 : vector<1x16x16xi1> to vector<4x16x16xi1>
    %170 = vector.broadcast %167 : f32 to vector<4x16x16xf32>
    %171 = arith.select %169, %166, %170 : vector<4x16x16xi1>, vector<4x16x16xf32>
    %c15_i32_50 = arith.constant 15 : i32
    %172 = tpu.dynamic_rotate %165 by %c15_i32_50 dim 2 : vector<4x16x16xf32>, i32 -> vector<4x16x16xf32>
    %c0_i32_51 = arith.constant 0 : i32
    %173 = arith.sitofp %c0_i32_51 : i32 to f32
    %174 = vector.shape_cast %26 : vector<16x16xi1> to vector<1x16x16xi1>
    %175 = vector.broadcast %174 : vector<1x16x16xi1> to vector<4x16x16xi1>
    %176 = vector.broadcast %173 : f32 to vector<4x16x16xf32>
    %177 = arith.select %175, %172, %176 : vector<4x16x16xi1>, vector<4x16x16xf32>
    %178 = arith.maximumf %171, %177 : vector<4x16x16xf32>
    %179 = arith.maximumf %165, %178 : vector<4x16x16xf32>
    %180 = arith.addf %151, %179 : vector<4x16x16xf32>
    %cst_52 = arith.constant 6.000000e+00 : f32
    %181 = vector.broadcast %cst_52 : f32 to vector<4x16x16xf32>
    %182 = arith.subf %181, %180 : vector<4x16x16xf32>
    %cst_53 = arith.constant 6.000000e+00 : f32
    %183 = vector.broadcast %cst_53 : f32 to vector<4x16x16xf32>
    %184 = arith.divf %182, %183 : vector<4x16x16xf32>
    %cst_54 = arith.constant 5.000000e+00 : f32
    %185 = vector.broadcast %cst_54 : f32 to vector<4x16x16xf32>
    %186 = arith.mulf %185, %184 : vector<4x16x16xf32>
    %187 = math.tanh %186 : vector<4x16x16xf32>
    %cst_55 = arith.constant 1.000000e+00 : f32
    %188 = vector.broadcast %cst_55 : f32 to vector<4x16x16xf32>
    %189 = arith.subf %188, %187 : vector<4x16x16xf32>
    %c0_56 = arith.constant 0 : index
    %c0_57 = arith.constant 0 : index
    %c0_58 = arith.constant 0 : index
    %c0_59 = arith.constant 0 : index
    %c0_60 = arith.constant 0 : index
    %190 = vector.load %arg2[%c0_56, %c0_57, %c0_58, %c0_59, %c0_60] : memref<1x3x4x16x16xf32, #tpu.memory_space<vmem>>, vector<1x1x4x16x16xf32>
    %191 = vector.shape_cast %190 : vector<1x1x4x16x16xf32> to vector<4x16x16xf32>
    %192 = arith.mulf %191, %189 : vector<4x16x16xf32>
    %c0_61 = arith.constant 0 : index
    %c0_62 = arith.constant 0 : index
    %c0_63 = arith.constant 0 : index
    %193 = vector.load %arg7[%c0_61, %c0_62, %c0_63] : memref<3x16x16xf32, #tpu.memory_space<vmem>>, vector<1x16x16xf32>
    %194 = vector.shape_cast %193 : vector<1x16x16xf32> to vector<16x16xf32>
    %195 = arith.mulf %192, %30 : vector<4x16x16xf32>
    %cst_64 = arith.constant dense<0.000000e+00> : vector<16x16xf32>
    %196 = vector.multi_reduction <add>, %195, %cst_64 [0] : vector<4x16x16xf32> to vector<16x16xf32>
    %197 = arith.addf %194, %196 : vector<16x16xf32>
    %c0_65 = arith.constant 0 : index
    %c0_66 = arith.constant 0 : index
    %c0_67 = arith.constant 0 : index
    %198 = vector.load %arg7[%c0_65, %c0_66, %c0_67] : memref<3x16x16xf32, #tpu.memory_space<vmem>>, vector<1x16x16xf32>
    %199 = vector.shape_cast %198 : vector<1x16x16xf32> to vector<16x16xf32>
    %200 = vector.shape_cast %197 : vector<16x16xf32> to vector<1x16x16xf32>
    tpu.vector_store %arg7[%c0_65, %c0_66, %c0_67], %200 {strides = array<i32>} : memref<3x16x16xf32, #tpu.memory_space<vmem>>, vector<1x16x16xf32>,
    %c0_68 = arith.constant 0 : index
    %c0_69 = arith.constant 0 : index
    %c0_70 = arith.constant 0 : index
    %201 = vector.load %arg8[%c0_68, %c0_69, %c0_70] : memref<3x16x16xf32, #tpu.memory_space<vmem>>, vector<1x16x16xf32>
    %202 = vector.shape_cast %201 : vector<1x16x16xf32> to vector<16x16xf32>
    %cst_71 = arith.constant dense<0.000000e+00> : vector<16x16xf32>
    %203 = vector.multi_reduction <add>, %192, %cst_71 [0] : vector<4x16x16xf32> to vector<16x16xf32>
    %204 = arith.addf %202, %203 : vector<16x16xf32>
    %c0_72 = arith.constant 0 : index
    %c0_73 = arith.constant 0 : index
    %c0_74 = arith.constant 0 : index
    %205 = vector.load %arg8[%c0_72, %c0_73, %c0_74] : memref<3x16x16xf32, #tpu.memory_space<vmem>>, vector<1x16x16xf32>
    %206 = vector.shape_cast %205 : vector<1x16x16xf32> to vector<16x16xf32>
    %207 = vector.shape_cast %204 : vector<16x16xf32> to vector<1x16x16xf32>
    tpu.vector_store %arg8[%c0_72, %c0_73, %c0_74], %207 {strides = array<i32>} : memref<3x16x16xf32, #tpu.memory_space<vmem>>, vector<1x16x16xf32>,
    %c0_75 = arith.constant 0 : index
    %c0_76 = arith.constant 0 : index
    %c0_77 = arith.constant 0 : index
    %208 = vector.load %arg9[%c0_75, %c0_76, %c0_77] : memref<3x16x16xf32, #tpu.memory_space<vmem>>, vector<1x16x16xf32>
    %209 = vector.shape_cast %208 : vector<1x16x16xf32> to vector<16x16xf32>
    %210 = arith.mulf %30, %189 : vector<4x16x16xf32>
    %cst_78 = arith.constant dense<0.000000e+00> : vector<16x16xf32>
    %211 = vector.multi_reduction <add>, %210, %cst_78 [0] : vector<4x16x16xf32> to vector<16x16xf32>
    %212 = arith.addf %209, %211 : vector<16x16xf32>
    %c0_79 = arith.constant 0 : index
    %c0_80 = arith.constant 0 : index
    %c0_81 = arith.constant 0 : index
    %213 = vector.load %arg9[%c0_79, %c0_80, %c0_81] : memref<3x16x16xf32, #tpu.memory_space<vmem>>, vector<1x16x16xf32>
    %214 = vector.shape_cast %213 : vector<1x16x16xf32> to vector<16x16xf32>
    %215 = vector.shape_cast %212 : vector<16x16xf32> to vector<1x16x16xf32>
    tpu.vector_store %arg9[%c0_79, %c0_80, %c0_81], %215 {strides = array<i32>} : memref<3x16x16xf32, #tpu.memory_space<vmem>>, vector<1x16x16xf32>,
    %c1_i32_82 = arith.constant 1 : i32
    %216 = vector.broadcast %c1_i32_82 : i32 to vector<4x16x16xi32>
    %217 = arith.cmpi eq, %4, %216 : vector<4x16x16xi32>
    %218 = arith.extui %217 : vector<4x16x16xi1> to vector<4x16x16xi32>
    %219 = arith.sitofp %218 : vector<4x16x16xi32> to vector<4x16x16xf32>
    %c1_i32_83 = arith.constant 1 : i32
    %220 = tpu.dynamic_rotate %219 by %c1_i32_83 dim 1 : vector<4x16x16xf32>, i32 -> vector<4x16x16xf32>
    %c0_i32_84 = arith.constant 0 : i32
    %221 = arith.sitofp %c0_i32_84 : i32 to f32
    %222 = vector.shape_cast %11 : vector<16x16xi1> to vector<1x16x16xi1>
    %223 = vector.broadcast %222 : vector<1x16x16xi1> to vector<4x16x16xi1>
    %224 = vector.broadcast %221 : f32 to vector<4x16x16xf32>
    %225 = arith.select %223, %220, %224 : vector<4x16x16xi1>, vector<4x16x16xf32>
    %c15_i32_85 = arith.constant 15 : i32
    %226 = tpu.dynamic_rotate %219 by %c15_i32_85 dim 1 : vector<4x16x16xf32>, i32 -> vector<4x16x16xf32>
    %c0_i32_86 = arith.constant 0 : i32
    %227 = arith.sitofp %c0_i32_86 : i32 to f32
    %228 = vector.shape_cast %16 : vector<16x16xi1> to vector<1x16x16xi1>
    %229 = vector.broadcast %228 : vector<1x16x16xi1> to vector<4x16x16xi1>
    %230 = vector.broadcast %227 : f32 to vector<4x16x16xf32>
    %231 = arith.select %229, %226, %230 : vector<4x16x16xi1>, vector<4x16x16xf32>
    %232 = arith.addf %225, %231 : vector<4x16x16xf32>
    %c1_i32_87 = arith.constant 1 : i32
    %233 = tpu.dynamic_rotate %219 by %c1_i32_87 dim 2 : vector<4x16x16xf32>, i32 -> vector<4x16x16xf32>
    %c0_i32_88 = arith.constant 0 : i32
    %234 = arith.sitofp %c0_i32_88 : i32 to f32
    %235 = vector.shape_cast %21 : vector<16x16xi1> to vector<1x16x16xi1>
    %236 = vector.broadcast %235 : vector<1x16x16xi1> to vector<4x16x16xi1>
    %237 = vector.broadcast %234 : f32 to vector<4x16x16xf32>
    %238 = arith.select %236, %233, %237 : vector<4x16x16xi1>, vector<4x16x16xf32>
    %239 = arith.addf %232, %238 : vector<4x16x16xf32>
    %c15_i32_89 = arith.constant 15 : i32
    %240 = tpu.dynamic_rotate %219 by %c15_i32_89 dim 2 : vector<4x16x16xf32>, i32 -> vector<4x16x16xf32>
    %c0_i32_90 = arith.constant 0 : i32
    %241 = arith.sitofp %c0_i32_90 : i32 to f32
    %242 = vector.shape_cast %26 : vector<16x16xi1> to vector<1x16x16xi1>
    %243 = vector.broadcast %242 : vector<1x16x16xi1> to vector<4x16x16xi1>
    %244 = vector.broadcast %241 : f32 to vector<4x16x16xf32>
    %245 = arith.select %243, %240, %244 : vector<4x16x16xi1>, vector<4x16x16xf32>
    %246 = arith.addf %239, %245 : vector<4x16x16xf32>
    %cst_91 = arith.constant 2.500000e-01 : f32
    %247 = vector.broadcast %cst_91 : f32 to vector<4x16x16xf32>
    %248 = arith.mulf %247, %246 : vector<4x16x16xf32>
    %249 = arith.subf %219, %248 : vector<4x16x16xf32>
    %cst_92 = arith.constant 0.000000e+00 : f32
    %250 = vector.broadcast %cst_92 : f32 to vector<4x16x16xf32>
    %251 = arith.cmpf ogt, %249, %250 : vector<4x16x16xf32>
    %252 = arith.extui %251 : vector<4x16x16xi1> to vector<4x16x16xi32>
    %253 = arith.sitofp %252 : vector<4x16x16xi32> to vector<4x16x16xf32>
    %c1_i32_93 = arith.constant 1 : i32
    %254 = tpu.dynamic_rotate %253 by %c1_i32_93 dim 1 : vector<4x16x16xf32>, i32 -> vector<4x16x16xf32>
    %c0_i32_94 = arith.constant 0 : i32
    %255 = arith.sitofp %c0_i32_94 : i32 to f32
    %256 = vector.shape_cast %11 : vector<16x16xi1> to vector<1x16x16xi1>
    %257 = vector.broadcast %256 : vector<1x16x16xi1> to vector<4x16x16xi1>
    %258 = vector.broadcast %255 : f32 to vector<4x16x16xf32>
    %259 = arith.select %257, %254, %258 : vector<4x16x16xi1>, vector<4x16x16xf32>
    %c15_i32_95 = arith.constant 15 : i32
    %260 = tpu.dynamic_rotate %253 by %c15_i32_95 dim 1 : vector<4x16x16xf32>, i32 -> vector<4x16x16xf32>
    %c0_i32_96 = arith.constant 0 : i32
    %261 = arith.sitofp %c0_i32_96 : i32 to f32
    %262 = vector.shape_cast %16 : vector<16x16xi1> to vector<1x16x16xi1>
    %263 = vector.broadcast %262 : vector<1x16x16xi1> to vector<4x16x16xi1>
    %264 = vector.broadcast %261 : f32 to vector<4x16x16xf32>
    %265 = arith.select %263, %260, %264 : vector<4x16x16xi1>, vector<4x16x16xf32>
    %266 = arith.maximumf %259, %265 : vector<4x16x16xf32>
    %267 = arith.maximumf %253, %266 : vector<4x16x16xf32>
    %c1_i32_97 = arith.constant 1 : i32
    %268 = tpu.dynamic_rotate %267 by %c1_i32_97 dim 2 : vector<4x16x16xf32>, i32 -> vector<4x16x16xf32>
    %c0_i32_98 = arith.constant 0 : i32
    %269 = arith.sitofp %c0_i32_98 : i32 to f32
    %270 = vector.shape_cast %21 : vector<16x16xi1> to vector<1x16x16xi1>
    %271 = vector.broadcast %270 : vector<1x16x16xi1> to vector<4x16x16xi1>
    %272 = vector.broadcast %269 : f32 to vector<4x16x16xf32>
    %273 = arith.select %271, %268, %272 : vector<4x16x16xi1>, vector<4x16x16xf32>
    %c15_i32_99 = arith.constant 15 : i32
    %274 = tpu.dynamic_rotate %267 by %c15_i32_99 dim 2 : vector<4x16x16xf32>, i32 -> vector<4x16x16xf32>
    %c0_i32_100 = arith.constant 0 : i32
    %275 = arith.sitofp %c0_i32_100 : i32 to f32
    %276 = vector.shape_cast %26 : vector<16x16xi1> to vector<1x16x16xi1>
    %277 = vector.broadcast %276 : vector<1x16x16xi1> to vector<4x16x16xi1>
    %278 = vector.broadcast %275 : f32 to vector<4x16x16xf32>
    %279 = arith.select %277, %274, %278 : vector<4x16x16xi1>, vector<4x16x16xf32>
    %280 = arith.maximumf %273, %279 : vector<4x16x16xf32>
    %281 = arith.maximumf %267, %280 : vector<4x16x16xf32>
    %282 = arith.addf %253, %281 : vector<4x16x16xf32>
    %c1_i32_101 = arith.constant 1 : i32
    %283 = tpu.dynamic_rotate %281 by %c1_i32_101 dim 1 : vector<4x16x16xf32>, i32 -> vector<4x16x16xf32>
    %c0_i32_102 = arith.constant 0 : i32
    %284 = arith.sitofp %c0_i32_102 : i32 to f32
    %285 = vector.shape_cast %11 : vector<16x16xi1> to vector<1x16x16xi1>
    %286 = vector.broadcast %285 : vector<1x16x16xi1> to vector<4x16x16xi1>
    %287 = vector.broadcast %284 : f32 to vector<4x16x16xf32>
    %288 = arith.select %286, %283, %287 : vector<4x16x16xi1>, vector<4x16x16xf32>
    %c15_i32_103 = arith.constant 15 : i32
    %289 = tpu.dynamic_rotate %281 by %c15_i32_103 dim 1 : vector<4x16x16xf32>, i32 -> vector<4x16x16xf32>
    %c0_i32_104 = arith.constant 0 : i32
    %290 = arith.sitofp %c0_i32_104 : i32 to f32
    %291 = vector.shape_cast %16 : vector<16x16xi1> to vector<1x16x16xi1>
    %292 = vector.broadcast %291 : vector<1x16x16xi1> to vector<4x16x16xi1>
    %293 = vector.broadcast %290 : f32 to vector<4x16x16xf32>
    %294 = arith.select %292, %289, %293 : vector<4x16x16xi1>, vector<4x16x16xf32>
    %295 = arith.maximumf %288, %294 : vector<4x16x16xf32>
    %296 = arith.maximumf %281, %295 : vector<4x16x16xf32>
    %c1_i32_105 = arith.constant 1 : i32
    %297 = tpu.dynamic_rotate %296 by %c1_i32_105 dim 2 : vector<4x16x16xf32>, i32 -> vector<4x16x16xf32>
    %c0_i32_106 = arith.constant 0 : i32
    %298 = arith.sitofp %c0_i32_106 : i32 to f32
    %299 = vector.shape_cast %21 : vector<16x16xi1> to vector<1x16x16xi1>
    %300 = vector.broadcast %299 : vector<1x16x16xi1> to vector<4x16x16xi1>
    %301 = vector.broadcast %298 : f32 to vector<4x16x16xf32>
    %302 = arith.select %300, %297, %301 : vector<4x16x16xi1>, vector<4x16x16xf32>
    %c15_i32_107 = arith.constant 15 : i32
    %303 = tpu.dynamic_rotate %296 by %c15_i32_107 dim 2 : vector<4x16x16xf32>, i32 -> vector<4x16x16xf32>
    %c0_i32_108 = arith.constant 0 : i32
    %304 = arith.sitofp %c0_i32_108 : i32 to f32
    %305 = vector.shape_cast %26 : vector<16x16xi1> to vector<1x16x16xi1>
    %306 = vector.broadcast %305 : vector<1x16x16xi1> to vector<4x16x16xi1>
    %307 = vector.broadcast %304 : f32 to vector<4x16x16xf32>
    %308 = arith.select %306, %303, %307 : vector<4x16x16xi1>, vector<4x16x16xf32>
    %309 = arith.maximumf %302, %308 : vector<4x16x16xf32>
    %310 = arith.maximumf %296, %309 : vector<4x16x16xf32>
    %311 = arith.addf %282, %310 : vector<4x16x16xf32>
    %c1_i32_109 = arith.constant 1 : i32
    %312 = tpu.dynamic_rotate %310 by %c1_i32_109 dim 1 : vector<4x16x16xf32>, i32 -> vector<4x16x16xf32>
    %c0_i32_110 = arith.constant 0 : i32
    %313 = arith.sitofp %c0_i32_110 : i32 to f32
    %314 = vector.shape_cast %11 : vector<16x16xi1> to vector<1x16x16xi1>
    %315 = vector.broadcast %314 : vector<1x16x16xi1> to vector<4x16x16xi1>
    %316 = vector.broadcast %313 : f32 to vector<4x16x16xf32>
    %317 = arith.select %315, %312, %316 : vector<4x16x16xi1>, vector<4x16x16xf32>
    %c15_i32_111 = arith.constant 15 : i32
    %318 = tpu.dynamic_rotate %310 by %c15_i32_111 dim 1 : vector<4x16x16xf32>, i32 -> vector<4x16x16xf32>
    %c0_i32_112 = arith.constant 0 : i32
    %319 = arith.sitofp %c0_i32_112 : i32 to f32
    %320 = vector.shape_cast %16 : vector<16x16xi1> to vector<1x16x16xi1>
    %321 = vector.broadcast %320 : vector<1x16x16xi1> to vector<4x16x16xi1>
    %322 = vector.broadcast %319 : f32 to vector<4x16x16xf32>
    %323 = arith.select %321, %318, %322 : vector<4x16x16xi1>, vector<4x16x16xf32>
    %324 = arith.maximumf %317, %323 : vector<4x16x16xf32>
    %325 = arith.maximumf %310, %324 : vector<4x16x16xf32>
    %c1_i32_113 = arith.constant 1 : i32
    %326 = tpu.dynamic_rotate %325 by %c1_i32_113 dim 2 : vector<4x16x16xf32>, i32 -> vector<4x16x16xf32>
    %c0_i32_114 = arith.constant 0 : i32
    %327 = arith.sitofp %c0_i32_114 : i32 to f32
    %328 = vector.shape_cast %21 : vector<16x16xi1> to vector<1x16x16xi1>
    %329 = vector.broadcast %328 : vector<1x16x16xi1> to vector<4x16x16xi1>
    %330 = vector.broadcast %327 : f32 to vector<4x16x16xf32>
    %331 = arith.select %329, %326, %330 : vector<4x16x16xi1>, vector<4x16x16xf32>
    %c15_i32_115 = arith.constant 15 : i32
    %332 = tpu.dynamic_rotate %325 by %c15_i32_115 dim 2 : vector<4x16x16xf32>, i32 -> vector<4x16x16xf32>
    %c0_i32_116 = arith.constant 0 : i32
    %333 = arith.sitofp %c0_i32_116 : i32 to f32
    %334 = vector.shape_cast %26 : vector<16x16xi1> to vector<1x16x16xi1>
    %335 = vector.broadcast %334 : vector<1x16x16xi1> to vector<4x16x16xi1>
    %336 = vector.broadcast %333 : f32 to vector<4x16x16xf32>
    %337 = arith.select %335, %332, %336 : vector<4x16x16xi1>, vector<4x16x16xf32>
    %338 = arith.maximumf %331, %337 : vector<4x16x16xf32>
    %339 = arith.maximumf %325, %338 : vector<4x16x16xf32>
    %340 = arith.addf %311, %339 : vector<4x16x16xf32>
    %c1_i32_117 = arith.constant 1 : i32
    %341 = tpu.dynamic_rotate %339 by %c1_i32_117 dim 1 : vector<4x16x16xf32>, i32 -> vector<4x16x16xf32>
    %c0_i32_118 = arith.constant 0 : i32
    %342 = arith.sitofp %c0_i32_118 : i32 to f32
    %343 = vector.shape_cast %11 : vector<16x16xi1> to vector<1x16x16xi1>
    %344 = vector.broadcast %343 : vector<1x16x16xi1> to vector<4x16x16xi1>
    %345 = vector.broadcast %342 : f32 to vector<4x16x16xf32>
    %346 = arith.select %344, %341, %345 : vector<4x16x16xi1>, vector<4x16x16xf32>
    %c15_i32_119 = arith.constant 15 : i32
    %347 = tpu.dynamic_rotate %339 by %c15_i32_119 dim 1 : vector<4x16x16xf32>, i32 -> vector<4x16x16xf32>
    %c0_i32_120 = arith.constant 0 : i32
    %348 = arith.sitofp %c0_i32_120 : i32 to f32
    %349 = vector.shape_cast %16 : vector<16x16xi1> to vector<1x16x16xi1>
    %350 = vector.broadcast %349 : vector<1x16x16xi1> to vector<4x16x16xi1>
    %351 = vector.broadcast %348 : f32 to vector<4x16x16xf32>
    %352 = arith.select %350, %347, %351 : vector<4x16x16xi1>, vector<4x16x16xf32>
    %353 = arith.maximumf %346, %352 : vector<4x16x16xf32>
    %354 = arith.maximumf %339, %353 : vector<4x16x16xf32>
    %c1_i32_121 = arith.constant 1 : i32
    %355 = tpu.dynamic_rotate %354 by %c1_i32_121 dim 2 : vector<4x16x16xf32>, i32 -> vector<4x16x16xf32>
    %c0_i32_122 = arith.constant 0 : i32
    %356 = arith.sitofp %c0_i32_122 : i32 to f32
    %357 = vector.shape_cast %21 : vector<16x16xi1> to vector<1x16x16xi1>
    %358 = vector.broadcast %357 : vector<1x16x16xi1> to vector<4x16x16xi1>
    %359 = vector.broadcast %356 : f32 to vector<4x16x16xf32>
    %360 = arith.select %358, %355, %359 : vector<4x16x16xi1>, vector<4x16x16xf32>
    %c15_i32_123 = arith.constant 15 : i32
    %361 = tpu.dynamic_rotate %354 by %c15_i32_123 dim 2 : vector<4x16x16xf32>, i32 -> vector<4x16x16xf32>
    %c0_i32_124 = arith.constant 0 : i32
    %362 = arith.sitofp %c0_i32_124 : i32 to f32
    %363 = vector.shape_cast %26 : vector<16x16xi1> to vector<1x16x16xi1>
    %364 = vector.broadcast %363 : vector<1x16x16xi1> to vector<4x16x16xi1>
    %365 = vector.broadcast %362 : f32 to vector<4x16x16xf32>
    %366 = arith.select %364, %361, %365 : vector<4x16x16xi1>, vector<4x16x16xf32>
    %367 = arith.maximumf %360, %366 : vector<4x16x16xf32>
    %368 = arith.maximumf %354, %367 : vector<4x16x16xf32>
    %369 = arith.addf %340, %368 : vector<4x16x16xf32>
    %cst_125 = arith.constant 6.000000e+00 : f32
    %370 = vector.broadcast %cst_125 : f32 to vector<4x16x16xf32>
    %371 = arith.subf %370, %369 : vector<4x16x16xf32>
    %cst_126 = arith.constant 6.000000e+00 : f32
    %372 = vector.broadcast %cst_126 : f32 to vector<4x16x16xf32>
    %373 = arith.divf %371, %372 : vector<4x16x16xf32>
    %cst_127 = arith.constant 5.000000e+00 : f32
    %374 = vector.broadcast %cst_127 : f32 to vector<4x16x16xf32>
    %375 = arith.mulf %374, %373 : vector<4x16x16xf32>
    %376 = math.tanh %375 : vector<4x16x16xf32>
    %cst_128 = arith.constant 1.000000e+00 : f32
    %377 = vector.broadcast %cst_128 : f32 to vector<4x16x16xf32>
    %378 = arith.subf %377, %376 : vector<4x16x16xf32>
    %c0_129 = arith.constant 0 : index
    %c1 = arith.constant 1 : index
    %c0_130 = arith.constant 0 : index
    %c0_131 = arith.constant 0 : index
    %c0_132 = arith.constant 0 : index
    %379 = vector.load %arg2[%c0_129, %c1, %c0_130, %c0_131, %c0_132] : memref<1x3x4x16x16xf32, #tpu.memory_space<vmem>>, vector<1x1x4x16x16xf32>
    %380 = vector.shape_cast %379 : vector<1x1x4x16x16xf32> to vector<4x16x16xf32>
    %381 = arith.mulf %380, %378 : vector<4x16x16xf32>
    %c1_133 = arith.constant 1 : index
    %c0_134 = arith.constant 0 : index
    %c0_135 = arith.constant 0 : index
    %382 = vector.load %arg7[%c1_133, %c0_134, %c0_135] : memref<3x16x16xf32, #tpu.memory_space<vmem>>, vector<1x16x16xf32>
    %383 = vector.shape_cast %382 : vector<1x16x16xf32> to vector<16x16xf32>
    %384 = arith.mulf %381, %219 : vector<4x16x16xf32>
    %cst_136 = arith.constant dense<0.000000e+00> : vector<16x16xf32>
    %385 = vector.multi_reduction <add>, %384, %cst_136 [0] : vector<4x16x16xf32> to vector<16x16xf32>
    %386 = arith.addf %383, %385 : vector<16x16xf32>
    %c1_137 = arith.constant 1 : index
    %c0_138 = arith.constant 0 : index
    %c0_139 = arith.constant 0 : index
    %387 = vector.load %arg7[%c1_137, %c0_138, %c0_139] : memref<3x16x16xf32, #tpu.memory_space<vmem>>, vector<1x16x16xf32>
    %388 = vector.shape_cast %387 : vector<1x16x16xf32> to vector<16x16xf32>
    %389 = vector.shape_cast %386 : vector<16x16xf32> to vector<1x16x16xf32>
    tpu.vector_store %arg7[%c1_137, %c0_138, %c0_139], %389 {strides = array<i32>} : memref<3x16x16xf32, #tpu.memory_space<vmem>>, vector<1x16x16xf32>,
    %c1_140 = arith.constant 1 : index
    %c0_141 = arith.constant 0 : index
    %c0_142 = arith.constant 0 : index
    %390 = vector.load %arg8[%c1_140, %c0_141, %c0_142] : memref<3x16x16xf32, #tpu.memory_space<vmem>>, vector<1x16x16xf32>
    %391 = vector.shape_cast %390 : vector<1x16x16xf32> to vector<16x16xf32>
    %cst_143 = arith.constant dense<0.000000e+00> : vector<16x16xf32>
    %392 = vector.multi_reduction <add>, %381, %cst_143 [0] : vector<4x16x16xf32> to vector<16x16xf32>
    %393 = arith.addf %391, %392 : vector<16x16xf32>
    %c1_144 = arith.constant 1 : index
    %c0_145 = arith.constant 0 : index
    %c0_146 = arith.constant 0 : index
    %394 = vector.load %arg8[%c1_144, %c0_145, %c0_146] : memref<3x16x16xf32, #tpu.memory_space<vmem>>, vector<1x16x16xf32>
    %395 = vector.shape_cast %394 : vector<1x16x16xf32> to vector<16x16xf32>
    %396 = vector.shape_cast %393 : vector<16x16xf32> to vector<1x16x16xf32>
    tpu.vector_store %arg8[%c1_144, %c0_145, %c0_146], %396 {strides = array<i32>} : memref<3x16x16xf32, #tpu.memory_space<vmem>>, vector<1x16x16xf32>,
    %c1_147 = arith.constant 1 : index
    %c0_148 = arith.constant 0 : index
    %c0_149 = arith.constant 0 : index
    %397 = vector.load %arg9[%c1_147, %c0_148, %c0_149] : memref<3x16x16xf32, #tpu.memory_space<vmem>>, vector<1x16x16xf32>
    %398 = vector.shape_cast %397 : vector<1x16x16xf32> to vector<16x16xf32>
    %399 = arith.mulf %219, %378 : vector<4x16x16xf32>
    %cst_150 = arith.constant dense<0.000000e+00> : vector<16x16xf32>
    %400 = vector.multi_reduction <add>, %399, %cst_150 [0] : vector<4x16x16xf32> to vector<16x16xf32>
    %401 = arith.addf %398, %400 : vector<16x16xf32>
    %c1_151 = arith.constant 1 : index
    %c0_152 = arith.constant 0 : index
    %c0_153 = arith.constant 0 : index
    %402 = vector.load %arg9[%c1_151, %c0_152, %c0_153] : memref<3x16x16xf32, #tpu.memory_space<vmem>>, vector<1x16x16xf32>
    %403 = vector.shape_cast %402 : vector<1x16x16xf32> to vector<16x16xf32>
    %404 = vector.shape_cast %401 : vector<16x16xf32> to vector<1x16x16xf32>
    tpu.vector_store %arg9[%c1_151, %c0_152, %c0_153], %404 {strides = array<i32>} : memref<3x16x16xf32, #tpu.memory_space<vmem>>, vector<1x16x16xf32>,
    %c2_i32 = arith.constant 2 : i32
    %405 = vector.broadcast %c2_i32 : i32 to vector<4x16x16xi32>
    %406 = arith.cmpi eq, %4, %405 : vector<4x16x16xi32>
    %407 = arith.extui %406 : vector<4x16x16xi1> to vector<4x16x16xi32>
    %408 = arith.sitofp %407 : vector<4x16x16xi32> to vector<4x16x16xf32>
    %c1_i32_154 = arith.constant 1 : i32
    %409 = tpu.dynamic_rotate %408 by %c1_i32_154 dim 1 : vector<4x16x16xf32>, i32 -> vector<4x16x16xf32>
    %c0_i32_155 = arith.constant 0 : i32
    %410 = arith.sitofp %c0_i32_155 : i32 to f32
    %411 = vector.shape_cast %11 : vector<16x16xi1> to vector<1x16x16xi1>
    %412 = vector.broadcast %411 : vector<1x16x16xi1> to vector<4x16x16xi1>
    %413 = vector.broadcast %410 : f32 to vector<4x16x16xf32>
    %414 = arith.select %412, %409, %413 : vector<4x16x16xi1>, vector<4x16x16xf32>
    %c15_i32_156 = arith.constant 15 : i32
    %415 = tpu.dynamic_rotate %408 by %c15_i32_156 dim 1 : vector<4x16x16xf32>, i32 -> vector<4x16x16xf32>
    %c0_i32_157 = arith.constant 0 : i32
    %416 = arith.sitofp %c0_i32_157 : i32 to f32
    %417 = vector.shape_cast %16 : vector<16x16xi1> to vector<1x16x16xi1>
    %418 = vector.broadcast %417 : vector<1x16x16xi1> to vector<4x16x16xi1>
    %419 = vector.broadcast %416 : f32 to vector<4x16x16xf32>
    %420 = arith.select %418, %415, %419 : vector<4x16x16xi1>, vector<4x16x16xf32>
    %421 = arith.addf %414, %420 : vector<4x16x16xf32>
    %c1_i32_158 = arith.constant 1 : i32
    %422 = tpu.dynamic_rotate %408 by %c1_i32_158 dim 2 : vector<4x16x16xf32>, i32 -> vector<4x16x16xf32>
    %c0_i32_159 = arith.constant 0 : i32
    %423 = arith.sitofp %c0_i32_159 : i32 to f32
    %424 = vector.shape_cast %21 : vector<16x16xi1> to vector<1x16x16xi1>
    %425 = vector.broadcast %424 : vector<1x16x16xi1> to vector<4x16x16xi1>
    %426 = vector.broadcast %423 : f32 to vector<4x16x16xf32>
    %427 = arith.select %425, %422, %426 : vector<4x16x16xi1>, vector<4x16x16xf32>
    %428 = arith.addf %421, %427 : vector<4x16x16xf32>
    %c15_i32_160 = arith.constant 15 : i32
    %429 = tpu.dynamic_rotate %408 by %c15_i32_160 dim 2 : vector<4x16x16xf32>, i32 -> vector<4x16x16xf32>
    %c0_i32_161 = arith.constant 0 : i32
    %430 = arith.sitofp %c0_i32_161 : i32 to f32
    %431 = vector.shape_cast %26 : vector<16x16xi1> to vector<1x16x16xi1>
    %432 = vector.broadcast %431 : vector<1x16x16xi1> to vector<4x16x16xi1>
    %433 = vector.broadcast %430 : f32 to vector<4x16x16xf32>
    %434 = arith.select %432, %429, %433 : vector<4x16x16xi1>, vector<4x16x16xf32>
    %435 = arith.addf %428, %434 : vector<4x16x16xf32>
    %cst_162 = arith.constant 2.500000e-01 : f32
    %436 = vector.broadcast %cst_162 : f32 to vector<4x16x16xf32>
    %437 = arith.mulf %436, %435 : vector<4x16x16xf32>
    %438 = arith.subf %408, %437 : vector<4x16x16xf32>
    %cst_163 = arith.constant 0.000000e+00 : f32
    %439 = vector.broadcast %cst_163 : f32 to vector<4x16x16xf32>
    %440 = arith.cmpf ogt, %438, %439 : vector<4x16x16xf32>
    %441 = arith.extui %440 : vector<4x16x16xi1> to vector<4x16x16xi32>
    %442 = arith.sitofp %441 : vector<4x16x16xi32> to vector<4x16x16xf32>
    %c1_i32_164 = arith.constant 1 : i32
    %443 = tpu.dynamic_rotate %442 by %c1_i32_164 dim 1 : vector<4x16x16xf32>, i32 -> vector<4x16x16xf32>
    %c0_i32_165 = arith.constant 0 : i32
    %444 = arith.sitofp %c0_i32_165 : i32 to f32
    %445 = vector.shape_cast %11 : vector<16x16xi1> to vector<1x16x16xi1>
    %446 = vector.broadcast %445 : vector<1x16x16xi1> to vector<4x16x16xi1>
    %447 = vector.broadcast %444 : f32 to vector<4x16x16xf32>
    %448 = arith.select %446, %443, %447 : vector<4x16x16xi1>, vector<4x16x16xf32>
    %c15_i32_166 = arith.constant 15 : i32
    %449 = tpu.dynamic_rotate %442 by %c15_i32_166 dim 1 : vector<4x16x16xf32>, i32 -> vector<4x16x16xf32>
    %c0_i32_167 = arith.constant 0 : i32
    %450 = arith.sitofp %c0_i32_167 : i32 to f32
    %451 = vector.shape_cast %16 : vector<16x16xi1> to vector<1x16x16xi1>
    %452 = vector.broadcast %451 : vector<1x16x16xi1> to vector<4x16x16xi1>
    %453 = vector.broadcast %450 : f32 to vector<4x16x16xf32>
    %454 = arith.select %452, %449, %453 : vector<4x16x16xi1>, vector<4x16x16xf32>
    %455 = arith.maximumf %448, %454 : vector<4x16x16xf32>
    %456 = arith.maximumf %442, %455 : vector<4x16x16xf32>
    %c1_i32_168 = arith.constant 1 : i32
    %457 = tpu.dynamic_rotate %456 by %c1_i32_168 dim 2 : vector<4x16x16xf32>, i32 -> vector<4x16x16xf32>
    %c0_i32_169 = arith.constant 0 : i32
    %458 = arith.sitofp %c0_i32_169 : i32 to f32
    %459 = vector.shape_cast %21 : vector<16x16xi1> to vector<1x16x16xi1>
    %460 = vector.broadcast %459 : vector<1x16x16xi1> to vector<4x16x16xi1>
    %461 = vector.broadcast %458 : f32 to vector<4x16x16xf32>
    %462 = arith.select %460, %457, %461 : vector<4x16x16xi1>, vector<4x16x16xf32>
    %c15_i32_170 = arith.constant 15 : i32
    %463 = tpu.dynamic_rotate %456 by %c15_i32_170 dim 2 : vector<4x16x16xf32>, i32 -> vector<4x16x16xf32>
    %c0_i32_171 = arith.constant 0 : i32
    %464 = arith.sitofp %c0_i32_171 : i32 to f32
    %465 = vector.shape_cast %26 : vector<16x16xi1> to vector<1x16x16xi1>
    %466 = vector.broadcast %465 : vector<1x16x16xi1> to vector<4x16x16xi1>
    %467 = vector.broadcast %464 : f32 to vector<4x16x16xf32>
    %468 = arith.select %466, %463, %467 : vector<4x16x16xi1>, vector<4x16x16xf32>
    %469 = arith.maximumf %462, %468 : vector<4x16x16xf32>
    %470 = arith.maximumf %456, %469 : vector<4x16x16xf32>
    %471 = arith.addf %442, %470 : vector<4x16x16xf32>
    %c1_i32_172 = arith.constant 1 : i32
    %472 = tpu.dynamic_rotate %470 by %c1_i32_172 dim 1 : vector<4x16x16xf32>, i32 -> vector<4x16x16xf32>
    %c0_i32_173 = arith.constant 0 : i32
    %473 = arith.sitofp %c0_i32_173 : i32 to f32
    %474 = vector.shape_cast %11 : vector<16x16xi1> to vector<1x16x16xi1>
    %475 = vector.broadcast %474 : vector<1x16x16xi1> to vector<4x16x16xi1>
    %476 = vector.broadcast %473 : f32 to vector<4x16x16xf32>
    %477 = arith.select %475, %472, %476 : vector<4x16x16xi1>, vector<4x16x16xf32>
    %c15_i32_174 = arith.constant 15 : i32
    %478 = tpu.dynamic_rotate %470 by %c15_i32_174 dim 1 : vector<4x16x16xf32>, i32 -> vector<4x16x16xf32>
    %c0_i32_175 = arith.constant 0 : i32
    %479 = arith.sitofp %c0_i32_175 : i32 to f32
    %480 = vector.shape_cast %16 : vector<16x16xi1> to vector<1x16x16xi1>
    %481 = vector.broadcast %480 : vector<1x16x16xi1> to vector<4x16x16xi1>
    %482 = vector.broadcast %479 : f32 to vector<4x16x16xf32>
    %483 = arith.select %481, %478, %482 : vector<4x16x16xi1>, vector<4x16x16xf32>
    %484 = arith.maximumf %477, %483 : vector<4x16x16xf32>
    %485 = arith.maximumf %470, %484 : vector<4x16x16xf32>
    %c1_i32_176 = arith.constant 1 : i32
    %486 = tpu.dynamic_rotate %485 by %c1_i32_176 dim 2 : vector<4x16x16xf32>, i32 -> vector<4x16x16xf32>
    %c0_i32_177 = arith.constant 0 : i32
    %487 = arith.sitofp %c0_i32_177 : i32 to f32
    %488 = vector.shape_cast %21 : vector<16x16xi1> to vector<1x16x16xi1>
    %489 = vector.broadcast %488 : vector<1x16x16xi1> to vector<4x16x16xi1>
    %490 = vector.broadcast %487 : f32 to vector<4x16x16xf32>
    %491 = arith.select %489, %486, %490 : vector<4x16x16xi1>, vector<4x16x16xf32>
    %c15_i32_178 = arith.constant 15 : i32
    %492 = tpu.dynamic_rotate %485 by %c15_i32_178 dim 2 : vector<4x16x16xf32>, i32 -> vector<4x16x16xf32>
    %c0_i32_179 = arith.constant 0 : i32
    %493 = arith.sitofp %c0_i32_179 : i32 to f32
    %494 = vector.shape_cast %26 : vector<16x16xi1> to vector<1x16x16xi1>
    %495 = vector.broadcast %494 : vector<1x16x16xi1> to vector<4x16x16xi1>
    %496 = vector.broadcast %493 : f32 to vector<4x16x16xf32>
    %497 = arith.select %495, %492, %496 : vector<4x16x16xi1>, vector<4x16x16xf32>
    %498 = arith.maximumf %491, %497 : vector<4x16x16xf32>
    %499 = arith.maximumf %485, %498 : vector<4x16x16xf32>
    %500 = arith.addf %471, %499 : vector<4x16x16xf32>
    %c1_i32_180 = arith.constant 1 : i32
    %501 = tpu.dynamic_rotate %499 by %c1_i32_180 dim 1 : vector<4x16x16xf32>, i32 -> vector<4x16x16xf32>
    %c0_i32_181 = arith.constant 0 : i32
    %502 = arith.sitofp %c0_i32_181 : i32 to f32
    %503 = vector.shape_cast %11 : vector<16x16xi1> to vector<1x16x16xi1>
    %504 = vector.broadcast %503 : vector<1x16x16xi1> to vector<4x16x16xi1>
    %505 = vector.broadcast %502 : f32 to vector<4x16x16xf32>
    %506 = arith.select %504, %501, %505 : vector<4x16x16xi1>, vector<4x16x16xf32>
    %c15_i32_182 = arith.constant 15 : i32
    %507 = tpu.dynamic_rotate %499 by %c15_i32_182 dim 1 : vector<4x16x16xf32>, i32 -> vector<4x16x16xf32>
    %c0_i32_183 = arith.constant 0 : i32
    %508 = arith.sitofp %c0_i32_183 : i32 to f32
    %509 = vector.shape_cast %16 : vector<16x16xi1> to vector<1x16x16xi1>
    %510 = vector.broadcast %509 : vector<1x16x16xi1> to vector<4x16x16xi1>
    %511 = vector.broadcast %508 : f32 to vector<4x16x16xf32>
    %512 = arith.select %510, %507, %511 : vector<4x16x16xi1>, vector<4x16x16xf32>
    %513 = arith.maximumf %506, %512 : vector<4x16x16xf32>
    %514 = arith.maximumf %499, %513 : vector<4x16x16xf32>
    %c1_i32_184 = arith.constant 1 : i32
    %515 = tpu.dynamic_rotate %514 by %c1_i32_184 dim 2 : vector<4x16x16xf32>, i32 -> vector<4x16x16xf32>
    %c0_i32_185 = arith.constant 0 : i32
    %516 = arith.sitofp %c0_i32_185 : i32 to f32
    %517 = vector.shape_cast %21 : vector<16x16xi1> to vector<1x16x16xi1>
    %518 = vector.broadcast %517 : vector<1x16x16xi1> to vector<4x16x16xi1>
    %519 = vector.broadcast %516 : f32 to vector<4x16x16xf32>
    %520 = arith.select %518, %515, %519 : vector<4x16x16xi1>, vector<4x16x16xf32>
    %c15_i32_186 = arith.constant 15 : i32
    %521 = tpu.dynamic_rotate %514 by %c15_i32_186 dim 2 : vector<4x16x16xf32>, i32 -> vector<4x16x16xf32>
    %c0_i32_187 = arith.constant 0 : i32
    %522 = arith.sitofp %c0_i32_187 : i32 to f32
    %523 = vector.shape_cast %26 : vector<16x16xi1> to vector<1x16x16xi1>
    %524 = vector.broadcast %523 : vector<1x16x16xi1> to vector<4x16x16xi1>
    %525 = vector.broadcast %522 : f32 to vector<4x16x16xf32>
    %526 = arith.select %524, %521, %525 : vector<4x16x16xi1>, vector<4x16x16xf32>
    %527 = arith.maximumf %520, %526 : vector<4x16x16xf32>
    %528 = arith.maximumf %514, %527 : vector<4x16x16xf32>
    %529 = arith.addf %500, %528 : vector<4x16x16xf32>
    %c1_i32_188 = arith.constant 1 : i32
    %530 = tpu.dynamic_rotate %528 by %c1_i32_188 dim 1 : vector<4x16x16xf32>, i32 -> vector<4x16x16xf32>
    %c0_i32_189 = arith.constant 0 : i32
    %531 = arith.sitofp %c0_i32_189 : i32 to f32
    %532 = vector.shape_cast %11 : vector<16x16xi1> to vector<1x16x16xi1>
    %533 = vector.broadcast %532 : vector<1x16x16xi1> to vector<4x16x16xi1>
    %534 = vector.broadcast %531 : f32 to vector<4x16x16xf32>
    %535 = arith.select %533, %530, %534 : vector<4x16x16xi1>, vector<4x16x16xf32>
    %c15_i32_190 = arith.constant 15 : i32
    %536 = tpu.dynamic_rotate %528 by %c15_i32_190 dim 1 : vector<4x16x16xf32>, i32 -> vector<4x16x16xf32>
    %c0_i32_191 = arith.constant 0 : i32
    %537 = arith.sitofp %c0_i32_191 : i32 to f32
    %538 = vector.shape_cast %16 : vector<16x16xi1> to vector<1x16x16xi1>
    %539 = vector.broadcast %538 : vector<1x16x16xi1> to vector<4x16x16xi1>
    %540 = vector.broadcast %537 : f32 to vector<4x16x16xf32>
    %541 = arith.select %539, %536, %540 : vector<4x16x16xi1>, vector<4x16x16xf32>
    %542 = arith.maximumf %535, %541 : vector<4x16x16xf32>
    %543 = arith.maximumf %528, %542 : vector<4x16x16xf32>
    %c1_i32_192 = arith.constant 1 : i32
    %544 = tpu.dynamic_rotate %543 by %c1_i32_192 dim 2 : vector<4x16x16xf32>, i32 -> vector<4x16x16xf32>
    %c0_i32_193 = arith.constant 0 : i32
    %545 = arith.sitofp %c0_i32_193 : i32 to f32
    %546 = vector.shape_cast %21 : vector<16x16xi1> to vector<1x16x16xi1>
    %547 = vector.broadcast %546 : vector<1x16x16xi1> to vector<4x16x16xi1>
    %548 = vector.broadcast %545 : f32 to vector<4x16x16xf32>
    %549 = arith.select %547, %544, %548 : vector<4x16x16xi1>, vector<4x16x16xf32>
    %c15_i32_194 = arith.constant 15 : i32
    %550 = tpu.dynamic_rotate %543 by %c15_i32_194 dim 2 : vector<4x16x16xf32>, i32 -> vector<4x16x16xf32>
    %c0_i32_195 = arith.constant 0 : i32
    %551 = arith.sitofp %c0_i32_195 : i32 to f32
    %552 = vector.shape_cast %26 : vector<16x16xi1> to vector<1x16x16xi1>
    %553 = vector.broadcast %552 : vector<1x16x16xi1> to vector<4x16x16xi1>
    %554 = vector.broadcast %551 : f32 to vector<4x16x16xf32>
    %555 = arith.select %553, %550, %554 : vector<4x16x16xi1>, vector<4x16x16xf32>
    %556 = arith.maximumf %549, %555 : vector<4x16x16xf32>
    %557 = arith.maximumf %543, %556 : vector<4x16x16xf32>
    %558 = arith.addf %529, %557 : vector<4x16x16xf32>
    %cst_196 = arith.constant 6.000000e+00 : f32
    %559 = vector.broadcast %cst_196 : f32 to vector<4x16x16xf32>
    %560 = arith.subf %559, %558 : vector<4x16x16xf32>
    %cst_197 = arith.constant 6.000000e+00 : f32
    %561 = vector.broadcast %cst_197 : f32 to vector<4x16x16xf32>
    %562 = arith.divf %560, %561 : vector<4x16x16xf32>
    %cst_198 = arith.constant 5.000000e+00 : f32
    %563 = vector.broadcast %cst_198 : f32 to vector<4x16x16xf32>
    %564 = arith.mulf %563, %562 : vector<4x16x16xf32>
    %565 = math.tanh %564 : vector<4x16x16xf32>
    %cst_199 = arith.constant 1.000000e+00 : f32
    %566 = vector.broadcast %cst_199 : f32 to vector<4x16x16xf32>
    %567 = arith.subf %566, %565 : vector<4x16x16xf32>
    %c0_200 = arith.constant 0 : index
    %c2 = arith.constant 2 : index
    %c0_201 = arith.constant 0 : index
    %c0_202 = arith.constant 0 : index
    %c0_203 = arith.constant 0 : index
    %568 = vector.load %arg2[%c0_200, %c2, %c0_201, %c0_202, %c0_203] : memref<1x3x4x16x16xf32, #tpu.memory_space<vmem>>, vector<1x1x4x16x16xf32>
    %569 = vector.shape_cast %568 : vector<1x1x4x16x16xf32> to vector<4x16x16xf32>
    %570 = arith.mulf %569, %567 : vector<4x16x16xf32>
    %c2_204 = arith.constant 2 : index
    %c0_205 = arith.constant 0 : index
    %c0_206 = arith.constant 0 : index
    %571 = vector.load %arg7[%c2_204, %c0_205, %c0_206] : memref<3x16x16xf32, #tpu.memory_space<vmem>>, vector<1x16x16xf32>
    %572 = vector.shape_cast %571 : vector<1x16x16xf32> to vector<16x16xf32>
    %573 = arith.mulf %570, %408 : vector<4x16x16xf32>
    %cst_207 = arith.constant dense<0.000000e+00> : vector<16x16xf32>
    %574 = vector.multi_reduction <add>, %573, %cst_207 [0] : vector<4x16x16xf32> to vector<16x16xf32>
    %575 = arith.addf %572, %574 : vector<16x16xf32>
    %c2_208 = arith.constant 2 : index
    %c0_209 = arith.constant 0 : index
    %c0_210 = arith.constant 0 : index
    %576 = vector.load %arg7[%c2_208, %c0_209, %c0_210] : memref<3x16x16xf32, #tpu.memory_space<vmem>>, vector<1x16x16xf32>
    %577 = vector.shape_cast %576 : vector<1x16x16xf32> to vector<16x16xf32>
    %578 = vector.shape_cast %575 : vector<16x16xf32> to vector<1x16x16xf32>
    tpu.vector_store %arg7[%c2_208, %c0_209, %c0_210], %578 {strides = array<i32>} : memref<3x16x16xf32, #tpu.memory_space<vmem>>, vector<1x16x16xf32>,
    %c2_211 = arith.constant 2 : index
    %c0_212 = arith.constant 0 : index
    %c0_213 = arith.constant 0 : index
    %579 = vector.load %arg8[%c2_211, %c0_212, %c0_213] : memref<3x16x16xf32, #tpu.memory_space<vmem>>, vector<1x16x16xf32>
    %580 = vector.shape_cast %579 : vector<1x16x16xf32> to vector<16x16xf32>
    %cst_214 = arith.constant dense<0.000000e+00> : vector<16x16xf32>
    %581 = vector.multi_reduction <add>, %570, %cst_214 [0] : vector<4x16x16xf32> to vector<16x16xf32>
    %582 = arith.addf %580, %581 : vector<16x16xf32>
    %c2_215 = arith.constant 2 : index
    %c0_216 = arith.constant 0 : index
    %c0_217 = arith.constant 0 : index
    %583 = vector.load %arg8[%c2_215, %c0_216, %c0_217] : memref<3x16x16xf32, #tpu.memory_space<vmem>>, vector<1x16x16xf32>
    %584 = vector.shape_cast %583 : vector<1x16x16xf32> to vector<16x16xf32>
    %585 = vector.shape_cast %582 : vector<16x16xf32> to vector<1x16x16xf32>
    tpu.vector_store %arg8[%c2_215, %c0_216, %c0_217], %585 {strides = array<i32>} : memref<3x16x16xf32, #tpu.memory_space<vmem>>, vector<1x16x16xf32>,
    %c2_218 = arith.constant 2 : index
    %c0_219 = arith.constant 0 : index
    %c0_220 = arith.constant 0 : index
    %586 = vector.load %arg9[%c2_218, %c0_219, %c0_220] : memref<3x16x16xf32, #tpu.memory_space<vmem>>, vector<1x16x16xf32>
    %587 = vector.shape_cast %586 : vector<1x16x16xf32> to vector<16x16xf32>
    %588 = arith.mulf %408, %567 : vector<4x16x16xf32>
    %cst_221 = arith.constant dense<0.000000e+00> : vector<16x16xf32>
    %589 = vector.multi_reduction <add>, %588, %cst_221 [0] : vector<4x16x16xf32> to vector<16x16xf32>
    %590 = arith.addf %587, %589 : vector<16x16xf32>
    %c2_222 = arith.constant 2 : index
    %c0_223 = arith.constant 0 : index
    %c0_224 = arith.constant 0 : index
    %591 = vector.load %arg9[%c2_222, %c0_223, %c0_224] : memref<3x16x16xf32, #tpu.memory_space<vmem>>, vector<1x16x16xf32>
    %592 = vector.shape_cast %591 : vector<1x16x16xf32> to vector<16x16xf32>
    %593 = vector.shape_cast %590 : vector<16x16xf32> to vector<1x16x16xf32>
    tpu.vector_store %arg9[%c2_222, %c0_223, %c0_224], %593 {strides = array<i32>} : memref<3x16x16xf32, #tpu.memory_space<vmem>>, vector<1x16x16xf32>,
    %c0_i32_225 = arith.constant 0 : i32
    %594 = arith.cmpi eq, %arg1, %c0_i32_225 : i32
    %595 = arith.extui %594 : i1 to i32
    %c0_i32_226 = arith.constant 0 : i32
    %596 = arith.cmpi ne, %595, %c0_i32_226 : i32
    scf.if %596 {
      %c0_227 = arith.constant 0 : index
      %c0_228 = arith.constant 0 : index
      %c0_229 = arith.constant 0 : index
      %597 = vector.load %arg7[%c0_227, %c0_228, %c0_229] : memref<3x16x16xf32, #tpu.memory_space<vmem>>, vector<3x16x16xf32>
      %cst_230 = arith.constant dense<0.000000e+00> : vector<3x16xf32>
      %598 = vector.multi_reduction <add>, %597, %cst_230 [1] : vector<3x16x16xf32> to vector<3x16xf32>
      %c0_231 = arith.constant 0 : index
      %c0_232 = arith.constant 0 : index
      %c0_233 = arith.constant 0 : index
      %599 = vector.load %arg4[%c0_231, %c0_232, %c0_233] : memref<1x3x16xf32, #tpu.memory_space<vmem>>, vector<1x3x16xf32>
      %600 = vector.shape_cast %599 : vector<1x3x16xf32> to vector<3x16xf32>
      %601 = vector.shape_cast %598 : vector<3x16xf32> to vector<1x3x16xf32>
      tpu.vector_store %arg4[%c0_231, %c0_232, %c0_233], %601 {strides = array<i32>} : memref<1x3x16xf32, #tpu.memory_space<vmem>>, vector<1x3x16xf32>,
      %c0_234 = arith.constant 0 : index
      %c0_235 = arith.constant 0 : index
      %c0_236 = arith.constant 0 : index
      %602 = vector.load %arg8[%c0_234, %c0_235, %c0_236] : memref<3x16x16xf32, #tpu.memory_space<vmem>>, vector<3x16x16xf32>
      %cst_237 = arith.constant dense<0.000000e+00> : vector<3x16xf32>
      %603 = vector.multi_reduction <add>, %602, %cst_237 [1] : vector<3x16x16xf32> to vector<3x16xf32>
      %c0_238 = arith.constant 0 : index
      %c0_239 = arith.constant 0 : index
      %c0_240 = arith.constant 0 : index
      %604 = vector.load %arg5[%c0_238, %c0_239, %c0_240] : memref<1x3x16xf32, #tpu.memory_space<vmem>>, vector<1x3x16xf32>
      %605 = vector.shape_cast %604 : vector<1x3x16xf32> to vector<3x16xf32>
      %606 = vector.shape_cast %603 : vector<3x16xf32> to vector<1x3x16xf32>
      tpu.vector_store %arg5[%c0_238, %c0_239, %c0_240], %606 {strides = array<i32>} : memref<1x3x16xf32, #tpu.memory_space<vmem>>, vector<1x3x16xf32>,
      %c0_241 = arith.constant 0 : index
      %c0_242 = arith.constant 0 : index
      %c0_243 = arith.constant 0 : index
      %607 = vector.load %arg9[%c0_241, %c0_242, %c0_243] : memref<3x16x16xf32, #tpu.memory_space<vmem>>, vector<3x16x16xf32>
      %cst_244 = arith.constant dense<0.000000e+00> : vector<3x16xf32>
      %608 = vector.multi_reduction <add>, %607, %cst_244 [1] : vector<3x16x16xf32> to vector<3x16xf32>
      %c0_245 = arith.constant 0 : index
      %c0_246 = arith.constant 0 : index
      %c0_247 = arith.constant 0 : index
      %609 = vector.load %arg6[%c0_245, %c0_246, %c0_247] : memref<1x3x16xf32, #tpu.memory_space<vmem>>, vector<1x3x16xf32>
      %610 = vector.shape_cast %609 : vector<1x3x16xf32> to vector<3x16xf32>
      %611 = vector.shape_cast %608 : vector<3x16xf32> to vector<1x3x16xf32>
      tpu.vector_store %arg6[%c0_245, %c0_246, %c0_247], %611 {strides = array<i32>} : memref<1x3x16xf32, #tpu.memory_space<vmem>>, vector<1x3x16xf32>,
    } else {
    }
    return
  }
  func.func @transform_0(%arg0: i32, %arg1: i32) -> (i32, i32, i32, i32, i32) {
    %c0_i32 = arith.constant 0 : i32
    %c0_i32_0 = arith.constant 0 : i32
    %c0_i32_1 = arith.constant 0 : i32
    %c0_i32_2 = arith.constant 0 : i32
    return %arg0, %c0_i32, %arg1, %c0_i32_0, %c0_i32_1 : i32, i32, i32, i32, i32
  }
  func.func @transform_1(%arg0: i32, %arg1: i32) -> (i32, i32, i32, i32) {
    %c0_i32 = arith.constant 0 : i32
    %c0_i32_0 = arith.constant 0 : i32
    %c0_i32_1 = arith.constant 0 : i32
    return %arg0, %arg1, %c0_i32, %c0_i32_0 : i32, i32, i32, i32
  }
  func.func @transform_2(%arg0: i32, %arg1: i32) -> (i32, i32, i32) {
    %c0_i32 = arith.constant 0 : i32
    %c0_i32_0 = arith.constant 0 : i32
    %c0_i32_1 = arith.constant 0 : i32
    return %arg0, %c0_i32, %c0_i32_0 : i32, i32, i32
  }
  func.func @transform_3(%arg0: i32, %arg1: i32) -> (i32, i32, i32) {
    %c0_i32 = arith.constant 0 : i32
    %c0_i32_0 = arith.constant 0 : i32
    %c0_i32_1 = arith.constant 0 : i32
    return %arg0, %c0_i32, %c0_i32_0 : i32, i32, i32
  }
  func.func @transform_4(%arg0: i32, %arg1: i32) -> (i32, i32, i32) {
    %c0_i32 = arith.constant 0 : i32
    %c0_i32_0 = arith.constant 0 : i32
    %c0_i32_1 = arith.constant 0 : i32
    return %arg0, %c0_i32, %c0_i32_0 : i32, i32, i32
  }
}

</mosaic_0001>

<bundles_post_ra>
// kernel: tpu_custom_call.1
= control target key start
LH: loop header
LB: loop body
LE: loop exit
PB: predicated region body
PF: predicated region fallthrough
CT: control target
= control target key end

     0   :  { %10 = vsyncpa [#allocation6], 0  ;;  %s10665_s0 = inlined_call_operand.hbm [shape: f32[2,3,4,16,16], index: 0, kind: input, shape index: {}]   ;;  %s10666_s1 = inlined_call_operand.hbm [shape: s32[2,4,16,16], index: 1, kind: input, shape index: {}]   ;;  %s10667_s2 = inlined_call_operand.vmem [shape: f32[2,3,16], index: 2, kind: output, shape index: {0}]   ;;  %s10668_s3 = inlined_call_operand.vmem [shape: f32[2,3,16], index: 3, kind: output, shape index: {1}]   ;;  %s10669_s4 = inlined_call_operand.vmem [shape: f32[2,3,16], index: 4, kind: output, shape index: {2}]  }
   0x1   :  { %12 = vsyncpa [#allocation6 + $0x1], 0 }
   0x2   :  { %13 = vsyncpa [#allocation8], 0 }
   0x3   :  { %15 = vsyncpa [#allocation8 + $0x1], 0  ;;  %s6082_s15 = smov 0   ;;  %s6084_s16 = smov 0  }
   0x4   :  { %s6086_s17 = smov 0   ;;  %s6088_s18 = smov 0  }
   0x5   :  { %s6090_s19 = smov 0   ;;  %s6092_s20 = smov 0  }
   0x6 LB: > { %s4480_s21 = sadd.s32 4294967295, %s6044_s20   ;;  %s33_s22 = sadd.s32 1, %s6040_s19  ;;  %s6044_s20 = sphi %s6092_s20, %s21_s20   ;;  %s6040_s19 = sphi %s6090_s19, %s11201_s19   ;;  %s6036_s18 = sphi %s6088_s18, %s11200_s18   ;;  %s6032_s17 = sphi %s6086_s17, %s11199_s17   ;;  %s6028_s16 = sphi %s6084_s16, %s11198_s16   ;;  %s6024_s15 = sphi %s6082_s15, %s11197_s15  }
   0x7   : > { %p35_p0 = scmp.ge.s32.totalorder %s33_s22, 2  ;;  %s42_s23 = sadd.s32 1, %s6032_s17 }
   0x8   : > { %p49_p1 = scmp.ne.s32.totalorder %s6032_s17, %s6028_s16  ;;  %p50_p2 = scmp.eq.s32.totalorder %s6044_s20, 0 }
   0x9   : > { %s11203_s22 = smov (%p35_p0, %s33_s22), 0  ;;  %p55_p4 = scmp.ne.s32.totalorder %s6028_s16, %s6024_s15 }
   0xa   : > { %p51_p3 = por %p50_p2, %p49_p1  ;;  %s37_s24 = ssub.s32 %s6040_s19, %s11203_s22 }
   0xb   : > { %p56_p5 = scmp.eq.s32.totalorder %s4480_s21, 0  ;;  %p40_p6 = scmp.eq.s32.totalorder %s37_s24, 0 }
   0xc   : > { %p4580_p8 = scmp.lt.s32.totalorder %s6044_s20, 2  ;;  %s6130_s27 = sand.u32 1, %s6032_s17  }
   0xd   : > { %p6121_p7 = por %p56_p5, %p55_p4  ;;  %s4567_s28 = smul.u32 3072, %s6040_s19 }
   0xe   : > { %s6127_s26 = scalar_select %p40_p6, %s6032_s17, %s42_s23  }
   0xf   : > { %s4566_s29 = smul.u32 192, %s6130_s27  ;;  %s198_s6 = scalar_lea.hbm %s10665_s0, %s4567_s28 }
  0x10   : > { %p6137_p9 = pnand %p4580_p8, %p51_p3  ;;  %s186_s10 = scalar_lea.sflag [#allocation6], %s6130_s27 }
  0x11   : > { %s189_s8 = scalar_lea.vmem [#allocation5], %s4566_s29  ;;  %s6046_s12 = smov [#allocation5]  }
  0x12   : > { %s199_s9 = sshll.u32 %s189_s8, 4  ;;  %p5936_p10 = pneg %p6137_p9  ;;  %s200_s9 = int_to_ptr.vmem [resolvable:$true] %s199_s9 }
  0x13   : > { %s5947_s11 = scalar_lea.vmem %s200_s9, 3072  ;;  %s5952_s13 = sshll.u32 %s6046_s12, 4  ;;  %s5953_s13 = int_to_ptr.vmem [resolvable:$false] %s5952_s13 }
  0x14   : > { %p5948_p11 = scmp.ne.s32.totalorder %s200_s9, %s5947_s11  ;;  %s5954_s14 = scalar_lea.vmem %s5953_s13, 6144 }
  0x15   : > { %p5955_p0 = scmp.lt.s32.totalorder %s200_s9, %s5953_s13  ;;  %p5956_p1 = scmp.lt.s32.totalorder %s5954_s14, %s5947_s11 }
  0x16   : > { %p5950_p12 = pnand %p5948_p11, %p5936_p10 }
  0x17   : > { %p5957_p2 = por %p5956_p1, %p5955_p0 }
  0x18   : > { %p5951_p13 = pneg %p5950_p12 }
  0x1a   : > { %p5958_p3 = pnand %p5957_p2, %p5951_p13 }
  0x1c   : > { %5961 = shalt.err (!%p5958_p3)
}
  0x1d   : > { %s6047_s15 = smov 128   ;;  %s6048_s21 = smov 8  }
  0x1e   : > { %4576 = dma.hbm_to_vmem [thread:$0]  (!%p6137_p9), %s198_s6, 3072, %s200_s9, %s186_s10, %s6047_s15, %s6047_s15, %s6048_s21  }
  0x1f   : > { %p4488_p4 = scmp.ge.s32.totalorder %s6044_s20, 1  ;;  %p231_p5 = scmp.lt.s32.totalorder %s6044_s20, 3 }
  0x20   : > { %s4485_s23 = sshll.u32 %s6130_s27, 6  ;;  %s4565_s28 = sshll.u32 %s6040_s19, 10 }
  0x21   : > { %p6155_p6 = pnand %p4488_p4, %p231_p5  ;;  %s213_s29 = scalar_lea.vmem [#allocation7], %s4485_s23 }
  0x22   : > { %s223_s30 = sshll.u32 %s213_s29, 4  ;;  %s222_s11 = scalar_lea.hbm %s10666_s1, %s4565_s28  ;;  %s224_s30 = int_to_ptr.vmem [resolvable:$true] %s223_s30 }
  0x23   : > { %s210_s12 = scalar_lea.sflag [#allocation8], %s6130_s27  ;;  %s5975_s13 = scalar_lea.vmem %s224_s30, 1024 }
  0x24   : > { %p5976_p8 = scmp.ne.s32.totalorder %s224_s30, %s5975_s13  ;;  %s6049_s6 = smov [#allocation7]  }
  0x25   : > { %s5980_s9 = sshll.u32 %s6049_s6, 4  ;;  %s5981_s9 = int_to_ptr.vmem [resolvable:$false] %s5980_s9 }
  0x26   : > { %p5978_p11 = pnand %p5976_p8, %p5936_p10  ;;  %s5982_s10 = scalar_lea.vmem %s5981_s9, 2048 }
  0x27   : > { %p5983_p13 = scmp.lt.s32.totalorder %s224_s30, %s5981_s9  ;;  %p5984_p0 = scmp.lt.s32.totalorder %s5982_s10, %s5975_s13 }
  0x28   : > { %p5979_p12 = pneg %p5978_p11 }
  0x29   : > { %p5985_p1 = por %p5984_p0, %p5983_p13 }
  0x2b   : > { %p5986_p2 = pnand %p5985_p1, %p5979_p12 }
  0x2d   : > { %5989 = shalt.err (!%p5986_p2)
}
  0x2e   : > { %4579 = dma.hbm_to_vmem [thread:$0]  (!%p6137_p9), %s222_s11, 1024, %s224_s30, %s210_s12, %s6047_s15, %s6047_s15, %s6048_s21  }
  0x2f   : > { %235 = sbr.rel (%p6155_p6) target bundleno = 2612 (0xa34), region = 28 }
  0x34   : > { %s237_s27 = sand.u32 1, %s6028_s16  }
  0x35   : > { %s4568_s14 = smul.u32 192, %s237_s27  ;;  %s238_s23 = scalar_lea.sflag [#allocation6], %s237_s27 }
  0x37   : > { %s6175_s28 = scalar_lea.vmem [#allocation5], %s4568_s14 }
  0x38   : > { %6015 = dma.done.wait (%p6121_p7), %s238_s23, 3072  }
  0x39   : > { %6017 = vsyncadd (%p6121_p7), %s238_s23, 4294964224  ;;  %s4489_s7 = sshll.u32 %s237_s27, 6  ;;  %s247_s29 = scalar_lea.sflag [#allocation8], %s237_s27 }
  0x3a   : > { %s6181_s5 = scalar_lea.vmem [#allocation7], %s4489_s7 }
  0x3b   : > { %6019 = dma.done.wait (%p6121_p7), %s247_s29, 1024  }
  0x3c   : > { %6021 = vsyncadd (%p6121_p7), %s247_s29, 4294966272  ;;  %v332_v0 = vlaneseq  ;;  %s6050_s15 = smov 16   ;;  %v326_v2 = vld [vmem:[%s6181_s5 + $0x10] sm:$0xff]  ;;  %v327_v3 = vld [vmem:[%s6181_s5 + $0x18] sm:$0xff]  ;;  %v10670_v6 = vmov 0.0   ;;  %s6052_s25 = smov 1  }
  0x3d   : > { %v324_v4 = vld [vmem:[%s6181_s5] sm:$0xff]  ;;  %v325_v5 = vld [vmem:[%s6181_s5 + $0x8] sm:$0xff]  ;;  %vm390_vm0 = vcmp.eq.s32.totalorder %v326_v2, 0  ;;  %vm391_vm1 = vcmp.eq.s32.totalorder %v327_v3, 0  ;;  %vm1664_vm6 = vcmp.eq.s32.totalorder %v326_v2, 1  ;;  %vm1665_vm7 = vcmp.eq.s32.totalorder %v327_v3, 1 }
  0x3e   : > { %v6188_v1 = vand.u32 127, %v332_v0  ;;  %vm388_vm2 = vcmp.eq.s32.totalorder %v324_v4, 0  ;;  %vm389_vm3 = vcmp.eq.s32.totalorder %v325_v5, 0  ;;  %v6197_v7 = vsel %vm390_vm0, 1.0, %v10670_v6  ;;  %v328_v15 = vld [vmem:[%s6181_s5 + $0x20] sm:$0xff]  ;;  %v329_v19 = vld [vmem:[%s6181_s5 + $0x28] sm:$0xff] }
  0x3f   : > { %10807 = vst [vmem:[#allocation11_spill] sm:$0xff] %v6197_v7  ;;  %v6200_v8 = vsel %vm391_vm1, 1.0, %v10670_v6  ;;  %v6203_v9 = vsel %vm388_vm2, 1.0, %v10670_v6  ;;  %v6206_v10 = vsel %vm389_vm3, 1.0, %v10670_v6  ;;  %vm1662_vm4 = vcmp.eq.s32.totalorder %v324_v4, 1  ;;  %v330_v27 = vld [vmem:[%s6181_s5 + $0x30] sm:$0xff] }
  0x40   : > { %368 = vrot.lane.b32.xlu0 %v6188_v1, %s6050_s15  ;;  %10808 = vst [vmem:[#allocation12_spill] sm:$0xff] %v6200_v8  ;;  %10809 = vst [vmem:[#allocation13_spill] sm:$0xff] %v6203_v9  ;;  %v4643_v11 = vpack.i.bf16 %v6200_v8, %v6197_v7  ;;  %v4638_v12 = vpack.i.bf16 %v6206_v10, %v6203_v9  ;;  %vm1663_vm5 = vcmp.eq.s32.totalorder %v325_v5, 1  ;;  %v6215_v13 = vsel %vm1662_vm4, 1.0, %v10670_v6  ;;  %v331_v30 = vld [vmem:[%s6181_s5 + $0x38] sm:$0xff]  ;;  %s6053_s21 = smov 15  }
  0x41   : > { %10810 = vst [vmem:[#allocation14_spill] sm:$0xff] %v6206_v10  ;;  %10811 = vst [vmem:[#allocation15_spill] sm:$0xff] %v6215_v13  ;;  %v6218_v14 = vsel %vm1663_vm5, 1.0, %v10670_v6  ;;  %v6224_v17 = vsel %vm1664_vm6, 1.0, %v10670_v6  ;;  %v6227_v18 = vsel %vm1665_vm7, 1.0, %v10670_v6  ;;  %vm2926_vm8 = vcmp.eq.s32.totalorder %v324_v4, 2 }
  0x42   : > { %4644 = vrot.lane.b32.xlu1 %v4643_v11, %s6050_s15  ;;  %10812 = vst [vmem:[#allocation16_spill] sm:$0xff] %v6218_v14  ;;  %v4648_v16 = vpack.i.bf16 %v6218_v14, %v6215_v13  ;;  %10813 = vst [vmem:[#allocation17_spill] sm:$0xff] %v6224_v17  ;;  %v4653_v20 = vpack.i.bf16 %v6227_v18, %v6224_v17  ;;  %vm2927_vm9 = vcmp.eq.s32.totalorder %v325_v5, 2  ;;  %v6233_v21 = vsel %vm2926_vm8, 1.0, %v10670_v6  ;;  %s6054_s24 = smov 113   ;;  %s6055_s30 = smov 127  }
  0x43   : > { %10814 = vst [vmem:[#allocation18_spill] sm:$0xff] %v6227_v18  ;;  %10815 = vst [vmem:[#allocation19_spill] sm:$0xff] %v6233_v21  ;;  %vm2928_vm10 = vcmp.eq.s32.totalorder %v326_v2, 2  ;;  %v6236_v22 = vsel %vm2927_vm9, 1.0, %v10670_v6  ;;  %vm2929_vm11 = vcmp.eq.s32.totalorder %v327_v3, 2  ;;  %vm392_vm12 = vcmp.eq.s32.totalorder %v328_v15, 0 }
  0x44   : > { %4639 = vrot.lane.b32.xlu0 %v4638_v12, %s6050_s15  ;;  %10816 = vst [vmem:[#allocation20_spill] sm:$0xff] %v6236_v22  ;;  %v6239_v23 = vsel %vm2928_vm10, 1.0, %v10670_v6  ;;  %v4658_v24 = vpack.i.bf16 %v6236_v22, %v6233_v21  ;;  %v6246_v25 = vsel %vm2929_vm11, 1.0, %v10670_v6  ;;  %vm393_vm13 = vcmp.eq.s32.totalorder %v329_v19, 0  ;;  %s6056_s8 = smov 14   ;;  %p289_p7 = scmp.lt.s32.totalorder %s6036_s18, 1 }
  0x45   : > { %10817 = vst [vmem:[#allocation21_spill] sm:$0xff] %v6239_v23  ;;  %10818 = vst [vmem:[#allocation22_spill] sm:$0xff] %v6246_v25  ;;  %v6249_v26 = vsel %vm392_vm12, 1.0, %v10670_v6  ;;  %v4663_v28 = vpack.i.bf16 %v6246_v25, %v6239_v23  ;;  %v6255_v29 = vsel %vm393_vm13, 1.0, %v10670_v6  ;;  %vm1666_vm14 = vcmp.eq.s32.totalorder %v328_v15, 1 }
  0x46   : > { %4649 = vrot.lane.b32.xlu1 %v4648_v16, %s6050_s15  ;;  %10819 = vst [vmem:[#allocation23_spill] sm:$0xff] %v6249_v26  ;;  %10820 = vst [vmem:[#allocation24_spill] sm:$0xff] %v6255_v29  ;;  %vm1667_vm15 = vcmp.eq.s32.totalorder %v329_v19, 1  ;;  %v6259_v31 = vsel %vm1666_vm14, 1.0, %v10670_v6  ;;  %vm2930_vm0 = vcmp.eq.s32.totalorder %v328_v15, 2  ;;  %vm2931_vm1 = vcmp.eq.s32.totalorder %v329_v19, 2 }
  0x47   : > { %10821 = vst [vmem:[#allocation25_spill] sm:$0xff] %v6259_v31  ;;  %v6262_v32 = vsel %vm1667_vm15, 1.0, %v10670_v6  ;;  %vm394_vm2 = vcmp.eq.s32.totalorder %v330_v27, 0  ;;  %v4668_v33 = vpack.i.bf16 %v6255_v29, %v6249_v26  ;;  %vm395_vm3 = vcmp.eq.s32.totalorder %v331_v30, 0  ;;  %s11205_s18 = smov (!%p289_p7, %s6036_s18), 1 }
  0x48   : > { %4654 = vrot.lane.b32.xlu0 %v4653_v20, %s6050_s15  ;;  %10822 = vst [vmem:[#allocation26_spill] sm:$0xff] %v6262_v32  ;;  %v4673_v34 = vpack.i.bf16 %v6262_v32, %v6259_v31  ;;  %v6271_v35 = vsel %vm2930_vm0, 1.0, %v10670_v6  ;;  %v6274_v36 = vsel %vm2931_vm1, 1.0, %v10670_v6  ;;  %v6277_v37 = vsel %vm394_vm2, 1.0, %v10670_v6  ;;  %s4490_s11 = sshll.u32 %s11205_s18, 2 }
  0x49   : > { %10823 = vst [vmem:[#allocation27_spill] sm:$0xff] %v6271_v35  ;;  %10824 = vst [vmem:[#allocation28_spill] sm:$0xff] %v6274_v36  ;;  %v6280_v38 = vsel %vm395_vm3, 1.0, %v10670_v6  ;;  %vm1668_vm4 = vcmp.eq.s32.totalorder %v330_v27, 1  ;;  %vm1669_vm5 = vcmp.eq.s32.totalorder %v331_v30, 1  ;;  %vm2932_vm6 = vcmp.eq.s32.totalorder %v330_v27, 2  ;;  %s296_s6 = scalar_lea.vmem %s10668_s3, %s4490_s11  ;;  %s300_s10 = scalar_lea.vmem %s10669_s4, %s4490_s11 }
  0x4a   : > { %4659 = vrot.lane.b32.xlu1 %v4658_v24, %s6050_s15  ;;  %10825 = vst [vmem:[#allocation29_spill] sm:$0xff] %v6277_v37  ;;  %10826 = vst [vmem:[#allocation30_spill] sm:$0xff] %v6280_v38  ;;  %vm2933_vm7 = vcmp.eq.s32.totalorder %v331_v30, 2  ;;  %v4678_v39 = vpack.i.bf16 %v6274_v36, %v6271_v35  ;;  %v4683_v40 = vpack.i.bf16 %v6280_v38, %v6277_v37  ;;  %v6289_v41 = vsel %vm1668_vm4, 1.0, %v10670_v6  ;;  %s292_s23 = scalar_lea.vmem %s10667_s2, %s4490_s11 }
  0x4b   : > { %10827 = vst [vmem:[#allocation31_spill] sm:$0xff] %v6289_v41  ;;  %v6292_v42 = vsel %vm1669_vm5, 1.0, %v10670_v6  ;;  %v6295_v43 = vsel %vm2932_vm6, 1.0, %v10670_v6  ;;  %v6298_v44 = vsel %vm2933_vm7, 1.0, %v10670_v6  ;;  %vm367_vm8 = vcmask 1047680  }
  0x4c   : > { %4664 = vrot.lane.b32.xlu0 %v4663_v28, %s6050_s15  ;;  %10828 = vst [vmem:[#allocation32_spill] sm:$0xff] %v6292_v42  ;;  %10829 = vst [vmem:[#allocation33_spill] sm:$0xff] %v6295_v43  ;;  %v4688_v45 = vpack.i.bf16 %v6292_v42, %v6289_v41  ;;  %v4693_v46 = vpack.i.bf16 %v6298_v44, %v6295_v43 }
  0x4d   : > { %10830 = vst [vmem:[#allocation34_spill] sm:$0xff] %v6298_v44 }
  0x4e   : > { %4669 = vrot.lane.b32.xlu1 %v4668_v33, %s6050_s15 }
  0x50   : > { %4674 = vrot.lane.b32.xlu0 %v4673_v34, %s6050_s15 }
  0x52   : > { %4679 = vrot.lane.b32.xlu1 %v4678_v39, %s6050_s15 }
  0x54   : > { %4684 = vrot.lane.b32.xlu0 %v4683_v40, %s6050_s15 }
  0x56   : > { %4689 = vrot.lane.b32.xlu1 %v4688_v45, %s6050_s15 }
  0x58   : > { %4694 = vrot.lane.b32.xlu0 %v4693_v46, %s6050_s15 }
  0x5a   : > { %381 = vrot.lane.b32.xlu1 %v6188_v1, %s6052_s25 }
  0x5c   : > { %374 = vrot.lane.b32.xlu0 %v6188_v1, %s6053_s21 }
  0xb2   : > { %v369_v47 = vpop.permute.xlu0 %368 }
  0xb3   : > { %v370_v48 = vsel %vm367_vm8, %v369_v47, %v6188_v1 }
  0xb4   : > { %371 = vrot.lane.b32.xlu1 %v370_v48, %s6050_s15  ;;  %v4645_v49 = vpop.permute.xlu1 %4644 }
  0xb5   : > { %v4647_v51 = vunpack.i.h.bf16 %v4645_v49  ;;  %v4646_v52 = vunpack.i.l.bf16 %v4645_v49 }
  0xb6   : > { %v4640_v50 = vpop.permute.xlu0 %4639 }
  0xb7   : > { %v4642_v53 = vunpack.i.h.bf16 %v4640_v50  ;;  %v4641_v54 = vunpack.i.l.bf16 %v4640_v50  ;;  %v484_v55 = vsel %vm367_vm8, %v4646_v52, %v6197_v7  ;;  %v487_v56 = vsel %vm367_vm8, %v4647_v51, %v6200_v8 }
  0xb8   : > { %v4650_v59 = vpop.permute.xlu1 %4649  ;;  %v4703_v61 = vpack.i.bf16 %v487_v56, %v484_v55 }
  0xb9   : > { %v478_v57 = vsel %vm367_vm8, %v4641_v54, %v6203_v9  ;;  %v481_v58 = vsel %vm367_vm8, %v4642_v53, %v6206_v10  ;;  %v4652_v63 = vunpack.i.h.bf16 %v4650_v59  ;;  %v4651_v2 = vunpack.i.l.bf16 %v4650_v59 }
  0xba   : > { %v4655_v60 = vpop.permute.xlu0 %4654  ;;  %v4698_v62 = vpack.i.bf16 %v481_v58, %v478_v57  ;;  %4704 = vrot.lane.b32.xlu1 %v4703_v61, %s6050_s15 }
  0xbb   : > { %v4657_v3 = vunpack.i.h.bf16 %v4655_v60  ;;  %v4656_v4 = vunpack.i.l.bf16 %v4655_v60  ;;  %v1744_v12 = vsel %vm367_vm8, %v4651_v2, %v6215_v13  ;;  %v1747_v15 = vsel %vm367_vm8, %v4652_v63, %v6218_v14 }
  0xbc   : > { %4699 = vrot.lane.b32.xlu0 %v4698_v62, %s6050_s15  ;;  %v4660_v16 = vpop.permute.xlu1 %4659  ;;  %v4708_v24 = vpack.i.bf16 %v1747_v15, %v1744_v12 }
  0xbd   : > { %v1750_v5 = vsel %vm367_vm8, %v4656_v4, %v6224_v17  ;;  %v1753_v11 = vsel %vm367_vm8, %v4657_v3, %v6227_v18  ;;  %v4662_v27 = vunpack.i.h.bf16 %v4660_v16  ;;  %v4661_v28 = vunpack.i.l.bf16 %v4660_v16 }
  0xbe   : > { %v4665_v19 = vpop.permute.xlu0 %4664  ;;  %v4713_v20 = vpack.i.bf16 %v1753_v11, %v1750_v5 }
  0xbf   : > { %v4667_v30 = vunpack.i.h.bf16 %v4665_v19  ;;  %v4666_v33 = vunpack.i.l.bf16 %v4665_v19  ;;  %v3008_v40 = vsel %vm367_vm8, %v4661_v28, %v6233_v21  ;;  %v3011_v45 = vsel %vm367_vm8, %v4662_v27, %v6236_v22 }
  0xc0   : > { %4714 = vrot.lane.b32.xlu1 %v4713_v20, %s6050_s15  ;;  %4709 = vrot.lane.b32.xlu0 %v4708_v24, %s6050_s15  ;;  %v4670_v46 = vpop.permute.xlu1 %4669  ;;  %v4718_v49 = vpack.i.bf16 %v3011_v45, %v3008_v40 }
  0xc1   : > { %v3014_v34 = vsel %vm367_vm8, %v4666_v33, %v6239_v23  ;;  %v3017_v39 = vsel %vm367_vm8, %v4667_v30, %v6246_v25  ;;  %v4672_v50 = vunpack.i.h.bf16 %v4670_v46  ;;  %v4671_v51 = vunpack.i.l.bf16 %v4670_v46 }
  0xc2   : > { %v4675_v47 = vpop.permute.xlu0 %4674  ;;  %v4723_v48 = vpack.i.bf16 %v3017_v39, %v3014_v34 }
  0xc3   : > { %v4677_v52 = vunpack.i.h.bf16 %v4675_v47  ;;  %v4676_v53 = vunpack.i.l.bf16 %v4675_v47  ;;  %v490_v56 = vsel %vm367_vm8, %v4671_v51, %v6249_v26  ;;  %v493_v57 = vsel %vm367_vm8, %v4672_v50, %v6255_v29 }
  0xc4   : > { %4724 = vrot.lane.b32.xlu1 %v4723_v48, %s6050_s15  ;;  %4719 = vrot.lane.b32.xlu0 %v4718_v49, %s6050_s15  ;;  %v4680_v58 = vpop.permute.xlu1 %4679  ;;  %v4728_v61 = vpack.i.bf16 %v493_v57, %v490_v56 }
  0xc5   : > { %v1756_v54 = vsel %vm367_vm8, %v4676_v53, %v6259_v31  ;;  %v1759_v55 = vsel %vm367_vm8, %v4677_v52, %v6262_v32  ;;  %v4682_v62 = vunpack.i.h.bf16 %v4680_v58  ;;  %v4681_v63 = vunpack.i.l.bf16 %v4680_v58 }
  0xc6   : > { %v4685_v59 = vpop.permute.xlu0 %4684  ;;  %v4733_v60 = vpack.i.bf16 %v1759_v55, %v1756_v54 }
  0xc7   : > { %v4687_v2 = vunpack.i.h.bf16 %v4685_v59  ;;  %v4686_v3 = vunpack.i.l.bf16 %v4685_v59  ;;  %v3020_v11 = vsel %vm367_vm8, %v4681_v63, %v6271_v35  ;;  %v3023_v12 = vsel %vm367_vm8, %v4682_v62, %v6274_v36 }
  0xc8   : > { %4734 = vrot.lane.b32.xlu1 %v4733_v60, %s6050_s15  ;;  %4729 = vrot.lane.b32.xlu0 %v4728_v61, %s6050_s15  ;;  %v4690_v15 = vpop.permute.xlu1 %4689  ;;  %v4738_v20 = vpack.i.bf16 %v3023_v12, %v3020_v11 }
  0xc9   : > { %v496_v4 = vsel %vm367_vm8, %v4686_v3, %v6277_v37  ;;  %v499_v5 = vsel %vm367_vm8, %v4687_v2, %v6280_v38  ;;  %v4692_v24 = vunpack.i.h.bf16 %v4690_v15  ;;  %v4691_v27 = vunpack.i.l.bf16 %v4690_v15 }
  0xca   : > { %v4695_v16 = vpop.permute.xlu0 %4694  ;;  %v4743_v19 = vpack.i.bf16 %v499_v5, %v496_v4 }
  0xcb   : > { %v4697_v28 = vunpack.i.h.bf16 %v4695_v16  ;;  %v4696_v30 = vunpack.i.l.bf16 %v4695_v16  ;;  %v1762_v39 = vsel %vm367_vm8, %v4691_v27, %v6289_v41  ;;  %v1765_v40 = vsel %vm367_vm8, %v4692_v24, %v6292_v42 }
  0xcc   : > { %4744 = vrot.lane.b32.xlu1 %v4743_v19, %s6050_s15  ;;  %4739 = vrot.lane.b32.xlu0 %v4738_v20, %s6050_s15  ;;  %v4748_v46 = vpack.i.bf16 %v1765_v40, %v1762_v39  ;;  %v382_v47 = vpop.permute.xlu1 %381 }
  0xcd   : > { %v3026_v33 = vsel %vm367_vm8, %v4696_v30, %v6295_v43  ;;  %v3029_v34 = vsel %vm367_vm8, %v4697_v28, %v6298_v44 }
  0xce   : > { %v4753_v45 = vpack.i.bf16 %v3029_v34, %v3026_v33  ;;  %v375_v49 = vpop.permute.xlu0 %374 }
  0xd0   : > { %4754 = vrot.lane.b32.xlu1 %v4753_v45, %s6050_s15  ;;  %4749 = vrot.lane.b32.xlu0 %v4748_v46, %s6050_s15 }
 0x126   : > { %v372_v48 = vpop.permute.xlu1 %371 }
 0x127   : > { %v373_v50 = vsel %vm367_vm8, %v372_v48, %v6188_v1 }
 0x128   : > { %v376_v51 = vsub.s32 %v373_v50, %v375_v49  ;;  %v383_v60 = vsub.s32 %v373_v50, %v382_v47 }
 0x12a   : > { %v378_v52 = vsub.s32 0, %v376_v51  ;;  %v385_v24 = vsub.s32 0, %v383_v60 }
 0x12c   : > { %v6375_v53 = vmin.u32 %v378_v52, %v376_v51  ;;  %v4705_v54 = vpop.permute.xlu1 %4704 }
 0x12d   : > { %v4707_v56 = vunpack.i.h.bf16 %v4705_v54  ;;  %v4706_v57 = vunpack.i.l.bf16 %v4705_v54 }
 0x12e   : > { %10831 = vst [vmem:[#allocation35_spill] sm:$0xff] %v6375_v53  ;;  %v4700_v55 = vpop.permute.xlu0 %4699  ;;  %vm380_vm9 = vcmp.eq.s32.totalorder %v6375_v53, 1 }
 0x12f   : > { %v4702_v58 = vunpack.i.h.bf16 %v4700_v55  ;;  %v4701_v59 = vunpack.i.l.bf16 %v4700_v55  ;;  %v6380_v61 = vsel %vm367_vm8, %v4706_v57, %v6197_v7  ;;  %v6384_v1 = vsel %vm367_vm8, %v4707_v56, %v6200_v8 }
 0x130   : > { %v528_v4 = vsel %vm380_vm9, %v6380_v61, 0.0  ;;  %v529_v5 = vsel %vm380_vm9, %v6384_v1, 0.0  ;;  %v6430_v55 = vmin.u32 %v385_v24, %v383_v60 }
 0x131   : > { %v516_v62 = vsel %vm367_vm8, %v4701_v59, %v6203_v9  ;;  %v517_v63 = vsel %vm367_vm8, %v4702_v58, %v6206_v10  ;;  %v4763_v27 = vpack.i.bf16 %v529_v5, %v528_v4 }
 0x132   : > { %v4715_v2 = vpop.permute.xlu1 %4714  ;;  %v4710_v3 = vpop.permute.xlu0 %4709  ;;  %v526_v11 = vsel %vm380_vm9, %v516_v62, 0.0  ;;  %v527_v12 = vsel %vm380_vm9, %v517_v63, 0.0  ;;  %10832 = vst [vmem:[#allocation36_spill] sm:$0xff] %v6430_v55  ;;  %vm387_vm10 = vcmp.eq.s32.totalorder %v6430_v55, 1  ;;  %v1713_v55 = vrot.slane %v6289_v41, 1 }
 0x133   : > { %v4717_v15 = vunpack.i.h.bf16 %v4715_v2  ;;  %v4716_v16 = vunpack.i.l.bf16 %v4715_v2  ;;  %v4712_v19 = vunpack.i.h.bf16 %v4710_v3  ;;  %v4711_v20 = vunpack.i.l.bf16 %v4710_v3  ;;  %4764 = vrot.lane.b32.xlu1 %v4763_v27, %s6054_s24 }
 0x134   : > { %v4758_v28 = vpack.i.bf16 %v527_v12, %v526_v11 }
 0x135   : > { %v6402_v30 = vsel %vm367_vm8, %v4716_v16, %v6224_v17  ;;  %v6406_v33 = vsel %vm367_vm8, %v4717_v15, %v6227_v18  ;;  %v6410_v34 = vsel %vm367_vm8, %v4711_v20, %v6215_v13  ;;  %v6414_v39 = vsel %vm367_vm8, %v4712_v19, %v6218_v14 }
 0x136   : > { %4759 = vrot.lane.b32.xlu0 %v4758_v28, %s6054_s24  ;;  %v4725_v40 = vpop.permute.xlu1 %4724  ;;  %v4720_v45 = vpop.permute.xlu0 %4719  ;;  %v1792_v46 = vsel %vm380_vm9, %v6402_v30, 0.0  ;;  %v1793_v47 = vsel %vm380_vm9, %v6406_v33, 0.0  ;;  %v1790_v48 = vsel %vm380_vm9, %v6410_v34, 0.0  ;;  %v1791_v49 = vsel %vm380_vm9, %v6414_v39, 0.0 }
 0x137   : > { %v4727_v50 = vunpack.i.h.bf16 %v4725_v40  ;;  %v4726_v51 = vunpack.i.l.bf16 %v4725_v40  ;;  %v4722_v52 = vunpack.i.h.bf16 %v4720_v45  ;;  %v4721_v54 = vunpack.i.l.bf16 %v4720_v45 }
 0x138   : > { %v4773_v56 = vpack.i.bf16 %v1793_v47, %v1792_v46  ;;  %v4768_v57 = vpack.i.bf16 %v1791_v49, %v1790_v48  ;;  %v576_v40 = vsel %vm387_vm10, %v516_v62, 0.0  ;;  %v577_v45 = vsel %vm387_vm10, %v517_v63, 0.0 }
 0x139   : > { %v6434_v58 = vsel %vm367_vm8, %v4726_v51, %v6239_v23  ;;  %v6438_v59 = vsel %vm367_vm8, %v4727_v50, %v6246_v25  ;;  %v3046_v2 = vsel %vm367_vm8, %v4721_v54, %v6233_v21  ;;  %v3047_v3 = vsel %vm367_vm8, %v4722_v52, %v6236_v22 }
 0x13a   : > { %4774 = vrot.lane.b32.xlu1 %v4773_v56, %s6054_s24  ;;  %4769 = vrot.lane.b32.xlu0 %v4768_v57, %s6054_s24  ;;  %v4735_v60 = vpop.permute.xlu1 %4734  ;;  %v4730_v4 = vpop.permute.xlu0 %4729  ;;  %v3056_v5 = vsel %vm380_vm9, %v6434_v58, 0.0  ;;  %v3057_v11 = vsel %vm380_vm9, %v6438_v59, 0.0  ;;  %v3054_v12 = vsel %vm380_vm9, %v3046_v2, 0.0  ;;  %v3055_v15 = vsel %vm380_vm9, %v3047_v3, 0.0 }
 0x13b   : > { %v4737_v16 = vunpack.i.h.bf16 %v4735_v60  ;;  %v4736_v19 = vunpack.i.l.bf16 %v4735_v60  ;;  %v4732_v20 = vunpack.i.h.bf16 %v4730_v4  ;;  %v4731_v24 = vunpack.i.l.bf16 %v4730_v4 }
 0x13c   : > { %v4783_v27 = vpack.i.bf16 %v3057_v11, %v3056_v5  ;;  %v4778_v28 = vpack.i.bf16 %v3055_v15, %v3054_v12  ;;  %v4793_v51 = vpack.i.bf16 %v577_v45, %v576_v40  ;;  %v578_v57 = vsel %vm387_vm10, %v6380_v61, 0.0 }
 0x13d   : > { %v6463_v46 = vsel %vm367_vm8, %v4731_v24, %v6249_v26  ;;  %v6467_v47 = vsel %vm367_vm8, %v4732_v20, %v6255_v29  ;;  %v6479_v63 = vsel %vm367_vm8, %v4736_v19, %v6259_v31  ;;  %v6483_v49 = vsel %vm367_vm8, %v4737_v16, %v6262_v32 }
 0x13e   : > { %4784 = vrot.lane.b32.xlu1 %v4783_v27, %s6054_s24  ;;  %4779 = vrot.lane.b32.xlu0 %v4778_v28, %s6054_s24  ;;  %v530_v48 = vsel %vm380_vm9, %v6463_v46, 0.0  ;;  %v531_v62 = vsel %vm380_vm9, %v6467_v47, 0.0  ;;  %v4740_v50 = vpop.permute.xlu0 %4739  ;;  %v1794_v54 = vsel %vm380_vm9, %v6479_v63, 0.0  ;;  %v1795_v56 = vsel %vm380_vm9, %v6483_v49, 0.0  ;;  %v4745_v11 = vpop.permute.xlu1 %4744 }
 0x13f   : > { %v4788_v52 = vpack.i.bf16 %v531_v62, %v530_v48  ;;  %v579_v60 = vsel %vm387_vm10, %v6384_v1, 0.0  ;;  %v4742_v4 = vunpack.i.h.bf16 %v4740_v50  ;;  %v4741_v5 = vunpack.i.l.bf16 %v4740_v50 }
 0x140   : > { %v4803_v12 = vpack.i.bf16 %v1795_v56, %v1794_v54  ;;  %v4798_v15 = vpack.i.bf16 %v579_v60, %v578_v57  ;;  %v1840_v16 = vsel %vm387_vm10, %v6402_v30, 0.0  ;;  %v1841_v61 = vsel %vm387_vm10, %v6406_v33, 0.0 }
 0x141   : > { %v1838_v1 = vsel %vm387_vm10, %v6410_v34, 0.0  ;;  %v1839_v19 = vsel %vm387_vm10, %v6414_v39, 0.0  ;;  %v4747_v20 = vunpack.i.h.bf16 %v4745_v11  ;;  %v4746_v24 = vunpack.i.l.bf16 %v4745_v11 }
 0x142   : > { %4794 = vrot.lane.b32.xlu1 %v4793_v51, %s6055_s30  ;;  %4789 = vrot.lane.b32.xlu0 %v4788_v52, %s6054_s24  ;;  %v3050_v30 = vsel %vm367_vm8, %v4741_v5, %v6271_v35  ;;  %v3051_v33 = vsel %vm367_vm8, %v4742_v4, %v6274_v36  ;;  %v4750_v27 = vpop.permute.xlu0 %4749  ;;  %v4813_v28 = vpack.i.bf16 %v1841_v61, %v1840_v16  ;;  %v3102_v34 = vsel %vm387_vm10, %v3046_v2, 0.0  ;;  %v4755_v52 = vpop.permute.xlu1 %4754 }
 0x143   : > { %v4808_v40 = vpack.i.bf16 %v1839_v19, %v1838_v1  ;;  %v3103_v39 = vsel %vm387_vm10, %v3047_v3, 0.0  ;;  %v3058_v45 = vsel %vm380_vm9, %v3050_v30, 0.0  ;;  %v3059_v48 = vsel %vm380_vm9, %v3051_v33, 0.0 }
 0x144   : > { %v4752_v62 = vunpack.i.h.bf16 %v4750_v27  ;;  %v4751_v50 = vunpack.i.l.bf16 %v4750_v27  ;;  %v522_v51 = vsel %vm367_vm8, %v4746_v24, %v6277_v37  ;;  %v523_v2 = vsel %vm367_vm8, %v4747_v20, %v6280_v38 }
 0x145   : > { %v4823_v3 = vpack.i.bf16 %v3103_v39, %v3102_v34  ;;  %v4818_v54 = vpack.i.bf16 %v3059_v48, %v3058_v45  ;;  %v532_v56 = vsel %vm380_vm9, %v522_v51, 0.0  ;;  %v533_v57 = vsel %vm380_vm9, %v523_v2, 0.0 }
 0x146   : > { %4804 = vrot.lane.b32.xlu1 %v4803_v12, %s6054_s24  ;;  %4799 = vrot.lane.b32.xlu0 %v4798_v15, %s6055_s30  ;;  %v3104_v60 = vsel %vm387_vm10, %v6434_v58, 0.0  ;;  %v3105_v4 = vsel %vm387_vm10, %v6438_v59, 0.0  ;;  %v4757_v5 = vunpack.i.h.bf16 %v4755_v52  ;;  %v4756_v11 = vunpack.i.l.bf16 %v4755_v52 }
 0x147   : > { %v1788_v12 = vsel %vm367_vm8, %v4751_v50, %v6289_v41  ;;  %v1789_v15 = vsel %vm367_vm8, %v4752_v62, %v6292_v42  ;;  %v4833_v16 = vpack.i.bf16 %v533_v57, %v532_v56  ;;  %v4828_v61 = vpack.i.bf16 %v3105_v4, %v3104_v60 }
 0x148   : > { %v1796_v58 = vsel %vm380_vm9, %v1788_v12, 0.0  ;;  %v1797_v59 = vsel %vm380_vm9, %v1789_v15, 0.0  ;;  %v580_v1 = vsel %vm387_vm10, %v6463_v46, 0.0  ;;  %v581_v19 = vsel %vm387_vm10, %v6467_v47, 0.0 }
 0x149   : > { %v3052_v20 = vsel %vm367_vm8, %v4756_v11, %v6295_v43  ;;  %v3053_v24 = vsel %vm367_vm8, %v4757_v5, %v6298_v44  ;;  %v4843_v27 = vpack.i.bf16 %v1797_v59, %v1796_v58  ;;  %v1842_v47 = vsel %vm387_vm10, %v6479_v63, 0.0 }
 0x14a   : > { %4814 = vrot.lane.b32.xlu1 %v4813_v28, %s6055_s30  ;;  %4809 = vrot.lane.b32.xlu0 %v4808_v40, %s6055_s30  ;;  %v4838_v28 = vpack.i.bf16 %v581_v19, %v580_v1  ;;  %v3060_v40 = vsel %vm380_vm9, %v3052_v20, 0.0  ;;  %v3061_v46 = vsel %vm380_vm9, %v3053_v24, 0.0  ;;  %v1843_v34 = vsel %vm387_vm10, %v6483_v49, 0.0 }
 0x14b   : > { %v4853_v39 = vpack.i.bf16 %v3061_v46, %v3060_v40  ;;  %v4848_v45 = vpack.i.bf16 %v1843_v34, %v1842_v47  ;;  %v582_v48 = vsel %vm387_vm10, %v522_v51, 0.0  ;;  %v583_v62 = vsel %vm387_vm10, %v523_v2, 0.0 }
 0x14c   : > { %v3106_v50 = vsel %vm387_vm10, %v3050_v30, 0.0  ;;  %v3107_v63 = vsel %vm387_vm10, %v3051_v33, 0.0  ;;  %v4863_v49 = vpack.i.bf16 %v583_v62, %v582_v48  ;;  %v3109_v51 = vsel %vm387_vm10, %v3053_v24, 0.0 }
 0x14d   : > { %v4858_v52 = vpack.i.bf16 %v3107_v63, %v3106_v50  ;;  %v1844_v2 = vsel %vm387_vm10, %v1788_v12, 0.0  ;;  %v1845_v30 = vsel %vm387_vm10, %v1789_v15, 0.0  ;;  %v6598_v56 = vshrl.u32 %v332_v0, 7 }
 0x14e   : > { %4824 = vrot.lane.b32.xlu1 %v4823_v3, %s6055_s30  ;;  %4819 = vrot.lane.b32.xlu0 %v4818_v54, %s6054_s24  ;;  %v3108_v3 = vsel %vm387_vm10, %v3052_v20, 0.0  ;;  %v4868_v54 = vpack.i.bf16 %v1845_v30, %v1844_v2  ;;  %v413_v46 = vrot.slane %v6197_v7, 7  ;;  %v417_v47 = vrot.slane %v6200_v8, 7 }
 0x14f   : > { %v4873_v33 = vpack.i.bf16 %v3109_v51, %v3108_v3  ;;  %v334_v57 = vadd.s32 8, %v6598_v56  ;;  %v337_v60 = vrot.slane %v6598_v56, 7  ;;  %vm339_vm11 = vcmp.lt.s32.totalorder %v6598_v56, 1 }
 0x150   : > { %v352_v5 = vrot.slane %v6598_v56, 1  ;;  %vm354_vm12 = vcmp.lt.s32.totalorder %v6598_v56, 7  ;;  %v445_v48 = vrot.slane %v6200_v8, 1  ;;  %v421_v62 = vsel %vm339_vm11, %v413_v46, %v417_v47 }
 0x151   : > { %v338_v4 = vrot.slane %v334_v57, 7  ;;  %v353_v11 = vrot.slane %v334_v57, 1  ;;  %v425_v50 = vsel %vm339_vm11, %v417_v47, %v413_v46  ;;  %v416_v30 = vrot.slane %v6206_v10, 7 }
 0x152   : > { %4834 = vrot.lane.b32.xlu1 %v4833_v16, %s6054_s24  ;;  %4829 = vrot.lane.b32.xlu0 %v4828_v61, %s6055_s30 }
 0x153   : > { %v340_v12 = vsel %vm339_vm11, %v337_v60, %v338_v4  ;;  %v341_v15 = vsel %vm339_vm11, %v338_v4, %v337_v60  ;;  %v355_v0 = vsel %vm354_vm12, %v352_v5, %v353_v11  ;;  %v356_v16 = vsel %vm354_vm12, %v353_v11, %v352_v5 }
 0x154   : > { %v342_v61 = vsub.s32 %v341_v15, %v6598_v56  ;;  %v343_v58 = vsub.s32 %v340_v12, %v334_v57  ;;  %v357_v59 = vsub.s32 %v355_v0, %v6598_v56  ;;  %v358_v1 = vsub.s32 %v356_v16, %v334_v57 }
 0x155   : > { %v440_v57 = vrot.slane %v6203_v9, 1  ;;  %v1687_v60 = vrot.slane %v6224_v17, 7  ;;  %v1691_v4 = vrot.slane %v6227_v18, 7  ;;  %v1711_v5 = vrot.slane %v6224_v17, 1 }
 0x156   : > { %4844 = vrot.lane.b32.xlu1 %v4843_v27, %s6054_s24  ;;  %4839 = vrot.lane.b32.xlu0 %v4838_v28, %s6055_s30  ;;  %v345_v19 = vsub.s32 0, %v342_v61  ;;  %v348_v20 = vsub.s32 0, %v343_v58  ;;  %v360_v24 = vsub.s32 0, %v357_v59  ;;  %v363_v27 = vsub.s32 0, %v358_v1 }
 0x157   : > { %v1715_v11 = vrot.slane %v6227_v18, 1 }
 0x158   : > { %v6615_v28 = vmin.u32 %v345_v19, %v342_v61  ;;  %v6617_v40 = vmin.u32 %v348_v20, %v343_v58  ;;  %v6621_v34 = vmin.u32 %v360_v24, %v357_v59  ;;  %v1695_v59 = vsel %vm339_vm11, %v1687_v60, %v1691_v4 }
 0x159   : > { %v1719_v19 = vsel %vm354_vm12, %v1711_v5, %v1715_v11  ;;  %v1723_v20 = vsel %vm354_vm12, %v1715_v11, %v1711_v5  ;;  %v1686_v24 = vrot.slane %v6215_v13, 7  ;;  %v2950_v5 = vrot.slane %v6233_v21, 7 }
 0x15a   : > { %4854 = vrot.lane.b32.xlu1 %v4853_v39, %s6054_s24  ;;  %4849 = vrot.lane.b32.xlu0 %v4848_v45, %s6055_s30  ;;  %v6623_v39 = vmin.u32 %v363_v27, %v358_v1  ;;  %v441_v45 = vrot.slane %v6197_v7, 1  ;;  %vm350_vm13 = vcmp.eq.s32.totalorder %v6615_v28, 1  ;;  %vm351_vm14 = vcmp.eq.s32.totalorder %v6617_v40, 1 }
 0x15b   : > { %vm365_vm15 = vcmp.eq.s32.totalorder %v6621_v34, 1  ;;  %v435_v3 = vsel %vm351_vm14, %v421_v62, 0.0  ;;  %v1699_v1 = vsel %vm339_vm11, %v1691_v4, %v1687_v60  ;;  %v1690_v27 = vrot.slane %v6218_v14, 7 }
 0x15c   : > { %vm366_vm0 = vcmp.eq.s32.totalorder %v6623_v39, 1  ;;  %v449_v63 = vsel %vm354_vm12, %v441_v45, %v445_v48  ;;  %v2954_v11 = vrot.slane %v6236_v22, 7 }
 0x15d   : > { %v462_v51 = vsel %vm365_vm15, %v449_v63, 0.0  ;;  %v1704_v63 = vsel %vm350_vm13, %v1699_v1, 0.0 }
 0x15e   : > { %4864 = vrot.lane.b32.xlu1 %v4863_v49, %s6055_s30  ;;  %4859 = vrot.lane.b32.xlu0 %v4858_v52, %s6055_s30  ;;  %v453_v49 = vsel %vm354_vm12, %v445_v48, %v441_v45  ;;  %v434_v52 = vsel %vm350_vm13, %v425_v50, 0.0  ;;  %v1710_v45 = vrot.slane %v6215_v13, 1  ;;  %v1714_v48 = vrot.slane %v6218_v14, 1 }
 0x15f   : > { %v463_v2 = vsel %vm366_vm0, %v453_v49, 0.0  ;;  %v6655_v12 = vadd.f32 %v462_v51, %v434_v52  ;;  %v1705_v49 = vsel %vm351_vm14, %v1695_v59, 0.0  ;;  %v1728_v52 = vsel %vm365_vm15, %v1719_v19, 0.0 }
 0x160   : > { %v6657_v15 = vadd.f32 %v463_v2, %v435_v3  ;;  %v1729_v3 = vsel %vm366_vm0, %v1723_v20, 0.0  ;;  %v2951_v51 = vrot.slane %v6239_v23, 7  ;;  %v2955_v2 = vrot.slane %v6246_v25, 7 }
 0x161   : > { %v1718_v60 = vsel %vm354_vm12, %v1710_v45, %v1714_v48  ;;  %v1722_v4 = vsel %vm354_vm12, %v1714_v48, %v1710_v45  ;;  %v2958_v45 = vsel %vm339_vm11, %v2950_v5, %v2954_v11  ;;  %v2962_v48 = vsel %vm339_vm11, %v2954_v11, %v2950_v5 }
 0x162   : > { %4874 = vrot.lane.b32.xlu1 %v4873_v33, %s6055_s30  ;;  %4869 = vrot.lane.b32.xlu0 %v4868_v54, %s6055_s30  ;;  %v412_v33 = vrot.slane %v6203_v9, 7  ;;  %v444_v54 = vrot.slane %v6206_v10, 1  ;;  %v2959_v19 = vsel %vm339_vm11, %v2951_v51, %v2955_v2  ;;  %v2963_v20 = vsel %vm339_vm11, %v2955_v2, %v2951_v51 }
 0x164   : > { %v420_v0 = vsel %vm339_vm11, %v412_v33, %v416_v30  ;;  %v424_v16 = vsel %vm339_vm11, %v416_v30, %v412_v33  ;;  %v448_v61 = vsel %vm354_vm12, %v440_v57, %v444_v54  ;;  %v452_v58 = vsel %vm354_vm12, %v444_v54, %v440_v57 }
 0x165   : > { %v432_v46 = vsel %vm350_vm13, %v424_v16, 0.0  ;;  %v433_v47 = vsel %vm351_vm14, %v420_v0, 0.0  ;;  %v460_v62 = vsel %vm365_vm15, %v448_v61, 0.0  ;;  %v461_v50 = vsel %vm366_vm0, %v452_v58, 0.0 }
 0x166   : > { %v1694_v30 = vsel %vm339_vm11, %v1686_v24, %v1690_v27  ;;  %v1698_v33 = vsel %vm339_vm11, %v1690_v27, %v1686_v24  ;;  %v2975_v54 = vrot.slane %v6239_v23, 1  ;;  %v2979_v57 = vrot.slane %v6246_v25, 1 }
 0x167   : > { %v6709_v0 = vadd.f32 %v460_v62, %v432_v46  ;;  %v6711_v16 = vadd.f32 %v461_v50, %v433_v47  ;;  %v6713_v61 = vadd.f32 %v1728_v52, %v1704_v63  ;;  %v6715_v58 = vadd.f32 %v1729_v3, %v1705_v49 }
 0x168   : > { %v1702_v59 = vsel %vm350_vm13, %v1698_v33, 0.0  ;;  %v1703_v1 = vsel %vm351_vm14, %v1694_v30, 0.0  ;;  %v1726_v24 = vsel %vm365_vm15, %v1718_v60, 0.0  ;;  %v1727_v27 = vsel %vm366_vm0, %v1722_v4, 0.0 }
 0x169   : > { %v2983_v46 = vsel %vm354_vm12, %v2975_v54, %v2979_v57  ;;  %v2987_v47 = vsel %vm354_vm12, %v2979_v57, %v2975_v54  ;;  %v2974_v62 = vrot.slane %v6233_v21, 1  ;;  %v2978_v50 = vrot.slane %v6236_v22, 1 }
 0x16a   : > { %v2968_v63 = vsel %vm350_vm13, %v2963_v20, 0.0  ;;  %v2969_v49 = vsel %vm351_vm14, %v2959_v19, 0.0  ;;  %v414_v52 = vrot.slane %v6249_v26, 7  ;;  %v418_v3 = vrot.slane %v6255_v29, 7 }
 0x16b   : > { %v2992_v51 = vsel %vm365_vm15, %v2983_v46, 0.0  ;;  %v2993_v2 = vsel %vm366_vm0, %v2987_v47, 0.0  ;;  %v442_v30 = vrot.slane %v6249_v26, 1  ;;  %v446_v33 = vrot.slane %v6255_v29, 1 }
 0x16c   : > { %v6751_v54 = vadd.f32 %v1726_v24, %v1702_v59  ;;  %v6753_v57 = vadd.f32 %v1727_v27, %v1703_v1  ;;  %v2966_v60 = vsel %vm350_vm13, %v2962_v48, 0.0  ;;  %v2967_v4 = vsel %vm351_vm14, %v2958_v45, 0.0 }
 0x16d   : > { %v2982_v5 = vsel %vm354_vm12, %v2974_v62, %v2978_v50  ;;  %v2986_v11 = vsel %vm354_vm12, %v2978_v50, %v2974_v62  ;;  %v1688_v19 = vrot.slane %v6259_v31, 7  ;;  %v1692_v20 = vrot.slane %v6262_v32, 7 }
 0x16e   : > { %v6765_v59 = vadd.f32 %v2992_v51, %v2968_v63  ;;  %v6767_v1 = vadd.f32 %v2993_v2, %v2969_v49  ;;  %v422_v24 = vsel %vm339_vm11, %v414_v52, %v418_v3  ;;  %v426_v27 = vsel %vm339_vm11, %v418_v3, %v414_v52 }
 0x16f   : > { %v450_v46 = vsel %vm354_vm12, %v442_v30, %v446_v33  ;;  %v454_v47 = vsel %vm354_vm12, %v446_v33, %v442_v30  ;;  %v1712_v45 = vrot.slane %v6259_v31, 1  ;;  %v1716_v48 = vrot.slane %v6262_v32, 1 }
 0x170   : > { %v2990_v62 = vsel %vm365_vm15, %v2982_v5, 0.0  ;;  %v2991_v50 = vsel %vm366_vm0, %v2986_v11, 0.0  ;;  %v2952_v63 = vrot.slane %v6271_v35, 7  ;;  %v2956_v49 = vrot.slane %v6274_v36, 7 }
 0x171   : > { %v436_v52 = vsel %vm350_vm13, %v426_v27, 0.0  ;;  %v437_v3 = vsel %vm351_vm14, %v422_v24, 0.0  ;;  %v1696_v51 = vsel %vm339_vm11, %v1688_v19, %v1692_v20  ;;  %v2976_v2 = vrot.slane %v6271_v35, 1 }
 0x172   : > { %v464_v30 = vsel %vm365_vm15, %v450_v46, 0.0  ;;  %v465_v33 = vsel %vm366_vm0, %v454_v47, 0.0  ;;  %v1700_v5 = vsel %vm339_vm11, %v1692_v20, %v1688_v19  ;;  %v2980_v11 = vrot.slane %v6274_v36, 1 }
 0x173   : > { %v6799_v27 = vadd.f32 %v2990_v62, %v2966_v60  ;;  %v6801_v6 = vadd.f32 %v2991_v50, %v2967_v4  ;;  %v1720_v24 = vsel %vm354_vm12, %v1712_v45, %v1716_v48  ;;  %v1724_v53 = vsel %vm354_vm12, %v1716_v48, %v1712_v45 }
 0x174   : > { %v2960_v46 = vsel %vm339_vm11, %v2952_v63, %v2956_v49  ;;  %v2964_v47 = vsel %vm339_vm11, %v2956_v49, %v2952_v63  ;;  %v415_v19 = vrot.slane %v6277_v37, 7  ;;  %v419_v20 = vrot.slane %v6280_v38, 7 }
 0x175   : > { %v6813_v60 = vadd.f32 %v464_v30, %v436_v52  ;;  %v6815_v4 = vadd.f32 %v465_v33, %v437_v3  ;;  %v1706_v62 = vsel %vm350_vm13, %v1700_v5, 0.0  ;;  %v1707_v45 = vsel %vm351_vm14, %v1696_v51, 0.0 }
 0x176   : > { %v1730_v48 = vsel %vm365_vm15, %v1720_v24, 0.0  ;;  %v1731_v50 = vsel %vm366_vm0, %v1724_v53, 0.0  ;;  %v2984_v63 = vsel %vm354_vm12, %v2976_v2, %v2980_v11  ;;  %v2988_v49 = vsel %vm354_vm12, %v2980_v11, %v2976_v2 }
 0x177   : > { %v2970_v52 = vsel %vm350_vm13, %v2964_v47, 0.0  ;;  %v2971_v3 = vsel %vm351_vm14, %v2960_v46, 0.0  ;;  %v443_v51 = vrot.slane %v6277_v37, 1  ;;  %v447_v30 = vrot.slane %v6280_v38, 1 }
 0x178   : > { %v423_v33 = vsel %vm339_vm11, %v415_v19, %v419_v20  ;;  %v427_v53 = vsel %vm339_vm11, %v419_v20, %v415_v19  ;;  %v1689_v5 = vrot.slane %v6289_v41, 7  ;;  %v1693_v2 = vrot.slane %v6292_v42, 7 }
 0x179   : > { %v2994_v46 = vsel %vm365_vm15, %v2984_v63, 0.0  ;;  %v2995_v47 = vsel %vm366_vm0, %v2988_v49, 0.0  ;;  %v1717_v35 = vrot.slane %v6292_v42, 1  ;;  %v2953_v36 = vrot.slane %v6295_v43, 7 }
 0x17a   : > { %v2957_v19 = vrot.slane %v6298_v44, 7  ;;  %v2977_v20 = vrot.slane %v6295_v43, 1  ;;  %v2981_v38 = vrot.slane %v6298_v44, 1  ;;  %v6853_v37 = vadd.f32 %v1730_v48, %v1706_v62 }
 0x17b   : > { %v6855_v31 = vadd.f32 %v1731_v50, %v1707_v45  ;;  %v438_v63 = vsel %vm350_vm13, %v427_v53, 0.0  ;;  %v439_v49 = vsel %vm351_vm14, %v423_v33, 0.0  ;;  %v451_v41 = vsel %vm354_vm12, %v443_v51, %v447_v30 }
 0x17c   : > { %v455_v42 = vsel %vm354_vm12, %v447_v30, %v443_v51  ;;  %v1697_v43 = vsel %vm339_vm11, %v1689_v5, %v1693_v2  ;;  %v1701_v62 = vsel %vm339_vm11, %v1693_v2, %v1689_v5  ;;  %v6873_v50 = vadd.f32 %v2994_v46, %v2970_v52 }
 0x17d   : > { %v6875_v53 = vadd.f32 %v2995_v47, %v2971_v3  ;;  %v1721_v33 = vsel %vm354_vm12, %v1713_v55, %v1717_v35  ;;  %v1725_v51 = vsel %vm354_vm12, %v1717_v35, %v1713_v55  ;;  %v2961_v30 = vsel %vm339_vm11, %v2953_v36, %v2957_v19 }
 0x17e   : > { %v2965_v5 = vsel %vm339_vm11, %v2957_v19, %v2953_v36  ;;  %v2985_v2 = vsel %vm354_vm12, %v2977_v20, %v2981_v38  ;;  %v2989_v52 = vsel %vm354_vm12, %v2981_v38, %v2977_v20  ;;  %v466_v3 = vsel %vm365_vm15, %v451_v41, 0.0 }
 0x17f   : > { %v467_v46 = vsel %vm366_vm0, %v455_v42, 0.0  ;;  %v1708_v35 = vsel %vm350_vm13, %v1701_v62, 0.0  ;;  %v1709_v55 = vsel %vm351_vm14, %v1697_v43, 0.0  ;;  %v1732_v36 = vsel %vm365_vm15, %v1721_v33, 0.0 }
 0x180   : > { %v1733_v47 = vsel %vm366_vm0, %v1725_v51, 0.0  ;;  %v2972_v41 = vsel %vm350_vm13, %v2965_v5, 0.0  ;;  %v2973_v42 = vsel %vm351_vm14, %v2961_v30, 0.0  ;;  %v2996_v20 = vsel %vm365_vm15, %v2985_v2, 0.0 }
 0x181   : > { %v2997_v43 = vsel %vm366_vm0, %v2989_v52, 0.0  ;;  %v6913_v62 = vadd.f32 %v466_v3, %v438_v63  ;;  %v6915_v33 = vadd.f32 %v467_v46, %v439_v49  ;;  %v6917_v51 = vadd.f32 %v1732_v36, %v1708_v35 }
 0x182   : > { %v6919_v44 = vadd.f32 %v1733_v47, %v1709_v55  ;;  %v6925_v32 = vadd.f32 %v2996_v20, %v2972_v41  ;;  %v6927_v2 = vadd.f32 %v2997_v43, %v2973_v42 }
 0x1a5   : > { %v6841_v11 = vpop.permute.xlu1 %4764 }
 0x1a6   : > { %v5886_v5 = vadd.high.f32.bf16 %v6657_v15, %v6841_v11  ;;  %v5887_v30 = vadd.low.f32.bf16 %v6655_v12, %v6841_v11 }
 0x1a8   : > { %v4760_v24 = vpop.permute.xlu0 %4759 }
 0x1a9   : > { %v5888_v63 = vadd.low.f32.bf16 %v6709_v0, %v4760_v24  ;;  %v5889_v49 = vadd.high.f32.bf16 %v6711_v16, %v4760_v24 }
 0x1ac   : > { %v6869_v45 = vpop.permute.xlu1 %4774  ;;  %v6871_v48 = vpop.permute.xlu0 %4769 }
 0x1ad   : > { %v5890_v3 = vadd.high.f32.bf16 %v6715_v58, %v6869_v45  ;;  %v5891_v15 = vadd.low.f32.bf16 %v6713_v61, %v6869_v45  ;;  %v5894_v12 = vadd.high.f32.bf16 %v6753_v57, %v6871_v48  ;;  %v5895_v11 = vadd.low.f32.bf16 %v6751_v54, %v6871_v48 }
 0x1b0   : > { %v6901_v19 = vpop.permute.xlu1 %4784  ;;  %v6903_v38 = vpop.permute.xlu0 %4779 }
 0x1b1   : > { %v5896_v55 = vadd.high.f32.bf16 %v6767_v1, %v6901_v19  ;;  %v5897_v0 = vadd.low.f32.bf16 %v6765_v59, %v6901_v19  ;;  %v5899_v61 = vadd.low.f32.bf16 %v6799_v27, %v6903_v38 }
 0x1b4   : > { %v4795_v29 = vpop.permute.xlu1 %4794  ;;  %v6929_v52 = vpop.permute.xlu0 %4789 }
 0x1b5   : > { %v5892_v46 = vadd.low.f32.bf16 %v5888_v63, %v4795_v29  ;;  %v5893_v35 = vadd.high.f32.bf16 %v5889_v49, %v4795_v29  ;;  %v5898_v29 = vadd.high.f32.bf16 %v6801_v6, %v6903_v38  ;;  %v10833_v38 = vmov 0.0  }
 0x1b7   : > { %v624_v24 = vmul.f32 0.25, %v5892_v46  ;;  %v625_v36 = vmul.f32 0.25, %v5893_v35 }
 0x1b8   : > { %v6945_v16 = vpop.permute.xlu1 %4804  ;;  %v4800_v58 = vpop.permute.xlu0 %4799 }
 0x1b9   : > { %v632_v57 = vsub.f32 %v6203_v9, %v624_v24  ;;  %v633_v54 = vsub.f32 %v6206_v10, %v625_v36  ;;  %v5904_v6 = vadd.high.f32.bf16 %v5886_v5, %v4800_v58  ;;  %v5905_v42 = vadd.low.f32.bf16 %v5887_v30, %v4800_v58 }
 0x1bb   : > { %vm640_vm1 = vcmp.gt.f32.partialorder %v632_v57, 0.0  ;;  %vm641_vm2 = vcmp.gt.f32.partialorder %v633_v54, 0.0  ;;  %v627_v49 = vmul.f32 0.25, %v5904_v6  ;;  %v626_v46 = vmul.f32 0.25, %v5905_v42 }
 0x1bc   : > { %v4815_v20 = vpop.permute.xlu1 %4814  ;;  %v4810_v27 = vpop.permute.xlu0 %4809  ;;  %v6962_v43 = vsel %vm640_vm1, 1.0, %v10833_v38  ;;  %v6965_v63 = vsel %vm641_vm2, 1.0, %v10833_v38 }
 0x1bd   : > { %10834 = vst [vmem:[#allocation37_spill] sm:$0xff] %v6962_v43  ;;  %10835 = vst [vmem:[#allocation38_spill] sm:$0xff] %v6965_v63  ;;  %v668_v24 = vrot.slane %v6965_v63, 7  ;;  %v635_v30 = vsub.f32 %v6200_v8, %v627_v49  ;;  %v634_v58 = vsub.f32 %v6197_v7, %v626_v46  ;;  %v5906_v57 = vadd.high.f32.bf16 %v5890_v3, %v4815_v20 }
 0x1be   : > { %v5907_v54 = vadd.low.f32.bf16 %v5891_v15, %v4815_v20  ;;  %v5908_v5 = vadd.low.f32.bf16 %v5895_v11, %v4810_v27  ;;  %v5909_v48 = vadd.high.f32.bf16 %v5894_v12, %v4810_v27 }
 0x1bf   : > { %vm643_vm3 = vcmp.gt.f32.partialorder %v635_v30, 0.0  ;;  %vm642_vm4 = vcmp.gt.f32.partialorder %v634_v58, 0.0  ;;  %v1889_v47 = vmul.f32 0.25, %v5906_v57 }
 0x1c0   : > { %v4825_v41 = vpop.permute.xlu1 %4824  ;;  %v1888_v6 = vmul.f32 0.25, %v5907_v54  ;;  %v6973_v42 = vpop.permute.xlu0 %4819  ;;  %v6976_v45 = vsel %vm643_vm3, 1.0, %v10833_v38  ;;  %v6979_v36 = vsel %vm642_vm4, 1.0, %v10833_v38  ;;  %v1886_v58 = vmul.f32 0.25, %v5908_v5 }
 0x1c1   : > { %10836 = vst [vmem:[#allocation39_spill] sm:$0xff] %v6976_v45  ;;  %10837 = vst [vmem:[#allocation40_spill] sm:$0xff] %v6979_v36  ;;  %v669_v49 = vrot.slane %v6976_v45, 7  ;;  %v1897_v46 = vsub.f32 %v6227_v18, %v1889_v47  ;;  %v1887_v57 = vmul.f32 0.25, %v5909_v48  ;;  %v5910_v54 = vadd.low.f32.bf16 %v5899_v61, %v4825_v41 }
 0x1c2   : > { %v1896_v30 = vsub.f32 %v6224_v17, %v1888_v6  ;;  %v5911_v35 = vadd.high.f32.bf16 %v5898_v29, %v4825_v41  ;;  %v1894_v12 = vsub.f32 %v6215_v13, %v1886_v58 }
 0x1c3   : > { %vm1905_vm5 = vcmp.gt.f32.partialorder %v1897_v46, 0.0  ;;  %v1895_v11 = vsub.f32 %v6218_v14, %v1887_v57  ;;  %v3150_v20 = vmul.f32 0.25, %v5910_v54 }
 0x1c4   : > { %vm1904_vm6 = vcmp.gt.f32.partialorder %v1896_v30, 0.0  ;;  %v6990_v27 = vsel %vm1905_vm5, 1.0, %v10833_v38  ;;  %v3151_v47 = vmul.f32 0.25, %v5911_v35  ;;  %v6995_v15 = vpop.permute.xlu1 %4834  ;;  %v4830_v5 = vpop.permute.xlu0 %4829  ;;  %vm1902_vm7 = vcmp.gt.f32.partialorder %v1894_v12, 0.0 }
 0x1c5   : > { %10838 = vst [vmem:[#allocation41_spill] sm:$0xff] %v6990_v27  ;;  %v6993_v3 = vsel %vm1904_vm6, 1.0, %v10833_v38  ;;  %vm1903_vm1 = vcmp.gt.f32.partialorder %v1895_v11, 0.0  ;;  %v3158_v6 = vsub.f32 %v6233_v21, %v3150_v20  ;;  %v7004_v30 = vsel %vm1902_vm7, 1.0, %v10833_v38  ;;  %v10868_v21 = vld [vmem:[#allocation25_spill] sm:$0xff] }
 0x1c6   : > { %10839 = vst [vmem:[#allocation42_spill] sm:$0xff] %v6993_v3  ;;  %v3159_v46 = vsub.f32 %v6236_v22, %v3151_v47  ;;  %10840 = vst [vmem:[#allocation43_spill] sm:$0xff] %v7004_v30  ;;  %v7007_v35 = vsel %vm1903_vm1, 1.0, %v10833_v38  ;;  %v5916_v11 = vadd.high.f32.bf16 %v5896_v55, %v4830_v5  ;;  %v5917_v61 = vadd.low.f32.bf16 %v5897_v0, %v4830_v5 }
 0x1c7   : > { %10841 = vst [vmem:[#allocation44_spill] sm:$0xff] %v7007_v35  ;;  %vm3166_vm2 = vcmp.gt.f32.partialorder %v3158_v6, 0.0  ;;  %v10844_v12 = vrot.slane %v6962_v43, 7  ;;  %v10846_v55 = vadd.low.f32.bf16 %v6813_v60, %v6929_v52  ;;  %v10847_v5 = vadd.high.f32.bf16 %v6815_v4, %v6929_v52 }
 0x1c8   : > { %vm3167_vm3 = vcmp.gt.f32.partialorder %v3159_v46, 0.0  ;;  %v7018_v47 = vsel %vm3166_vm2, 1.0, %v10833_v38  ;;  %v7023_v29 = vpop.permute.xlu1 %4844  ;;  %v4840_v48 = vpop.permute.xlu0 %4839  ;;  %v3153_v57 = vmul.f32 0.25, %v5916_v11  ;;  %v3152_v54 = vmul.f32 0.25, %v5917_v61 }
 0x1c9   : > { %10842 = vst [vmem:[#allocation45_spill] sm:$0xff] %v7018_v47  ;;  %v7021_v41 = vsel %vm3167_vm3, 1.0, %v10833_v38  ;;  %v672_v20 = vsel %vm339_vm11, %v10844_v12, %v668_v24  ;;  %v10845_v58 = vmov %v10844_v12  ;;  %v5920_v0 = vadd.low.f32.bf16 %v10846_v55, %v4840_v48 }
 0x1ca   : > { %10843 = vst [vmem:[#allocation46_spill] sm:$0xff] %v7021_v41  ;;  %v676_v1 = vsel %vm339_vm11, %v668_v24, %v10845_v58  ;;  %v5921_v61 = vadd.high.f32.bf16 %v10847_v5, %v4840_v48  ;;  %v3161_v12 = vsub.f32 %v6246_v25, %v3153_v57  ;;  %v3160_v11 = vsub.f32 %v6239_v23, %v3152_v54 }
 0x1cb   : > { %v680_v24 = vsel %vm350_vm13, %v676_v1, 0.0  ;;  %v681_v58 = vsel %vm351_vm14, %v672_v20, 0.0  ;;  %v628_v59 = vmul.f32 0.25, %v5920_v0  ;;  %v10848_v6 = vrot.slane %v6965_v63, 1  ;;  %v10854_v0 = vld [vmem:[#allocation24_spill] sm:$0xff] }
 0x1cc   : > { %v629_v19 = vmul.f32 0.25, %v5921_v61  ;;  %v10849_v60 = vrot.slane %v6962_v43, 1  ;;  %vm3169_vm4 = vcmp.gt.f32.partialorder %v3161_v12, 0.0  ;;  %vm3168_vm5 = vcmp.gt.f32.partialorder %v3160_v11, 0.0  ;;  %v7091_v61 = vpop.permute.xlu1 %4854 }
 0x1cd   : > { %v10851_v48 = vmov %v10848_v6  ;;  %v7084_v1 = vsel %vm3169_vm4, 1.0, %v10833_v38  ;;  %v636_v55 = vsub.f32 %v6249_v26, %v628_v59  ;;  %v10859_v12 = vrot.slane %v6976_v45, 1 }
 0x1ce   : > { %v696_v4 = vsel %vm354_vm12, %v10849_v60, %v10848_v6  ;;  %v10850_v52 = vmov %v10849_v60  ;;  %10852 = vst [vmem:[#allocation47_spill] sm:$0xff] %v7084_v1  ;;  %v7087_v6 = vsel %vm3168_vm5, 1.0, %v10833_v38  ;;  %v637_v5 = vsub.f32 %v10854_v0, %v629_v19 }
 0x1cf   : > { %v700_v57 = vsel %vm354_vm12, %v10851_v48, %v10850_v52  ;;  %v704_v54 = vsel %vm365_vm15, %v696_v4, 0.0  ;;  %10853 = vst [vmem:[#allocation48_spill] sm:$0xff] %v7087_v6  ;;  %v4850_v52 = vpop.permute.xlu0 %4849  ;;  %vm644_vm6 = vcmp.gt.f32.partialorder %v636_v55, 0.0  ;;  %v10862_v26 = vadd.low.f32.bf16 %v6853_v37, %v6945_v16 }
 0x1d0   : > { %v705_v20 = vsel %vm366_vm0, %v700_v57, 0.0  ;;  %vm645_vm7 = vcmp.gt.f32.partialorder %v637_v5, 0.0  ;;  %v712_v48 = vmax.f32 %v680_v24, %v704_v54  ;;  %v7098_v46 = vsel %vm644_vm6, 1.0, %v10833_v38 }
 0x1d1   : > { %v713_v57 = vmax.f32 %v681_v58, %v705_v20  ;;  %10855 = vst [vmem:[#allocation49_spill] sm:$0xff] %v7098_v46  ;;  %v7101_v59 = vsel %vm645_vm7, 1.0, %v10833_v38  ;;  %v10857_v20 = vrot.slane %v6979_v36, 7  ;;  %v5925_v0 = vadd.low.f32.bf16 %v10862_v26, %v4850_v52 }
 0x1d2   : > { %10856 = vst [vmem:[#allocation50_spill] sm:$0xff] %v7101_v59  ;;  %v7108_v4 = vmax.f32 %v6962_v43, %v712_v48 }
 0x1d3   : > { %v7111_v24 = vmax.f32 %v6965_v63, %v713_v57  ;;  %v673_v55 = vsel %vm339_vm11, %v10857_v20, %v669_v49  ;;  %v10858_v5 = vmov %v10857_v20  ;;  %v4865_v57 = vpop.permute.xlu1 %4864  ;;  %v10860_v20 = vrot.slane %v6979_v36, 1  ;;  %v4860_v54 = vpop.permute.xlu0 %4859 }
 0x1d4   : > { %v677_v48 = vsel %vm339_vm11, %v669_v49, %v10858_v5  ;;  %v683_v19 = vsel %vm351_vm14, %v673_v55, 0.0  ;;  %v10861_v49 = vadd.high.f32.bf16 %v6855_v31, %v6945_v16  ;;  %v10864_v55 = vmov %v10859_v12 }
 0x1d5   : > { %v4878_v11 = vpack.i.bf16 %v7111_v24, %v7108_v4  ;;  %v682_v60 = vsel %vm350_vm13, %v677_v48, 0.0  ;;  %v697_v58 = vsel %vm354_vm12, %v10860_v20, %v10859_v12  ;;  %v10863_v48 = vmov %v10860_v20 }
 0x1d6   : > { %v5924_v5 = vadd.high.f32.bf16 %v10861_v49, %v4850_v52  ;;  %v701_v23 = vsel %vm354_vm12, %v10864_v55, %v10863_v48  ;;  %v706_v25 = vsel %vm365_vm15, %v697_v58, 0.0  ;;  %v1890_v49 = vmul.f32 0.25, %v5925_v0  ;;  %v10867_v55 = vld [vmem:[#allocation26_spill] sm:$0xff] }
 0x1d7   : > { %4879 = vrot.lane.b32.xlu0 %v4878_v11, %s6050_s15  ;;  %v707_v31 = vsel %vm366_vm0, %v701_v23, 0.0  ;;  %v714_v12 = vmax.f32 %v682_v60, %v706_v25  ;;  %v10865_v16 = vadd.low.f32.bf16 %v6913_v62, %v6995_v15  ;;  %v10866_v48 = vadd.high.f32.bf16 %v6915_v33, %v6995_v15 }
 0x1d8   : > { %v1891_v20 = vmul.f32 0.25, %v5924_v5  ;;  %v715_v37 = vmax.f32 %v683_v19, %v707_v31  ;;  %v1898_v22 = vsub.f32 %v10868_v21, %v1890_v49  ;;  %v10869_v25 = vadd.high.f32.bf16 %v6875_v53, %v6973_v42 }
 0x1d9   : > { %v7159_v26 = vmax.f32 %v6979_v36, %v714_v12  ;;  %v5926_v52 = vadd.low.f32.bf16 %v10865_v16, %v4865_v57  ;;  %v5927_v58 = vadd.high.f32.bf16 %v10866_v48, %v4865_v57  ;;  %v10870_v62 = vadd.low.f32.bf16 %v6873_v50, %v6973_v42  ;;  %v10875_v50 = vld [vmem:[#allocation29_spill] sm:$0xff] }
 0x1da   : > { %v1899_v11 = vsub.f32 %v10867_v55, %v1891_v20  ;;  %v7170_v23 = vmax.f32 %v6976_v45, %v715_v37  ;;  %v5928_v0 = vadd.high.f32.bf16 %v10869_v25, %v4860_v54  ;;  %v10871_v33 = vrot.slane %v6990_v27, 7 }
 0x1db   : > { %v630_v60 = vmul.f32 0.25, %v5926_v52  ;;  %v631_v19 = vmul.f32 0.25, %v5927_v58  ;;  %v5929_v5 = vadd.low.f32.bf16 %v10870_v62, %v4860_v54  ;;  %v10872_v15 = vrot.slane %v6993_v3, 7  ;;  %v10876_v54 = vld [vmem:[#allocation30_spill] sm:$0xff]  ;;  %v10877_v58 = vld [vmem:[#allocation28_spill] sm:$0xff] }
 0x1dc   : > { %vm1907_vm1 = vcmp.gt.f32.partialorder %v1899_v11, 0.0  ;;  %vm1906_vm2 = vcmp.gt.f32.partialorder %v1898_v22, 0.0  ;;  %v4883_v31 = vpack.i.bf16 %v7170_v23, %v7159_v26  ;;  %v3155_v53 = vmul.f32 0.25, %v5928_v0 }
 0x1dd   : > { %v1935_v57 = vsel %vm339_vm11, %v10872_v15, %v10871_v33  ;;  %v7187_v12 = vsel %vm1907_vm1, 1.0, %v10833_v38  ;;  %v7190_v20 = vsel %vm1906_vm2, 1.0, %v10833_v38  ;;  %v638_v42 = vsub.f32 %v10875_v50, %v630_v60 }
 0x1de   : > { %10873 = vst [vmem:[#allocation51_spill] sm:$0xff] %v7187_v12  ;;  %10874 = vst [vmem:[#allocation52_spill] sm:$0xff] %v7190_v20  ;;  %v639_v49 = vsub.f32 %v10876_v54, %v631_v19  ;;  %4884 = vrot.lane.b32.xlu1 %v4883_v31, %s6050_s15  ;;  %v3154_v48 = vmul.f32 0.25, %v5929_v5  ;;  %v3163_v11 = vsub.f32 %v10877_v58, %v3155_v53  ;;  %v10880_v60 = vmov %v10872_v15 }
 0x1df   : > { %vm646_vm3 = vcmp.gt.f32.partialorder %v638_v42, 0.0  ;;  %v10881_v19 = vmov %v10871_v33  ;;  %v1945_v33 = vsel %vm351_vm14, %v1935_v57, 0.0  ;;  %v10882_v42 = vld [vmem:[#allocation27_spill] sm:$0xff]  ;;  %v10883_v16 = vrot.slane %v6990_v27, 1 }
 0x1e0   : > { %vm647_vm4 = vcmp.gt.f32.partialorder %v639_v49, 0.0  ;;  %v7201_v25 = vsel %vm646_vm3, 1.0, %v10833_v38  ;;  %v1939_v62 = vsel %vm339_vm11, %v10881_v19, %v10880_v60  ;;  %v3162_v49 = vsub.f32 %v10882_v42, %v3154_v48 }
 0x1e1   : > { %10878 = vst [vmem:[#allocation53_spill] sm:$0xff] %v7201_v25  ;;  %v7204_v0 = vsel %vm647_vm4, 1.0, %v10833_v38  ;;  %vm3171_vm5 = vcmp.gt.f32.partialorder %v3163_v11, 0.0  ;;  %v1944_v52 = vsel %vm350_vm13, %v1939_v62, 0.0  ;;  %v10884_v60 = vrot.slane %v6993_v3, 1 }
 0x1e2   : > { %10879 = vst [vmem:[#allocation54_spill] sm:$0xff] %v7204_v0  ;;  %v7228_v19 = vsel %vm3171_vm5, 1.0, %v10833_v38  ;;  %v10887_v53 = vmov %v10883_v16  ;;  %v10888_v62 = vrot.slane %v7007_v35, 7  ;;  %v10889_v5 = vrot.slane %v7004_v30, 7 }
 0x1e3   : > { %v1959_v57 = vsel %vm354_vm12, %v10884_v60, %v10883_v16  ;;  %10885 = vst [vmem:[#allocation55_spill] sm:$0xff] %v7228_v19  ;;  %v10886_v31 = vmov %v10884_v60  ;;  %vm3170_vm6 = vcmp.gt.f32.partialorder %v3162_v49, 0.0  ;;  %v4875_v49 = vpop.permute.xlu1 %4874  ;;  %v10898_v54 = vadd.high.f32.bf16 %v6927_v2, %v7091_v61 }
 0x1e4   : > { %v1963_v48 = vsel %vm354_vm12, %v10887_v53, %v10886_v31  ;;  %v1968_v11 = vsel %vm365_vm15, %v1959_v57, 0.0  ;;  %v1934_v16 = vsel %vm339_vm11, %v10889_v5, %v10888_v62  ;;  %v7249_v31 = vsel %vm3170_vm6, 1.0, %v10833_v38 }
 0x1e5   : > { %v1969_v22 = vsel %vm366_vm0, %v1963_v48, 0.0  ;;  %10890 = vst [vmem:[#allocation56_spill] sm:$0xff] %v7249_v31  ;;  %v1976_v53 = vmax.f32 %v1944_v52, %v1968_v11  ;;  %v10891_v37 = vmov %v10889_v5  ;;  %v10892_v42 = vmov %v10888_v62  ;;  %v4870_v52 = vpop.permute.xlu0 %4869 }
 0x1e6   : > { %v1977_v57 = vmax.f32 %v1945_v33, %v1969_v22  ;;  %v1938_v5 = vsel %vm339_vm11, %v10892_v42, %v10891_v37  ;;  %v1943_v60 = vsel %vm351_vm14, %v1934_v16, 0.0  ;;  %v10893_v37 = vrot.slane %v7007_v35, 1 }
 0x1e7   : > { %v1942_v48 = vsel %vm350_vm13, %v1938_v5, 0.0  ;;  %v7264_v22 = vmax.f32 %v6993_v3, %v1976_v53  ;;  %v10894_v42 = vrot.slane %v7004_v30, 1  ;;  %v5931_v21 = vadd.high.f32.bf16 %v10898_v54, %v4875_v49 }
 0x1e8   : > { %v7267_v33 = vmax.f32 %v6990_v27, %v1977_v57  ;;  %v10896_v5 = vmov %v10893_v37  ;;  %v10936_v14 = vrot.slane %v7187_v12, 1 }
 0x1e9   : > { %v1958_v11 = vsel %vm354_vm12, %v10894_v42, %v10893_v37  ;;  %v10895_v15 = vmov %v10894_v42  ;;  %v10897_v37 = vadd.low.f32.bf16 %v6925_v32, %v7091_v61  ;;  %v10901_v32 = vadd.high.f32.bf16 %v6919_v44, %v7023_v29 }
 0x1ea   : > { %v1962_v16 = vsel %vm354_vm12, %v10896_v5, %v10895_v15  ;;  %v1966_v53 = vsel %vm365_vm15, %v1958_v11, 0.0  ;;  %v4893_v62 = vpack.i.bf16 %v7267_v33, %v7264_v22  ;;  %v10899_v15 = vrot.slane %v7021_v41, 7 }
 0x1eb   : > { %v1967_v57 = vsel %vm366_vm0, %v1962_v16, 0.0  ;;  %v1974_v58 = vmax.f32 %v1942_v48, %v1966_v53  ;;  %v5930_v42 = vadd.low.f32.bf16 %v10897_v37, %v4875_v49  ;;  %v10900_v11 = vrot.slane %v7018_v47, 7 }
 0x1ec   : > { %v1975_v50 = vmax.f32 %v1943_v60, %v1967_v57  ;;  %4894 = vrot.lane.b32.xlu1 %v4893_v62, %s6050_s15  ;;  %v5932_v2 = vadd.high.f32.bf16 %v10901_v32, %v4870_v52  ;;  %v10903_v54 = vmov %v10899_v15  ;;  %v3157_v53 = vmul.f32 0.25, %v5931_v21 }
 0x1ed   : > { %v3198_v5 = vsel %vm339_vm11, %v10900_v11, %v10899_v15  ;;  %v7301_v48 = vmax.f32 %v7004_v30, %v1974_v58  ;;  %v10902_v61 = vmov %v10900_v11  ;;  %v3156_v16 = vmul.f32 0.25, %v5930_v42  ;;  %v10907_v42 = vld [vmem:[#allocation33_spill] sm:$0xff] }
 0x1ee   : > { %v7304_v60 = vmax.f32 %v7007_v35, %v1975_v50  ;;  %v3202_v49 = vsel %vm339_vm11, %v10903_v54, %v10902_v61  ;;  %v10904_v58 = vadd.low.f32.bf16 %v6917_v51, %v7023_v29  ;;  %v1893_v57 = vmul.f32 0.25, %v5932_v2  ;;  %v10908_v29 = vld [vmem:[#allocation34_spill] sm:$0xff] }
 0x1ef   : > { %v3206_v50 = vsel %vm350_vm13, %v3202_v49, 0.0  ;;  %v3207_v37 = vsel %vm351_vm14, %v3198_v5, 0.0  ;;  %v10905_v15 = vrot.slane %v7021_v41, 1  ;;  %v10906_v11 = vrot.slane %v7018_v47, 1  ;;  %v10911_v5 = vld [vmem:[#allocation32_spill] sm:$0xff] }
 0x1f0   : > { %v5933_v62 = vadd.low.f32.bf16 %v10904_v58, %v4870_v52  ;;  %v4888_v44 = vpack.i.bf16 %v7304_v60, %v7301_v48  ;;  %v3164_v51 = vsub.f32 %v10907_v42, %v3156_v16  ;;  %v3165_v52 = vsub.f32 %v10908_v29, %v3157_v53 }
 0x1f1   : > { %v3222_v21 = vsel %vm354_vm12, %v10906_v11, %v10905_v15  ;;  %v10909_v61 = vmov %v10906_v11  ;;  %v10910_v54 = vmov %v10905_v15  ;;  %v1901_v49 = vsub.f32 %v10911_v5, %v1893_v57  ;;  %v10914_v11 = vld [vmem:[#allocation31_spill] sm:$0xff] }
 0x1f2   : > { %v1892_v32 = vmul.f32 0.25, %v5933_v62  ;;  %v3226_v2 = vsel %vm354_vm12, %v10910_v54, %v10909_v61  ;;  %4889 = vrot.lane.b32.xlu0 %v4888_v44, %s6050_s15  ;;  %v3230_v58 = vsel %vm365_vm15, %v3222_v21, 0.0  ;;  %v10912_v53 = vrot.slane %v7084_v1, 7 }
 0x1f3   : > { %v3231_v16 = vsel %vm366_vm0, %v3226_v2, 0.0  ;;  %v10913_v62 = vrot.slane %v7087_v6, 7  ;;  %vm3172_vm7 = vcmp.gt.f32.partialorder %v3164_v51, 0.0  ;;  %vm3173_vm1 = vcmp.gt.f32.partialorder %v3165_v52, 0.0 }
 0x1f4   : > { %v1900_v61 = vsub.f32 %v10914_v11, %v1892_v32  ;;  %v3238_v44 = vmax.f32 %v3206_v50, %v3230_v58  ;;  %v7352_v57 = vsel %vm3172_vm7, 1.0, %v10833_v38  ;;  %v7355_v21 = vsel %vm3173_vm1, 1.0, %v10833_v38 }
 0x1f5   : > { %v3199_v15 = vsel %vm339_vm11, %v10913_v62, %v10912_v53  ;;  %10915 = vst [vmem:[#allocation57_spill] sm:$0xff] %v7352_v57  ;;  %10916 = vst [vmem:[#allocation58_spill] sm:$0xff] %v7355_v21  ;;  %vm1909_vm2 = vcmp.gt.f32.partialorder %v1901_v49, 0.0  ;;  %v3239_v54 = vmax.f32 %v3207_v37, %v3231_v16  ;;  %v10919_v16 = vmov %v10913_v62 }
 0x1f6   : > { %v7362_v52 = vsel %vm1909_vm2, 1.0, %v10833_v38  ;;  %vm1908_vm3 = vcmp.gt.f32.partialorder %v1900_v61, 0.0  ;;  %v7365_v50 = vmax.f32 %v7018_v47, %v3238_v44  ;;  %v3203_v62 = vsel %vm339_vm11, %v10912_v53, %v10919_v16 }
 0x1f7   : > { %10917 = vst [vmem:[#allocation59_spill] sm:$0xff] %v7362_v52  ;;  %v7368_v32 = vmax.f32 %v7021_v41, %v3239_v54  ;;  %v7373_v58 = vsel %vm1908_vm3, 1.0, %v10833_v38  ;;  %v3208_v49 = vsel %vm350_vm13, %v3203_v62, 0.0  ;;  %v3209_v37 = vsel %vm351_vm14, %v3199_v15, 0.0 }
 0x1f8   : > { %10918 = vst [vmem:[#allocation60_spill] sm:$0xff] %v7373_v58  ;;  %v10920_v42 = vrot.slane %v7084_v1, 1  ;;  %v10921_v51 = vrot.slane %v7087_v6, 1  ;;  %v10924_v2 = vrot.slane %v7101_v59, 7  ;;  %v10925_v62 = vrot.slane %v7098_v46, 7 }
 0x1f9   : > { %v4898_v54 = vpack.i.bf16 %v7368_v32, %v7365_v50  ;;  %v10956_v8 = vrot.slane %v7355_v21, 7 }
 0x1fa   : > { %v3223_v16 = vsel %vm354_vm12, %v10921_v51, %v10920_v42  ;;  %v10922_v53 = vmov %v10921_v51  ;;  %v10923_v44 = vmov %v10920_v42  ;;  %v674_v15 = vsel %vm339_vm11, %v10925_v62, %v10924_v2 }
 0x1fb   : > { %v3227_v61 = vsel %vm354_vm12, %v10923_v44, %v10922_v53  ;;  %4899 = vrot.lane.b32.xlu0 %v4898_v54, %s6050_s15  ;;  %v3232_v5 = vsel %vm365_vm15, %v3223_v16, 0.0  ;;  %v10926_v51 = vmov %v10925_v62  ;;  %v10927_v11 = vmov %v10924_v2 }
 0x1fc   : > { %v3233_v42 = vsel %vm366_vm0, %v3227_v61, 0.0  ;;  %v678_v44 = vsel %vm339_vm11, %v10927_v11, %v10926_v51  ;;  %v685_v53 = vsel %vm351_vm14, %v674_v15, 0.0  ;;  %v3240_v29 = vmax.f32 %v3208_v49, %v3232_v5 }
 0x1fd   : > { %v3241_v2 = vmax.f32 %v3209_v37, %v3233_v42  ;;  %v684_v54 = vsel %vm350_vm13, %v678_v44, 0.0  ;;  %v10928_v16 = vrot.slane %v7101_v59, 1  ;;  %v10929_v62 = vrot.slane %v7098_v46, 1 }
 0x1fe   : > { %v10932_v37 = vrot.slane %v7187_v12, 7  ;;  %v10933_v49 = vrot.slane %v7190_v20, 7 }
 0x1ff   : > { %v698_v61 = vsel %vm354_vm12, %v10929_v62, %v10928_v16  ;;  %v10930_v55 = vmov %v10929_v62  ;;  %v10931_v13 = vmov %v10928_v16  ;;  %v7449_v16 = vmax.f32 %v7087_v6, %v3240_v29 }
 0x200   : > { %v702_v11 = vsel %vm354_vm12, %v10931_v13, %v10930_v55  ;;  %v708_v5 = vsel %vm365_vm15, %v698_v61, 0.0  ;;  %v1936_v15 = vsel %vm339_vm11, %v10933_v49, %v10932_v37  ;;  %v10934_v42 = vmov %v10933_v49 }
 0x201   : > { %v10935_v51 = vmov %v10932_v37  ;;  %v7452_v13 = vmax.f32 %v7084_v1, %v3241_v2  ;;  %v709_v55 = vsel %vm366_vm0, %v702_v11, 0.0  ;;  %v716_v62 = vmax.f32 %v684_v54, %v708_v5 }
 0x202   : > { %v1940_v44 = vsel %vm339_vm11, %v10935_v51, %v10934_v42  ;;  %v717_v61 = vmax.f32 %v685_v53, %v709_v55  ;;  %v1947_v49 = vsel %vm351_vm14, %v1936_v15, 0.0  ;;  %v10937_v42 = vrot.slane %v7190_v20, 1 }
 0x203   : > { %v1946_v37 = vsel %vm350_vm13, %v1940_v44, 0.0  ;;  %v4903_v2 = vpack.i.bf16 %v7452_v13, %v7449_v16  ;;  %v7469_v11 = vmax.f32 %v7098_v46, %v716_v62  ;;  %v10939_v54 = vmov %v10936_v14 }
 0x204   : > { %v1960_v29 = vsel %vm354_vm12, %v10937_v42, %v10936_v14  ;;  %v10938_v53 = vmov %v10937_v42  ;;  %v7480_v51 = vmax.f32 %v7101_v59, %v717_v61  ;;  %v10940_v55 = vrot.slane %v7204_v0, 7 }
 0x205   : > { %v1964_v5 = vsel %vm354_vm12, %v10939_v54, %v10938_v53  ;;  %v1970_v15 = vsel %vm365_vm15, %v1960_v29, 0.0  ;;  %v10941_v62 = vrot.slane %v7201_v25, 7  ;;  %4904 = vrot.lane.b32.xlu1 %v4903_v2, %s6050_s15 }
 0x206   : > { %v1971_v14 = vsel %vm366_vm0, %v1964_v5, 0.0  ;;  %v1978_v44 = vmax.f32 %v1946_v37, %v1970_v15  ;;  %v10943_v29 = vmov %v10940_v55  ;;  %v10944_v5 = vrot.slane %v7204_v0, 1 }
 0x207   : > { %v675_v42 = vsel %vm339_vm11, %v10941_v62, %v10940_v55  ;;  %v1979_v53 = vmax.f32 %v1947_v49, %v1971_v14  ;;  %v10942_v54 = vmov %v10941_v62  ;;  %v10945_v15 = vrot.slane %v7201_v25, 1 }
 0x208   : > { %v679_v61 = vsel %vm339_vm11, %v10943_v29, %v10942_v54  ;;  %v687_v37 = vsel %vm351_vm14, %v675_v42, 0.0  ;;  %v4908_v49 = vpack.i.bf16 %v7480_v51, %v7469_v11  ;;  %v7508_v2 = vmax.f32 %v7190_v20, %v1978_v44 }
 0x209   : > { %v699_v55 = vsel %vm354_vm12, %v10945_v15, %v10944_v5  ;;  %v686_v14 = vsel %vm350_vm13, %v679_v61, 0.0  ;;  %v10946_v62 = vmov %v10945_v15  ;;  %v10947_v42 = vmov %v10944_v5 }
 0x20a   : > { %v703_v54 = vsel %vm354_vm12, %v10947_v42, %v10946_v62  ;;  %v7519_v29 = vmax.f32 %v7187_v12, %v1979_v53  ;;  %v710_v5 = vsel %vm365_vm15, %v699_v55, 0.0  ;;  %v10948_v15 = vrot.slane %v7228_v19, 7  ;;  %4909 = vrot.lane.b32.xlu0 %v4908_v49, %s6050_s15 }
 0x20b   : > { %v711_v44 = vsel %vm366_vm0, %v703_v54, 0.0  ;;  %v10949_v61 = vrot.slane %v7249_v31, 7  ;;  %v718_v18 = vmax.f32 %v686_v14, %v710_v5  ;;  %v10952_v49 = vrot.slane %v7228_v19, 1 }
 0x20c   : > { %v719_v62 = vmax.f32 %v687_v37, %v711_v44  ;;  %v10951_v42 = vmov %v10948_v15  ;;  %v4913_v7 = vpack.i.bf16 %v7519_v29, %v7508_v2  ;;  %v10953_v37 = vrot.slane %v7249_v31, 1 }
 0x20d   : > { %v3200_v17 = vsel %vm339_vm11, %v10949_v61, %v10948_v15  ;;  %v10950_v53 = vmov %v10949_v61  ;;  %v10955_v44 = vmov %v10952_v49  ;;  %v7557_v61 = vmax.f32 %v7201_v25, %v718_v18 }
 0x20e   : > { %v3204_v55 = vsel %vm339_vm11, %v10951_v42, %v10950_v53  ;;  %v3211_v54 = vsel %vm351_vm14, %v3200_v17, 0.0  ;;  %v3224_v14 = vsel %vm354_vm12, %v10953_v37, %v10952_v49  ;;  %v10954_v5 = vmov %v10953_v37  ;;  %4914 = vrot.lane.b32.xlu1 %v4913_v7, %s6050_s15 }
 0x20f   : > { %v3210_v15 = vsel %vm350_vm13, %v3204_v55, 0.0  ;;  %v3228_v17 = vsel %vm354_vm12, %v10955_v44, %v10954_v5  ;;  %v7560_v53 = vmax.f32 %v7204_v0, %v719_v62  ;;  %v3234_v42 = vsel %vm365_vm15, %v3224_v14, 0.0 }
 0x210   : > { %v3235_v55 = vsel %vm366_vm0, %v3228_v17, 0.0  ;;  %v3242_v49 = vmax.f32 %v3210_v15, %v3234_v42  ;;  %v10957_v5 = vrot.slane %v7352_v57, 7  ;;  %v10959_v44 = vmov %v10956_v8 }
 0x211   : > { %v3243_v37 = vmax.f32 %v3211_v54, %v3235_v55  ;;  %v4923_v17 = vpack.i.bf16 %v7560_v53, %v7557_v61  ;;  %v10960_v15 = vrot.slane %v7355_v21, 1 }
 0x212   : > { %v3201_v18 = vsel %vm339_vm11, %v10957_v5, %v10956_v8  ;;  %v10958_v62 = vmov %v10957_v5  ;;  %v10961_v8 = vrot.slane %v7352_v57, 1  ;;  %v7592_v55 = vmax.f32 %v7249_v31, %v3242_v49 }
 0x213   : > { %v3205_v14 = vsel %vm339_vm11, %v10959_v44, %v10958_v62  ;;  %v3213_v54 = vsel %vm351_vm14, %v3201_v18, 0.0  ;;  %v7595_v5 = vmax.f32 %v7228_v19, %v3243_v37  ;;  %v10963_v44 = vmov %v10960_v15  ;;  %4924 = vrot.lane.b32.xlu1 %v4923_v17, %s6050_s15 }
 0x214   : > { %v3212_v7 = vsel %vm350_vm13, %v3205_v14, 0.0  ;;  %v3225_v42 = vsel %vm354_vm12, %v10961_v8, %v10960_v15  ;;  %v10962_v62 = vmov %v10961_v8  ;;  %v10964_v49 = vrot.slane %v7362_v52, 7 }
 0x215   : > { %v3229_v18 = vsel %vm354_vm12, %v10963_v44, %v10962_v62  ;;  %v3236_v14 = vsel %vm365_vm15, %v3225_v42, 0.0  ;;  %v10965_v8 = vrot.slane %v7373_v58, 7  ;;  %v4918_v42 = vpack.i.bf16 %v7595_v5, %v7592_v55 }
 0x216   : > { %v3237_v9 = vsel %vm366_vm0, %v3229_v18, 0.0  ;;  %v3244_v15 = vmax.f32 %v3212_v7, %v3236_v14  ;;  %v10967_v38 = vmov %v10964_v49 }
 0x217   : > { %v1937_v37 = vsel %vm339_vm11, %v10965_v8, %v10964_v49  ;;  %v10966_v10 = vmov %v10965_v8  ;;  %v3245_v7 = vmax.f32 %v3213_v54, %v3237_v9  ;;  %v10969_v49 = vrot.slane %v7362_v52, 1  ;;  %4919 = vrot.lane.b32.xlu0 %v4918_v42, %s6050_s15 }
 0x218   : > { %v1941_v62 = vsel %vm339_vm11, %v10967_v38, %v10966_v10  ;;  %v1949_v18 = vsel %vm351_vm14, %v1937_v37, 0.0  ;;  %v7627_v14 = vmax.f32 %v7352_v57, %v3244_v15  ;;  %v10970_v8 = vrot.slane %v7373_v58, 1 }
 0x219   : > { %v1948_v44 = vsel %vm350_vm13, %v1941_v62, 0.0  ;;  %v10972_v9 = vmov %v10969_v49  ;;  %v7643_v54 = vmax.f32 %v7355_v21, %v3245_v7 }
 0x21a   : > { %10968 = vst [vmem:[#allocation61_spill] sm:$0xff] %v7627_v14  ;;  %v1961_v10 = vsel %vm354_vm12, %v10970_v8, %v10969_v49  ;;  %v10971_v38 = vmov %v10970_v8 }
 0x21b   : > { %v1965_v17 = vsel %vm354_vm12, %v10972_v9, %v10971_v38  ;;  %10973 = vst [vmem:[#allocation62_spill] sm:$0xff] %v7643_v54  ;;  %v1972_v15 = vsel %vm365_vm15, %v1961_v10, 0.0  ;;  %v4933_v8 = vpack.i.bf16 %v7643_v54, %v7627_v14 }
 0x21c   : > { %v1973_v37 = vsel %vm366_vm0, %v1965_v17, 0.0  ;;  %v1980_v62 = vmax.f32 %v1948_v44, %v1972_v15 }
 0x21d   : > { %v1981_v49 = vmax.f32 %v1949_v18, %v1973_v37  ;;  %4934 = vrot.lane.b32.xlu1 %v4933_v8, %s6050_s15 }
 0x21e   : > { %v7652_v57 = vmax.f32 %v7373_v58, %v1980_v62 }
 0x21f   : > { %v7655_v38 = vmax.f32 %v7362_v52, %v1981_v49 }
 0x220   : > { %10974 = vst [vmem:[#allocation63_spill] sm:$0xff] %v7652_v57 }
 0x221   : > { %10975 = vst [vmem:[#allocation64_spill] sm:$0xff] %v7655_v38  ;;  %v4928_v42 = vpack.i.bf16 %v7655_v38, %v7652_v57 }
 0x223   : > { %4929 = vrot.lane.b32.xlu0 %v4928_v42, %s6050_s15 }
 0x249   : > { %v4880_v7 = vpop.permute.xlu0 %4879 }
 0x24a   : > { %v4882_v10 = vunpack.i.h.bf16 %v4880_v7  ;;  %v4881_v44 = vunpack.i.l.bf16 %v4880_v7 }
 0x24c   : > { %v730_v18 = vsel %vm367_vm8, %v4881_v44, %v7108_v4  ;;  %v733_v9 = vsel %vm367_vm8, %v4882_v10, %v7111_v24 }
 0x24d   : > { %v4938_v17 = vpack.i.bf16 %v733_v9, %v730_v18 }
 0x24f   : > { %4939 = vrot.lane.b32.xlu0 %v4938_v17, %s6050_s15 }
 0x250   : > { %v4885_v15 = vpop.permute.xlu1 %4884 }
 0x251   : > { %v4887_v37 = vunpack.i.h.bf16 %v4885_v15  ;;  %v4886_v62 = vunpack.i.l.bf16 %v4885_v15 }
 0x253   : > { %v736_v49 = vsel %vm367_vm8, %v4886_v62, %v7159_v26  ;;  %v739_v8 = vsel %vm367_vm8, %v4887_v37, %v7170_v23 }
 0x254   : > { %v4943_v42 = vpack.i.bf16 %v739_v8, %v736_v49 }
 0x256   : > { %4944 = vrot.lane.b32.xlu1 %v4943_v42, %s6050_s15 }
 0x25e   : > { %v4895_v7 = vpop.permute.xlu1 %4894 }
 0x25f   : > { %v4897_v44 = vunpack.i.h.bf16 %v4895_v7  ;;  %v4896_v52 = vunpack.i.l.bf16 %v4895_v7 }
 0x261   : > { %v1998_v10 = vsel %vm367_vm8, %v4896_v52, %v7264_v22  ;;  %v2001_v18 = vsel %vm367_vm8, %v4897_v44, %v7267_v33 }
 0x262   : > { %v4953_v17 = vpack.i.bf16 %v2001_v18, %v1998_v10 }
 0x264   : > { %v4890_v9 = vpop.permute.xlu0 %4889  ;;  %4954 = vrot.lane.b32.xlu1 %v4953_v17, %s6050_s15 }
 0x265   : > { %v4892_v15 = vunpack.i.h.bf16 %v4890_v9  ;;  %v4891_v58 = vunpack.i.l.bf16 %v4890_v9 }
 0x267   : > { %v1992_v37 = vsel %vm367_vm8, %v4891_v58, %v7301_v48  ;;  %v1995_v62 = vsel %vm367_vm8, %v4892_v15, %v7304_v60 }
 0x268   : > { %v4948_v49 = vpack.i.bf16 %v1995_v62, %v1992_v37 }
 0x26a   : > { %4949 = vrot.lane.b32.xlu0 %v4948_v49, %s6050_s15 }
 0x26d   : > { %v4900_v8 = vpop.permute.xlu0 %4899 }
 0x26e   : > { %v4902_v52 = vunpack.i.h.bf16 %v4900_v8  ;;  %v4901_v42 = vunpack.i.l.bf16 %v4900_v8 }
 0x270   : > { %v3256_v7 = vsel %vm367_vm8, %v4901_v42, %v7365_v50  ;;  %v3259_v44 = vsel %vm367_vm8, %v4902_v52, %v7368_v32 }
 0x271   : > { %v4958_v10 = vpack.i.bf16 %v3259_v44, %v3256_v7 }
 0x273   : > { %4959 = vrot.lane.b32.xlu0 %v4958_v10, %s6050_s15 }
 0x277   : > { %v4905_v18 = vpop.permute.xlu1 %4904 }
 0x278   : > { %v4907_v58 = vunpack.i.h.bf16 %v4905_v18  ;;  %v4906_v9 = vunpack.i.l.bf16 %v4905_v18 }
 0x27a   : > { %v3262_v15 = vsel %vm367_vm8, %v4906_v9, %v7449_v16  ;;  %v3265_v37 = vsel %vm367_vm8, %v4907_v58, %v7452_v13 }
 0x27b   : > { %v4963_v8 = vpack.i.bf16 %v3265_v37, %v3262_v15 }
 0x27c   : > { %v4910_v17 = vpop.permute.xlu0 %4909 }
 0x27d   : > { %v4912_v62 = vunpack.i.h.bf16 %v4910_v17  ;;  %v4911_v49 = vunpack.i.l.bf16 %v4910_v17  ;;  %4964 = vrot.lane.b32.xlu1 %v4963_v8, %s6050_s15 }
 0x27f   : > { %v742_v52 = vsel %vm367_vm8, %v4911_v49, %v7469_v11  ;;  %v745_v7 = vsel %vm367_vm8, %v4912_v62, %v7480_v51 }
 0x280   : > { %v4915_v42 = vpop.permute.xlu1 %4914  ;;  %v4968_v18 = vpack.i.bf16 %v745_v7, %v742_v52 }
 0x281   : > { %v4917_v44 = vunpack.i.h.bf16 %v4915_v42  ;;  %v4916_v10 = vunpack.i.l.bf16 %v4915_v42 }
 0x282   : > { %4969 = vrot.lane.b32.xlu0 %v4968_v18, %s6050_s15 }
 0x283   : > { %v2004_v58 = vsel %vm367_vm8, %v4916_v10, %v7508_v2  ;;  %v2007_v9 = vsel %vm367_vm8, %v4917_v44, %v7519_v29 }
 0x284   : > { %v4973_v15 = vpack.i.bf16 %v2007_v9, %v2004_v58 }
 0x285   : > { %v4925_v17 = vpop.permute.xlu1 %4924 }
 0x286   : > { %v4927_v37 = vunpack.i.h.bf16 %v4925_v17  ;;  %v4926_v8 = vunpack.i.l.bf16 %v4925_v17  ;;  %4974 = vrot.lane.b32.xlu1 %v4973_v15, %s6050_s15 }
 0x288   : > { %v748_v42 = vsel %vm367_vm8, %v4926_v8, %v7557_v61  ;;  %v751_v52 = vsel %vm367_vm8, %v4927_v37, %v7560_v53 }
 0x289   : > { %v4920_v21 = vpop.permute.xlu0 %4919  ;;  %v4983_v7 = vpack.i.bf16 %v751_v52, %v748_v42 }
 0x28a   : > { %v4922_v49 = vunpack.i.h.bf16 %v4920_v21  ;;  %v4921_v62 = vunpack.i.l.bf16 %v4920_v21 }
 0x28b   : > { %4984 = vrot.lane.b32.xlu1 %v4983_v7, %s6050_s15 }
 0x28c   : > { %v3268_v10 = vsel %vm367_vm8, %v4921_v62, %v7592_v55  ;;  %v3271_v44 = vsel %vm367_vm8, %v4922_v49, %v7595_v5 }
 0x28d   : > { %v4978_v58 = vpack.i.bf16 %v3271_v44, %v3268_v10 }
 0x28f   : > { %v4935_v18 = vpop.permute.xlu1 %4934  ;;  %4979 = vrot.lane.b32.xlu0 %v4978_v58, %s6050_s15 }
 0x290   : > { %v4937_v9 = vunpack.i.h.bf16 %v4935_v18  ;;  %v4936_v17 = vunpack.i.l.bf16 %v4935_v18 }
 0x292   : > { %v3274_v15 = vsel %vm367_vm8, %v4936_v17, %v7627_v14  ;;  %v3277_v37 = vsel %vm367_vm8, %v4937_v9, %v7643_v54 }
 0x293   : > { %v4993_v42 = vpack.i.bf16 %v3277_v37, %v3274_v15 }
 0x295   : > { %v4930_v21 = vpop.permute.xlu0 %4929  ;;  %4994 = vrot.lane.b32.xlu1 %v4993_v42, %s6050_s15 }
 0x296   : > { %v4932_v8 = vunpack.i.h.bf16 %v4930_v21  ;;  %v4931_v62 = vunpack.i.l.bf16 %v4930_v21 }
 0x298   : > { %v2010_v49 = vsel %vm367_vm8, %v4931_v62, %v7652_v57  ;;  %v2013_v52 = vsel %vm367_vm8, %v4932_v8, %v7655_v38 }
 0x299   : > { %v4988_v7 = vpack.i.bf16 %v2013_v52, %v2010_v49 }
 0x29b   : > { %4989 = vrot.lane.b32.xlu0 %v4988_v7, %s6050_s15 }
 0x2c1   : > { %v4940_v10 = vpop.permute.xlu0 %4939 }
 0x2c2   : > { %v4942_v44 = vunpack.i.h.bf16 %v4940_v10  ;;  %v4941_v18 = vunpack.i.l.bf16 %v4940_v10 }
 0x2c4   : > { %v7723_v58 = vsel %vm367_vm8, %v4941_v18, %v7108_v4  ;;  %v7727_v9 = vsel %vm367_vm8, %v4942_v44, %v7111_v24 }
 0x2c5   : > { %v784_v21 = vsel %vm387_vm10, %v7723_v58, 0.0  ;;  %v785_v15 = vsel %vm387_vm10, %v7727_v9, 0.0 }
 0x2c6   : > { %v4998_v37 = vpack.i.bf16 %v785_v15, %v784_v21 }
 0x2c8   : > { %v4945_v8 = vpop.permute.xlu1 %4944  ;;  %4999 = vrot.lane.b32.xlu0 %v4998_v37, %s6056_s8 }
 0x2c9   : > { %v4947_v62 = vunpack.i.h.bf16 %v4945_v8  ;;  %v4946_v42 = vunpack.i.l.bf16 %v4945_v8 }
 0x2cb   : > { %v7738_v49 = vsel %vm367_vm8, %v4946_v42, %v7159_v26  ;;  %v7742_v52 = vsel %vm367_vm8, %v4947_v62, %v7170_v23 }
 0x2cc   : > { %v786_v7 = vsel %vm387_vm10, %v7738_v49, 0.0  ;;  %v787_v10 = vsel %vm387_vm10, %v7742_v52, 0.0 }
 0x2cd   : > { %v5003_v44 = vpack.i.bf16 %v787_v10, %v786_v7 }
 0x2cf   : > { %5004 = vrot.lane.b32.xlu1 %v5003_v44, %s6056_s8 }
 0x2d6   : > { %v4955_v18 = vpop.permute.xlu1 %4954 }
 0x2d7   : > { %v4957_v21 = vunpack.i.h.bf16 %v4955_v18  ;;  %v4956_v15 = vunpack.i.l.bf16 %v4955_v18 }
 0x2d9   : > { %v7753_v37 = vsel %vm367_vm8, %v4956_v15, %v7264_v22  ;;  %v7757_v8 = vsel %vm367_vm8, %v4957_v21, %v7267_v33 }
 0x2da   : > { %v2048_v42 = vsel %vm387_vm10, %v7753_v37, 0.0  ;;  %v2049_v7 = vsel %vm387_vm10, %v7757_v8, 0.0 }
 0x2db   : > { %v5013_v18 = vpack.i.bf16 %v2049_v7, %v2048_v42 }
 0x2dc   : > { %v4950_v62 = vpop.permute.xlu0 %4949 }
 0x2dd   : > { %v4952_v10 = vunpack.i.h.bf16 %v4950_v62  ;;  %v4951_v44 = vunpack.i.l.bf16 %v4950_v62  ;;  %5014 = vrot.lane.b32.xlu1 %v5013_v18, %s6056_s8 }
 0x2df   : > { %v7768_v15 = vsel %vm367_vm8, %v4951_v44, %v7301_v48  ;;  %v7772_v21 = vsel %vm367_vm8, %v4952_v10, %v7304_v60 }
 0x2e0   : > { %v2046_v19 = vsel %vm387_vm10, %v7768_v15, 0.0  ;;  %v2047_v31 = vsel %vm387_vm10, %v7772_v21, 0.0 }
 0x2e1   : > { %v5008_v62 = vpack.i.bf16 %v2047_v31, %v2046_v19 }
 0x2e3   : > { %5009 = vrot.lane.b32.xlu0 %v5008_v62, %s6056_s8 }
 0x2e5   : > { %v4960_v42 = vpop.permute.xlu0 %4959 }
 0x2e6   : > { %v4962_v7 = vunpack.i.h.bf16 %v4960_v42  ;;  %v4961_v18 = vunpack.i.l.bf16 %v4960_v42 }
 0x2e8   : > { %v7783_v44 = vsel %vm367_vm8, %v4961_v18, %v7365_v50  ;;  %v7787_v10 = vsel %vm367_vm8, %v4962_v7, %v7368_v32 }
 0x2e9   : > { %v3310_v0 = vsel %vm387_vm10, %v7783_v44, 0.0  ;;  %v3311_v19 = vsel %vm387_vm10, %v7787_v10, 0.0 }
 0x2ea   : > { %v5018_v31 = vpack.i.bf16 %v3311_v19, %v3310_v0 }
 0x2ec   : > { %5019 = vrot.lane.b32.xlu0 %v5018_v31, %s6056_s8 }
 0x2ef   : > { %v4965_v62 = vpop.permute.xlu1 %4964 }
 0x2f0   : > { %v4967_v42 = vunpack.i.h.bf16 %v4965_v62  ;;  %v4966_v25 = vunpack.i.l.bf16 %v4965_v62 }
 0x2f2   : > { %v7798_v12 = vsel %vm367_vm8, %v4966_v25, %v7449_v16  ;;  %v7802_v7 = vsel %vm367_vm8, %v4967_v42, %v7452_v13 }
 0x2f3   : > { %v3312_v0 = vsel %vm387_vm10, %v7798_v12, 0.0  ;;  %v3313_v19 = vsel %vm387_vm10, %v7802_v7, 0.0 }
 0x2f4   : > { %v4970_v18 = vpop.permute.xlu0 %4969  ;;  %v5023_v31 = vpack.i.bf16 %v3313_v19, %v3312_v0 }
 0x2f5   : > { %v4972_v20 = vunpack.i.h.bf16 %v4970_v18  ;;  %v4971_v59 = vunpack.i.l.bf16 %v4970_v18 }
 0x2f6   : > { %5024 = vrot.lane.b32.xlu1 %v5023_v31, %s6056_s8 }
 0x2f7   : > { %v7812_v25 = vsel %vm367_vm8, %v4971_v59, %v7469_v11  ;;  %v7816_v42 = vsel %vm367_vm8, %v4972_v20, %v7480_v51 }
 0x2f8   : > { %v4975_v62 = vpop.permute.xlu1 %4974  ;;  %v788_v1 = vsel %vm387_vm10, %v7812_v25, 0.0  ;;  %v789_v0 = vsel %vm387_vm10, %v7816_v42, 0.0 }
 0x2f9   : > { %v4977_v18 = vunpack.i.h.bf16 %v4975_v62  ;;  %v4976_v46 = vunpack.i.l.bf16 %v4975_v62  ;;  %v5028_v19 = vpack.i.bf16 %v789_v0, %v788_v1 }
 0x2fb   : > { %v7827_v59 = vsel %vm367_vm8, %v4976_v46, %v7508_v2  ;;  %v7831_v20 = vsel %vm367_vm8, %v4977_v18, %v7519_v29  ;;  %5029 = vrot.lane.b32.xlu0 %v5028_v19, %s6056_s8 }
 0x2fc   : > { %v2050_v62 = vsel %vm387_vm10, %v7827_v59, 0.0  ;;  %v2051_v6 = vsel %vm387_vm10, %v7831_v20, 0.0 }
 0x2fd   : > { %v4985_v31 = vpop.permute.xlu1 %4984  ;;  %v5033_v41 = vpack.i.bf16 %v2051_v6, %v2050_v62 }
 0x2fe   : > { %v4987_v1 = vunpack.i.h.bf16 %v4985_v31  ;;  %v4986_v0 = vunpack.i.l.bf16 %v4985_v31 }
 0x2ff   : > { %5034 = vrot.lane.b32.xlu1 %v5033_v41, %s6056_s8 }
 0x300   : > { %v7843_v18 = vsel %vm367_vm8, %v4986_v0, %v7557_v61  ;;  %v7847_v19 = vsel %vm367_vm8, %v4987_v1, %v7560_v53 }
 0x301   : > { %v4980_v46 = vpop.permute.xlu0 %4979  ;;  %v790_v30 = vsel %vm387_vm10, %v7843_v18, 0.0  ;;  %v791_v6 = vsel %vm387_vm10, %v7847_v19, 0.0 }
 0x302   : > { %v4982_v47 = vunpack.i.h.bf16 %v4980_v46  ;;  %v4981_v35 = vunpack.i.l.bf16 %v4980_v46  ;;  %v5043_v31 = vpack.i.bf16 %v791_v6, %v790_v30 }
 0x304   : > { %v7857_v41 = vsel %vm367_vm8, %v4981_v35, %v7592_v55  ;;  %v7861_v62 = vsel %vm367_vm8, %v4982_v47, %v7595_v5  ;;  %5044 = vrot.lane.b32.xlu1 %v5043_v31, %s6056_s8 }
 0x305   : > { %v3314_v1 = vsel %vm387_vm10, %v7857_v41, 0.0  ;;  %v3315_v46 = vsel %vm387_vm10, %v7861_v62, 0.0 }
 0x306   : > { %v5038_v30 = vpack.i.bf16 %v3315_v46, %v3314_v1 }
 0x307   : > { %v4995_v0 = vpop.permute.xlu1 %4994 }
 0x308   : > { %v4997_v27 = vunpack.i.h.bf16 %v4995_v0  ;;  %v4996_v3 = vunpack.i.l.bf16 %v4995_v0  ;;  %5039 = vrot.lane.b32.xlu0 %v5038_v30, %s6056_s8 }
 0x30a   : > { %v7873_v47 = vsel %vm367_vm8, %v4996_v3, %v7627_v14  ;;  %v7877_v6 = vsel %vm367_vm8, %v4997_v27, %v7643_v54 }
 0x30b   : > { %v3316_v0 = vsel %vm387_vm10, %v7873_v47, 0.0  ;;  %v3317_v31 = vsel %vm387_vm10, %v7877_v6, 0.0 }
 0x30c   : > { %v5053_v1 = vpack.i.bf16 %v3317_v31, %v3316_v0 }
 0x30d   : > { %v4990_v35 = vpop.permute.xlu0 %4989 }
 0x30e   : > { %v4992_v36 = vunpack.i.h.bf16 %v4990_v35  ;;  %v4991_v45 = vunpack.i.l.bf16 %v4990_v35  ;;  %5054 = vrot.lane.b32.xlu1 %v5053_v1, %s6056_s8  ;;  %v776_v1 = vsel %vm380_vm9, %v7723_v58, 0.0 }
 0x310   : > { %v7887_v46 = vsel %vm367_vm8, %v4991_v45, %v7652_v57  ;;  %v7891_v3 = vsel %vm367_vm8, %v4992_v36, %v7655_v38  ;;  %v777_v36 = vsel %vm380_vm9, %v7727_v9, 0.0  ;;  %v778_v9 = vsel %vm380_vm9, %v7738_v49, 0.0 }
 0x311   : > { %v2052_v27 = vsel %vm387_vm10, %v7887_v46, 0.0  ;;  %v2053_v30 = vsel %vm387_vm10, %v7891_v3, 0.0 }
 0x312   : > { %v5048_v35 = vpack.i.bf16 %v2053_v30, %v2052_v27 }
 0x314   : > { %5049 = vrot.lane.b32.xlu0 %v5048_v35, %s6056_s8  ;;  %v779_v35 = vsel %vm380_vm9, %v7742_v52, 0.0 }
 0x33a   : > { %v5000_v0 = vpop.permute.xlu0 %4999 }
 0x33b   : > { %v5002_v45 = vunpack.i.h.bf16 %v5000_v0  ;;  %v5001_v31 = vunpack.i.l.bf16 %v5000_v0 }
 0x33d   : > { %v825_v63 = vmax.f32 %v777_v36, %v5002_v45  ;;  %v824_v57 = vmax.f32 %v776_v1, %v5001_v31 }
 0x33f   : > { %v5058_v38 = vpack.i.bf16 %v825_v63, %v824_v57 }
 0x341   : > { %v5005_v14 = vpop.permute.xlu1 %5004  ;;  %5059 = vrot.lane.b32.xlu0 %v5058_v38, %s6054_s24  ;;  %v2041_v38 = vsel %vm380_vm9, %v7757_v8, 0.0 }
 0x342   : > { %v5007_v27 = vunpack.i.h.bf16 %v5005_v14  ;;  %v5006_v30 = vunpack.i.l.bf16 %v5005_v14  ;;  %v2040_v14 = vsel %vm380_vm9, %v7753_v37, 0.0 }
 0x344   : > { %v827_v0 = vmax.f32 %v779_v35, %v5007_v27  ;;  %v826_v17 = vmax.f32 %v778_v9, %v5006_v30 }
 0x346   : > { %v5063_v54 = vpack.i.bf16 %v827_v0, %v826_v17  ;;  %v2039_v17 = vsel %vm380_vm9, %v7772_v21, 0.0  ;;  %v3302_v0 = vsel %vm380_vm9, %v7783_v44, 0.0  ;;  %v3305_v44 = vsel %vm380_vm9, %v7802_v7, 0.0 }
 0x348   : > { %5064 = vrot.lane.b32.xlu1 %v5063_v54, %s6054_s24  ;;  %v2038_v54 = vsel %vm380_vm9, %v7768_v15, 0.0  ;;  %v3303_v15 = vsel %vm380_vm9, %v7787_v10, 0.0 }
 0x34f   : > { %v5015_v58 = vpop.permute.xlu1 %5014 }
 0x350   : > { %v5017_v63 = vunpack.i.h.bf16 %v5015_v58  ;;  %v5016_v57 = vunpack.i.l.bf16 %v5015_v58 }
 0x352   : > { %v2089_v52 = vmax.f32 %v2041_v38, %v5017_v63  ;;  %v2088_v45 = vmax.f32 %v2040_v14, %v5016_v57 }
 0x354   : > { %v5073_v1 = vpack.i.bf16 %v2089_v52, %v2088_v45  ;;  %v3304_v52 = vsel %vm380_vm9, %v7798_v12, 0.0 }
 0x355   : > { %v5010_v31 = vpop.permute.xlu0 %5009 }
 0x356   : > { %v5012_v49 = vunpack.i.h.bf16 %v5010_v31  ;;  %v5011_v36 = vunpack.i.l.bf16 %v5010_v31  ;;  %5074 = vrot.lane.b32.xlu1 %v5073_v1, %s6054_s24  ;;  %v780_v1 = vsel %vm380_vm9, %v7812_v25, 0.0  ;;  %v2043_v25 = vsel %vm380_vm9, %v7831_v20, 0.0 }
 0x358   : > { %v2087_v27 = vmax.f32 %v2039_v17, %v5012_v49  ;;  %v2086_v37 = vmax.f32 %v2038_v54, %v5011_v36  ;;  %v781_v54 = vsel %vm380_vm9, %v7816_v42, 0.0 }
 0x35a   : > { %v5068_v30 = vpack.i.bf16 %v2087_v27, %v2086_v37 }
 0x35c   : > { %5069 = vrot.lane.b32.xlu0 %v5068_v30, %s6054_s24 }
 0x35e   : > { %v5020_v8 = vpop.permute.xlu0 %5019 }
 0x35f   : > { %v5022_v35 = vunpack.i.h.bf16 %v5020_v8  ;;  %v5021_v9 = vunpack.i.l.bf16 %v5020_v8  ;;  %v2042_v8 = vsel %vm380_vm9, %v7827_v59, 0.0  ;;  %v783_v59 = vsel %vm380_vm9, %v7847_v19, 0.0 }
 0x361   : > { %v3351_v58 = vmax.f32 %v3303_v15, %v5022_v35  ;;  %v3350_v21 = vmax.f32 %v3302_v0, %v5021_v9 }
 0x363   : > { %v5078_v63 = vpack.i.bf16 %v3351_v58, %v3350_v21 }
 0x365   : > { %5079 = vrot.lane.b32.xlu0 %v5078_v63, %s6054_s24  ;;  %v782_v63 = vsel %vm380_vm9, %v7843_v18, 0.0 }
 0x368   : > { %v5025_v57 = vpop.permute.xlu1 %5024 }
 0x369   : > { %v5027_v14 = vunpack.i.h.bf16 %v5025_v57  ;;  %v5026_v38 = vunpack.i.l.bf16 %v5025_v57 }
 0x36b   : > { %v3353_v45 = vmax.f32 %v3305_v44, %v5027_v14  ;;  %v3352_v31 = vmax.f32 %v3304_v52, %v5026_v38  ;;  %v3306_v44 = vsel %vm380_vm9, %v7857_v41, 0.0  ;;  %v3309_v41 = vsel %vm380_vm9, %v7877_v6, 0.0 }
 0x36d   : > { %v5030_v49 = vpop.permute.xlu0 %5029  ;;  %v5083_v17 = vpack.i.bf16 %v3353_v45, %v3352_v31  ;;  %v3307_v45 = vsel %vm380_vm9, %v7861_v62, 0.0 }
 0x36e   : > { %v5032_v10 = vunpack.i.h.bf16 %v5030_v49  ;;  %v5031_v36 = vunpack.i.l.bf16 %v5030_v49 }
 0x36f   : > { %5084 = vrot.lane.b32.xlu1 %v5083_v17, %s6054_s24 }
 0x370   : > { %v829_v27 = vmax.f32 %v781_v54, %v5032_v10  ;;  %v828_v12 = vmax.f32 %v780_v1, %v5031_v36  ;;  %v3308_v54 = vsel %vm380_vm9, %v7873_v47, 0.0 }
 0x371   : > { %v5035_v37 = vpop.permute.xlu1 %5034 }
 0x372   : > { %v5037_v7 = vunpack.i.h.bf16 %v5035_v37  ;;  %v5036_v30 = vunpack.i.l.bf16 %v5035_v37  ;;  %v5088_v35 = vpack.i.bf16 %v829_v27, %v828_v12 }
 0x374   : > { %v2091_v9 = vmax.f32 %v2043_v25, %v5037_v7  ;;  %v2090_v0 = vmax.f32 %v2042_v8, %v5036_v30  ;;  %5089 = vrot.lane.b32.xlu0 %v5088_v35, %s6054_s24  ;;  %v2044_v7 = vsel %vm380_vm9, %v7887_v46, 0.0  ;;  %v2045_v30 = vsel %vm380_vm9, %v7891_v3, 0.0 }
 0x376   : > { %v5045_v42 = vpop.permute.xlu1 %5044  ;;  %v5093_v21 = vpack.i.bf16 %v2091_v9, %v2090_v0 }
 0x377   : > { %v5047_v15 = vunpack.i.h.bf16 %v5045_v42  ;;  %v5046_v58 = vunpack.i.l.bf16 %v5045_v42 }
 0x378   : > { %5094 = vrot.lane.b32.xlu1 %v5093_v21, %s6054_s24 }
 0x379   : > { %v831_v14 = vmax.f32 %v783_v59, %v5047_v15  ;;  %v830_v20 = vmax.f32 %v782_v63, %v5046_v58 }
 0x37a   : > { %v5040_v57 = vpop.permute.xlu0 %5039 }
 0x37b   : > { %v5042_v38 = vunpack.i.h.bf16 %v5040_v57  ;;  %v5041_v52 = vunpack.i.l.bf16 %v5040_v57  ;;  %v5103_v49 = vpack.i.bf16 %v831_v14, %v830_v20 }
 0x37d   : > { %v3355_v18 = vmax.f32 %v3307_v45, %v5042_v38  ;;  %v3354_v31 = vmax.f32 %v3306_v44, %v5041_v52  ;;  %5104 = vrot.lane.b32.xlu1 %v5103_v49, %s6054_s24 }
 0x37f   : > { %v5098_v1 = vpack.i.bf16 %v3355_v18, %v3354_v31 }
 0x380   : > { %v5055_v10 = vpop.permute.xlu1 %5054 }
 0x381   : > { %v5057_v19 = vunpack.i.h.bf16 %v5055_v10  ;;  %v5056_v36 = vunpack.i.l.bf16 %v5055_v10  ;;  %5099 = vrot.lane.b32.xlu0 %v5098_v1, %s6054_s24 }
 0x383   : > { %v3357_v17 = vmax.f32 %v3309_v41, %v5057_v19  ;;  %v3356_v27 = vmax.f32 %v3308_v54, %v5056_v36 }
 0x385   : > { %v5113_v47 = vpack.i.bf16 %v3357_v17, %v3356_v27 }
 0x386   : > { %v5050_v62 = vpop.permute.xlu0 %5049 }
 0x387   : > { %v5052_v12 = vunpack.i.h.bf16 %v5050_v62  ;;  %v5051_v37 = vunpack.i.l.bf16 %v5050_v62  ;;  %5114 = vrot.lane.b32.xlu1 %v5113_v47, %s6054_s24 }
 0x389   : > { %v2093_v8 = vmax.f32 %v2045_v30, %v5052_v12  ;;  %v2092_v25 = vmax.f32 %v2044_v7, %v5051_v37 }
 0x38b   : > { %v5108_v6 = vpack.i.bf16 %v2093_v8, %v2092_v25 }
 0x38d   : > { %5109 = vrot.lane.b32.xlu0 %v5108_v6, %s6054_s24 }
 0x3b3   : > { %v5060_v35 = vpop.permute.xlu0 %5059 }
 0x3b4   : > { %v5062_v9 = vunpack.i.h.bf16 %v5060_v35  ;;  %v5061_v0 = vunpack.i.l.bf16 %v5060_v35 }
 0x3b6   : > { %v7986_v42 = vmax.f32 %v7111_v24, %v5062_v9  ;;  %v7989_v46 = vmax.f32 %v7108_v4, %v5061_v0 }
 0x3b8   : > { %v884_v15 = vrot.slane %v7986_v42, 7  ;;  %v908_v3 = vrot.slane %v7986_v42, 1  ;;  %v880_v58 = vrot.slane %v7989_v46, 7  ;;  %v904_v21 = vrot.slane %v7989_v46, 1 }
 0x3ba   : > { %v888_v63 = vsel %vm339_vm11, %v880_v58, %v884_v15  ;;  %v892_v59 = vsel %vm339_vm11, %v884_v15, %v880_v58  ;;  %v912_v24 = vsel %vm354_vm12, %v904_v21, %v908_v3  ;;  %v916_v4 = vsel %vm354_vm12, %v908_v3, %v904_v21  ;;  %v5065_v57 = vpop.permute.xlu1 %5064 }
 0x3bb   : > { %v896_v14 = vsel %vm350_vm13, %v892_v59, 0.0  ;;  %v897_v20 = vsel %vm351_vm14, %v888_v63, 0.0  ;;  %v920_v38 = vsel %vm365_vm15, %v912_v24, 0.0  ;;  %v921_v52 = vsel %vm366_vm0, %v916_v4, 0.0 }
 0x3bc   : > { %v928_v44 = vmax.f32 %v896_v14, %v920_v38  ;;  %v929_v45 = vmax.f32 %v897_v20, %v921_v52  ;;  %v5067_v18 = vunpack.i.h.bf16 %v5065_v57  ;;  %v5066_v31 = vunpack.i.l.bf16 %v5065_v57 }
 0x3be   : > { %v8012_v49 = vmax.f32 %v7989_v46, %v928_v44  ;;  %v8015_v10 = vmax.f32 %v7986_v42, %v929_v45  ;;  %v8018_v19 = vmax.f32 %v7170_v23, %v5067_v18  ;;  %v8021_v36 = vmax.f32 %v7159_v26, %v5066_v31 }
 0x3c0   : > { %v885_v1 = vrot.slane %v8018_v19, 7  ;;  %v909_v54 = vrot.slane %v8018_v19, 1  ;;  %v881_v41 = vrot.slane %v8021_v36, 7  ;;  %v905_v17 = vrot.slane %v8021_v36, 1 }
 0x3c1   : > { %v5118_v27 = vpack.i.bf16 %v8015_v10, %v8012_v49 }
 0x3c2   : > { %v889_v62 = vsel %vm339_vm11, %v881_v41, %v885_v1  ;;  %v893_v23 = vsel %vm339_vm11, %v885_v1, %v881_v41  ;;  %v913_v26 = vsel %vm354_vm12, %v905_v17, %v909_v54  ;;  %v917_v12 = vsel %vm354_vm12, %v909_v54, %v905_v17 }
 0x3c3   : > { %v898_v37 = vsel %vm350_vm13, %v893_v23, 0.0  ;;  %v899_v7 = vsel %vm351_vm14, %v889_v62, 0.0  ;;  %v922_v30 = vsel %vm365_vm15, %v913_v26, 0.0  ;;  %v923_v47 = vsel %vm366_vm0, %v917_v12, 0.0  ;;  %5119 = vrot.lane.b32.xlu0 %v5118_v27, %s6050_s15 }
 0x3c4   : > { %v930_v8 = vmax.f32 %v898_v37, %v922_v30  ;;  %v931_v25 = vmax.f32 %v899_v7, %v923_v47 }
 0x3c6   : > { %v8047_v6 = vmax.f32 %v8021_v36, %v930_v8  ;;  %v8050_v35 = vmax.f32 %v8018_v19, %v931_v25 }
 0x3c8   : > { %v5075_v9 = vpop.permute.xlu1 %5074  ;;  %v5123_v3 = vpack.i.bf16 %v8050_v35, %v8047_v6 }
 0x3c9   : > { %v5077_v0 = vunpack.i.h.bf16 %v5075_v9  ;;  %v5076_v15 = vunpack.i.l.bf16 %v5075_v9 }
 0x3ca   : > { %5124 = vrot.lane.b32.xlu1 %v5123_v3, %s6050_s15 }
 0x3cb   : > { %v8055_v58 = vmax.f32 %v7267_v33, %v5077_v0  ;;  %v8058_v21 = vmax.f32 %v7264_v22, %v5076_v15 }
 0x3cd   : > { %v2147_v59 = vrot.slane %v8055_v58, 7  ;;  %v2171_v24 = vrot.slane %v8055_v58, 1  ;;  %v2143_v4 = vrot.slane %v8058_v21, 7  ;;  %v2167_v57 = vrot.slane %v8058_v21, 1 }
 0x3ce   : > { %v5070_v63 = vpop.permute.xlu0 %5069 }
 0x3cf   : > { %v5072_v14 = vunpack.i.h.bf16 %v5070_v63  ;;  %v5071_v20 = vunpack.i.l.bf16 %v5070_v63  ;;  %v2151_v33 = vsel %vm339_vm11, %v2143_v4, %v2147_v59  ;;  %v2155_v22 = vsel %vm339_vm11, %v2147_v59, %v2143_v4 }
 0x3d0   : > { %v2175_v38 = vsel %vm354_vm12, %v2167_v57, %v2171_v24  ;;  %v2179_v52 = vsel %vm354_vm12, %v2171_v24, %v2167_v57  ;;  %v2160_v44 = vsel %vm350_vm13, %v2155_v22, 0.0  ;;  %v2161_v45 = vsel %vm351_vm14, %v2151_v33, 0.0 }
 0x3d1   : > { %v2184_v18 = vsel %vm365_vm15, %v2175_v38, 0.0  ;;  %v2185_v31 = vsel %vm366_vm0, %v2179_v52, 0.0  ;;  %v8082_v41 = vmax.f32 %v7304_v60, %v5072_v14  ;;  %v8085_v17 = vmax.f32 %v7301_v48, %v5071_v20 }
 0x3d2   : > { %v2192_v1 = vmax.f32 %v2160_v44, %v2184_v18  ;;  %v2193_v54 = vmax.f32 %v2161_v45, %v2185_v31 }
 0x3d3   : > { %v2146_v23 = vrot.slane %v8082_v41, 7  ;;  %v2170_v26 = vrot.slane %v8082_v41, 1  ;;  %v2142_v12 = vrot.slane %v8085_v17, 7  ;;  %v2166_v37 = vrot.slane %v8085_v17, 1 }
 0x3d4   : > { %v8088_v27 = vmax.f32 %v8058_v21, %v2192_v1  ;;  %v8091_v62 = vmax.f32 %v8055_v58, %v2193_v54 }
 0x3d5   : > { %v2150_v47 = vsel %vm339_vm11, %v2142_v12, %v2146_v23  ;;  %v2154_v8 = vsel %vm339_vm11, %v2146_v23, %v2142_v12  ;;  %v2174_v25 = vsel %vm354_vm12, %v2166_v37, %v2170_v26  ;;  %v2178_v9 = vsel %vm354_vm12, %v2170_v26, %v2166_v37 }
 0x3d6   : > { %v5133_v48 = vpack.i.bf16 %v8091_v62, %v8088_v27  ;;  %v2158_v0 = vsel %vm350_vm13, %v2154_v8, 0.0  ;;  %v2159_v15 = vsel %vm351_vm14, %v2150_v47, 0.0  ;;  %v2182_v3 = vsel %vm365_vm15, %v2174_v25, 0.0 }
 0x3d7   : > { %v5080_v7 = vpop.permute.xlu0 %5079  ;;  %v2183_v63 = vsel %vm366_vm0, %v2178_v9, 0.0  ;;  %v2190_v59 = vmax.f32 %v2158_v0, %v2182_v3 }
 0x3d8   : > { %v5082_v60 = vunpack.i.h.bf16 %v5080_v7  ;;  %v5081_v30 = vunpack.i.l.bf16 %v5080_v7  ;;  %5134 = vrot.lane.b32.xlu1 %v5133_v48, %s6050_s15  ;;  %v2191_v24 = vmax.f32 %v2159_v15, %v2183_v63 }
 0x3d9   : > { %v8123_v14 = vmax.f32 %v8085_v17, %v2190_v59 }
 0x3da   : > { %v8117_v4 = vmax.f32 %v7368_v32, %v5082_v60  ;;  %v8120_v57 = vmax.f32 %v7365_v50, %v5081_v30  ;;  %v8126_v20 = vmax.f32 %v8082_v41, %v2191_v24 }
 0x3dc   : > { %10978 = vst [vmem:[#allocation65_spill] sm:$0xff] %v8117_v4  ;;  %v3410_v33 = vrot.slane %v8117_v4, 7  ;;  %v3434_v22 = vrot.slane %v8117_v4, 1  ;;  %v3406_v38 = vrot.slane %v8120_v57, 7  ;;  %v3430_v52 = vrot.slane %v8120_v57, 1 }
 0x3dd   : > { %v5128_v50 = vpack.i.bf16 %v8126_v20, %v8123_v14 }
 0x3de   : > { %v3414_v18 = vsel %vm339_vm11, %v3406_v38, %v3410_v33  ;;  %v3418_v31 = vsel %vm339_vm11, %v3410_v33, %v3406_v38  ;;  %v3438_v1 = vsel %vm354_vm12, %v3430_v52, %v3434_v22  ;;  %v3442_v54 = vsel %vm354_vm12, %v3434_v22, %v3430_v52 }
 0x3df   : > { %v3422_v23 = vsel %vm350_vm13, %v3418_v31, 0.0  ;;  %v3423_v26 = vsel %vm351_vm14, %v3414_v18, 0.0  ;;  %v3446_v12 = vsel %vm365_vm15, %v3438_v1, 0.0  ;;  %v3447_v37 = vsel %vm366_vm0, %v3442_v54, 0.0  ;;  %5129 = vrot.lane.b32.xlu0 %v5128_v50, %s6050_s15 }
 0x3e0   : > { %v3454_v60 = vmax.f32 %v3422_v23, %v3446_v12  ;;  %v3455_v30 = vmax.f32 %v3423_v26, %v3447_v37 }
 0x3e1   : > { %v5085_v44 = vpop.permute.xlu1 %5084 }
 0x3e2   : > { %v5087_v32 = vunpack.i.h.bf16 %v5085_v44  ;;  %v5086_v45 = vunpack.i.l.bf16 %v5085_v44  ;;  %v8158_v9 = vmax.f32 %v8120_v57, %v3454_v60  ;;  %v8161_v0 = vmax.f32 %v8117_v4, %v3455_v30 }
 0x3e4   : > { %v8152_v48 = vmax.f32 %v7452_v13, %v5087_v32  ;;  %v8155_v47 = vmax.f32 %v7449_v16, %v5086_v45  ;;  %v5138_v38 = vpack.i.bf16 %v8161_v0, %v8158_v9 }
 0x3e6   : > { %v5090_v7 = vpop.permute.xlu0 %5089  ;;  %10979 = vst [vmem:[#allocation66_spill] sm:$0xff] %v8152_v48  ;;  %10980 = vst [vmem:[#allocation67_spill] sm:$0xff] %v8155_v47  ;;  %v3411_v15 = vrot.slane %v8152_v48, 7  ;;  %v3435_v3 = vrot.slane %v8152_v48, 1  ;;  %v3407_v59 = vrot.slane %v8155_v47, 7  ;;  %v3431_v13 = vrot.slane %v8155_v47, 1  ;;  %5139 = vrot.lane.b32.xlu0 %v5138_v38, %s6050_s15 }
 0x3e7   : > { %v5092_v8 = vunpack.i.h.bf16 %v5090_v7  ;;  %v5091_v25 = vunpack.i.l.bf16 %v5090_v7 }
 0x3e8   : > { %v3415_v52 = vsel %vm339_vm11, %v3407_v59, %v3411_v15  ;;  %v3419_v44 = vsel %vm339_vm11, %v3411_v15, %v3407_v59  ;;  %v3439_v32 = vsel %vm354_vm12, %v3431_v13, %v3435_v3 }
 0x3e9   : > { %v8168_v16 = vmax.f32 %v7480_v51, %v5092_v8  ;;  %v8171_v24 = vmax.f32 %v7469_v11, %v5091_v25  ;;  %v3443_v51 = vsel %vm354_vm12, %v3435_v3, %v3431_v13  ;;  %v3424_v11 = vsel %vm350_vm13, %v3419_v44, 0.0 }
 0x3ea   : > { %v5095_v63 = vpop.permute.xlu1 %5094  ;;  %v3425_v45 = vsel %vm351_vm14, %v3415_v52, 0.0  ;;  %v3448_v50 = vsel %vm365_vm15, %v3439_v32, 0.0  ;;  %v3449_v18 = vsel %vm366_vm0, %v3443_v51, 0.0 }
 0x3eb   : > { %10981 = vst [vmem:[#allocation68_spill] sm:$0xff] %v8168_v16  ;;  %10982 = vst [vmem:[#allocation69_spill] sm:$0xff] %v8171_v24  ;;  %v5097_v33 = vunpack.i.h.bf16 %v5095_v63  ;;  %v5096_v22 = vunpack.i.l.bf16 %v5095_v63  ;;  %v3456_v1 = vmax.f32 %v3424_v11, %v3448_v50  ;;  %v3457_v54 = vmax.f32 %v3425_v45, %v3449_v18 }
 0x3ec   : > { %v886_v23 = vrot.slane %v8168_v16, 7  ;;  %v910_v26 = vrot.slane %v8168_v16, 1  ;;  %v882_v12 = vrot.slane %v8171_v24, 7  ;;  %v906_v37 = vrot.slane %v8171_v24, 1 }
 0x3ed   : > { %v8197_v7 = vmax.f32 %v7519_v29, %v5097_v33  ;;  %v8200_v60 = vmax.f32 %v7508_v2, %v5096_v22  ;;  %v8203_v30 = vmax.f32 %v8155_v47, %v3456_v1  ;;  %v8206_v8 = vmax.f32 %v8152_v48, %v3457_v54 }
 0x3ee   : > { %v890_v3 = vsel %vm339_vm11, %v882_v12, %v886_v23  ;;  %v894_v63 = vsel %vm339_vm11, %v886_v23, %v882_v12  ;;  %v914_v29 = vsel %vm354_vm12, %v906_v37, %v910_v26  ;;  %v918_v2 = vsel %vm354_vm12, %v910_v26, %v906_v37 }
 0x3ef   : > { %v5105_v31 = vpop.permute.xlu1 %5104  ;;  %10983 = vst [vmem:[#allocation70_spill] sm:$0xff] %v8197_v7  ;;  %10984 = vst [vmem:[#allocation71_spill] sm:$0xff] %v8200_v60  ;;  %v900_v59 = vsel %vm350_vm13, %v894_v63, 0.0  ;;  %v901_v13 = vsel %vm351_vm14, %v890_v3, 0.0  ;;  %v924_v33 = vsel %vm365_vm15, %v914_v29, 0.0  ;;  %v925_v22 = vsel %vm366_vm0, %v918_v2, 0.0 }
 0x3f0   : > { %10985 = vst [vmem:[#allocation72_spill] sm:$0xff] %v8203_v30  ;;  %10986 = vst [vmem:[#allocation73_spill] sm:$0xff] %v8206_v8  ;;  %v5107_v25 = vunpack.i.h.bf16 %v5105_v31  ;;  %v5106_v15 = vunpack.i.l.bf16 %v5105_v31  ;;  %v932_v52 = vmax.f32 %v900_v59, %v924_v33  ;;  %v933_v44 = vmax.f32 %v901_v13, %v925_v22 }
 0x3f1   : > { %v2148_v32 = vrot.slane %v8197_v7, 7  ;;  %v2172_v51 = vrot.slane %v8197_v7, 1  ;;  %v2144_v11 = vrot.slane %v8200_v60, 7  ;;  %v2168_v45 = vrot.slane %v8200_v60, 1 }
 0x3f2   : > { %v8229_v50 = vmax.f32 %v7560_v53, %v5107_v25  ;;  %v8232_v18 = vmax.f32 %v7557_v61, %v5106_v15  ;;  %v8235_v31 = vmax.f32 %v8171_v24, %v932_v52  ;;  %v8238_v1 = vmax.f32 %v8168_v16, %v933_v44 }
 0x3f3   : > { %v5100_v38 = vpop.permute.xlu0 %5099  ;;  %v2152_v26 = vsel %vm339_vm11, %v2144_v11, %v2148_v32  ;;  %v2156_v12 = vsel %vm339_vm11, %v2148_v32, %v2144_v11  ;;  %v2176_v53 = vsel %vm354_vm12, %v2168_v45, %v2172_v51  ;;  %v2180_v61 = vsel %vm354_vm12, %v2172_v51, %v2168_v45 }
 0x3f4   : > { %10987 = vst [vmem:[#allocation74_spill] sm:$0xff] %v8229_v50  ;;  %10988 = vst [vmem:[#allocation75_spill] sm:$0xff] %v8232_v18  ;;  %v5102_v54 = vunpack.i.h.bf16 %v5100_v38  ;;  %v5101_v23 = vunpack.i.l.bf16 %v5100_v38  ;;  %v2162_v37 = vsel %vm350_vm13, %v2156_v12, 0.0  ;;  %v2163_v25 = vsel %vm351_vm14, %v2152_v26, 0.0 }
 0x3f5   : > { %10989 = vst [vmem:[#allocation76_spill] sm:$0xff] %v8235_v31  ;;  %10990 = vst [vmem:[#allocation77_spill] sm:$0xff] %v8238_v1  ;;  %v2186_v15 = vsel %vm365_vm15, %v2176_v53, 0.0  ;;  %v2187_v3 = vsel %vm366_vm0, %v2180_v61, 0.0  ;;  %v887_v59 = vrot.slane %v8229_v50, 7  ;;  %v911_v13 = vrot.slane %v8229_v50, 1 }
 0x3f6   : > { %v2194_v29 = vmax.f32 %v2162_v37, %v2186_v15  ;;  %v2195_v2 = vmax.f32 %v2163_v25, %v2187_v3  ;;  %v883_v33 = vrot.slane %v8232_v18, 7  ;;  %v907_v22 = vrot.slane %v8232_v18, 1 }
 0x3f7   : > { %v8261_v38 = vmax.f32 %v7595_v5, %v5102_v54  ;;  %v8264_v52 = vmax.f32 %v7592_v55, %v5101_v23  ;;  %v5143_v51 = vpack.i.bf16 %v8206_v8, %v8203_v30 }
 0x3f8   : > { %v8267_v44 = vmax.f32 %v8200_v60, %v2194_v29  ;;  %v8270_v32 = vmax.f32 %v8197_v7, %v2195_v2  ;;  %v891_v45 = vsel %vm339_vm11, %v883_v33, %v887_v59  ;;  %v895_v5 = vsel %vm339_vm11, %v887_v59, %v883_v33  ;;  %v10995_v59 = vld [vmem:[#allocation62_spill] sm:$0xff] }
 0x3f9   : > { %v5115_v63 = vpop.permute.xlu1 %5114  ;;  %10991 = vst [vmem:[#allocation78_spill] sm:$0xff] %v8261_v38  ;;  %10992 = vst [vmem:[#allocation79_spill] sm:$0xff] %v8264_v52  ;;  %v915_v55 = vsel %vm354_vm12, %v907_v22, %v911_v13  ;;  %v919_v54 = vsel %vm354_vm12, %v911_v13, %v907_v22  ;;  %v902_v23 = vsel %vm350_vm13, %v895_v5, 0.0  ;;  %v903_v26 = vsel %vm351_vm14, %v891_v45, 0.0  ;;  %5144 = vrot.lane.b32.xlu1 %v5143_v51, %s6050_s15 }
 0x3fa   : > { %10993 = vst [vmem:[#allocation80_spill] sm:$0xff] %v8267_v44  ;;  %10994 = vst [vmem:[#allocation81_spill] sm:$0xff] %v8270_v32  ;;  %v5117_v11 = vunpack.i.h.bf16 %v5115_v63  ;;  %v926_v12 = vsel %vm365_vm15, %v915_v55, 0.0  ;;  %v927_v53 = vsel %vm366_vm0, %v919_v54, 0.0  ;;  %v3412_v15 = vrot.slane %v8261_v38, 7 }
 0x3fb   : > { %v934_v37 = vmax.f32 %v902_v23, %v926_v12  ;;  %v935_v25 = vmax.f32 %v903_v26, %v927_v53  ;;  %v3436_v3 = vrot.slane %v8261_v38, 1  ;;  %v3408_v29 = vrot.slane %v8264_v52, 7 }
 0x3fc   : > { %v3432_v2 = vrot.slane %v8264_v52, 1  ;;  %v8296_v13 = vmax.f32 %v10995_v59, %v5117_v11  ;;  %v5116_v33 = vunpack.i.l.bf16 %v5115_v63 }
 0x3fd   : > { %v8299_v22 = vmax.f32 %v8232_v18, %v934_v37  ;;  %v8302_v51 = vmax.f32 %v8229_v50, %v935_v25  ;;  %v3416_v55 = vsel %vm339_vm11, %v3408_v29, %v3412_v15  ;;  %v3420_v54 = vsel %vm339_vm11, %v3412_v15, %v3408_v29  ;;  %v10999_v29 = vld [vmem:[#allocation61_spill] sm:$0xff] }
 0x3fe   : > { %10996 = vst [vmem:[#allocation62_spill] sm:$0xff] %v8296_v13  ;;  %v3440_v23 = vsel %vm354_vm12, %v3432_v2, %v3436_v3  ;;  %v3444_v63 = vsel %vm354_vm12, %v3436_v3, %v3432_v2  ;;  %v3426_v11 = vsel %vm350_vm13, %v3420_v54, 0.0  ;;  %v3427_v26 = vsel %vm351_vm14, %v3416_v55, 0.0  ;;  %v11001_v2 = vld [vmem:[#allocation64_spill] sm:$0xff]  ;;  %v11003_v54 = vld [vmem:[#allocation63_spill] sm:$0xff] }
 0x3ff   : > { %v5110_v61 = vpop.permute.xlu0 %5109  ;;  %10997 = vst [vmem:[#allocation82_spill] sm:$0xff] %v8299_v22  ;;  %10998 = vst [vmem:[#allocation83_spill] sm:$0xff] %v8302_v51  ;;  %v3450_v12 = vsel %vm365_vm15, %v3440_v23, 0.0  ;;  %v3451_v53 = vsel %vm366_vm0, %v3444_v63, 0.0  ;;  %v3413_v25 = vrot.slane %v8296_v13, 7  ;;  %v3437_v15 = vrot.slane %v8296_v13, 1 }
 0x400   : > { %v5112_v45 = vunpack.i.h.bf16 %v5110_v61  ;;  %v5111_v5 = vunpack.i.l.bf16 %v5110_v61  ;;  %v3458_v61 = vmax.f32 %v3426_v11, %v3450_v12  ;;  %v3459_v37 = vmax.f32 %v3427_v26, %v3451_v53 }
 0x401   : > { %v8323_v3 = vmax.f32 %v10999_v29, %v5116_v33  ;;  %v5148_v23 = vpack.i.bf16 %v8238_v1, %v8235_v31  ;;  %v5153_v26 = vpack.i.bf16 %v8270_v32, %v8267_v44 }
 0x402   : > { %v8326_v59 = vmax.f32 %v11001_v2, %v5112_v45  ;;  %v8329_v55 = vmax.f32 %v11003_v54, %v5111_v5  ;;  %v8334_v63 = vmax.f32 %v8264_v52, %v3458_v61  ;;  %v8337_v11 = vmax.f32 %v8261_v38, %v3459_v37 }
 0x403   : > { %11000 = vst [vmem:[#allocation61_spill] sm:$0xff] %v8323_v3  ;;  %v3409_v33 = vrot.slane %v8323_v3, 7  ;;  %v3433_v45 = vrot.slane %v8323_v3, 1  ;;  %5149 = vrot.lane.b32.xlu0 %v5148_v23, %s6050_s15  ;;  %v5163_v5 = vpack.i.bf16 %v8302_v51, %v8299_v22  ;;  %5154 = vrot.lane.b32.xlu1 %v5153_v26, %s6050_s15 }
 0x404   : > { %11002 = vst [vmem:[#allocation64_spill] sm:$0xff] %v8326_v59  ;;  %11004 = vst [vmem:[#allocation63_spill] sm:$0xff] %v8329_v55  ;;  %v2149_v12 = vrot.slane %v8326_v59, 7  ;;  %v2173_v53 = vrot.slane %v8326_v59, 1  ;;  %v2145_v61 = vrot.slane %v8329_v55, 7  ;;  %v2169_v37 = vrot.slane %v8329_v55, 1 }
 0x405   : > { %11005 = vst [vmem:[#allocation84_spill] sm:$0xff] %v8334_v63  ;;  %11006 = vst [vmem:[#allocation85_spill] sm:$0xff] %v8337_v11  ;;  %v5158_v29 = vpack.i.bf16 %v8337_v11, %v8334_v63  ;;  %v3417_v2 = vsel %vm339_vm11, %v3409_v33, %v3413_v25  ;;  %v3421_v54 = vsel %vm339_vm11, %v3413_v25, %v3409_v33 }
 0x406   : > { %v3441_v23 = vsel %vm354_vm12, %v3433_v45, %v3437_v15  ;;  %v3445_v38 = vsel %vm354_vm12, %v3437_v15, %v3433_v45  ;;  %v3428_v52 = vsel %vm350_vm13, %v3421_v54, 0.0  ;;  %v3429_v26 = vsel %vm351_vm14, %v3417_v2, 0.0 }
 0x407   : > { %v3452_v50 = vsel %vm365_vm15, %v3441_v23, 0.0  ;;  %v3453_v18 = vsel %vm366_vm0, %v3445_v38, 0.0  ;;  %v2153_v33 = vsel %vm339_vm11, %v2145_v61, %v2149_v12  ;;  %v2157_v15 = vsel %vm339_vm11, %v2149_v12, %v2145_v61  ;;  %5159 = vrot.lane.b32.xlu0 %v5158_v29, %s6050_s15  ;;  %5164 = vrot.lane.b32.xlu1 %v5163_v5, %s6050_s15 }
 0x408   : > { %v3460_v7 = vmax.f32 %v3428_v52, %v3452_v50  ;;  %v3461_v25 = vmax.f32 %v3429_v26, %v3453_v18  ;;  %v2164_v45 = vsel %vm350_vm13, %v2157_v15, 0.0  ;;  %v2165_v2 = vsel %vm351_vm14, %v2153_v33, 0.0 }
 0x409   : > { %v2177_v54 = vsel %vm354_vm12, %v2169_v37, %v2173_v53  ;;  %v2181_v50 = vsel %vm354_vm12, %v2173_v53, %v2169_v37 }
 0x40a   : > { %v8384_v18 = vmax.f32 %v8323_v3, %v3460_v7  ;;  %v8387_v38 = vmax.f32 %v8296_v13, %v3461_v25  ;;  %v2188_v52 = vsel %vm365_vm15, %v2177_v54, 0.0  ;;  %v2189_v12 = vsel %vm366_vm0, %v2181_v50, 0.0 }
 0x40b   : > { %v2196_v61 = vmax.f32 %v2164_v45, %v2188_v52  ;;  %v2197_v29 = vmax.f32 %v2165_v2, %v2189_v12 }
 0x40c   : > { %11007 = vst [vmem:[#allocation86_spill] sm:$0xff] %v8384_v18  ;;  %v5173_v23 = vpack.i.bf16 %v8387_v38, %v8384_v18 }
 0x40d   : > { %v8396_v53 = vmax.f32 %v8329_v55, %v2196_v61  ;;  %v8399_v7 = vmax.f32 %v8326_v59, %v2197_v29 }
 0x40e   : > { %5174 = vrot.lane.b32.xlu1 %v5173_v23, %s6050_s15 }
 0x40f   : > { %11008 = vst [vmem:[#allocation87_spill] sm:$0xff] %v8396_v53  ;;  %11009 = vst [vmem:[#allocation88_spill] sm:$0xff] %v8399_v7  ;;  %v5168_v5 = vpack.i.bf16 %v8399_v7, %v8396_v53 }
 0x411   : > { %5169 = vrot.lane.b32.xlu0 %v5168_v5, %s6050_s15 }
 0x435   : > { %v5120_v37 = vpop.permute.xlu0 %5119 }
 0x436   : > { %v5122_v26 = vunpack.i.h.bf16 %v5120_v37  ;;  %v5121_v25 = vunpack.i.l.bf16 %v5120_v37 }
 0x438   : > { %v949_v33 = vsel %vm367_vm8, %v5122_v26, %v8015_v10  ;;  %v946_v15 = vsel %vm367_vm8, %v5121_v25, %v8012_v49 }
 0x439   : > { %v5178_v45 = vpack.i.bf16 %v949_v33, %v946_v15 }
 0x43b   : > { %5179 = vrot.lane.b32.xlu0 %v5178_v45, %s6050_s15 }
 0x43c   : > { %v5125_v2 = vpop.permute.xlu1 %5124 }
 0x43d   : > { %v5127_v54 = vunpack.i.h.bf16 %v5125_v2  ;;  %v5126_v50 = vunpack.i.l.bf16 %v5125_v2 }
 0x43f   : > { %v955_v52 = vsel %vm367_vm8, %v5127_v54, %v8050_v35  ;;  %v952_v12 = vsel %vm367_vm8, %v5126_v50, %v8047_v6 }
 0x440   : > { %v5183_v61 = vpack.i.bf16 %v955_v52, %v952_v12 }
 0x442   : > { %5184 = vrot.lane.b32.xlu1 %v5183_v61, %s6050_s15 }
 0x44a   : > { %v5135_v29 = vpop.permute.xlu1 %5134 }
 0x44b   : > { %v5137_v23 = vunpack.i.h.bf16 %v5135_v29  ;;  %v5136_v5 = vunpack.i.l.bf16 %v5135_v29 }
 0x44d   : > { %v2217_v37 = vsel %vm367_vm8, %v5137_v23, %v8091_v62  ;;  %v2214_v26 = vsel %vm367_vm8, %v5136_v5, %v8088_v27 }
 0x44e   : > { %v5193_v25 = vpack.i.bf16 %v2217_v37, %v2214_v26 }
 0x450   : > { %5194 = vrot.lane.b32.xlu1 %v5193_v25, %s6050_s15 }
 0x451   : > { %v5130_v33 = vpop.permute.xlu0 %5129 }
 0x452   : > { %v5132_v15 = vunpack.i.h.bf16 %v5130_v33  ;;  %v5131_v45 = vunpack.i.l.bf16 %v5130_v33 }
 0x454   : > { %v2211_v2 = vsel %vm367_vm8, %v5132_v15, %v8126_v20  ;;  %v2208_v54 = vsel %vm367_vm8, %v5131_v45, %v8123_v14 }
 0x455   : > { %v5188_v50 = vpack.i.bf16 %v2211_v2, %v2208_v54 }
 0x457   : > { %5189 = vrot.lane.b32.xlu0 %v5188_v50, %s6050_s15 }
 0x458   : > { %v5140_v52 = vpop.permute.xlu0 %5139 }
 0x459   : > { %v5142_v12 = vunpack.i.h.bf16 %v5140_v52  ;;  %v5141_v61 = vunpack.i.l.bf16 %v5140_v52 }
 0x45b   : > { %v3475_v29 = vsel %vm367_vm8, %v5142_v12, %v8161_v0  ;;  %v3472_v23 = vsel %vm367_vm8, %v5141_v61, %v8158_v9 }
 0x45c   : > { %v5198_v5 = vpack.i.bf16 %v3475_v29, %v3472_v23 }
 0x45e   : > { %5199 = vrot.lane.b32.xlu0 %v5198_v5, %s6050_s15 }
 0x46b   : > { %v5145_v37 = vpop.permute.xlu1 %5144 }
 0x46c   : > { %v5147_v26 = vunpack.i.h.bf16 %v5145_v37  ;;  %v5146_v25 = vunpack.i.l.bf16 %v5145_v37 }
 0x46e   : > { %v3481_v33 = vsel %vm367_vm8, %v5147_v26, %v8206_v8  ;;  %v3478_v15 = vsel %vm367_vm8, %v5146_v25, %v8203_v30 }
 0x46f   : > { %v5203_v45 = vpack.i.bf16 %v3481_v33, %v3478_v15 }
 0x471   : > { %5204 = vrot.lane.b32.xlu1 %v5203_v45, %s6050_s15 }
 0x475   : > { %v5150_v2 = vpop.permute.xlu0 %5149  ;;  %v5155_v52 = vpop.permute.xlu1 %5154 }
 0x476   : > { %v5152_v54 = vunpack.i.h.bf16 %v5150_v2  ;;  %v5151_v50 = vunpack.i.l.bf16 %v5150_v2  ;;  %v5157_v12 = vunpack.i.h.bf16 %v5155_v52  ;;  %v5156_v61 = vunpack.i.l.bf16 %v5155_v52 }
 0x478   : > { %v961_v29 = vsel %vm367_vm8, %v5152_v54, %v8238_v1  ;;  %v958_v23 = vsel %vm367_vm8, %v5151_v50, %v8235_v31  ;;  %v2223_v5 = vsel %vm367_vm8, %v5157_v12, %v8270_v32  ;;  %v2220_v37 = vsel %vm367_vm8, %v5156_v61, %v8267_v44 }
 0x479   : > { %v5208_v26 = vpack.i.bf16 %v961_v29, %v958_v23  ;;  %v5160_v25 = vpop.permute.xlu0 %5159  ;;  %v5165_v33 = vpop.permute.xlu1 %5164  ;;  %v5213_v2 = vpack.i.bf16 %v2223_v5, %v2220_v37 }
 0x47a   : > { %v5162_v15 = vunpack.i.h.bf16 %v5160_v25  ;;  %v5161_v45 = vunpack.i.l.bf16 %v5160_v25  ;;  %v5167_v52 = vunpack.i.h.bf16 %v5165_v33  ;;  %v5166_v59 = vunpack.i.l.bf16 %v5165_v33 }
 0x47b   : > { %5209 = vrot.lane.b32.xlu0 %v5208_v26, %s6050_s15  ;;  %5214 = vrot.lane.b32.xlu1 %v5213_v2, %s6050_s15 }
 0x47c   : > { %v3487_v54 = vsel %vm367_vm8, %v5162_v15, %v8337_v11  ;;  %v3484_v50 = vsel %vm367_vm8, %v5161_v45, %v8334_v63  ;;  %v967_v12 = vsel %vm367_vm8, %v5167_v52, %v8302_v51  ;;  %v964_v61 = vsel %vm367_vm8, %v5166_v59, %v8299_v22 }
 0x47d   : > { %v5218_v29 = vpack.i.bf16 %v3487_v54, %v3484_v50  ;;  %v5223_v23 = vpack.i.bf16 %v967_v12, %v964_v61 }
 0x47f   : > { %5219 = vrot.lane.b32.xlu0 %v5218_v29, %s6050_s15  ;;  %5224 = vrot.lane.b32.xlu1 %v5223_v23, %s6050_s15 }
 0x480   : > { %v5175_v5 = vpop.permute.xlu1 %5174 }
 0x481   : > { %v5177_v37 = vunpack.i.h.bf16 %v5175_v5  ;;  %v5176_v26 = vunpack.i.l.bf16 %v5175_v5 }
 0x483   : > { %v3493_v25 = vsel %vm367_vm8, %v5177_v37, %v8387_v38  ;;  %v3490_v33 = vsel %vm367_vm8, %v5176_v26, %v8384_v18  ;;  %v5170_v15 = vpop.permute.xlu0 %5169 }
 0x484   : > { %v5172_v45 = vunpack.i.h.bf16 %v5170_v15  ;;  %v5171_v2 = vunpack.i.l.bf16 %v5170_v15  ;;  %v5233_v52 = vpack.i.bf16 %v3493_v25, %v3490_v33 }
 0x486   : > { %v2229_v59 = vsel %vm367_vm8, %v5172_v45, %v8399_v7  ;;  %v2226_v54 = vsel %vm367_vm8, %v5171_v2, %v8396_v53  ;;  %5234 = vrot.lane.b32.xlu1 %v5233_v52, %s6050_s15 }
 0x487   : > { %v5228_v50 = vpack.i.bf16 %v2229_v59, %v2226_v54 }
 0x489   : > { %5229 = vrot.lane.b32.xlu0 %v5228_v50, %s6050_s15 }
 0x4ad   : > { %v5180_v12 = vpop.permute.xlu0 %5179 }
 0x4ae   : > { %v5182_v61 = vunpack.i.h.bf16 %v5180_v12  ;;  %v5181_v29 = vunpack.i.l.bf16 %v5180_v12 }
 0x4b0   : > { %v8467_v23 = vsel %vm367_vm8, %v5182_v61, %v8015_v10  ;;  %v8471_v5 = vsel %vm367_vm8, %v5181_v29, %v8012_v49 }
 0x4b1   : > { %v1000_v26 = vsel %vm387_vm10, %v8471_v5, 0.0  ;;  %v1001_v25 = vsel %vm387_vm10, %v8467_v23, 0.0 }
 0x4b2   : > { %v5238_v33 = vpack.i.bf16 %v1001_v25, %v1000_v26 }
 0x4b4   : > { %v5185_v15 = vpop.permute.xlu1 %5184  ;;  %5239 = vrot.lane.b32.xlu0 %v5238_v33, %s6056_s8 }
 0x4b5   : > { %v5187_v45 = vunpack.i.h.bf16 %v5185_v15  ;;  %v5186_v2 = vunpack.i.l.bf16 %v5185_v15 }
 0x4b7   : > { %v8482_v52 = vsel %vm367_vm8, %v5187_v45, %v8050_v35  ;;  %v8486_v59 = vsel %vm367_vm8, %v5186_v2, %v8047_v6 }
 0x4b8   : > { %v1002_v54 = vsel %vm387_vm10, %v8486_v59, 0.0  ;;  %v1003_v50 = vsel %vm387_vm10, %v8482_v52, 0.0 }
 0x4b9   : > { %v5243_v12 = vpack.i.bf16 %v1003_v50, %v1002_v54 }
 0x4bb   : > { %5244 = vrot.lane.b32.xlu1 %v5243_v12, %s6056_s8 }
 0x4c2   : > { %v5195_v61 = vpop.permute.xlu1 %5194 }
 0x4c3   : > { %v5197_v29 = vunpack.i.h.bf16 %v5195_v61  ;;  %v5196_v26 = vunpack.i.l.bf16 %v5195_v61 }
 0x4c5   : > { %v8497_v25 = vsel %vm367_vm8, %v5197_v29, %v8091_v62  ;;  %v8501_v33 = vsel %vm367_vm8, %v5196_v26, %v8088_v27 }
 0x4c6   : > { %v2264_v15 = vsel %vm387_vm10, %v8501_v33, 0.0  ;;  %v2265_v45 = vsel %vm387_vm10, %v8497_v25, 0.0 }
 0x4c7   : > { %v5253_v2 = vpack.i.bf16 %v2265_v45, %v2264_v15 }
 0x4c9   : > { %v5190_v54 = vpop.permute.xlu0 %5189  ;;  %5254 = vrot.lane.b32.xlu1 %v5253_v2, %s6056_s8 }
 0x4ca   : > { %v5192_v50 = vunpack.i.h.bf16 %v5190_v54  ;;  %v5191_v12 = vunpack.i.l.bf16 %v5190_v54 }
 0x4cc   : > { %v8512_v61 = vsel %vm367_vm8, %v5192_v50, %v8126_v20  ;;  %v8516_v29 = vsel %vm367_vm8, %v5191_v12, %v8123_v14 }
 0x4cd   : > { %v2262_v26 = vsel %vm387_vm10, %v8516_v29, 0.0  ;;  %v2263_v15 = vsel %vm387_vm10, %v8512_v61, 0.0 }
 0x4ce   : > { %v5248_v45 = vpack.i.bf16 %v2263_v15, %v2262_v26 }
 0x4d0   : > { %v5200_v2 = vpop.permute.xlu0 %5199  ;;  %5249 = vrot.lane.b32.xlu0 %v5248_v45, %s6056_s8 }
 0x4d1   : > { %v5202_v54 = vunpack.i.h.bf16 %v5200_v2  ;;  %v5201_v55 = vunpack.i.l.bf16 %v5200_v2 }
 0x4d3   : > { %v8527_v50 = vsel %vm367_vm8, %v5202_v54, %v8161_v0  ;;  %v8531_v12 = vsel %vm367_vm8, %v5201_v55, %v8158_v9 }
 0x4d4   : > { %v3526_v13 = vsel %vm387_vm10, %v8531_v12, 0.0  ;;  %v3527_v26 = vsel %vm387_vm10, %v8527_v50, 0.0 }
 0x4d5   : > { %v5258_v15 = vpack.i.bf16 %v3527_v26, %v3526_v13 }
 0x4d7   : > { %5259 = vrot.lane.b32.xlu0 %v5258_v15, %s6056_s8 }
 0x4e3   : > { %v5205_v45 = vpop.permute.xlu1 %5204 }
 0x4e4   : > { %v5207_v2 = vunpack.i.h.bf16 %v5205_v45  ;;  %v5206_v3 = vunpack.i.l.bf16 %v5205_v45 }
 0x4e6   : > { %v8542_v54 = vsel %vm367_vm8, %v5207_v2, %v8206_v8  ;;  %v8546_v55 = vsel %vm367_vm8, %v5206_v3, %v8203_v30 }
 0x4e7   : > { %v3528_v60 = vsel %vm387_vm10, %v8546_v55, 0.0  ;;  %v3529_v13 = vsel %vm387_vm10, %v8542_v54, 0.0 }
 0x4e8   : > { %v5263_v26 = vpack.i.bf16 %v3529_v13, %v3528_v60 }
 0x4ea   : > { %5264 = vrot.lane.b32.xlu1 %v5263_v26, %s6056_s8 }
 0x4ed   : > { %v5210_v15 = vpop.permute.xlu0 %5209  ;;  %v5215_v2 = vpop.permute.xlu1 %5214 }
 0x4ee   : > { %v5212_v45 = vunpack.i.h.bf16 %v5210_v15  ;;  %v5211_v16 = vunpack.i.l.bf16 %v5210_v15  ;;  %v5217_v24 = vunpack.i.h.bf16 %v5215_v2  ;;  %v5216_v48 = vunpack.i.l.bf16 %v5215_v2 }
 0x4f0   : > { %v8557_v3 = vsel %vm367_vm8, %v5212_v45, %v8238_v1  ;;  %v8561_v47 = vsel %vm367_vm8, %v5211_v16, %v8235_v31  ;;  %v8565_v30 = vsel %vm367_vm8, %v5217_v24, %v8270_v32  ;;  %v8569_v60 = vsel %vm367_vm8, %v5216_v48, %v8267_v44 }
 0x4f1   : > { %v1004_v13 = vsel %vm387_vm10, %v8561_v47, 0.0  ;;  %v1005_v26 = vsel %vm387_vm10, %v8557_v3, 0.0  ;;  %v5220_v15 = vpop.permute.xlu0 %5219  ;;  %v5225_v16 = vpop.permute.xlu1 %5224  ;;  %v2266_v24 = vsel %vm387_vm10, %v8569_v60, 0.0  ;;  %v2267_v44 = vsel %vm387_vm10, %v8565_v30, 0.0 }
 0x4f2   : > { %v5268_v45 = vpack.i.bf16 %v1005_v26, %v1004_v13  ;;  %v5222_v2 = vunpack.i.h.bf16 %v5220_v15  ;;  %v5221_v31 = vunpack.i.l.bf16 %v5220_v15  ;;  %v5227_v32 = vunpack.i.h.bf16 %v5225_v16 }
 0x4f3   : > { %v5226_v48 = vunpack.i.l.bf16 %v5225_v16  ;;  %v5273_v26 = vpack.i.bf16 %v2267_v44, %v2266_v24 }
 0x4f4   : > { %5269 = vrot.lane.b32.xlu0 %v5268_v45, %s6056_s8  ;;  %v8586_v1 = vsel %vm367_vm8, %v5222_v2, %v8337_v11  ;;  %v8590_v13 = vsel %vm367_vm8, %v5221_v31, %v8334_v63  ;;  %v8594_v15 = vsel %vm367_vm8, %v5227_v32, %v8302_v51 }
 0x4f5   : > { %v8598_v16 = vsel %vm367_vm8, %v5226_v48, %v8299_v22  ;;  %v3530_v45 = vsel %vm387_vm10, %v8590_v13, 0.0  ;;  %v3531_v2 = vsel %vm387_vm10, %v8586_v1, 0.0  ;;  %5274 = vrot.lane.b32.xlu1 %v5273_v26, %s6056_s8  ;;  %v1007_v44 = vsel %vm387_vm10, %v8594_v15, 0.0 }
 0x4f6   : > { %v1006_v31 = vsel %vm387_vm10, %v8598_v16, 0.0  ;;  %v5278_v32 = vpack.i.bf16 %v3531_v2, %v3530_v45 }
 0x4f7   : > { %v5283_v48 = vpack.i.bf16 %v1007_v44, %v1006_v31 }
 0x4f8   : > { %v5235_v24 = vpop.permute.xlu1 %5234  ;;  %5279 = vrot.lane.b32.xlu0 %v5278_v32, %s6056_s8 }
 0x4f9   : > { %v5237_v22 = vunpack.i.h.bf16 %v5235_v24  ;;  %v5236_v51 = vunpack.i.l.bf16 %v5235_v24  ;;  %5284 = vrot.lane.b32.xlu1 %v5283_v48, %s6056_s8 }
 0x4fb   : > { %v8616_v63 = vsel %vm367_vm8, %v5237_v22, %v8387_v38  ;;  %v8620_v26 = vsel %vm367_vm8, %v5236_v51, %v8384_v18  ;;  %v5230_v11 = vpop.permute.xlu0 %5229 }
 0x4fc   : > { %v5232_v8 = vunpack.i.h.bf16 %v5230_v11  ;;  %v5231_v4 = vunpack.i.l.bf16 %v5230_v11  ;;  %v3532_v45 = vsel %vm387_vm10, %v8620_v26, 0.0  ;;  %v3533_v2 = vsel %vm387_vm10, %v8616_v63, 0.0 }
 0x4fd   : > { %v5293_v31 = vpack.i.bf16 %v3533_v2, %v3532_v45  ;;  %v992_v45 = vsel %vm380_vm9, %v8471_v5, 0.0 }
 0x4fe   : > { %v8631_v22 = vsel %vm367_vm8, %v5232_v8, %v8399_v7  ;;  %v8635_v51 = vsel %vm367_vm8, %v5231_v4, %v8396_v53  ;;  %v993_v4 = vsel %vm380_vm9, %v8467_v23, 0.0  ;;  %v994_v23 = vsel %vm380_vm9, %v8486_v59, 0.0 }
 0x4ff   : > { %5294 = vrot.lane.b32.xlu1 %v5293_v31, %s6056_s8  ;;  %v2268_v11 = vsel %vm387_vm10, %v8635_v51, 0.0  ;;  %v2269_v44 = vsel %vm387_vm10, %v8631_v22, 0.0 }
 0x500   : > { %v5288_v32 = vpack.i.bf16 %v2269_v44, %v2268_v11 }
 0x502   : > { %5289 = vrot.lane.b32.xlu0 %v5288_v32, %s6056_s8  ;;  %v995_v32 = vsel %vm380_vm9, %v8482_v52, 0.0 }
 0x526   : > { %v5240_v24 = vpop.permute.xlu0 %5239 }
 0x527   : > { %v5242_v8 = vunpack.i.h.bf16 %v5240_v24  ;;  %v5241_v48 = vunpack.i.l.bf16 %v5240_v24 }
 0x529   : > { %v1041_v2 = vmax.f32 %v993_v4, %v5242_v8  ;;  %v1040_v31 = vmax.f32 %v992_v45, %v5241_v48 }
 0x52b   : > { %v5298_v53 = vpack.i.bf16 %v1041_v2, %v1040_v31 }
 0x52d   : > { %v5245_v7 = vpop.permute.xlu1 %5244  ;;  %5299 = vrot.lane.b32.xlu0 %v5298_v53, %s6054_s24  ;;  %v2256_v53 = vsel %vm380_vm9, %v8501_v33, 0.0  ;;  %v2255_v33 = vsel %vm380_vm9, %v8512_v61, 0.0 }
 0x52e   : > { %v5247_v11 = vunpack.i.h.bf16 %v5245_v7  ;;  %v5246_v44 = vunpack.i.l.bf16 %v5245_v7  ;;  %v2257_v7 = vsel %vm380_vm9, %v8497_v25, 0.0 }
 0x530   : > { %v1043_v24 = vmax.f32 %v995_v32, %v5247_v11  ;;  %v1042_v37 = vmax.f32 %v994_v23, %v5246_v44 }
 0x532   : > { %v5303_v18 = vpack.i.bf16 %v1043_v24, %v1042_v37  ;;  %v3518_v24 = vsel %vm380_vm9, %v8531_v12, 0.0  ;;  %v3521_v12 = vsel %vm380_vm9, %v8542_v54, 0.0 }
 0x534   : > { %5304 = vrot.lane.b32.xlu1 %v5303_v18, %s6054_s24  ;;  %v2254_v18 = vsel %vm380_vm9, %v8516_v29, 0.0  ;;  %v3519_v29 = vsel %vm380_vm9, %v8527_v50, 0.0 }
 0x53b   : > { %v5255_v5 = vpop.permute.xlu1 %5254 }
 0x53c   : > { %v5257_v8 = vunpack.i.h.bf16 %v5255_v5  ;;  %v5256_v48 = vunpack.i.l.bf16 %v5255_v5 }
 0x53e   : > { %v2305_v52 = vmax.f32 %v2257_v7, %v5257_v8  ;;  %v2304_v4 = vmax.f32 %v2256_v53, %v5256_v48 }
 0x540   : > { %v5313_v45 = vpack.i.bf16 %v2305_v52, %v2304_v4  ;;  %v3520_v52 = vsel %vm380_vm9, %v8546_v55, 0.0  ;;  %v997_v55 = vsel %vm380_vm9, %v8557_v3, 0.0  ;;  %v3522_v3 = vsel %vm380_vm9, %v8590_v13, 0.0 }
 0x542   : > { %v5250_v59 = vpop.permute.xlu0 %5249  ;;  %5314 = vrot.lane.b32.xlu1 %v5313_v45, %s6054_s24 }
 0x543   : > { %v5252_v37 = vunpack.i.h.bf16 %v5250_v59  ;;  %v5251_v2 = vunpack.i.l.bf16 %v5250_v59 }
 0x545   : > { %v2303_v31 = vmax.f32 %v2255_v33, %v5252_v37  ;;  %v2302_v11 = vmax.f32 %v2254_v18, %v5251_v2  ;;  %v996_v18 = vsel %vm380_vm9, %v8561_v47, 0.0 }
 0x547   : > { %v5308_v44 = vpack.i.bf16 %v2303_v31, %v2302_v11 }
 0x549   : > { %v5260_v25 = vpop.permute.xlu0 %5259  ;;  %5309 = vrot.lane.b32.xlu0 %v5308_v44, %s6054_s24 }
 0x54a   : > { %v5262_v32 = vunpack.i.h.bf16 %v5260_v25  ;;  %v5261_v23 = vunpack.i.l.bf16 %v5260_v25  ;;  %v2258_v25 = vsel %vm380_vm9, %v8569_v60, 0.0 }
 0x54c   : > { %v3567_v5 = vmax.f32 %v3519_v29, %v5262_v32  ;;  %v3566_v8 = vmax.f32 %v3518_v24, %v5261_v23  ;;  %v2259_v32 = vsel %vm380_vm9, %v8565_v30, 0.0 }
 0x54e   : > { %v5318_v48 = vpack.i.bf16 %v3567_v5, %v3566_v8 }
 0x550   : > { %5319 = vrot.lane.b32.xlu0 %v5318_v48, %s6054_s24  ;;  %v3523_v48 = vsel %vm380_vm9, %v8586_v1, 0.0 }
 0x55c   : > { %v5265_v61 = vpop.permute.xlu1 %5264 }
 0x55d   : > { %v5267_v53 = vunpack.i.h.bf16 %v5265_v61  ;;  %v5266_v7 = vunpack.i.l.bf16 %v5265_v61 }
 0x55f   : > { %v3569_v4 = vmax.f32 %v3521_v12, %v5267_v53  ;;  %v3568_v45 = vmax.f32 %v3520_v52, %v5266_v7  ;;  %v998_v52 = vsel %vm380_vm9, %v8598_v16, 0.0  ;;  %v999_v12 = vsel %vm380_vm9, %v8594_v15, 0.0 }
 0x560   : > { %v3525_v16 = vsel %vm380_vm9, %v8616_v63, 0.0 }
 0x561   : > { %v5323_v59 = vpack.i.bf16 %v3569_v4, %v3568_v45 }
 0x563   : > { %5324 = vrot.lane.b32.xlu1 %v5323_v59, %s6054_s24 }
 0x566   : > { %v5270_v50 = vpop.permute.xlu0 %5269 }
 0x567   : > { %v5272_v37 = vunpack.i.h.bf16 %v5270_v50  ;;  %v5271_v2 = vunpack.i.l.bf16 %v5270_v50  ;;  %v5275_v33 = vpop.permute.xlu1 %5274 }
 0x568   : > { %v5277_v54 = vunpack.i.h.bf16 %v5275_v33  ;;  %v5276_v44 = vunpack.i.l.bf16 %v5275_v33 }
 0x569   : > { %v1045_v31 = vmax.f32 %v997_v55, %v5272_v37  ;;  %v1044_v11 = vmax.f32 %v996_v18, %v5271_v2  ;;  %v3524_v18 = vsel %vm380_vm9, %v8620_v26, 0.0  ;;  %v2261_v26 = vsel %vm380_vm9, %v8631_v22, 0.0  ;;  %v11012_v22 = vld [vmem:[#allocation37_spill] sm:$0xff] }
 0x56a   : > { %v5280_v23 = vpop.permute.xlu0 %5279  ;;  %v2307_v24 = vmax.f32 %v2259_v32, %v5277_v54  ;;  %v2306_v47 = vmax.f32 %v2258_v25, %v5276_v44  ;;  %v2260_v54 = vsel %vm380_vm9, %v8635_v51, 0.0  ;;  %v11011_v51 = vld [vmem:[#allocation38_spill] sm:$0xff] }
 0x56b   : > { %v5328_v29 = vpack.i.bf16 %v1045_v31, %v1044_v11  ;;  %v5282_v5 = vunpack.i.h.bf16 %v5280_v23  ;;  %v5285_v8 = vpop.permute.xlu1 %5284  ;;  %v5281_v61 = vunpack.i.l.bf16 %v5280_v23 }
 0x56c   : > { %v5287_v60 = vunpack.i.h.bf16 %v5285_v8  ;;  %v5286_v53 = vunpack.i.l.bf16 %v5285_v8  ;;  %v5333_v7 = vpack.i.bf16 %v2307_v24, %v2306_v47  ;;  %v873_v8 = vadd.f32 %v11011_v51, %v7986_v42 }
 0x56d   : > { %5329 = vrot.lane.b32.xlu0 %v5328_v29, %s6054_s24  ;;  %v3571_v30 = vmax.f32 %v3523_v48, %v5282_v5  ;;  %v3570_v13 = vmax.f32 %v3522_v3, %v5281_v61  ;;  %v872_v3 = vadd.f32 %v11012_v22, %v7989_v46 }
 0x56e   : > { %v1047_v4 = vmax.f32 %v999_v12, %v5287_v60  ;;  %v1046_v45 = vmax.f32 %v998_v52, %v5286_v53  ;;  %5334 = vrot.lane.b32.xlu1 %v5333_v7, %s6054_s24 }
 0x56f   : > { %v5338_v59 = vpack.i.bf16 %v3571_v30, %v3570_v13 }
 0x570   : > { %v5343_v2 = vpack.i.bf16 %v1047_v4, %v1046_v45 }
 0x571   : > { %v5295_v1 = vpop.permute.xlu1 %5294  ;;  %5339 = vrot.lane.b32.xlu0 %v5338_v59, %s6054_s24 }
 0x572   : > { %v5297_v50 = vunpack.i.h.bf16 %v5295_v1  ;;  %v5296_v37 = vunpack.i.l.bf16 %v5295_v1  ;;  %5344 = vrot.lane.b32.xlu1 %v5343_v2, %s6054_s24 }
 0x574   : > { %v3573_v15 = vmax.f32 %v3525_v16, %v5297_v50  ;;  %v3572_v55 = vmax.f32 %v3524_v18, %v5296_v37  ;;  %v5290_v33 = vpop.permute.xlu0 %5289 }
 0x575   : > { %v5292_v31 = vunpack.i.h.bf16 %v5290_v33  ;;  %v5291_v11 = vunpack.i.l.bf16 %v5290_v33 }
 0x576   : > { %v5353_v44 = vpack.i.bf16 %v3573_v15, %v3572_v55  ;;  %v11015_v55 = vld [vmem:[#allocation39_spill] sm:$0xff] }
 0x577   : > { %v2309_v25 = vmax.f32 %v2261_v26, %v5292_v31  ;;  %v2308_v63 = vmax.f32 %v2260_v54, %v5291_v11  ;;  %v875_v33 = vadd.f32 %v11015_v55, %v8018_v19  ;;  %v11016_v31 = vld [vmem:[#allocation40_spill] sm:$0xff] }
 0x578   : > { %5354 = vrot.lane.b32.xlu1 %v5353_v44, %s6054_s24  ;;  %v874_v11 = vadd.f32 %v11016_v31, %v8021_v36 }
 0x579   : > { %v5348_v32 = vpack.i.bf16 %v2309_v25, %v2308_v63 }
 0x57b   : > { %5349 = vrot.lane.b32.xlu0 %v5348_v32, %s6054_s24 }
 0x59f   : > { %v5300_v23 = vpop.permute.xlu0 %5299 }
 0x5a0   : > { %v5302_v24 = vunpack.i.h.bf16 %v5300_v23  ;;  %v5301_v47 = vunpack.i.l.bf16 %v5300_v23 }
 0x5a2   : > { %v1081_v29 = vmax.f32 %v8015_v10, %v5302_v24  ;;  %v1080_v5 = vmax.f32 %v8012_v49, %v5301_v47 }
 0x5a4   : > { %v1100_v48 = vrot.slane %v1081_v29, 7  ;;  %v1124_v61 = vrot.slane %v1081_v29, 1  ;;  %v1096_v60 = vrot.slane %v1080_v5, 7  ;;  %v1120_v53 = vrot.slane %v1080_v5, 1 }
 0x5a5   : > { %v8735_v30 = vadd.f32 %v1081_v29, %v873_v8  ;;  %v8737_v7 = vadd.f32 %v1080_v5, %v872_v3 }
 0x5a6   : > { %v1104_v52 = vsel %vm339_vm11, %v1096_v60, %v1100_v48  ;;  %v1108_v49 = vsel %vm339_vm11, %v1100_v48, %v1096_v60  ;;  %v1128_v42 = vsel %vm354_vm12, %v1120_v53, %v1124_v61  ;;  %v1132_v46 = vsel %vm354_vm12, %v1124_v61, %v1120_v53  ;;  %v5305_v10 = vpop.permute.xlu1 %5304 }
 0x5a7   : > { %11013 = vst [vmem:[#allocation38_spill] sm:$0xff] %v8735_v30  ;;  %11014 = vst [vmem:[#allocation37_spill] sm:$0xff] %v8737_v7  ;;  %v1112_v12 = vsel %vm350_vm13, %v1108_v49, 0.0  ;;  %v1113_v13 = vsel %vm351_vm14, %v1104_v52, 0.0  ;;  %v1136_v4 = vsel %vm365_vm15, %v1128_v42, 0.0  ;;  %v1137_v45 = vsel %vm366_vm0, %v1132_v46, 0.0 }
 0x5a8   : > { %v1144_v1 = vmax.f32 %v1112_v12, %v1136_v4  ;;  %v1145_v59 = vmax.f32 %v1113_v13, %v1137_v45  ;;  %v5307_v50 = vunpack.i.h.bf16 %v5305_v10  ;;  %v5306_v37 = vunpack.i.l.bf16 %v5305_v10  ;;  %v11019_v42 = vld [vmem:[#allocation42_spill] sm:$0xff]  ;;  %v11020_v10 = vld [vmem:[#allocation41_spill] sm:$0xff] }
 0x5a9   : > { %v2136_v46 = vadd.f32 %v11019_v42, %v8058_v21  ;;  %v2137_v12 = vadd.f32 %v11020_v10, %v8055_v58 }
 0x5aa   : > { %v8755_v2 = vmax.f32 %v1080_v5, %v1144_v1  ;;  %v8757_v18 = vmax.f32 %v1081_v29, %v1145_v59  ;;  %v1083_v16 = vmax.f32 %v8050_v35, %v5307_v50  ;;  %v1082_v15 = vmax.f32 %v8047_v6, %v5306_v37 }
 0x5ac   : > { %v1101_v54 = vrot.slane %v1083_v16, 7  ;;  %v1125_v26 = vrot.slane %v1083_v16, 1  ;;  %v1097_v44 = vrot.slane %v1082_v15, 7  ;;  %v1121_v25 = vrot.slane %v1082_v15, 1 }
 0x5ad   : > { %v5358_v63 = vpack.i.bf16 %v8757_v18, %v8755_v2  ;;  %v8767_v32 = vadd.f32 %v1083_v16, %v875_v33  ;;  %v8769_v23 = vadd.f32 %v1082_v15, %v874_v11 }
 0x5ae   : > { %v1105_v6 = vsel %vm339_vm11, %v1097_v44, %v1101_v54  ;;  %v1109_v19 = vsel %vm339_vm11, %v1101_v54, %v1097_v44  ;;  %v1129_v36 = vsel %vm354_vm12, %v1121_v25, %v1125_v26  ;;  %v1133_v35 = vsel %vm354_vm12, %v1125_v26, %v1121_v25 }
 0x5af   : > { %11017 = vst [vmem:[#allocation39_spill] sm:$0xff] %v8767_v32  ;;  %11018 = vst [vmem:[#allocation40_spill] sm:$0xff] %v8769_v23  ;;  %v1114_v24 = vsel %vm350_vm13, %v1109_v19, 0.0  ;;  %v1115_v47 = vsel %vm351_vm14, %v1105_v6, 0.0  ;;  %v1138_v29 = vsel %vm365_vm15, %v1129_v36, 0.0  ;;  %v1139_v5 = vsel %vm366_vm0, %v1133_v35, 0.0  ;;  %5359 = vrot.lane.b32.xlu0 %v5358_v63, %s6050_s15 }
 0x5b0   : > { %v1146_v51 = vmax.f32 %v1114_v24, %v1138_v29  ;;  %v1147_v8 = vmax.f32 %v1115_v47, %v1139_v5  ;;  %v11023_v19 = vld [vmem:[#allocation43_spill] sm:$0xff]  ;;  %v11024_v35 = vld [vmem:[#allocation44_spill] sm:$0xff] }
 0x5b1   : > { %v2134_v36 = vadd.f32 %v11023_v19, %v8085_v17  ;;  %v2135_v24 = vadd.f32 %v11024_v35, %v8082_v41 }
 0x5b2   : > { %v8788_v22 = vmax.f32 %v1082_v15, %v1146_v51  ;;  %v8790_v3 = vmax.f32 %v1083_v16, %v1147_v8 }
 0x5b4   : > { %v5315_v48 = vpop.permute.xlu1 %5314  ;;  %v5363_v53 = vpack.i.bf16 %v8790_v3, %v8788_v22 }
 0x5b5   : > { %v5317_v61 = vunpack.i.h.bf16 %v5315_v48  ;;  %v5316_v60 = vunpack.i.l.bf16 %v5315_v48 }
 0x5b6   : > { %5364 = vrot.lane.b32.xlu1 %v5363_v53, %s6050_s15 }
 0x5b7   : > { %v2345_v52 = vmax.f32 %v8091_v62, %v5317_v61  ;;  %v2344_v49 = vmax.f32 %v8088_v27, %v5316_v60 }
 0x5b9   : > { %v2363_v13 = vrot.slane %v2345_v52, 7  ;;  %v2387_v4 = vrot.slane %v2345_v52, 1  ;;  %v2359_v45 = vrot.slane %v2344_v49, 7  ;;  %v2383_v1 = vrot.slane %v2344_v49, 1 }
 0x5ba   : > { %v8801_v59 = vadd.f32 %v2344_v49, %v2136_v46  ;;  %v8803_v50 = vadd.f32 %v2345_v52, %v2137_v12 }
 0x5bb   : > { %v2367_v62 = vsel %vm339_vm11, %v2359_v45, %v2363_v13  ;;  %v2371_v27 = vsel %vm339_vm11, %v2363_v13, %v2359_v45  ;;  %v2391_v21 = vsel %vm354_vm12, %v2383_v1, %v2387_v4  ;;  %v2395_v58 = vsel %vm354_vm12, %v2387_v4, %v2383_v1  ;;  %v5310_v37 = vpop.permute.xlu0 %5309 }
 0x5bc   : > { %11021 = vst [vmem:[#allocation42_spill] sm:$0xff] %v8801_v59  ;;  %11022 = vst [vmem:[#allocation41_spill] sm:$0xff] %v8803_v50  ;;  %v2376_v16 = vsel %vm350_vm13, %v2371_v27, 0.0  ;;  %v2377_v15 = vsel %vm351_vm14, %v2367_v62, 0.0  ;;  %v2400_v55 = vsel %vm365_vm15, %v2391_v21, 0.0  ;;  %v2401_v33 = vsel %vm366_vm0, %v2395_v58, 0.0 }
 0x5bd   : > { %v2408_v31 = vmax.f32 %v2376_v16, %v2400_v55  ;;  %v2409_v11 = vmax.f32 %v2377_v15, %v2401_v33  ;;  %v5312_v54 = vunpack.i.h.bf16 %v5310_v37  ;;  %v5311_v26 = vunpack.i.l.bf16 %v5310_v37  ;;  %v11027_v27 = vld [vmem:[#allocation45_spill] sm:$0xff]  ;;  %v11029_v37 = vld [vmem:[#allocation46_spill] sm:$0xff] }
 0x5be   : > { %v3398_v21 = vadd.f32 %v11027_v27, %v8120_v57  ;;  %v11028_v58 = vld [vmem:[#allocation65_spill] sm:$0xff] }
 0x5bf   : > { %v8821_v44 = vmax.f32 %v2344_v49, %v2408_v31  ;;  %v8823_v25 = vmax.f32 %v2345_v52, %v2409_v11  ;;  %v2343_v63 = vmax.f32 %v8126_v20, %v5312_v54  ;;  %v2342_v6 = vmax.f32 %v8123_v14, %v5311_v26 }
 0x5c0   : > { %v3399_v16 = vadd.f32 %v11029_v37, %v11028_v58 }
 0x5c1   : > { %v2362_v47 = vrot.slane %v2343_v63, 7  ;;  %v2386_v29 = vrot.slane %v2343_v63, 1  ;;  %v2358_v5 = vrot.slane %v2342_v6, 7  ;;  %v2382_v51 = vrot.slane %v2342_v6, 1 }
 0x5c2   : > { %v5320_v8 = vpop.permute.xlu0 %5319  ;;  %v5373_v48 = vpack.i.bf16 %v8823_v25, %v8821_v44  ;;  %v8833_v61 = vadd.f32 %v2342_v6, %v2134_v36  ;;  %v8835_v60 = vadd.f32 %v2343_v63, %v2135_v24 }
 0x5c3   : > { %v2366_v14 = vsel %vm339_vm11, %v2358_v5, %v2362_v47  ;;  %v2370_v17 = vsel %vm339_vm11, %v2362_v47, %v2358_v5  ;;  %v2390_v41 = vsel %vm354_vm12, %v2382_v51, %v2386_v29  ;;  %v2394_v20 = vsel %vm354_vm12, %v2386_v29, %v2382_v51 }
 0x5c4   : > { %11025 = vst [vmem:[#allocation43_spill] sm:$0xff] %v8833_v61  ;;  %11026 = vst [vmem:[#allocation44_spill] sm:$0xff] %v8835_v60  ;;  %v2374_v53 = vsel %vm350_vm13, %v2370_v17, 0.0  ;;  %v2375_v52 = vsel %vm351_vm14, %v2366_v14, 0.0  ;;  %v2398_v49 = vsel %vm365_vm15, %v2390_v41, 0.0  ;;  %v2399_v42 = vsel %vm366_vm0, %v2394_v20, 0.0  ;;  %5374 = vrot.lane.b32.xlu1 %v5373_v48, %s6050_s15 }
 0x5c5   : > { %v2406_v46 = vmax.f32 %v2374_v53, %v2398_v49  ;;  %v2407_v10 = vmax.f32 %v2375_v52, %v2399_v42  ;;  %v5322_v12 = vunpack.i.h.bf16 %v5320_v8  ;;  %v5321_v13 = vunpack.i.l.bf16 %v5320_v8  ;;  %v11032_v17 = vld [vmem:[#allocation73_spill] sm:$0xff]  ;;  %v11033_v20 = vld [vmem:[#allocation72_spill] sm:$0xff]  ;;  %v11034_v52 = vld [vmem:[#allocation67_spill] sm:$0xff] }
 0x5c6   : > { %v11035_v49 = vld [vmem:[#allocation48_spill] sm:$0xff] }
 0x5c7   : > { %v8854_v4 = vmax.f32 %v2342_v6, %v2406_v46  ;;  %v8856_v45 = vmax.f32 %v2343_v63, %v2407_v10  ;;  %v3607_v1 = vmax.f32 %v8161_v0, %v5322_v12  ;;  %v3606_v62 = vmax.f32 %v8158_v9, %v5321_v13  ;;  %v11036_v46 = vld [vmem:[#allocation66_spill] sm:$0xff]  ;;  %v11037_v10 = vld [vmem:[#allocation47_spill] sm:$0xff]  ;;  %v11038_v13 = vld [vmem:[#allocation69_spill] sm:$0xff] }
 0x5c8   : > { %v3400_v42 = vadd.f32 %v11035_v49, %v11034_v52  ;;  %v3401_v12 = vadd.f32 %v11037_v10, %v11036_v46  ;;  %v11048_v52 = vld [vmem:[#allocation75_spill] sm:$0xff]  ;;  %v11049_v49 = vld [vmem:[#allocation53_spill] sm:$0xff] }
 0x5c9   : > { %v3626_v15 = vrot.slane %v3607_v1, 7  ;;  %v3650_v55 = vrot.slane %v3607_v1, 1  ;;  %v3622_v33 = vrot.slane %v3606_v62, 7  ;;  %v3646_v31 = vrot.slane %v3606_v62, 1 }
 0x5ca   : > { %v5368_v11 = vpack.i.bf16 %v8856_v45, %v8854_v4  ;;  %v8866_v54 = vadd.f32 %v3606_v62, %v3398_v21  ;;  %v8868_v26 = vadd.f32 %v3607_v1, %v3399_v16 }
 0x5cb   : > { %v3630_v9 = vsel %vm339_vm11, %v3622_v33, %v3626_v15  ;;  %v3634_v57 = vsel %vm339_vm11, %v3626_v15, %v3622_v33  ;;  %v3654_v0 = vsel %vm354_vm12, %v3646_v31, %v3650_v55  ;;  %v3658_v63 = vsel %vm354_vm12, %v3650_v55, %v3646_v31  ;;  %v11042_v55 = vld [vmem:[#allocation68_spill] sm:$0xff]  ;;  %v11043_v33 = vld [vmem:[#allocation50_spill] sm:$0xff] }
 0x5cc   : > { %11030 = vst [vmem:[#allocation45_spill] sm:$0xff] %v8866_v54  ;;  %11031 = vst [vmem:[#allocation65_spill] sm:$0xff] %v8868_v26  ;;  %v3638_v6 = vsel %vm350_vm13, %v3634_v57, 0.0  ;;  %v3639_v19 = vsel %vm351_vm14, %v3630_v9, 0.0  ;;  %v3662_v36 = vsel %vm365_vm15, %v3654_v0, 0.0  ;;  %v3663_v35 = vsel %vm366_vm0, %v3658_v63, 0.0  ;;  %5369 = vrot.lane.b32.xlu0 %v5368_v11, %s6050_s15 }
 0x5cd   : > { %v3670_v24 = vmax.f32 %v3638_v6, %v3662_v36  ;;  %v3671_v47 = vmax.f32 %v3639_v19, %v3663_v35  ;;  %v8910_v31 = vadd.f32 %v11043_v33, %v11042_v55  ;;  %v11044_v11 = vld [vmem:[#allocation71_spill] sm:$0xff]  ;;  %v11045_v9 = vld [vmem:[#allocation52_spill] sm:$0xff]  ;;  %v11073_v54 = vld [vmem:[#allocation82_spill] sm:$0xff] }
 0x5ce   : > { %v8914_v57 = vadd.f32 %v11045_v9, %v11044_v11  ;;  %v11056_v11 = vld [vmem:[#allocation78_spill] sm:$0xff]  ;;  %v11057_v9 = vld [vmem:[#allocation55_spill] sm:$0xff] }
 0x5cf   : > { %v8887_v29 = vmax.f32 %v3606_v62, %v3670_v24  ;;  %v8889_v5 = vmax.f32 %v3607_v1, %v3671_v47  ;;  %v11039_v1 = vld [vmem:[#allocation49_spill] sm:$0xff] }
 0x5d0   : > { %v8902_v62 = vadd.f32 %v11039_v1, %v11038_v13  ;;  %v11051_v13 = vld [vmem:[#allocation54_spill] sm:$0xff] }
 0x5d1   : > { %v5378_v8 = vpack.i.bf16 %v8889_v5, %v8887_v29 }
 0x5d3   : > { %5379 = vrot.lane.b32.xlu0 %v5378_v8, %s6050_s15 }
 0x5d5   : > { %v5325_v51 = vpop.permute.xlu1 %5324 }
 0x5d6   : > { %v5327_v48 = vunpack.i.h.bf16 %v5325_v51  ;;  %v5326_v14 = vunpack.i.l.bf16 %v5325_v51 }
 0x5d8   : > { %v3609_v41 = vmax.f32 %v11032_v17, %v5327_v48  ;;  %v3608_v53 = vmax.f32 %v11033_v20, %v5326_v14  ;;  %v11046_v14 = vld [vmem:[#allocation70_spill] sm:$0xff]  ;;  %v11047_v17 = vld [vmem:[#allocation51_spill] sm:$0xff] }
 0x5d9   : > { %v8934_v20 = vadd.f32 %v11047_v17, %v11046_v14  ;;  %v11064_v17 = vld [vmem:[#allocation63_spill] sm:$0xff] }
 0x5da   : > { %v3627_v27 = vrot.slane %v3609_v41, 7  ;;  %v3651_v21 = vrot.slane %v3609_v41, 1  ;;  %v3623_v58 = vrot.slane %v3608_v53, 7  ;;  %v3647_v37 = vrot.slane %v3608_v53, 1 }
 0x5db   : > { %v8904_v16 = vadd.f32 %v3608_v53, %v3400_v42  ;;  %v8906_v15 = vadd.f32 %v3609_v41, %v3401_v12  ;;  %v8938_v42 = vadd.f32 %v11049_v49, %v11048_v52  ;;  %v11050_v12 = vld [vmem:[#allocation74_spill] sm:$0xff]  ;;  %v11065_v52 = vld [vmem:[#allocation60_spill] sm:$0xff] }
 0x5dc   : > { %v3631_v0 = vsel %vm339_vm11, %v3623_v58, %v3627_v27  ;;  %v3635_v63 = vsel %vm339_vm11, %v3627_v27, %v3623_v58  ;;  %v3655_v6 = vsel %vm354_vm12, %v3647_v37, %v3651_v21  ;;  %v3659_v19 = vsel %vm354_vm12, %v3651_v21, %v3647_v37  ;;  %v11052_v27 = vld [vmem:[#allocation79_spill] sm:$0xff]  ;;  %v11053_v21 = vld [vmem:[#allocation56_spill] sm:$0xff] }
 0x5dd   : > { %11040 = vst [vmem:[#allocation46_spill] sm:$0xff] %v8904_v16  ;;  %11041 = vst [vmem:[#allocation73_spill] sm:$0xff] %v8906_v15  ;;  %v3640_v36 = vsel %vm350_vm13, %v3635_v63, 0.0  ;;  %v3641_v35 = vsel %vm351_vm14, %v3631_v0, 0.0  ;;  %v3664_v24 = vsel %vm365_vm15, %v3655_v6, 0.0  ;;  %v3665_v47 = vsel %vm366_vm0, %v3659_v19, 0.0 }
 0x5de   : > { %v3672_v51 = vmax.f32 %v3640_v36, %v3664_v24  ;;  %v3673_v8 = vmax.f32 %v3641_v35, %v3665_v47  ;;  %v8942_v1 = vadd.f32 %v11051_v13, %v11050_v12  ;;  %v8946_v58 = vadd.f32 %v11053_v21, %v11052_v27  ;;  %v11058_v63 = vld [vmem:[#allocation61_spill] sm:$0xff]  ;;  %v11061_v24 = vld [vmem:[#allocation76_spill] sm:$0xff]  ;;  %v11067_v13 = vld [vmem:[#allocation59_spill] sm:$0xff] }
 0x5df   : > { %v5330_v48 = vpop.permute.xlu0 %5329  ;;  %v8954_v0 = vadd.f32 %v11057_v9, %v11056_v11  ;;  %v11059_v6 = vld [vmem:[#allocation57_spill] sm:$0xff]  ;;  %v8974_v49 = vadd.f32 %v11065_v52, %v11064_v17  ;;  %v11066_v12 = vld [vmem:[#allocation64_spill] sm:$0xff] }
 0x5e0   : > { %v5332_v46 = vunpack.i.h.bf16 %v5330_v48  ;;  %v5331_v10 = vunpack.i.l.bf16 %v5330_v48  ;;  %v8948_v37 = vmax.f32 %v3608_v53, %v3672_v51  ;;  %v8950_v55 = vmax.f32 %v3609_v41, %v3673_v8  ;;  %v5335_v33 = vpop.permute.xlu1 %5334  ;;  %v11060_v36 = vld [vmem:[#allocation77_spill] sm:$0xff]  ;;  %v11062_v51 = vld [vmem:[#allocation62_spill] sm:$0xff] }
 0x5e1   : > { %v8958_v19 = vadd.f32 %v11059_v6, %v11058_v63  ;;  %v5337_v48 = vunpack.i.h.bf16 %v5335_v33  ;;  %v5336_v53 = vunpack.i.l.bf16 %v5335_v33  ;;  %v11063_v8 = vld [vmem:[#allocation58_spill] sm:$0xff]  ;;  %v11068_v9 = vld [vmem:[#allocation81_spill] sm:$0xff]  ;;  %v11069_v6 = vld [vmem:[#allocation80_spill] sm:$0xff] }
 0x5e2   : > { %11054 = vst [vmem:[#allocation72_spill] sm:$0xff] %v8948_v37  ;;  %11055 = vst [vmem:[#allocation67_spill] sm:$0xff] %v8950_v55  ;;  %v8961_v35 = vmax.f32 %v11060_v36, %v5332_v46  ;;  %v8964_v47 = vmax.f32 %v11061_v24, %v5331_v10  ;;  %v5383_v41 = vpack.i.bf16 %v8950_v55, %v8948_v37  ;;  %v11070_v16 = vld [vmem:[#allocation85_spill] sm:$0xff] }
 0x5e3   : > { %v8970_v14 = vadd.f32 %v11063_v8, %v11062_v51  ;;  %v8978_v46 = vadd.f32 %v11067_v13, %v11066_v12  ;;  %v5340_v11 = vpop.permute.xlu0 %5339  ;;  %v8985_v63 = vmax.f32 %v11068_v9, %v5337_v48  ;;  %v8988_v36 = vmax.f32 %v11069_v6, %v5336_v53 }
 0x5e4   : > { %v1102_v10 = vrot.slane %v8961_v35, 7  ;;  %v1126_v27 = vrot.slane %v8961_v35, 1  ;;  %v1098_v21 = vrot.slane %v8964_v47, 7  ;;  %v1122_v33 = vrot.slane %v8964_v47, 1  ;;  %5384 = vrot.lane.b32.xlu1 %v5383_v41, %s6050_s15  ;;  %v5345_v12 = vpop.permute.xlu1 %5344 }
 0x5e5   : > { %v5342_v24 = vunpack.i.h.bf16 %v5340_v11  ;;  %v5341_v51 = vunpack.i.l.bf16 %v5340_v11  ;;  %v2364_v9 = vrot.slane %v8985_v63, 7  ;;  %v2388_v6 = vrot.slane %v8985_v63, 1 }
 0x5e6   : > { %v1106_v8 = vsel %vm339_vm11, %v1098_v21, %v1102_v10  ;;  %v1110_v17 = vsel %vm339_vm11, %v1102_v10, %v1098_v21  ;;  %v1130_v52 = vsel %vm354_vm12, %v1122_v33, %v1126_v27  ;;  %v1134_v48 = vsel %vm354_vm12, %v1126_v27, %v1122_v33 }
 0x5e7   : > { %v1116_v53 = vsel %vm350_vm13, %v1110_v17, 0.0  ;;  %v1117_v13 = vsel %vm351_vm14, %v1106_v8, 0.0  ;;  %v1140_v41 = vsel %vm365_vm15, %v1130_v52, 0.0  ;;  %v1141_v11 = vsel %vm366_vm0, %v1134_v48, 0.0 }
 0x5e8   : > { %v1148_v10 = vmax.f32 %v1116_v53, %v1140_v41  ;;  %v1149_v21 = vmax.f32 %v1117_v13, %v1141_v11  ;;  %v2360_v27 = vrot.slane %v8988_v36, 7  ;;  %v2384_v33 = vrot.slane %v8988_v36, 1  ;;  %v11071_v53 = vld [vmem:[#allocation84_spill] sm:$0xff] }
 0x5e9   : > { %v5347_v17 = vunpack.i.h.bf16 %v5345_v12  ;;  %v5346_v15 = vunpack.i.l.bf16 %v5345_v12  ;;  %v9018_v48 = vmax.f32 %v11070_v16, %v5342_v24  ;;  %v9021_v13 = vmax.f32 %v11071_v53, %v5341_v51 }
 0x5ea   : > { %v9012_v8 = vmax.f32 %v8964_v47, %v1148_v10  ;;  %v9015_v52 = vmax.f32 %v8961_v35, %v1149_v21  ;;  %v2368_v41 = vsel %vm339_vm11, %v2360_v27, %v2364_v9  ;;  %v2372_v11 = vsel %vm339_vm11, %v2364_v9, %v2360_v27  ;;  %v11072_v27 = vld [vmem:[#allocation83_spill] sm:$0xff] }
 0x5eb   : > { %v2392_v12 = vsel %vm354_vm12, %v2384_v33, %v2388_v6  ;;  %v2396_v10 = vsel %vm354_vm12, %v2388_v6, %v2384_v33  ;;  %v2378_v21 = vsel %vm350_vm13, %v2372_v11, 0.0  ;;  %v2379_v16 = vsel %vm351_vm14, %v2368_v41, 0.0 }
 0x5ec   : > { %v2402_v24 = vsel %vm365_vm15, %v2392_v12, 0.0  ;;  %v2403_v51 = vsel %vm366_vm0, %v2396_v10, 0.0  ;;  %v9040_v26 = vmax.f32 %v11072_v27, %v5347_v17  ;;  %v9043_v60 = vmax.f32 %v11073_v54, %v5346_v15 }
 0x5ed   : > { %v2410_v53 = vmax.f32 %v2378_v21, %v2402_v24  ;;  %v2411_v9 = vmax.f32 %v2379_v16, %v2403_v51  ;;  %v3628_v6 = vrot.slane %v9018_v48, 7  ;;  %v3652_v33 = vrot.slane %v9018_v48, 1 }
 0x5ee   : > { %v3624_v41 = vrot.slane %v9021_v13, 7  ;;  %v3648_v11 = vrot.slane %v9021_v13, 1  ;;  %v1103_v17 = vrot.slane %v9040_v26, 7  ;;  %v1127_v21 = vrot.slane %v9040_v26, 1 }
 0x5ef   : > { %v9050_v12 = vmax.f32 %v8988_v36, %v2410_v53  ;;  %v9053_v10 = vmax.f32 %v8985_v63, %v2411_v9  ;;  %v1099_v54 = vrot.slane %v9043_v60, 7  ;;  %v1123_v15 = vrot.slane %v9043_v60, 1 }
 0x5f0   : > { %v3632_v16 = vsel %vm339_vm11, %v3624_v41, %v3628_v6  ;;  %v3636_v24 = vsel %vm339_vm11, %v3628_v6, %v3624_v41  ;;  %v3656_v9 = vsel %vm354_vm12, %v3648_v11, %v3652_v33  ;;  %v3660_v27 = vsel %vm354_vm12, %v3652_v33, %v3648_v11 }
 0x5f1   : > { %v3642_v51 = vsel %vm350_vm13, %v3636_v24, 0.0  ;;  %v3643_v53 = vsel %vm351_vm14, %v3632_v16, 0.0  ;;  %v1107_v61 = vsel %vm339_vm11, %v1099_v54, %v1103_v17  ;;  %v1111_v50 = vsel %vm339_vm11, %v1103_v17, %v1099_v54  ;;  %v5355_v24 = vpop.permute.xlu1 %5354  ;;  %v5350_v17 = vpop.permute.xlu0 %5349 }
 0x5f2   : > { %v1131_v6 = vsel %vm354_vm12, %v1123_v15, %v1127_v21  ;;  %v1135_v41 = vsel %vm354_vm12, %v1127_v21, %v1123_v15  ;;  %v1118_v16 = vsel %vm350_vm13, %v1111_v50, 0.0  ;;  %v1119_v59 = vsel %vm351_vm14, %v1107_v61, 0.0 }
 0x5f3   : > { %v1142_v33 = vsel %vm365_vm15, %v1131_v6, 0.0  ;;  %v1143_v11 = vsel %vm366_vm0, %v1135_v41, 0.0  ;;  %v3666_v32 = vsel %vm365_vm15, %v3656_v9, 0.0  ;;  %v3667_v21 = vsel %vm366_vm0, %v3660_v27, 0.0 }
 0x5f4   : > { %v1150_v54 = vmax.f32 %v1118_v16, %v1142_v33  ;;  %v1151_v23 = vmax.f32 %v1119_v59, %v1143_v11  ;;  %v3674_v15 = vmax.f32 %v3642_v51, %v3666_v32  ;;  %v3675_v50 = vmax.f32 %v3643_v53, %v3667_v21  ;;  %v11077_v32 = vld [vmem:[#allocation86_spill] sm:$0xff]  ;;  %v11078_v53 = vld [vmem:[#allocation88_spill] sm:$0xff]  ;;  %v11079_v16 = vld [vmem:[#allocation87_spill] sm:$0xff] }
 0x5f5   : > { %v5357_v7 = vunpack.i.h.bf16 %v5355_v24  ;;  %v5356_v30 = vunpack.i.l.bf16 %v5355_v24  ;;  %v5352_v41 = vunpack.i.h.bf16 %v5350_v17  ;;  %v5351_v43 = vunpack.i.l.bf16 %v5350_v17 }
 0x5f6   : > { %v9092_v61 = vmax.f32 %v9043_v60, %v1150_v54  ;;  %v9095_v6 = vmax.f32 %v9040_v26, %v1151_v23  ;;  %v9098_v59 = vmax.f32 %v9021_v13, %v3674_v15  ;;  %v9101_v9 = vmax.f32 %v9018_v48, %v3675_v50 }
 0x5f7   : > { %v3613_v27 = vmax.f32 %v8387_v38, %v5357_v7  ;;  %v3612_v51 = vmax.f32 %v11077_v32, %v5356_v30  ;;  %v2349_v24 = vmax.f32 %v11078_v53, %v5352_v41  ;;  %v2348_v33 = vmax.f32 %v11079_v16, %v5351_v43 }
 0x5f8   : > { %11074 = vst [vmem:[#allocation48_spill] sm:$0xff] %v9092_v61  ;;  %11075 = vst [vmem:[#allocation66_spill] sm:$0xff] %v9098_v59  ;;  %v5388_v23 = vpack.i.bf16 %v9015_v52, %v9012_v8  ;;  %v5393_v11 = vpack.i.bf16 %v9053_v10, %v9050_v12 }
 0x5f9   : > { %11076 = vst [vmem:[#allocation47_spill] sm:$0xff] %v9101_v9  ;;  %v3629_v17 = vrot.slane %v3613_v27, 7  ;;  %v3653_v54 = vrot.slane %v3613_v27, 1  ;;  %v3625_v21 = vrot.slane %v3612_v51, 7  ;;  %v3649_v15 = vrot.slane %v3612_v51, 1 }
 0x5fa   : > { %v2365_v50 = vrot.slane %v2349_v24, 7  ;;  %v2389_v37 = vrot.slane %v2349_v24, 1  ;;  %v2361_v55 = vrot.slane %v2348_v33, 7  ;;  %v2385_v38 = vrot.slane %v2348_v33, 1  ;;  %5389 = vrot.lane.b32.xlu0 %v5388_v23, %s6050_s15  ;;  %5394 = vrot.lane.b32.xlu1 %v5393_v11, %s6050_s15 }
 0x5fb   : > { %v3633_v43 = vsel %vm339_vm11, %v3625_v21, %v3629_v17  ;;  %v3637_v30 = vsel %vm339_vm11, %v3629_v17, %v3625_v21  ;;  %v3657_v7 = vsel %vm354_vm12, %v3649_v15, %v3653_v54  ;;  %v3661_v41 = vsel %vm354_vm12, %v3653_v54, %v3649_v15 }
 0x5fc   : > { %v3644_v32 = vsel %vm350_vm13, %v3637_v30, 0.0  ;;  %v3645_v53 = vsel %vm351_vm14, %v3633_v43, 0.0  ;;  %v3668_v16 = vsel %vm365_vm15, %v3657_v7, 0.0  ;;  %v3669_v23 = vsel %vm366_vm0, %v3661_v41, 0.0 }
 0x5fd   : > { %v3676_v11 = vmax.f32 %v3644_v32, %v3668_v16  ;;  %v3677_v17 = vmax.f32 %v3645_v53, %v3669_v23  ;;  %v2369_v21 = vsel %vm339_vm11, %v2361_v55, %v2365_v50  ;;  %v2373_v54 = vsel %vm339_vm11, %v2365_v50, %v2361_v55 }
 0x5fe   : > { %v2380_v15 = vsel %vm350_vm13, %v2373_v54, 0.0  ;;  %v2381_v43 = vsel %vm351_vm14, %v2369_v21, 0.0  ;;  %v2393_v30 = vsel %vm354_vm12, %v2385_v38, %v2389_v37  ;;  %v2397_v7 = vsel %vm354_vm12, %v2389_v37, %v2385_v38 }
 0x5ff   : > { %v9141_v41 = vmax.f32 %v3612_v51, %v3676_v11  ;;  %v9143_v32 = vmax.f32 %v3613_v27, %v3677_v17  ;;  %v2404_v53 = vsel %vm365_vm15, %v2393_v30, 0.0  ;;  %v2405_v55 = vsel %vm366_vm0, %v2397_v7, 0.0 }
 0x600   : > { %v2412_v50 = vmax.f32 %v2380_v15, %v2404_v53  ;;  %v2413_v16 = vmax.f32 %v2381_v43, %v2405_v55  ;;  %v5403_v23 = vpack.i.bf16 %v9095_v6, %v9092_v61  ;;  %v5398_v21 = vpack.i.bf16 %v9101_v9, %v9098_v59 }
 0x601   : > { %v5413_v37 = vpack.i.bf16 %v9143_v32, %v9141_v41  ;;  %v9157_v38 = vadd.f32 %v8964_v47, %v8902_v62  ;;  %v9161_v11 = vadd.f32 %v8961_v35, %v8910_v31  ;;  %v9165_v17 = vadd.f32 %v8988_v36, %v8914_v57 }
 0x602   : > { %v9167_v54 = vmax.f32 %v2348_v33, %v2412_v50  ;;  %v9169_v15 = vmax.f32 %v2349_v24, %v2413_v16  ;;  %5404 = vrot.lane.b32.xlu1 %v5403_v23, %s6050_s15  ;;  %5399 = vrot.lane.b32.xlu0 %v5398_v21, %s6050_s15  ;;  %v9175_v62 = vadd.f32 %v8985_v63, %v8934_v20 }
 0x603   : > { %11080 = vst [vmem:[#allocation69_spill] sm:$0xff] %v9161_v11  ;;  %11081 = vst [vmem:[#allocation49_spill] sm:$0xff] %v9165_v17  ;;  %v9179_v31 = vadd.f32 %v9043_v60, %v8938_v42  ;;  %v9183_v57 = vadd.f32 %v9040_v26, %v8942_v1  ;;  %v9187_v35 = vadd.f32 %v9021_v13, %v8946_v58 }
 0x604   : > { %11082 = vst [vmem:[#allocation68_spill] sm:$0xff] %v9167_v54  ;;  %11083 = vst [vmem:[#allocation50_spill] sm:$0xff] %v9169_v15  ;;  %v9191_v47 = vadd.f32 %v9018_v48, %v8954_v0  ;;  %v5408_v20 = vpack.i.bf16 %v9169_v15, %v9167_v54  ;;  %v9196_v63 = vadd.f32 %v3612_v51, %v8958_v19 }
 0x605   : > { %11084 = vst [vmem:[#allocation71_spill] sm:$0xff] %v9175_v62  ;;  %11085 = vst [vmem:[#allocation52_spill] sm:$0xff] %v9179_v31  ;;  %v9199_v60 = vadd.f32 %v3613_v27, %v8970_v14  ;;  %v9202_v26 = vadd.f32 %v2348_v33, %v8974_v49  ;;  %v9205_v42 = vadd.f32 %v2349_v24, %v8978_v46 }
 0x606   : > { %11086 = vst [vmem:[#allocation70_spill] sm:$0xff] %v9183_v57  ;;  %11087 = vst [vmem:[#allocation51_spill] sm:$0xff] %v9187_v35  ;;  %5414 = vrot.lane.b32.xlu1 %v5413_v37, %s6050_s15  ;;  %5409 = vrot.lane.b32.xlu0 %v5408_v20, %s6050_s15 }
 0x607   : > { %11088 = vst [vmem:[#allocation75_spill] sm:$0xff] %v9191_v47  ;;  %11089 = vst [vmem:[#allocation53_spill] sm:$0xff] %v9196_v63 }
 0x608   : > { %11090 = vst [vmem:[#allocation74_spill] sm:$0xff] %v9199_v60  ;;  %11091 = vst [vmem:[#allocation54_spill] sm:$0xff] %v9202_v26 }
 0x609   : > { %11092 = vst [vmem:[#allocation79_spill] sm:$0xff] %v9205_v42 }
 0x621   : > { %v5360_v1 = vpop.permute.xlu0 %5359 }
 0x622   : > { %v5362_v58 = vunpack.i.h.bf16 %v5360_v1  ;;  %v5361_v0 = vunpack.i.l.bf16 %v5360_v1 }
 0x624   : > { %v1165_v19 = vsel %vm367_vm8, %v5362_v58, %v8757_v18  ;;  %v1162_v14 = vsel %vm367_vm8, %v5361_v0, %v8755_v2 }
 0x625   : > { %v5418_v36 = vpack.i.bf16 %v1165_v19, %v1162_v14 }
 0x627   : > { %5419 = vrot.lane.b32.xlu0 %v5418_v36, %s6050_s15 }
 0x628   : > { %v5365_v49 = vpop.permute.xlu1 %5364 }
 0x629   : > { %v5367_v48 = vunpack.i.h.bf16 %v5365_v49  ;;  %v5366_v46 = vunpack.i.l.bf16 %v5365_v49 }
 0x62b   : > { %v1171_v13 = vsel %vm367_vm8, %v5367_v48, %v8790_v3  ;;  %v1168_v27 = vsel %vm367_vm8, %v5366_v46, %v8788_v22  ;;  %v11093_v46 = vld [vmem:[#allocation67_spill] sm:$0xff] }
 0x62c   : > { %v5423_v51 = vpack.i.bf16 %v1171_v13, %v1168_v27  ;;  %v11094_v27 = vld [vmem:[#allocation72_spill] sm:$0xff] }
 0x62e   : > { %5424 = vrot.lane.b32.xlu1 %v5423_v51, %s6050_s15 }
 0x636   : > { %v5375_v24 = vpop.permute.xlu1 %5374 }
 0x637   : > { %v5377_v33 = vunpack.i.h.bf16 %v5375_v24  ;;  %v5376_v43 = vunpack.i.l.bf16 %v5375_v24 }
 0x639   : > { %v2433_v30 = vsel %vm367_vm8, %v5377_v33, %v8823_v25  ;;  %v2430_v7 = vsel %vm367_vm8, %v5376_v43, %v8821_v44 }
 0x63a   : > { %v5433_v53 = vpack.i.bf16 %v2433_v30, %v2430_v7 }
 0x63c   : > { %5434 = vrot.lane.b32.xlu1 %v5433_v53, %s6050_s15 }
 0x63e   : > { %v5370_v55 = vpop.permute.xlu0 %5369 }
 0x63f   : > { %v5372_v50 = vunpack.i.h.bf16 %v5370_v55  ;;  %v5371_v16 = vunpack.i.l.bf16 %v5370_v55 }
 0x641   : > { %v2427_v23 = vsel %vm367_vm8, %v5372_v50, %v8856_v45  ;;  %v2424_v21 = vsel %vm367_vm8, %v5371_v16, %v8854_v4 }
 0x642   : > { %v5428_v37 = vpack.i.bf16 %v2427_v23, %v2424_v21 }
 0x644   : > { %5429 = vrot.lane.b32.xlu0 %v5428_v37, %s6050_s15 }
 0x645   : > { %v5380_v20 = vpop.permute.xlu0 %5379 }
 0x646   : > { %v5382_v1 = vunpack.i.h.bf16 %v5380_v20  ;;  %v5381_v58 = vunpack.i.l.bf16 %v5380_v20 }
 0x648   : > { %v3691_v0 = vsel %vm367_vm8, %v5382_v1, %v8889_v5  ;;  %v3688_v19 = vsel %vm367_vm8, %v5381_v58, %v8887_v29 }
 0x649   : > { %v5438_v14 = vpack.i.bf16 %v3691_v0, %v3688_v19 }
 0x64b   : > { %5439 = vrot.lane.b32.xlu0 %v5438_v14, %s6050_s15 }
 0x656   : > { %v5385_v36 = vpop.permute.xlu1 %5384 }
 0x657   : > { %v5387_v49 = vunpack.i.h.bf16 %v5385_v36  ;;  %v5386_v48 = vunpack.i.l.bf16 %v5385_v36 }
 0x659   : > { %v3697_v13 = vsel %vm367_vm8, %v5387_v49, %v11093_v46  ;;  %v3694_v51 = vsel %vm367_vm8, %v5386_v48, %v11094_v27 }
 0x65a   : > { %v5443_v24 = vpack.i.bf16 %v3697_v13, %v3694_v51 }
 0x65c   : > { %5444 = vrot.lane.b32.xlu1 %v5443_v24, %s6050_s15 }
 0x66c   : > { %v5390_v33 = vpop.permute.xlu0 %5389  ;;  %v5395_v43 = vpop.permute.xlu1 %5394 }
 0x66d   : > { %v5392_v30 = vunpack.i.h.bf16 %v5390_v33  ;;  %v5391_v7 = vunpack.i.l.bf16 %v5390_v33  ;;  %v5397_v53 = vunpack.i.h.bf16 %v5395_v43  ;;  %v5396_v55 = vunpack.i.l.bf16 %v5395_v43 }
 0x66f   : > { %v1177_v50 = vsel %vm367_vm8, %v5392_v30, %v9015_v52  ;;  %v1174_v16 = vsel %vm367_vm8, %v5391_v7, %v9012_v8  ;;  %v2439_v23 = vsel %vm367_vm8, %v5397_v53, %v9053_v10  ;;  %v2436_v21 = vsel %vm367_vm8, %v5396_v55, %v9050_v12 }
 0x670   : > { %v5448_v37 = vpack.i.bf16 %v1177_v50, %v1174_v16  ;;  %v5453_v20 = vpack.i.bf16 %v2439_v23, %v2436_v21 }
 0x672   : > { %5449 = vrot.lane.b32.xlu0 %v5448_v37, %s6050_s15  ;;  %5454 = vrot.lane.b32.xlu1 %v5453_v20, %s6050_s15 }
 0x674   : > { %v5405_v1 = vpop.permute.xlu1 %5404  ;;  %v5400_v58 = vpop.permute.xlu0 %5399 }
 0x675   : > { %v5407_v0 = vunpack.i.h.bf16 %v5405_v1  ;;  %v5406_v19 = vunpack.i.l.bf16 %v5405_v1  ;;  %v5402_v14 = vunpack.i.h.bf16 %v5400_v58  ;;  %v5401_v36 = vunpack.i.l.bf16 %v5400_v58 }
 0x677   : > { %v1183_v49 = vsel %vm367_vm8, %v5407_v0, %v9095_v6  ;;  %v1180_v48 = vsel %vm367_vm8, %v5406_v19, %v9092_v61  ;;  %v3703_v13 = vsel %vm367_vm8, %v5402_v14, %v9101_v9  ;;  %v3700_v51 = vsel %vm367_vm8, %v5401_v36, %v9098_v59 }
 0x678   : > { %v5463_v24 = vpack.i.bf16 %v1183_v49, %v1180_v48  ;;  %v5458_v33 = vpack.i.bf16 %v3703_v13, %v3700_v51  ;;  %v5415_v43 = vpop.permute.xlu1 %5414  ;;  %v5410_v30 = vpop.permute.xlu0 %5409 }
 0x679   : > { %v5417_v7 = vunpack.i.h.bf16 %v5415_v43  ;;  %v5416_v53 = vunpack.i.l.bf16 %v5415_v43  ;;  %v5412_v55 = vunpack.i.h.bf16 %v5410_v30  ;;  %v5411_v50 = vunpack.i.l.bf16 %v5410_v30 }
 0x67a   : > { %5464 = vrot.lane.b32.xlu1 %v5463_v24, %s6050_s15  ;;  %5459 = vrot.lane.b32.xlu0 %v5458_v33, %s6050_s15 }
 0x67b   : > { %v3709_v16 = vsel %vm367_vm8, %v5417_v7, %v9143_v32  ;;  %v3706_v23 = vsel %vm367_vm8, %v5416_v53, %v9141_v41  ;;  %v2445_v21 = vsel %vm367_vm8, %v5412_v55, %v9169_v15  ;;  %v2442_v37 = vsel %vm367_vm8, %v5411_v50, %v9167_v54 }
 0x67c   : > { %v5473_v20 = vpack.i.bf16 %v3709_v16, %v3706_v23  ;;  %v5468_v1 = vpack.i.bf16 %v2445_v21, %v2442_v37 }
 0x67e   : > { %5474 = vrot.lane.b32.xlu1 %v5473_v20, %s6050_s15  ;;  %5469 = vrot.lane.b32.xlu0 %v5468_v1, %s6050_s15 }
 0x699   : > { %v5420_v58 = vpop.permute.xlu0 %5419 }
 0x69a   : > { %v5422_v0 = vunpack.i.h.bf16 %v5420_v58  ;;  %v5421_v19 = vunpack.i.l.bf16 %v5420_v58 }
 0x69c   : > { %v9271_v14 = vsel %vm367_vm8, %v5422_v0, %v8757_v18  ;;  %v9275_v36 = vsel %vm367_vm8, %v5421_v19, %v8755_v2 }
 0x69d   : > { %v1217_v48 = vsel %vm387_vm10, %v9271_v14, 0.0  ;;  %v1216_v13 = vsel %vm387_vm10, %v9275_v36, 0.0  ;;  %v1208_v49 = vsel %vm380_vm9, %v9275_v36, 0.0 }
 0x69e   : > { %v5478_v51 = vpack.i.bf16 %v1217_v48, %v1216_v13 }
 0x6a0   : > { %v5425_v24 = vpop.permute.xlu1 %5424  ;;  %5479 = vrot.lane.b32.xlu0 %v5478_v51, %s6056_s8 }
 0x6a1   : > { %v5427_v33 = vunpack.i.h.bf16 %v5425_v24  ;;  %v5426_v43 = vunpack.i.l.bf16 %v5425_v24 }
 0x6a3   : > { %v9286_v30 = vsel %vm367_vm8, %v5427_v33, %v8790_v3  ;;  %v9290_v7 = vsel %vm367_vm8, %v5426_v43, %v8788_v22 }
 0x6a4   : > { %v1219_v53 = vsel %vm387_vm10, %v9286_v30, 0.0  ;;  %v1218_v55 = vsel %vm387_vm10, %v9290_v7, 0.0 }
 0x6a5   : > { %v5483_v50 = vpack.i.bf16 %v1219_v53, %v1218_v55 }
 0x6a7   : > { %5484 = vrot.lane.b32.xlu1 %v5483_v50, %s6056_s8 }
 0x6ae   : > { %v5435_v16 = vpop.permute.xlu1 %5434 }
 0x6af   : > { %v5437_v23 = vunpack.i.h.bf16 %v5435_v16  ;;  %v5436_v21 = vunpack.i.l.bf16 %v5435_v16 }
 0x6b1   : > { %v9301_v37 = vsel %vm367_vm8, %v5437_v23, %v8823_v25  ;;  %v9305_v20 = vsel %vm367_vm8, %v5436_v21, %v8821_v44 }
 0x6b2   : > { %v2481_v1 = vsel %vm387_vm10, %v9301_v37, 0.0  ;;  %v2480_v58 = vsel %vm387_vm10, %v9305_v20, 0.0 }
 0x6b3   : > { %v5493_v0 = vpack.i.bf16 %v2481_v1, %v2480_v58 }
 0x6b5   : > { %5494 = vrot.lane.b32.xlu1 %v5493_v0, %s6056_s8 }
 0x6b6   : > { %v5430_v19 = vpop.permute.xlu0 %5429 }
 0x6b7   : > { %v5432_v48 = vunpack.i.h.bf16 %v5430_v19  ;;  %v5431_v13 = vunpack.i.l.bf16 %v5430_v19 }
 0x6b9   : > { %v9316_v51 = vsel %vm367_vm8, %v5432_v48, %v8856_v45  ;;  %v9320_v24 = vsel %vm367_vm8, %v5431_v13, %v8854_v4 }
 0x6ba   : > { %v2479_v33 = vsel %vm387_vm10, %v9316_v51, 0.0  ;;  %v2478_v43 = vsel %vm387_vm10, %v9320_v24, 0.0 }
 0x6bb   : > { %v5488_v53 = vpack.i.bf16 %v2479_v33, %v2478_v43 }
 0x6bd   : > { %v5440_v55 = vpop.permute.xlu0 %5439  ;;  %5489 = vrot.lane.b32.xlu0 %v5488_v53, %s6056_s8 }
 0x6be   : > { %v5442_v50 = vunpack.i.h.bf16 %v5440_v55  ;;  %v5441_v16 = vunpack.i.l.bf16 %v5440_v55 }
 0x6c0   : > { %v9331_v23 = vsel %vm367_vm8, %v5442_v50, %v8889_v5  ;;  %v9335_v21 = vsel %vm367_vm8, %v5441_v16, %v8887_v29 }
 0x6c1   : > { %v3743_v1 = vsel %vm387_vm10, %v9331_v23, 0.0  ;;  %v3742_v58 = vsel %vm387_vm10, %v9335_v21, 0.0 }
 0x6c2   : > { %v5498_v0 = vpack.i.bf16 %v3743_v1, %v3742_v58 }
 0x6c4   : > { %5499 = vrot.lane.b32.xlu0 %v5498_v0, %s6056_s8 }
 0x6ce   : > { %v5445_v19 = vpop.permute.xlu1 %5444 }
 0x6cf   : > { %v5447_v48 = vunpack.i.h.bf16 %v5445_v19  ;;  %v5446_v13 = vunpack.i.l.bf16 %v5445_v19 }
 0x6d1   : > { %v9346_v33 = vsel %vm367_vm8, %v5447_v48, %v11093_v46  ;;  %v9350_v43 = vsel %vm367_vm8, %v5446_v13, %v11094_v27 }
 0x6d2   : > { %v3745_v53 = vsel %vm387_vm10, %v9346_v33, 0.0  ;;  %v3744_v55 = vsel %vm387_vm10, %v9350_v43, 0.0 }
 0x6d3   : > { %v5503_v50 = vpack.i.bf16 %v3745_v53, %v3744_v55 }
 0x6d5   : > { %5504 = vrot.lane.b32.xlu1 %v5503_v50, %s6056_s8 }
 0x6e4   : > { %v5450_v16 = vpop.permute.xlu0 %5449  ;;  %v5455_v1 = vpop.permute.xlu1 %5454 }
 0x6e5   : > { %v5452_v58 = vunpack.i.h.bf16 %v5450_v16  ;;  %v5451_v0 = vunpack.i.l.bf16 %v5450_v16  ;;  %v5457_v19 = vunpack.i.h.bf16 %v5455_v1  ;;  %v5456_v48 = vunpack.i.l.bf16 %v5455_v1 }
 0x6e7   : > { %v9361_v13 = vsel %vm367_vm8, %v5452_v58, %v9015_v52  ;;  %v9365_v42 = vsel %vm367_vm8, %v5451_v0, %v9012_v8  ;;  %v9369_v26 = vsel %vm367_vm8, %v5457_v19, %v9053_v10  ;;  %v9373_v53 = vsel %vm367_vm8, %v5456_v48, %v9050_v12 }
 0x6e8   : > { %v1221_v55 = vsel %vm387_vm10, %v9361_v13, 0.0  ;;  %v1220_v50 = vsel %vm387_vm10, %v9365_v42, 0.0  ;;  %v2483_v16 = vsel %vm387_vm10, %v9369_v26, 0.0  ;;  %v2482_v1 = vsel %vm387_vm10, %v9373_v53, 0.0 }
 0x6e9   : > { %v5508_v58 = vpack.i.bf16 %v1221_v55, %v1220_v50  ;;  %v5513_v0 = vpack.i.bf16 %v2483_v16, %v2482_v1 }
 0x6eb   : > { %5509 = vrot.lane.b32.xlu0 %v5508_v58, %s6056_s8  ;;  %5514 = vrot.lane.b32.xlu1 %v5513_v0, %s6056_s8 }
 0x6ec   : > { %v5465_v19 = vpop.permute.xlu1 %5464  ;;  %v5460_v48 = vpop.permute.xlu0 %5459 }
 0x6ed   : > { %v5467_v60 = vunpack.i.h.bf16 %v5465_v19  ;;  %v5466_v63 = vunpack.i.l.bf16 %v5465_v19  ;;  %v5462_v47 = vunpack.i.h.bf16 %v5460_v48  ;;  %v5461_v35 = vunpack.i.l.bf16 %v5460_v48 }
 0x6ef   : > { %v9391_v57 = vsel %vm367_vm8, %v5467_v60, %v9095_v6  ;;  %v9395_v31 = vsel %vm367_vm8, %v5466_v63, %v9092_v61  ;;  %v9399_v55 = vsel %vm367_vm8, %v5462_v47, %v9101_v9  ;;  %v9403_v50 = vsel %vm367_vm8, %v5461_v35, %v9098_v59 }
 0x6f0   : > { %v1223_v16 = vsel %vm387_vm10, %v9391_v57, 0.0  ;;  %v1222_v60 = vsel %vm387_vm10, %v9395_v31, 0.0  ;;  %v3747_v63 = vsel %vm387_vm10, %v9399_v55, 0.0  ;;  %v3746_v47 = vsel %vm387_vm10, %v9403_v50, 0.0  ;;  %v5475_v1 = vpop.permute.xlu1 %5474  ;;  %v5470_v58 = vpop.permute.xlu0 %5469 }
 0x6f1   : > { %v5477_v35 = vunpack.i.h.bf16 %v5475_v1  ;;  %v5476_v0 = vunpack.i.l.bf16 %v5475_v1  ;;  %v5472_v19 = vunpack.i.h.bf16 %v5470_v58  ;;  %v5471_v48 = vunpack.i.l.bf16 %v5470_v58 }
 0x6f2   : > { %v5523_v62 = vpack.i.bf16 %v1223_v16, %v1222_v60  ;;  %v5518_v17 = vpack.i.bf16 %v3747_v63, %v3746_v47 }
 0x6f3   : > { %v9419_v11 = vsel %vm367_vm8, %v5477_v35, %v9143_v32  ;;  %v9423_v59 = vsel %vm367_vm8, %v5476_v0, %v9141_v41  ;;  %v9427_v9 = vsel %vm367_vm8, %v5472_v19, %v9169_v15  ;;  %v9431_v61 = vsel %vm367_vm8, %v5471_v48, %v9167_v54 }
 0x6f4   : > { %v3749_v16 = vsel %vm387_vm10, %v9419_v11, 0.0  ;;  %v3748_v60 = vsel %vm387_vm10, %v9423_v59, 0.0  ;;  %v2485_v63 = vsel %vm387_vm10, %v9427_v9, 0.0  ;;  %v2484_v47 = vsel %vm387_vm10, %v9431_v61, 0.0  ;;  %5524 = vrot.lane.b32.xlu1 %v5523_v62, %s6056_s8  ;;  %5519 = vrot.lane.b32.xlu0 %v5518_v17, %s6056_s8 }
 0x6f5   : > { %v5533_v1 = vpack.i.bf16 %v3749_v16, %v3748_v60  ;;  %v5528_v58 = vpack.i.bf16 %v2485_v63, %v2484_v47  ;;  %v1209_v54 = vsel %vm380_vm9, %v9271_v14, 0.0  ;;  %v1211_v47 = vsel %vm380_vm9, %v9286_v30, 0.0 }
 0x6f6   : > { %v1210_v14 = vsel %vm380_vm9, %v9290_v7, 0.0  ;;  %v2473_v30 = vsel %vm380_vm9, %v9301_v37, 0.0 }
 0x6f8   : > { %5534 = vrot.lane.b32.xlu1 %v5533_v1, %s6056_s8  ;;  %5529 = vrot.lane.b32.xlu0 %v5528_v58, %s6056_s8 }
 0x712   : > { %v5480_v35 = vpop.permute.xlu0 %5479 }
 0x713   : > { %v5482_v0 = vunpack.i.h.bf16 %v5480_v35  ;;  %v5481_v19 = vunpack.i.l.bf16 %v5480_v35 }
 0x715   : > { %v1257_v62 = vmax.f32 %v1209_v54, %v5482_v0  ;;  %v1256_v15 = vmax.f32 %v1208_v49, %v5481_v19  ;;  %v2472_v49 = vsel %vm380_vm9, %v9305_v20, 0.0  ;;  %v2471_v20 = vsel %vm380_vm9, %v9316_v51, 0.0 }
 0x717   : > { %v5538_v17 = vpack.i.bf16 %v1257_v62, %v1256_v15 }
 0x719   : > { %v5485_v16 = vpop.permute.xlu1 %5484  ;;  %5539 = vrot.lane.b32.xlu0 %v5538_v17, %s6054_s24 }
 0x71a   : > { %v5487_v60 = vunpack.i.h.bf16 %v5485_v16  ;;  %v5486_v63 = vunpack.i.l.bf16 %v5485_v16 }
 0x71c   : > { %v1259_v1 = vmax.f32 %v1211_v47, %v5487_v60  ;;  %v1258_v58 = vmax.f32 %v1210_v14, %v5486_v63  ;;  %v2470_v60 = vsel %vm380_vm9, %v9320_v24, 0.0  ;;  %v3735_v24 = vsel %vm380_vm9, %v9331_v23, 0.0 }
 0x71e   : > { %v5543_v35 = vpack.i.bf16 %v1259_v1, %v1258_v58 }
 0x720   : > { %5544 = vrot.lane.b32.xlu1 %v5543_v35, %s6054_s24  ;;  %v3734_v35 = vsel %vm380_vm9, %v9335_v21, 0.0  ;;  %v3737_v21 = vsel %vm380_vm9, %v9346_v33, 0.0  ;;  %v2474_v33 = vsel %vm380_vm9, %v9373_v53, 0.0 }
 0x727   : > { %v5495_v54 = vpop.permute.xlu1 %5494 }
 0x728   : > { %v5497_v15 = vunpack.i.h.bf16 %v5495_v54  ;;  %v5496_v36 = vunpack.i.l.bf16 %v5495_v54 }
 0x72a   : > { %v2521_v0 = vmax.f32 %v2473_v30, %v5497_v15  ;;  %v2520_v19 = vmax.f32 %v2472_v49, %v5496_v36 }
 0x72c   : > { %v5553_v62 = vpack.i.bf16 %v2521_v0, %v2520_v19  ;;  %v3736_v0 = vsel %vm380_vm9, %v9350_v43, 0.0  ;;  %v1213_v43 = vsel %vm380_vm9, %v9361_v13, 0.0 }
 0x72e   : > { %5554 = vrot.lane.b32.xlu1 %v5553_v62, %s6054_s24 }
 0x72f   : > { %v5490_v7 = vpop.permute.xlu0 %5489 }
 0x730   : > { %v5492_v17 = vunpack.i.h.bf16 %v5490_v7  ;;  %v5491_v16 = vunpack.i.l.bf16 %v5490_v7 }
 0x732   : > { %v2519_v63 = vmax.f32 %v2471_v20, %v5492_v17  ;;  %v2518_v47 = vmax.f32 %v2470_v60, %v5491_v16 }
 0x734   : > { %v5548_v14 = vpack.i.bf16 %v2519_v63, %v2518_v47  ;;  %v1212_v47 = vsel %vm380_vm9, %v9365_v42, 0.0 }
 0x736   : > { %v5500_v37 = vpop.permute.xlu0 %5499  ;;  %5549 = vrot.lane.b32.xlu0 %v5548_v14, %s6054_s24  ;;  %v2475_v14 = vsel %vm380_vm9, %v9369_v26, 0.0  ;;  %v1214_v26 = vsel %vm380_vm9, %v9395_v31, 0.0 }
 0x737   : > { %v5502_v1 = vunpack.i.h.bf16 %v5500_v37  ;;  %v5501_v58 = vunpack.i.l.bf16 %v5500_v37 }
 0x739   : > { %v3783_v54 = vmax.f32 %v3735_v24, %v5502_v1  ;;  %v3782_v15 = vmax.f32 %v3734_v35, %v5501_v58 }
 0x73b   : > { %v5558_v36 = vpack.i.bf16 %v3783_v54, %v3782_v15 }
 0x73d   : > { %5559 = vrot.lane.b32.xlu0 %v5558_v36, %s6054_s24 }
 0x747   : > { %v5505_v51 = vpop.permute.xlu1 %5504 }
 0x748   : > { %v5507_v49 = vunpack.i.h.bf16 %v5505_v51  ;;  %v5506_v30 = vunpack.i.l.bf16 %v5505_v51 }
 0x74a   : > { %v3785_v19 = vmax.f32 %v3737_v21, %v5507_v49  ;;  %v3784_v62 = vmax.f32 %v3736_v0, %v5506_v30  ;;  %v1215_v49 = vsel %vm380_vm9, %v9391_v57, 0.0  ;;  %v3738_v30 = vsel %vm380_vm9, %v9403_v50, 0.0 }
 0x74b   : > { %v3739_v0 = vsel %vm380_vm9, %v9399_v55, 0.0  ;;  %v3740_v57 = vsel %vm380_vm9, %v9423_v59, 0.0  ;;  %v3741_v50 = vsel %vm380_vm9, %v9419_v11, 0.0 }
 0x74c   : > { %v5563_v7 = vpack.i.bf16 %v3785_v19, %v3784_v62 }
 0x74e   : > { %5564 = vrot.lane.b32.xlu1 %v5563_v7, %s6054_s24 }
 0x75d   : > { %v5510_v23 = vpop.permute.xlu0 %5509  ;;  %v5515_v17 = vpop.permute.xlu1 %5514 }
 0x75e   : > { %v5512_v16 = vunpack.i.h.bf16 %v5510_v23  ;;  %v5511_v60 = vunpack.i.l.bf16 %v5510_v23  ;;  %v5517_v20 = vunpack.i.h.bf16 %v5515_v17  ;;  %v5516_v63 = vunpack.i.l.bf16 %v5515_v17 }
 0x760   : > { %v1261_v37 = vmax.f32 %v1213_v43, %v5512_v16  ;;  %v1260_v1 = vmax.f32 %v1212_v47, %v5511_v60  ;;  %v2523_v58 = vmax.f32 %v2475_v14, %v5517_v20  ;;  %v2522_v35 = vmax.f32 %v2474_v33, %v5516_v63 }
 0x761   : > { %v2476_v33 = vsel %vm380_vm9, %v9431_v61, 0.0  ;;  %v2477_v14 = vsel %vm380_vm9, %v9427_v9, 0.0 }
 0x762   : > { %v5568_v24 = vpack.i.bf16 %v1261_v37, %v1260_v1  ;;  %v5573_v54 = vpack.i.bf16 %v2523_v58, %v2522_v35 }
 0x764   : > { %5569 = vrot.lane.b32.xlu0 %v5568_v24, %s6054_s24  ;;  %5574 = vrot.lane.b32.xlu1 %v5573_v54, %s6054_s24 }
 0x766   : > { %v5525_v42 = vpop.permute.xlu1 %5524  ;;  %v5520_v13 = vpop.permute.xlu0 %5519 }
 0x767   : > { %v5527_v15 = vunpack.i.h.bf16 %v5525_v42  ;;  %v5526_v36 = vunpack.i.l.bf16 %v5525_v42  ;;  %v5522_v51 = vunpack.i.h.bf16 %v5520_v13  ;;  %v5521_v53 = vunpack.i.l.bf16 %v5520_v13 }
 0x769   : > { %v1263_v21 = vmax.f32 %v1215_v49, %v5527_v15  ;;  %v1262_v19 = vmax.f32 %v1214_v26, %v5526_v36  ;;  %v3787_v62 = vmax.f32 %v3739_v0, %v5522_v51  ;;  %v3786_v7 = vmax.f32 %v3738_v30, %v5521_v53  ;;  %v11097_v36 = vld [vmem:[#allocation38_spill] sm:$0xff]  ;;  %v11098_v53 = vld [vmem:[#allocation37_spill] sm:$0xff] }
 0x76a   : > { %v5535_v23 = vpop.permute.xlu1 %5534  ;;  %v5530_v17 = vpop.permute.xlu0 %5529 }
 0x76b   : > { %v5583_v16 = vpack.i.bf16 %v1263_v21, %v1262_v19  ;;  %v5578_v31 = vpack.i.bf16 %v3787_v62, %v3786_v7  ;;  %v5537_v60 = vunpack.i.h.bf16 %v5535_v23  ;;  %v5536_v20 = vunpack.i.l.bf16 %v5535_v23 }
 0x76c   : > { %v5532_v63 = vunpack.i.h.bf16 %v5530_v17  ;;  %v5531_v55 = vunpack.i.l.bf16 %v5530_v17 }
 0x76d   : > { %v3789_v47 = vmax.f32 %v3741_v50, %v5537_v60  ;;  %v3788_v43 = vmax.f32 %v3740_v57, %v5536_v20  ;;  %5584 = vrot.lane.b32.xlu1 %v5583_v16, %s6054_s24  ;;  %5579 = vrot.lane.b32.xlu0 %v5578_v31, %s6054_s24 }
 0x76e   : > { %v2525_v59 = vmax.f32 %v2477_v14, %v5532_v63  ;;  %v2524_v37 = vmax.f32 %v2476_v33, %v5531_v55  ;;  %v11099_v14 = vld [vmem:[#allocation39_spill] sm:$0xff] }
 0x76f   : > { %v5593_v1 = vpack.i.bf16 %v3789_v47, %v3788_v43 }
 0x770   : > { %v5588_v11 = vpack.i.bf16 %v2525_v59, %v2524_v37  ;;  %v11100_v37 = vld [vmem:[#allocation40_spill] sm:$0xff] }
 0x771   : > { %5594 = vrot.lane.b32.xlu1 %v5593_v1, %s6054_s24 }
 0x772   : > { %5589 = vrot.lane.b32.xlu0 %v5588_v11, %s6054_s24 }
 0x78b   : > { %v5540_v58 = vpop.permute.xlu0 %5539 }
 0x78c   : > { %v5542_v35 = vunpack.i.h.bf16 %v5540_v58  ;;  %v5541_v24 = vunpack.i.l.bf16 %v5540_v58 }
 0x78e   : > { %v1297_v61 = vmax.f32 %v8757_v18, %v5542_v35  ;;  %v1296_v54 = vmax.f32 %v8755_v2, %v5541_v24 }
 0x790   : > { %v1316_v9 = vrot.slane %v1297_v61, 7  ;;  %v1340_v42 = vrot.slane %v1297_v61, 1  ;;  %v1312_v13 = vrot.slane %v1296_v54, 7  ;;  %v1336_v15 = vrot.slane %v1296_v54, 1 }
 0x791   : > { %v9536_v51 = vadd.f32 %v1297_v61, %v11097_v36  ;;  %v9539_v26 = vadd.f32 %v1296_v54, %v11098_v53 }
 0x792   : > { %v1320_v49 = vsel %vm339_vm11, %v1312_v13, %v1316_v9  ;;  %v1324_v30 = vsel %vm339_vm11, %v1316_v9, %v1312_v13  ;;  %v1344_v18 = vsel %vm354_vm12, %v1336_v15, %v1340_v42  ;;  %v1348_v2 = vsel %vm354_vm12, %v1340_v42, %v1336_v15  ;;  %v5545_v0 = vpop.permute.xlu1 %5544 }
 0x793   : > { %v1328_v21 = vsel %vm350_vm13, %v1324_v30, 0.0  ;;  %v1329_v19 = vsel %vm351_vm14, %v1320_v49, 0.0  ;;  %v1352_v62 = vsel %vm365_vm15, %v1344_v18, 0.0  ;;  %v1353_v7 = vsel %vm366_vm0, %v1348_v2, 0.0 }
 0x794   : > { %v1360_v23 = vmax.f32 %v1328_v21, %v1352_v62  ;;  %v1361_v17 = vmax.f32 %v1329_v19, %v1353_v7  ;;  %v5547_v16 = vunpack.i.h.bf16 %v5545_v0  ;;  %v5546_v31 = vunpack.i.l.bf16 %v5545_v0  ;;  %v11101_v7 = vld [vmem:[#allocation42_spill] sm:$0xff] }
 0x796   : > { %v9557_v60 = vmax.f32 %v1296_v54, %v1360_v23  ;;  %v9559_v20 = vmax.f32 %v1297_v61, %v1361_v17  ;;  %v1299_v57 = vmax.f32 %v8790_v3, %v5547_v16  ;;  %v1298_v50 = vmax.f32 %v8788_v22, %v5546_v31  ;;  %v11102_v17 = vld [vmem:[#allocation41_spill] sm:$0xff] }
 0x798   : > { %v1317_v63 = vrot.slane %v1299_v57, 7  ;;  %v1341_v55 = vrot.slane %v1299_v57, 1  ;;  %v1313_v47 = vrot.slane %v1298_v50, 7  ;;  %v1337_v43 = vrot.slane %v1298_v50, 1 }
 0x799   : > { %v5598_v33 = vpack.i.bf16 %v9559_v20, %v9557_v60  ;;  %v9566_v59 = vadd.f32 %v1299_v57, %v11099_v14  ;;  %v9569_v1 = vadd.f32 %v1298_v50, %v11100_v37 }
 0x79a   : > { %v1321_v11 = vsel %vm339_vm11, %v1313_v47, %v1317_v63  ;;  %v1325_v3 = vsel %vm339_vm11, %v1317_v63, %v1313_v47  ;;  %v1345_v22 = vsel %vm354_vm12, %v1337_v43, %v1341_v55  ;;  %v1349_v58 = vsel %vm354_vm12, %v1341_v55, %v1337_v43 }
 0x79b   : > { %v1330_v35 = vsel %vm350_vm13, %v1325_v3, 0.0  ;;  %v1331_v24 = vsel %vm351_vm14, %v1321_v11, 0.0  ;;  %v1354_v61 = vsel %vm365_vm15, %v1345_v22, 0.0  ;;  %v1355_v54 = vsel %vm366_vm0, %v1349_v58, 0.0  ;;  %5599 = vrot.lane.b32.xlu0 %v5598_v33, %s6050_s15 }
 0x79c   : > { %v1362_v9 = vmax.f32 %v1330_v35, %v1354_v61  ;;  %v1363_v42 = vmax.f32 %v1331_v24, %v1355_v54 }
 0x79e   : > { %v9588_v13 = vmax.f32 %v1298_v50, %v1362_v9  ;;  %v9590_v15 = vmax.f32 %v1299_v57, %v1363_v42 }
 0x7a0   : > { %v5555_v36 = vpop.permute.xlu1 %5554  ;;  %v5603_v30 = vpack.i.bf16 %v9590_v15, %v9588_v13 }
 0x7a1   : > { %v5557_v53 = vunpack.i.h.bf16 %v5555_v36  ;;  %v5556_v49 = vunpack.i.l.bf16 %v5555_v36  ;;  %v11103_v36 = vld [vmem:[#allocation43_spill] sm:$0xff] }
 0x7a2   : > { %5604 = vrot.lane.b32.xlu1 %v5603_v30, %s6050_s15 }
 0x7a3   : > { %v2561_v18 = vmax.f32 %v8823_v25, %v5557_v53  ;;  %v2560_v2 = vmax.f32 %v8821_v44, %v5556_v49  ;;  %v11104_v49 = vld [vmem:[#allocation44_spill] sm:$0xff] }
 0x7a5   : > { %v2579_v0 = vrot.slane %v2561_v18, 7  ;;  %v2603_v21 = vrot.slane %v2561_v18, 1  ;;  %v2575_v19 = vrot.slane %v2560_v2, 7  ;;  %v2599_v62 = vrot.slane %v2560_v2, 1 }
 0x7a6   : > { %v9598_v23 = vadd.f32 %v2560_v2, %v11101_v7  ;;  %v9601_v16 = vadd.f32 %v2561_v18, %v11102_v17 }
 0x7a7   : > { %v2583_v31 = vsel %vm339_vm11, %v2575_v19, %v2579_v0  ;;  %v2587_v25 = vsel %vm339_vm11, %v2579_v0, %v2575_v19  ;;  %v2607_v44 = vsel %vm354_vm12, %v2599_v62, %v2603_v21  ;;  %v2611_v57 = vsel %vm354_vm12, %v2603_v21, %v2599_v62 }
 0x7a8   : > { %v2592_v50 = vsel %vm350_vm13, %v2587_v25, 0.0  ;;  %v2593_v63 = vsel %vm351_vm14, %v2583_v31, 0.0  ;;  %v2616_v55 = vsel %vm365_vm15, %v2607_v44, 0.0  ;;  %v2617_v47 = vsel %vm366_vm0, %v2611_v57, 0.0  ;;  %v5550_v43 = vpop.permute.xlu0 %5549 }
 0x7a9   : > { %v2624_v33 = vmax.f32 %v2592_v50, %v2616_v55  ;;  %v2625_v14 = vmax.f32 %v2593_v63, %v2617_v47  ;;  %v5552_v37 = vunpack.i.h.bf16 %v5550_v43  ;;  %v5551_v11 = vunpack.i.l.bf16 %v5550_v43 }
 0x7ab   : > { %v9619_v3 = vmax.f32 %v2560_v2, %v2624_v33  ;;  %v9621_v22 = vmax.f32 %v2561_v18, %v2625_v14  ;;  %v2559_v58 = vmax.f32 %v8856_v45, %v5552_v37  ;;  %v2558_v35 = vmax.f32 %v8854_v4, %v5551_v11  ;;  %v11105_v11 = vld [vmem:[#allocation45_spill] sm:$0xff] }
 0x7ad   : > { %v2578_v24 = vrot.slane %v2559_v58, 7  ;;  %v2602_v61 = vrot.slane %v2559_v58, 1  ;;  %v2574_v54 = vrot.slane %v2558_v35, 7  ;;  %v2598_v9 = vrot.slane %v2558_v35, 1 }
 0x7ae   : > { %v5613_v42 = vpack.i.bf16 %v9621_v22, %v9619_v3  ;;  %v9628_v53 = vadd.f32 %v2558_v35, %v11103_v36  ;;  %v9631_v30 = vadd.f32 %v2559_v58, %v11104_v49 }
 0x7af   : > { %v2582_v18 = vsel %vm339_vm11, %v2574_v54, %v2578_v24  ;;  %v2586_v45 = vsel %vm339_vm11, %v2578_v24, %v2574_v54  ;;  %v2606_v4 = vsel %vm354_vm12, %v2598_v9, %v2602_v61  ;;  %v2610_v2 = vsel %vm354_vm12, %v2602_v61, %v2598_v9  ;;  %v5560_v0 = vpop.permute.xlu0 %5559  ;;  %v11106_v61 = vld [vmem:[#allocation65_spill] sm:$0xff] }
 0x7b0   : > { %v2590_v21 = vsel %vm350_vm13, %v2586_v45, 0.0  ;;  %v2591_v19 = vsel %vm351_vm14, %v2582_v18, 0.0  ;;  %v2614_v62 = vsel %vm365_vm15, %v2606_v4, 0.0  ;;  %v2615_v7 = vsel %vm366_vm0, %v2610_v2, 0.0  ;;  %5614 = vrot.lane.b32.xlu1 %v5613_v42, %s6050_s15 }
 0x7b1   : > { %v2622_v17 = vmax.f32 %v2590_v21, %v2614_v62  ;;  %v2623_v31 = vmax.f32 %v2591_v19, %v2615_v7  ;;  %v5562_v25 = vunpack.i.h.bf16 %v5560_v0  ;;  %v5561_v44 = vunpack.i.l.bf16 %v5560_v0 }
 0x7b3   : > { %v9650_v57 = vmax.f32 %v2558_v35, %v2622_v17  ;;  %v9652_v50 = vmax.f32 %v2559_v58, %v2623_v31  ;;  %v3823_v63 = vmax.f32 %v8889_v5, %v5562_v25  ;;  %v3822_v55 = vmax.f32 %v8887_v29, %v5561_v44 }
 0x7b5   : > { %v3842_v47 = vrot.slane %v3823_v63, 7  ;;  %v3866_v43 = vrot.slane %v3823_v63, 1  ;;  %v3838_v33 = vrot.slane %v3822_v55, 7  ;;  %v3862_v14 = vrot.slane %v3822_v55, 1 }
 0x7b6   : > { %v5608_v37 = vpack.i.bf16 %v9652_v50, %v9650_v57  ;;  %v9659_v24 = vadd.f32 %v3822_v55, %v11105_v11  ;;  %v9662_v54 = vadd.f32 %v3823_v63, %v11106_v61 }
 0x7b7   : > { %v3846_v58 = vsel %vm339_vm11, %v3838_v33, %v3842_v47  ;;  %v3850_v5 = vsel %vm339_vm11, %v3842_v47, %v3838_v33  ;;  %v3870_v29 = vsel %vm354_vm12, %v3862_v14, %v3866_v43  ;;  %v3874_v35 = vsel %vm354_vm12, %v3866_v43, %v3862_v14 }
 0x7b8   : > { %v3854_v9 = vsel %vm350_vm13, %v3850_v5, 0.0  ;;  %v3855_v42 = vsel %vm351_vm14, %v3846_v58, 0.0  ;;  %v3878_v36 = vsel %vm365_vm15, %v3870_v29, 0.0  ;;  %v3879_v49 = vsel %vm366_vm0, %v3874_v35, 0.0  ;;  %5609 = vrot.lane.b32.xlu0 %v5608_v37, %s6050_s15 }
 0x7b9   : > { %v3886_v18 = vmax.f32 %v3854_v9, %v3878_v36  ;;  %v3887_v45 = vmax.f32 %v3855_v42, %v3879_v49 }
 0x7bb   : > { %v9681_v4 = vmax.f32 %v3822_v55, %v3886_v18  ;;  %v9683_v2 = vmax.f32 %v3823_v63, %v3887_v45  ;;  %v11107_v55 = vld [vmem:[#allocation46_spill] sm:$0xff]  ;;  %v11109_v63 = vld [vmem:[#allocation73_spill] sm:$0xff] }
 0x7bd   : > { %v5618_v62 = vpack.i.bf16 %v9683_v2, %v9681_v4 }
 0x7bf   : > { %5619 = vrot.lane.b32.xlu0 %v5618_v62, %s6050_s15 }
 0x7c0   : > { %v5565_v0 = vpop.permute.xlu1 %5564 }
 0x7c1   : > { %v5567_v21 = vunpack.i.h.bf16 %v5565_v0  ;;  %v5566_v19 = vunpack.i.l.bf16 %v5565_v0 }
 0x7c3   : > { %v3825_v7 = vmax.f32 %v11093_v46, %v5567_v21  ;;  %v3824_v17 = vmax.f32 %v11094_v27, %v5566_v19 }
 0x7c5   : > { %v3843_v31 = vrot.slane %v3825_v7, 7  ;;  %v3867_v25 = vrot.slane %v3825_v7, 1  ;;  %v3839_v44 = vrot.slane %v3824_v17, 7  ;;  %v3863_v47 = vrot.slane %v3824_v17, 1 }
 0x7c6   : > { %v9691_v43 = vadd.f32 %v3824_v17, %v11107_v55  ;;  %v9694_v33 = vadd.f32 %v3825_v7, %v11109_v63 }
 0x7c7   : > { %v3847_v14 = vsel %vm339_vm11, %v3839_v44, %v3843_v31  ;;  %v3851_v46 = vsel %vm339_vm11, %v3843_v31, %v3839_v44  ;;  %v3871_v27 = vsel %vm354_vm12, %v3863_v47, %v3867_v25  ;;  %v3875_v37 = vsel %vm354_vm12, %v3867_v25, %v3863_v47 }
 0x7c8   : > { %11108 = vst [vmem:[#allocation56_spill] sm:$0xff] %v9691_v43  ;;  %11110 = vst [vmem:[#allocation78_spill] sm:$0xff] %v9694_v33  ;;  %v3856_v11 = vsel %vm350_vm13, %v3851_v46, 0.0  ;;  %v3857_v61 = vsel %vm351_vm14, %v3847_v14, 0.0  ;;  %v3880_v58 = vsel %vm365_vm15, %v3871_v27, 0.0  ;;  %v3881_v5 = vsel %vm366_vm0, %v3875_v37, 0.0 }
 0x7c9   : > { %v3888_v29 = vmax.f32 %v3856_v11, %v3880_v58  ;;  %v3889_v35 = vmax.f32 %v3857_v61, %v3881_v5  ;;  %v11126_v43 = vld [vmem:[#allocation71_spill] sm:$0xff] }
 0x7cb   : > { %v9712_v9 = vmax.f32 %v3824_v17, %v3888_v29  ;;  %v9714_v42 = vmax.f32 %v3825_v7, %v3889_v35 }
 0x7cd   : > { %v5623_v36 = vpack.i.bf16 %v9714_v42, %v9712_v9 }
 0x7cf   : > { %5624 = vrot.lane.b32.xlu1 %v5623_v36, %s6050_s15 }
 0x7d6   : > { %v5570_v49 = vpop.permute.xlu0 %5569  ;;  %v5575_v18 = vpop.permute.xlu1 %5574 }
 0x7d7   : > { %v5572_v45 = vunpack.i.h.bf16 %v5570_v49  ;;  %v5571_v0 = vunpack.i.l.bf16 %v5570_v49  ;;  %v5577_v21 = vunpack.i.h.bf16 %v5575_v18  ;;  %v5576_v19 = vunpack.i.l.bf16 %v5575_v18 }
 0x7d9   : > { %v9720_v62 = vmax.f32 %v9015_v52, %v5572_v45  ;;  %v1300_v31 = vmax.f32 %v9012_v8, %v5571_v0  ;;  %v9724_v17 = vmax.f32 %v9053_v10, %v5577_v21  ;;  %v9727_v7 = vmax.f32 %v9050_v12, %v5576_v19 }
 0x7db   : > { %v1318_v25 = vrot.slane %v9720_v62, 7  ;;  %v1342_v44 = vrot.slane %v9720_v62, 1  ;;  %v1314_v47 = vrot.slane %v1300_v31, 7  ;;  %v1338_v55 = vrot.slane %v1300_v31, 1 }
 0x7dc   : > { %v2580_v63 = vrot.slane %v9724_v17, 7  ;;  %v2604_v14 = vrot.slane %v9724_v17, 1  ;;  %v2576_v52 = vrot.slane %v9727_v7, 7  ;;  %v2600_v8 = vrot.slane %v9727_v7, 1 }
 0x7dd   : > { %v1322_v10 = vsel %vm339_vm11, %v1314_v47, %v1318_v25  ;;  %v1326_v12 = vsel %vm339_vm11, %v1318_v25, %v1314_v47  ;;  %v1346_v46 = vsel %vm354_vm12, %v1338_v55, %v1342_v44  ;;  %v1350_v27 = vsel %vm354_vm12, %v1342_v44, %v1338_v55 }
 0x7de   : > { %v1332_v37 = vsel %vm350_vm13, %v1326_v12, 0.0  ;;  %v1333_v11 = vsel %vm351_vm14, %v1322_v10, 0.0  ;;  %v1356_v61 = vsel %vm365_vm15, %v1346_v46, 0.0  ;;  %v1357_v58 = vsel %vm366_vm0, %v1350_v27, 0.0 }
 0x7df   : > { %v1364_v5 = vmax.f32 %v1332_v37, %v1356_v61  ;;  %v1365_v29 = vmax.f32 %v1333_v11, %v1357_v58  ;;  %v2584_v35 = vsel %vm339_vm11, %v2576_v52, %v2580_v63  ;;  %v2588_v36 = vsel %vm339_vm11, %v2580_v63, %v2576_v52  ;;  %v5585_v49 = vpop.permute.xlu1 %5584  ;;  %v5580_v19 = vpop.permute.xlu0 %5579 }
 0x7e0   : > { %v2594_v18 = vsel %vm350_vm13, %v2588_v36, 0.0  ;;  %v2595_v45 = vsel %vm351_vm14, %v2584_v35, 0.0  ;;  %v2608_v0 = vsel %vm354_vm12, %v2600_v8, %v2604_v14  ;;  %v2612_v21 = vsel %vm354_vm12, %v2604_v14, %v2600_v8  ;;  %v11115_v35 = vld [vmem:[#allocation47_spill] sm:$0xff] }
 0x7e1   : > { %v9763_v25 = vmax.f32 %v1300_v31, %v1364_v5  ;;  %v9766_v44 = vmax.f32 %v9720_v62, %v1365_v29  ;;  %v2618_v47 = vsel %vm365_vm15, %v2608_v0, 0.0  ;;  %v2619_v55 = vsel %vm366_vm0, %v2612_v21, 0.0  ;;  %v11114_v5 = vld [vmem:[#allocation48_spill] sm:$0xff] }
 0x7e2   : > { %v2626_v63 = vmax.f32 %v2594_v18, %v2618_v47  ;;  %v2627_v52 = vmax.f32 %v2595_v45, %v2619_v55  ;;  %v5587_v10 = vunpack.i.h.bf16 %v5585_v49  ;;  %v5586_v12 = vunpack.i.l.bf16 %v5585_v49  ;;  %v11116_v49 = vld [vmem:[#allocation66_spill] sm:$0xff] }
 0x7e3   : > { %v5582_v46 = vunpack.i.h.bf16 %v5580_v19  ;;  %v5581_v27 = vunpack.i.l.bf16 %v5580_v19  ;;  %v5595_v37 = vpop.permute.xlu1 %5594  ;;  %v5628_v14 = vpack.i.bf16 %v9766_v44, %v9763_v25  ;;  %v9775_v8 = vadd.f32 %v1300_v31, %v9157_v38 }
 0x7e4   : > { %v9778_v11 = vmax.f32 %v9727_v7, %v2626_v63  ;;  %v9781_v61 = vmax.f32 %v9724_v17, %v2627_v52  ;;  %v9784_v58 = vmax.f32 %v9095_v6, %v5587_v10  ;;  %v9787_v29 = vmax.f32 %v11114_v5, %v5586_v12 }
 0x7e5   : > { %11111 = vst [vmem:[#allocation55_spill] sm:$0xff] %v9775_v8  ;;  %v9790_v36 = vmax.f32 %v11115_v35, %v5582_v46  ;;  %v9793_v18 = vmax.f32 %v11116_v49, %v5581_v27  ;;  %v5597_v38 = vunpack.i.h.bf16 %v5595_v37  ;;  %v5596_v31 = vunpack.i.l.bf16 %v5595_v37  ;;  %5629 = vrot.lane.b32.xlu0 %v5628_v14, %s6050_s15  ;;  %v11124_v8 = vld [vmem:[#allocation49_spill] sm:$0xff] }
 0x7e6   : > { %11112 = vst [vmem:[#allocation61_spill] sm:$0xff] %v9778_v11  ;;  %11113 = vst [vmem:[#allocation57_spill] sm:$0xff] %v9781_v61  ;;  %v1319_v45 = vrot.slane %v9784_v58, 7  ;;  %v1343_v0 = vrot.slane %v9784_v58, 1  ;;  %v1315_v6 = vrot.slane %v9787_v29, 7  ;;  %v1339_v21 = vrot.slane %v9787_v29, 1 }
 0x7e7   : > { %v3844_v19 = vrot.slane %v9790_v36, 7  ;;  %v3868_v47 = vrot.slane %v9790_v36, 1  ;;  %v3840_v55 = vrot.slane %v9793_v18, 7  ;;  %v3864_v63 = vrot.slane %v9793_v18, 1 }
 0x7e8   : > { %v1323_v52 = vsel %vm339_vm11, %v1315_v6, %v1319_v45  ;;  %v1327_v10 = vsel %vm339_vm11, %v1319_v45, %v1315_v6  ;;  %v1347_v12 = vsel %vm354_vm12, %v1339_v21, %v1343_v0  ;;  %v1351_v46 = vsel %vm354_vm12, %v1343_v0, %v1339_v21 }
 0x7e9   : > { %v1334_v27 = vsel %vm350_vm13, %v1327_v10, 0.0  ;;  %v1335_v37 = vsel %vm351_vm14, %v1323_v52, 0.0  ;;  %v1358_v14 = vsel %vm365_vm15, %v1347_v12, 0.0  ;;  %v1359_v5 = vsel %vm366_vm0, %v1351_v46, 0.0  ;;  %v5590_v12 = vpop.permute.xlu0 %5589 }
 0x7ea   : > { %v1366_v35 = vmax.f32 %v1334_v27, %v1358_v14  ;;  %v1367_v49 = vmax.f32 %v1335_v37, %v1359_v5  ;;  %v3848_v45 = vsel %vm339_vm11, %v3840_v55, %v3844_v19  ;;  %v3852_v0 = vsel %vm339_vm11, %v3844_v19, %v3840_v55 }
 0x7eb   : > { %v3858_v6 = vsel %vm350_vm13, %v3852_v0, 0.0  ;;  %v3859_v21 = vsel %vm351_vm14, %v3848_v45, 0.0  ;;  %v3872_v52 = vsel %vm354_vm12, %v3864_v63, %v3868_v47  ;;  %v3876_v10 = vsel %vm354_vm12, %v3868_v47, %v3864_v63 }
 0x7ec   : > { %v9833_v46 = vmax.f32 %v9787_v29, %v1366_v35  ;;  %v9836_v27 = vmax.f32 %v9784_v58, %v1367_v49  ;;  %v3882_v19 = vsel %vm365_vm15, %v3872_v52, 0.0  ;;  %v3883_v55 = vsel %vm366_vm0, %v3876_v10, 0.0 }
 0x7ed   : > { %v3890_v37 = vmax.f32 %v3858_v6, %v3882_v19  ;;  %v3891_v14 = vmax.f32 %v3859_v21, %v3883_v55  ;;  %v3829_v5 = vmax.f32 %v9143_v32, %v5597_v38  ;;  %v3828_v45 = vmax.f32 %v9141_v41, %v5596_v31  ;;  %v11121_v38 = vld [vmem:[#allocation50_spill] sm:$0xff]  ;;  %v11122_v31 = vld [vmem:[#allocation68_spill] sm:$0xff]  ;;  %v11123_v55 = vld [vmem:[#allocation69_spill] sm:$0xff] }
 0x7ee   : > { %11117 = vst [vmem:[#allocation77_spill] sm:$0xff] %v9833_v46  ;;  %11118 = vst [vmem:[#allocation76_spill] sm:$0xff] %v9836_v27  ;;  %v5592_v47 = vunpack.i.h.bf16 %v5590_v12  ;;  %v5591_v63 = vunpack.i.l.bf16 %v5590_v12  ;;  %v5633_v35 = vpack.i.bf16 %v9781_v61, %v9778_v11  ;;  %v5643_v49 = vpack.i.bf16 %v9836_v27, %v9833_v46 }
 0x7ef   : > { %v9849_v0 = vmax.f32 %v9793_v18, %v3890_v37  ;;  %v9852_v52 = vmax.f32 %v9790_v36, %v3891_v14  ;;  %v3845_v6 = vrot.slane %v3829_v5, 7  ;;  %v3869_v21 = vrot.slane %v3829_v5, 1 }
 0x7f0   : > { %v3841_v10 = vrot.slane %v3828_v45, 7  ;;  %v3865_v32 = vrot.slane %v3828_v45, 1  ;;  %v2565_v41 = vmax.f32 %v11121_v38, %v5592_v47  ;;  %v2564_v12 = vmax.f32 %v11122_v31, %v5591_v63  ;;  %5634 = vrot.lane.b32.xlu1 %v5633_v35, %s6050_s15 }
 0x7f1   : > { %11119 = vst [vmem:[#allocation62_spill] sm:$0xff] %v9849_v0  ;;  %11120 = vst [vmem:[#allocation58_spill] sm:$0xff] %v9852_v52  ;;  %v5638_v19 = vpack.i.bf16 %v9852_v52, %v9849_v0  ;;  %v9861_v37 = vadd.f32 %v9720_v62, %v11123_v55  ;;  %v9865_v14 = vadd.f32 %v9727_v7, %v11124_v8  ;;  %v11128_v55 = vld [vmem:[#allocation52_spill] sm:$0xff] }
 0x7f2   : > { %v9869_v33 = vadd.f32 %v9724_v17, %v11126_v43  ;;  %v3849_v47 = vsel %vm339_vm11, %v3841_v10, %v3845_v6  ;;  %v3853_v63 = vsel %vm339_vm11, %v3845_v6, %v3841_v10  ;;  %v3873_v35 = vsel %vm354_vm12, %v3865_v32, %v3869_v21 }
 0x7f3   : > { %11125 = vst [vmem:[#allocation63_spill] sm:$0xff] %v9865_v14  ;;  %v3877_v62 = vsel %vm354_vm12, %v3869_v21, %v3865_v32  ;;  %v3860_v7 = vsel %vm350_vm13, %v3853_v63, 0.0  ;;  %v3861_v8 = vsel %vm351_vm14, %v3849_v47, 0.0  ;;  %v3884_v43 = vsel %vm365_vm15, %v3873_v35, 0.0  ;;  %5639 = vrot.lane.b32.xlu0 %v5638_v19, %s6050_s15  ;;  %v11130_v47 = vld [vmem:[#allocation70_spill] sm:$0xff]  ;;  %v11134_v19 = vld [vmem:[#allocation51_spill] sm:$0xff] }
 0x7f4   : > { %11127 = vst [vmem:[#allocation60_spill] sm:$0xff] %v9869_v33  ;;  %v3885_v17 = vsel %vm366_vm0, %v3877_v62, 0.0  ;;  %v3892_v6 = vmax.f32 %v3860_v7, %v3884_v43  ;;  %v2581_v38 = vrot.slane %v2565_v41, 7  ;;  %v2605_v31 = vrot.slane %v2565_v41, 1  ;;  %5644 = vrot.lane.b32.xlu1 %v5643_v49, %s6050_s15 }
 0x7f5   : > { %v3893_v10 = vmax.f32 %v3861_v8, %v3885_v17  ;;  %v2577_v21 = vrot.slane %v2564_v12, 7  ;;  %v2601_v32 = vrot.slane %v2564_v12, 1  ;;  %v9891_v63 = vadd.f32 %v9787_v29, %v11128_v55  ;;  %v11136_v8 = vld [vmem:[#allocation75_spill] sm:$0xff] }
 0x7f6   : > { %v9895_v35 = vadd.f32 %v9784_v58, %v11130_v47  ;;  %v9897_v14 = vmax.f32 %v3828_v45, %v3892_v6  ;;  %v9903_v7 = vadd.f32 %v9793_v18, %v11134_v19  ;;  %v9907_v49 = vadd.f32 %v9790_v36, %v11136_v8  ;;  %v11138_v47 = vld [vmem:[#allocation53_spill] sm:$0xff]  ;;  %v11144_v19 = vld [vmem:[#allocation79_spill] sm:$0xff] }
 0x7f7   : > { %11129 = vst [vmem:[#allocation64_spill] sm:$0xff] %v9891_v63  ;;  %v9899_v62 = vmax.f32 %v3829_v5, %v3893_v10  ;;  %v2585_v29 = vsel %vm339_vm11, %v2577_v21, %v2581_v38  ;;  %v2589_v43 = vsel %vm339_vm11, %v2581_v38, %v2577_v21  ;;  %v2609_v58 = vsel %vm354_vm12, %v2601_v32, %v2605_v31 }
 0x7f8   : > { %11131 = vst [vmem:[#allocation59_spill] sm:$0xff] %v9895_v35  ;;  %11132 = vst [vmem:[#allocation81_spill] sm:$0xff] %v9897_v14  ;;  %v2613_v17 = vsel %vm354_vm12, %v2605_v31, %v2601_v32  ;;  %v2596_v18 = vsel %vm350_vm13, %v2589_v43, 0.0  ;;  %v2597_v6 = vsel %vm351_vm14, %v2585_v29, 0.0  ;;  %v2620_v36 = vsel %vm365_vm15, %v2609_v58, 0.0  ;;  %v11140_v31 = vld [vmem:[#allocation74_spill] sm:$0xff] }
 0x7f9   : > { %11133 = vst [vmem:[#allocation80_spill] sm:$0xff] %v9899_v62  ;;  %11135 = vst [vmem:[#allocation85_spill] sm:$0xff] %v9903_v7  ;;  %v2621_v10 = vsel %vm366_vm0, %v2613_v17, 0.0  ;;  %v2628_v55 = vmax.f32 %v2596_v18, %v2620_v36  ;;  %v5653_v21 = vpack.i.bf16 %v9899_v62, %v9897_v14  ;;  %v9928_v56 = vadd.f32 %v3828_v45, %v11138_v47  ;;  %v11142_v32 = vld [vmem:[#allocation54_spill] sm:$0xff] }
 0x7fa   : > { %11137 = vst [vmem:[#allocation84_spill] sm:$0xff] %v9907_v49  ;;  %v2629_v38 = vmax.f32 %v2597_v6, %v2621_v10  ;;  %v9931_v28 = vadd.f32 %v3829_v5, %v11140_v31  ;;  %v9934_v40 = vadd.f32 %v2564_v12, %v11142_v32  ;;  %v9937_v34 = vadd.f32 %v2565_v41, %v11144_v19 }
 0x7fb   : > { %11139 = vst [vmem:[#allocation83_spill] sm:$0xff] %v9928_v56  ;;  %v9939_v8 = vmax.f32 %v2564_v12, %v2628_v55  ;;  %5654 = vrot.lane.b32.xlu1 %v5653_v21, %s6050_s15  ;;  %vm305_vm11 = vcmask 130048  }
 0x7fc   : > { %11141 = vst [vmem:[#allocation82_spill] sm:$0xff] %v9931_v28  ;;  %11143 = vst [vmem:[#allocation86_spill] sm:$0xff] %v9934_v40  ;;  %v9941_v39 = vmax.f32 %v2565_v41, %v2629_v38 }
 0x7fd   : > { %11145 = vst [vmem:[#allocation88_spill] sm:$0xff] %v9937_v34  ;;  %11146 = vst [vmem:[#allocation87_spill] sm:$0xff] %v9939_v8 }
 0x7fe   : > { %11147 = vst [vmem:[#allocation67_spill] sm:$0xff] %v9941_v39  ;;  %v5648_v29 = vpack.i.bf16 %v9941_v39, %v9939_v8 }
 0x800   : > { %5649 = vrot.lane.b32.xlu0 %v5648_v29, %s6050_s15 }
 0x80d   : > { %v5600_v45 = vpop.permute.xlu0 %5599 }
 0x80e   : > { %v5602_v5 = vunpack.i.h.bf16 %v5600_v45  ;;  %v5601_v43 = vunpack.i.l.bf16 %v5600_v45 }
 0x810   : > { %v1381_v58 = vsel %vm367_vm8, %v5602_v5, %v9559_v20  ;;  %v1378_v17 = vsel %vm367_vm8, %v5601_v43, %v9557_v60 }
 0x811   : > { %v5658_v12 = vpack.i.bf16 %v1381_v58, %v1378_v17 }
 0x813   : > { %5659 = vrot.lane.b32.xlu0 %v5658_v12, %s6050_s15 }
 0x814   : > { %v5605_v41 = vpop.permute.xlu1 %5604 }
 0x815   : > { %v5607_v18 = vunpack.i.h.bf16 %v5605_v41  ;;  %v5606_v6 = vunpack.i.l.bf16 %v5605_v41 }
 0x817   : > { %v1387_v36 = vsel %vm367_vm8, %v5607_v18, %v9590_v15  ;;  %v1384_v10 = vsel %vm367_vm8, %v5606_v6, %v9588_v13 }
 0x818   : > { %v5663_v55 = vpack.i.bf16 %v1387_v36, %v1384_v10 }
 0x81a   : > { %5664 = vrot.lane.b32.xlu1 %v5663_v55, %s6050_s15 }
 0x822   : > { %v5615_v38 = vpop.permute.xlu1 %5614 }
 0x823   : > { %v5617_v21 = vunpack.i.h.bf16 %v5615_v38  ;;  %v5616_v47 = vunpack.i.l.bf16 %v5615_v38 }
 0x825   : > { %v2649_v31 = vsel %vm367_vm8, %v5617_v21, %v9621_v22  ;;  %v2646_v32 = vsel %vm367_vm8, %v5616_v47, %v9619_v3 }
 0x826   : > { %v5673_v19 = vpack.i.bf16 %v2649_v31, %v2646_v32 }
 0x828   : > { %5674 = vrot.lane.b32.xlu1 %v5673_v19, %s6050_s15 }
 0x82a   : > { %v5610_v29 = vpop.permute.xlu0 %5609 }
 0x82b   : > { %v5612_v45 = vunpack.i.h.bf16 %v5610_v29  ;;  %v5611_v5 = vunpack.i.l.bf16 %v5610_v29 }
 0x82d   : > { %v2643_v43 = vsel %vm367_vm8, %v5612_v45, %v9652_v50  ;;  %v2640_v58 = vsel %vm367_vm8, %v5611_v5, %v9650_v57 }
 0x82e   : > { %v5668_v17 = vpack.i.bf16 %v2643_v43, %v2640_v58 }
 0x830   : > { %5669 = vrot.lane.b32.xlu0 %v5668_v17, %s6050_s15 }
 0x831   : > { %v5620_v12 = vpop.permute.xlu0 %5619 }
 0x832   : > { %v5622_v41 = vunpack.i.h.bf16 %v5620_v12  ;;  %v5621_v18 = vunpack.i.l.bf16 %v5620_v12 }
 0x834   : > { %v3907_v6 = vsel %vm367_vm8, %v5622_v41, %v9683_v2  ;;  %v3904_v36 = vsel %vm367_vm8, %v5621_v18, %v9681_v4 }
 0x835   : > { %v5678_v10 = vpack.i.bf16 %v3907_v6, %v3904_v36 }
 0x837   : > { %5679 = vrot.lane.b32.xlu0 %v5678_v10, %s6050_s15 }
 0x841   : > { %v5625_v55 = vpop.permute.xlu1 %5624 }
 0x842   : > { %v5627_v38 = vunpack.i.h.bf16 %v5625_v55  ;;  %v5626_v21 = vunpack.i.l.bf16 %v5625_v55 }
 0x844   : > { %v3913_v47 = vsel %vm367_vm8, %v5627_v38, %v9714_v42  ;;  %v3910_v31 = vsel %vm367_vm8, %v5626_v21, %v9712_v9 }
 0x845   : > { %v5683_v32 = vpack.i.bf16 %v3913_v47, %v3910_v31 }
 0x847   : > { %5684 = vrot.lane.b32.xlu1 %v5683_v32, %s6050_s15 }
 0x857   : > { %v5630_v19 = vpop.permute.xlu0 %5629 }
 0x858   : > { %v5632_v29 = vunpack.i.h.bf16 %v5630_v19  ;;  %v5631_v45 = vunpack.i.l.bf16 %v5630_v19 }
 0x85a   : > { %v1393_v5 = vsel %vm367_vm8, %v5632_v29, %v9766_v44  ;;  %v1390_v43 = vsel %vm367_vm8, %v5631_v45, %v9763_v25 }
 0x85b   : > { %v5688_v58 = vpack.i.bf16 %v1393_v5, %v1390_v43 }
 0x85d   : > { %5689 = vrot.lane.b32.xlu0 %v5688_v58, %s6050_s15 }
 0x862   : > { %v5635_v17 = vpop.permute.xlu1 %5634 }
 0x863   : > { %v5637_v12 = vunpack.i.h.bf16 %v5635_v17  ;;  %v5636_v41 = vunpack.i.l.bf16 %v5635_v17 }
 0x865   : > { %v2655_v18 = vsel %vm367_vm8, %v5637_v12, %v9781_v61  ;;  %v2652_v6 = vsel %vm367_vm8, %v5636_v41, %v9778_v11  ;;  %v5640_v36 = vpop.permute.xlu0 %5639 }
 0x866   : > { %v5693_v10 = vpack.i.bf16 %v2655_v18, %v2652_v6  ;;  %v5645_v55 = vpop.permute.xlu1 %5644  ;;  %v5642_v38 = vunpack.i.h.bf16 %v5640_v36  ;;  %v5641_v21 = vunpack.i.l.bf16 %v5640_v36 }
 0x867   : > { %v5647_v47 = vunpack.i.h.bf16 %v5645_v55  ;;  %v5646_v31 = vunpack.i.l.bf16 %v5645_v55 }
 0x868   : > { %v3919_v32 = vsel %vm367_vm8, %v5642_v38, %v9852_v52  ;;  %v3916_v19 = vsel %vm367_vm8, %v5641_v21, %v9849_v0  ;;  %5694 = vrot.lane.b32.xlu1 %v5693_v10, %s6050_s15 }
 0x869   : > { %v1399_v29 = vsel %vm367_vm8, %v5647_v47, %v9836_v27  ;;  %v1396_v45 = vsel %vm367_vm8, %v5646_v31, %v9833_v46  ;;  %v5698_v5 = vpack.i.bf16 %v3919_v32, %v3916_v19 }
 0x86a   : > { %v5703_v43 = vpack.i.bf16 %v1399_v29, %v1396_v45 }
 0x86b   : > { %5699 = vrot.lane.b32.xlu0 %v5698_v5, %s6050_s15 }
 0x86c   : > { %5704 = vrot.lane.b32.xlu1 %v5703_v43, %s6050_s15 }
 0x86d   : > { %v5655_v58 = vpop.permute.xlu1 %5654 }
 0x86e   : > { %v5657_v17 = vunpack.i.h.bf16 %v5655_v58  ;;  %v5656_v12 = vunpack.i.l.bf16 %v5655_v58 }
 0x870   : > { %v3925_v41 = vsel %vm367_vm8, %v5657_v17, %v9899_v62  ;;  %v3922_v18 = vsel %vm367_vm8, %v5656_v12, %v9897_v14 }
 0x871   : > { %v5713_v6 = vpack.i.bf16 %v3925_v41, %v3922_v18 }
 0x872   : > { %v5650_v36 = vpop.permute.xlu0 %5649 }
 0x873   : > { %v5652_v10 = vunpack.i.h.bf16 %v5650_v36  ;;  %v5651_v55 = vunpack.i.l.bf16 %v5650_v36  ;;  %5714 = vrot.lane.b32.xlu1 %v5713_v6, %s6050_s15 }
 0x875   : > { %v2661_v38 = vsel %vm367_vm8, %v5652_v10, %v9941_v39  ;;  %v2658_v21 = vsel %vm367_vm8, %v5651_v55, %v9939_v8 }
 0x876   : > { %v5708_v47 = vpack.i.bf16 %v2661_v38, %v2658_v21 }
 0x878   : > { %5709 = vrot.lane.b32.xlu0 %v5708_v47, %s6050_s15 }
 0x885   : > { %v5660_v31 = vpop.permute.xlu0 %5659 }
 0x886   : > { %v5662_v32 = vunpack.i.h.bf16 %v5660_v31  ;;  %v5661_v19 = vunpack.i.l.bf16 %v5660_v31 }
 0x888   : > { %v10009_v29 = vsel %vm367_vm8, %v5662_v32, %v9559_v20  ;;  %v10013_v45 = vsel %vm367_vm8, %v5661_v19, %v9557_v60 }
 0x889   : > { %v1433_v43 = vsel %vm387_vm10, %v10009_v29, 0.0  ;;  %v1432_v58 = vsel %vm387_vm10, %v10013_v45, 0.0 }
 0x88a   : > { %v5718_v17 = vpack.i.bf16 %v1433_v43, %v1432_v58 }
 0x88c   : > { %v5665_v12 = vpop.permute.xlu1 %5664  ;;  %5719 = vrot.lane.b32.xlu0 %v5718_v17, %s6056_s8 }
 0x88d   : > { %v5667_v41 = vunpack.i.h.bf16 %v5665_v12  ;;  %v5666_v18 = vunpack.i.l.bf16 %v5665_v12 }
 0x88f   : > { %v10024_v6 = vsel %vm367_vm8, %v5667_v41, %v9590_v15  ;;  %v10028_v36 = vsel %vm367_vm8, %v5666_v18, %v9588_v13 }
 0x890   : > { %v1435_v10 = vsel %vm387_vm10, %v10024_v6, 0.0  ;;  %v1434_v55 = vsel %vm387_vm10, %v10028_v36, 0.0 }
 0x891   : > { %v5723_v38 = vpack.i.bf16 %v1435_v10, %v1434_v55 }
 0x893   : > { %5724 = vrot.lane.b32.xlu1 %v5723_v38, %s6056_s8 }
 0x89a   : > { %v5675_v21 = vpop.permute.xlu1 %5674 }
 0x89b   : > { %v5677_v47 = vunpack.i.h.bf16 %v5675_v21  ;;  %v5676_v31 = vunpack.i.l.bf16 %v5675_v21 }
 0x89d   : > { %v10039_v32 = vsel %vm367_vm8, %v5677_v47, %v9621_v22  ;;  %v10043_v19 = vsel %vm367_vm8, %v5676_v31, %v9619_v3 }
 0x89e   : > { %v2697_v43 = vsel %vm387_vm10, %v10039_v32, 0.0  ;;  %v2696_v58 = vsel %vm387_vm10, %v10043_v19, 0.0 }
 0x89f   : > { %v5733_v17 = vpack.i.bf16 %v2697_v43, %v2696_v58 }
 0x8a1   : > { %5734 = vrot.lane.b32.xlu1 %v5733_v17, %s6056_s8 }
 0x8a2   : > { %v5670_v12 = vpop.permute.xlu0 %5669 }
 0x8a3   : > { %v5672_v41 = vunpack.i.h.bf16 %v5670_v12  ;;  %v5671_v18 = vunpack.i.l.bf16 %v5670_v12 }
 0x8a5   : > { %v10054_v10 = vsel %vm367_vm8, %v5672_v41, %v9652_v50  ;;  %v10058_v55 = vsel %vm367_vm8, %v5671_v18, %v9650_v57 }
 0x8a6   : > { %v2695_v38 = vsel %vm387_vm10, %v10054_v10, 0.0  ;;  %v2694_v21 = vsel %vm387_vm10, %v10058_v55, 0.0 }
 0x8a7   : > { %v5728_v47 = vpack.i.bf16 %v2695_v38, %v2694_v21 }
 0x8a9   : > { %v5680_v31 = vpop.permute.xlu0 %5679  ;;  %5729 = vrot.lane.b32.xlu0 %v5728_v47, %s6056_s8 }
 0x8aa   : > { %v5682_v43 = vunpack.i.h.bf16 %v5680_v31  ;;  %v5681_v58 = vunpack.i.l.bf16 %v5680_v31 }
 0x8ac   : > { %v10069_v17 = vsel %vm367_vm8, %v5682_v43, %v9683_v2  ;;  %v10073_v12 = vsel %vm367_vm8, %v5681_v58, %v9681_v4 }
 0x8ad   : > { %v3959_v41 = vsel %vm387_vm10, %v10069_v17, 0.0  ;;  %v3958_v18 = vsel %vm387_vm10, %v10073_v12, 0.0 }
 0x8ae   : > { %v5738_v38 = vpack.i.bf16 %v3959_v41, %v3958_v18 }
 0x8b0   : > { %5739 = vrot.lane.b32.xlu0 %v5738_v38, %s6056_s8 }
 0x8b9   : > { %v5685_v21 = vpop.permute.xlu1 %5684 }
 0x8ba   : > { %v5687_v47 = vunpack.i.h.bf16 %v5685_v21  ;;  %v5686_v31 = vunpack.i.l.bf16 %v5685_v21 }
 0x8bc   : > { %v10084_v43 = vsel %vm367_vm8, %v5687_v47, %v9714_v42  ;;  %v10088_v58 = vsel %vm367_vm8, %v5686_v31, %v9712_v9 }
 0x8bd   : > { %v3961_v40 = vsel %vm387_vm10, %v10084_v43, 0.0  ;;  %v3960_v41 = vsel %vm387_vm10, %v10088_v58, 0.0 }
 0x8be   : > { %v5743_v18 = vpack.i.bf16 %v3961_v40, %v3960_v41 }
 0x8c0   : > { %5744 = vrot.lane.b32.xlu1 %v5743_v18, %s6056_s8 }
 0x8cf   : > { %v5690_v38 = vpop.permute.xlu0 %5689 }
 0x8d0   : > { %v5692_v21 = vunpack.i.h.bf16 %v5690_v38  ;;  %v5691_v34 = vunpack.i.l.bf16 %v5690_v38 }
 0x8d2   : > { %v10099_v47 = vsel %vm367_vm8, %v5692_v21, %v9766_v44  ;;  %v10103_v31 = vsel %vm367_vm8, %v5691_v34, %v9763_v25 }
 0x8d3   : > { %v1437_v56 = vsel %vm387_vm10, %v10099_v47, 0.0  ;;  %v1436_v40 = vsel %vm387_vm10, %v10103_v31, 0.0 }
 0x8d4   : > { %v5748_v41 = vpack.i.bf16 %v1437_v56, %v1436_v40 }
 0x8d6   : > { %5749 = vrot.lane.b32.xlu0 %v5748_v41, %s6056_s8 }
 0x8da   : > { %v5695_v18 = vpop.permute.xlu1 %5694 }
 0x8db   : > { %v5697_v38 = vunpack.i.h.bf16 %v5695_v18  ;;  %v5696_v28 = vunpack.i.l.bf16 %v5695_v18 }
 0x8dd   : > { %v10114_v21 = vsel %vm367_vm8, %v5697_v38, %v9781_v61  ;;  %v10118_v34 = vsel %vm367_vm8, %v5696_v28, %v9778_v11  ;;  %v5700_v7 = vpop.permute.xlu0 %5699 }
 0x8de   : > { %v2699_v49 = vsel %vm387_vm10, %v10114_v21, 0.0  ;;  %v2698_v56 = vsel %vm387_vm10, %v10118_v34, 0.0  ;;  %v5705_v40 = vpop.permute.xlu1 %5704  ;;  %v5702_v41 = vunpack.i.h.bf16 %v5700_v7  ;;  %v5701_v18 = vunpack.i.l.bf16 %v5700_v7 }
 0x8df   : > { %v5707_v63 = vunpack.i.h.bf16 %v5705_v40  ;;  %v5706_v35 = vunpack.i.l.bf16 %v5705_v40  ;;  %v5753_v38 = vpack.i.bf16 %v2699_v49, %v2698_v56 }
 0x8e0   : > { %v10128_v33 = vsel %vm367_vm8, %v5702_v41, %v9852_v52  ;;  %v10132_v28 = vsel %vm367_vm8, %v5701_v18, %v9849_v0 }
 0x8e1   : > { %v10136_v11 = vsel %vm367_vm8, %v5707_v63, %v9836_v27  ;;  %v10140_v61 = vsel %vm367_vm8, %v5706_v35, %v9833_v46  ;;  %v3963_v7 = vsel %vm387_vm10, %v10128_v33, 0.0  ;;  %v3962_v49 = vsel %vm387_vm10, %v10132_v28, 0.0  ;;  %5754 = vrot.lane.b32.xlu1 %v5753_v38, %s6056_s8 }
 0x8e2   : > { %v1439_v56 = vsel %vm387_vm10, %v10136_v11, 0.0  ;;  %v1438_v63 = vsel %vm387_vm10, %v10140_v61, 0.0  ;;  %v5758_v35 = vpack.i.bf16 %v3963_v7, %v3962_v49 }
 0x8e3   : > { %v5763_v40 = vpack.i.bf16 %v1439_v56, %v1438_v63 }
 0x8e4   : > { %5759 = vrot.lane.b32.xlu0 %v5758_v35, %s6056_s8 }
 0x8e5   : > { %v5715_v41 = vpop.permute.xlu1 %5714  ;;  %5764 = vrot.lane.b32.xlu1 %v5763_v40, %s6056_s8 }
 0x8e6   : > { %v5717_v18 = vunpack.i.h.bf16 %v5715_v41  ;;  %v5716_v0 = vunpack.i.l.bf16 %v5715_v41  ;;  %v11149_v41 = vmov 0.0  }
 0x8e7   : > { %306 = vst.msk [vmem:[#allocation2] sm:$0xff] %vm305_vm11, %v11149_v41  ;;  %307 = vst.msk [vmem:[#allocation2 + $0x8] sm:$0xff] %vm305_vm11, %v11149_v41 }
 0x8e8   : > { %v10159_v38 = vsel %vm367_vm8, %v5717_v18, %v9899_v62  ;;  %v10163_v52 = vsel %vm367_vm8, %v5716_v0, %v9897_v14  ;;  %308 = vst.msk [vmem:[#allocation2 + $0x10] sm:$0xff] %vm305_vm11, %v11149_v41  ;;  %309 = vst.msk [vmem:[#allocation2 + $0x18] sm:$0xff] %vm305_vm11, %v11149_v41 }
 0x8e9   : > { %v3965_v7 = vsel %vm387_vm10, %v10159_v38, 0.0  ;;  %v3964_v49 = vsel %vm387_vm10, %v10163_v52, 0.0  ;;  %310 = vst.msk [vmem:[#allocation2 + $0x20] sm:$0xff] %vm305_vm11, %v11149_v41  ;;  %311 = vst.msk [vmem:[#allocation2 + $0x28] sm:$0xff] %vm305_vm11, %v11149_v41 }
 0x8ea   : > { %v5710_v56 = vpop.permute.xlu0 %5709  ;;  %v5773_v40 = vpack.i.bf16 %v3965_v7, %v3964_v49  ;;  %312 = vst.msk [vmem:[#allocation3] sm:$0xff] %vm305_vm11, %v11149_v41  ;;  %313 = vst.msk [vmem:[#allocation3 + $0x8] sm:$0xff] %vm305_vm11, %v11149_v41 }
 0x8eb   : > { %v5712_v63 = vunpack.i.h.bf16 %v5710_v56  ;;  %v5711_v35 = vunpack.i.l.bf16 %v5710_v56  ;;  %314 = vst.msk [vmem:[#allocation3 + $0x10] sm:$0xff] %vm305_vm11, %v11149_v41  ;;  %315 = vst.msk [vmem:[#allocation3 + $0x18] sm:$0xff] %vm305_vm11, %v11149_v41 }
 0x8ec   : > { %316 = vst.msk [vmem:[#allocation3 + $0x20] sm:$0xff] %vm305_vm11, %v11149_v41  ;;  %317 = vst.msk [vmem:[#allocation3 + $0x28] sm:$0xff] %vm305_vm11, %v11149_v41  ;;  %5774 = vrot.lane.b32.xlu1 %v5773_v40, %s6056_s8  ;;  %v1424_v40 = vsel %vm380_vm9, %v10013_v45, 0.0 }
 0x8ed   : > { %318 = vst.msk [vmem:[#allocation4] sm:$0xff] %vm305_vm11, %v11149_v41  ;;  %319 = vst.msk [vmem:[#allocation4 + $0x8] sm:$0xff] %vm305_vm11, %v11149_v41  ;;  %v10209_v0 = vsel %vm367_vm8, %v5712_v63, %v9941_v39  ;;  %v10213_v18 = vsel %vm367_vm8, %v5711_v35, %v9939_v8  ;;  %v1425_v35 = vsel %vm380_vm9, %v10009_v29, 0.0  ;;  %v1426_v29 = vsel %vm380_vm9, %v10028_v36, 0.0 }
 0x8ee   : > { %320 = vst.msk [vmem:[#allocation4 + $0x10] sm:$0xff] %vm305_vm11, %v11149_v41  ;;  %321 = vst.msk [vmem:[#allocation4 + $0x18] sm:$0xff] %vm305_vm11, %v11149_v41  ;;  %v2701_v7 = vsel %vm387_vm10, %v10209_v0, 0.0  ;;  %v2700_v49 = vsel %vm387_vm10, %v10213_v18, 0.0  ;;  %vm4229_vm8 = vcmask 1041409   ;;  %vm4234_vm10 = vcmask 124928  }
 0x8ef   : > { %322 = vst.msk [vmem:[#allocation4 + $0x20] sm:$0xff] %vm305_vm11, %v11149_v41  ;;  %323 = vst.msk [vmem:[#allocation4 + $0x28] sm:$0xff] %vm305_vm11, %v11149_v41  ;;  %v5768_v56 = vpack.i.bf16 %v2701_v7, %v2700_v49  ;;  %v1427_v49 = vsel %vm380_vm9, %v10024_v6, 0.0 }
 0x8f1   : > { %5769 = vrot.lane.b32.xlu0 %v5768_v56, %s6056_s8 }
 0x8fe   : > { %v5720_v41 = vpop.permute.xlu0 %5719 }
 0x8ff   : > { %v5722_v63 = vunpack.i.h.bf16 %v5720_v41  ;;  %v5721_v39 = vunpack.i.l.bf16 %v5720_v41 }
 0x901   : > { %v1473_v8 = vmax.f32 %v1425_v35, %v5722_v63  ;;  %v1472_v14 = vmax.f32 %v1424_v40, %v5721_v39 }
 0x903   : > { %v5778_v62 = vpack.i.bf16 %v1473_v8, %v1472_v14 }
 0x905   : > { %v5725_v46 = vpop.permute.xlu1 %5724  ;;  %5779 = vrot.lane.b32.xlu0 %v5778_v62, %s6054_s24  ;;  %v2689_v62 = vsel %vm380_vm9, %v10039_v32, 0.0 }
 0x906   : > { %v5727_v5 = vunpack.i.h.bf16 %v5725_v46  ;;  %v5726_v7 = vunpack.i.l.bf16 %v5725_v46  ;;  %v2688_v46 = vsel %vm380_vm9, %v10043_v19, 0.0  ;;  %v2687_v19 = vsel %vm380_vm9, %v10054_v10, 0.0 }
 0x908   : > { %v1475_v56 = vmax.f32 %v1427_v49, %v5727_v5  ;;  %v1474_v41 = vmax.f32 %v1426_v29, %v5726_v7 }
 0x90a   : > { %v5783_v27 = vpack.i.bf16 %v1475_v56, %v1474_v41  ;;  %v3950_v41 = vsel %vm380_vm9, %v10073_v12, 0.0  ;;  %v3953_v12 = vsel %vm380_vm9, %v10084_v43, 0.0 }
 0x90c   : > { %5784 = vrot.lane.b32.xlu1 %v5783_v27, %s6054_s24  ;;  %v2686_v27 = vsel %vm380_vm9, %v10058_v55, 0.0  ;;  %v3951_v55 = vsel %vm380_vm9, %v10069_v17, 0.0 }
 0x913   : > { %v5735_v39 = vpop.permute.xlu1 %5734 }
 0x914   : > { %v5737_v14 = vunpack.i.h.bf16 %v5735_v39  ;;  %v5736_v8 = vunpack.i.l.bf16 %v5735_v39 }
 0x916   : > { %v2737_v45 = vmax.f32 %v2689_v62, %v5737_v14  ;;  %v2736_v6 = vmax.f32 %v2688_v46, %v5736_v8 }
 0x918   : > { %v5793_v63 = vpack.i.bf16 %v2737_v45, %v2736_v6  ;;  %v3952_v45 = vsel %vm380_vm9, %v10088_v58, 0.0  ;;  %v1429_v58 = vsel %vm380_vm9, %v10099_v47, 0.0 }
 0x91a   : > { %5794 = vrot.lane.b32.xlu1 %v5793_v63, %s6054_s24 }
 0x91b   : > { %v5730_v36 = vpop.permute.xlu0 %5729 }
 0x91c   : > { %v5732_v35 = vunpack.i.h.bf16 %v5730_v36  ;;  %v5731_v40 = vunpack.i.l.bf16 %v5730_v36 }
 0x91e   : > { %v2735_v5 = vmax.f32 %v2687_v19, %v5732_v35  ;;  %v2734_v7 = vmax.f32 %v2686_v27, %v5731_v40  ;;  %v1428_v27 = vsel %vm380_vm9, %v10103_v31, 0.0  ;;  %v2691_v31 = vsel %vm380_vm9, %v10114_v21, 0.0 }
 0x91f   : > { %v1430_v21 = vsel %vm380_vm9, %v10140_v61, 0.0  ;;  %v3956_v61 = vsel %vm380_vm9, %v10163_v52, 0.0 }
 0x920   : > { %v5788_v49 = vpack.i.bf16 %v2735_v5, %v2734_v7 }
 0x922   : > { %v5740_v32 = vpop.permute.xlu0 %5739  ;;  %5789 = vrot.lane.b32.xlu0 %v5788_v49, %s6054_s24 }
 0x923   : > { %v5742_v29 = vunpack.i.h.bf16 %v5740_v32  ;;  %v5741_v56 = vunpack.i.l.bf16 %v5740_v32 }
 0x925   : > { %v3999_v39 = vmax.f32 %v3951_v55, %v5742_v29  ;;  %v3998_v14 = vmax.f32 %v3950_v41, %v5741_v56  ;;  %v2690_v29 = vsel %vm380_vm9, %v10118_v34, 0.0  ;;  %v3955_v34 = vsel %vm380_vm9, %v10128_v33, 0.0 }
 0x927   : > { %v5798_v8 = vpack.i.bf16 %v3999_v39, %v3998_v14  ;;  %v3954_v39 = vsel %vm380_vm9, %v10132_v28, 0.0 }
 0x929   : > { %5799 = vrot.lane.b32.xlu0 %v5798_v8, %s6054_s24 }
 0x932   : > { %v5745_v10 = vpop.permute.xlu1 %5744 }
 0x933   : > { %v5747_v46 = vunpack.i.h.bf16 %v5745_v10  ;;  %v5746_v62 = vunpack.i.l.bf16 %v5745_v10 }
 0x935   : > { %v4001_v6 = vmax.f32 %v3953_v12, %v5747_v46  ;;  %v4000_v63 = vmax.f32 %v3952_v45, %v5746_v62  ;;  %v1431_v45 = vsel %vm380_vm9, %v10136_v11, 0.0  ;;  %v3957_v11 = vsel %vm380_vm9, %v10159_v38, 0.0 }
 0x937   : > { %v5803_v36 = vpack.i.bf16 %v4001_v6, %v4000_v63 }
 0x939   : > { %5804 = vrot.lane.b32.xlu1 %v5803_v36, %s6054_s24 }
 0x948   : > { %v5750_v17 = vpop.permute.xlu0 %5749 }
 0x949   : > { %v5752_v35 = vunpack.i.h.bf16 %v5750_v17  ;;  %v5751_v40 = vunpack.i.l.bf16 %v5750_v17 }
 0x94b   : > { %v1477_v19 = vmax.f32 %v1429_v58, %v5752_v35  ;;  %v1476_v5 = vmax.f32 %v1428_v27, %v5751_v40 }
 0x94d   : > { %v5808_v7 = vpack.i.bf16 %v1477_v19, %v1476_v5 }
 0x94f   : > { %5809 = vrot.lane.b32.xlu0 %v5808_v7, %s6054_s24 }
 0x953   : > { %v5755_v43 = vpop.permute.xlu1 %5754 }
 0x954   : > { %v5757_v49 = vunpack.i.h.bf16 %v5755_v43  ;;  %v5756_v32 = vunpack.i.l.bf16 %v5755_v43 }
 0x956   : > { %v2739_v56 = vmax.f32 %v2691_v31, %v5757_v49  ;;  %v2738_v41 = vmax.f32 %v2690_v29, %v5756_v32  ;;  %v5760_v55 = vpop.permute.xlu0 %5759  ;;  %v2692_v49 = vsel %vm380_vm9, %v10213_v18, 0.0  ;;  %v2693_v32 = vsel %vm380_vm9, %v10209_v0, 0.0 }
 0x957   : > { %v5765_v47 = vpop.permute.xlu1 %5764  ;;  %v5762_v14 = vunpack.i.h.bf16 %v5760_v55  ;;  %v5761_v8 = vunpack.i.l.bf16 %v5760_v55  ;;  %vm4231_vm9 = vcmask 1042434  }
 0x958   : > { %v5813_v10 = vpack.i.bf16 %v2739_v56, %v2738_v41  ;;  %v5767_v46 = vunpack.i.h.bf16 %v5765_v47  ;;  %v5766_v62 = vunpack.i.l.bf16 %v5765_v47 }
 0x959   : > { %v4003_v12 = vmax.f32 %v3955_v34, %v5762_v14  ;;  %v4002_v6 = vmax.f32 %v3954_v39, %v5761_v8 }
 0x95a   : > { %v1479_v28 = vmax.f32 %v1431_v45, %v5767_v46  ;;  %v1478_v63 = vmax.f32 %v1430_v21, %v5766_v62  ;;  %5814 = vrot.lane.b32.xlu1 %v5813_v10, %s6054_s24 }
 0x95b   : > { %v5818_v36 = vpack.i.bf16 %v4003_v12, %v4002_v6 }
 0x95c   : > { %v5823_v17 = vpack.i.bf16 %v1479_v28, %v1478_v63 }
 0x95d   : > { %5819 = vrot.lane.b32.xlu0 %v5818_v36, %s6054_s24 }
 0x95e   : > { %v5775_v35 = vpop.permute.xlu1 %5774  ;;  %5824 = vrot.lane.b32.xlu1 %v5823_v17, %s6054_s24 }
 0x95f   : > { %v5777_v33 = vunpack.i.h.bf16 %v5775_v35  ;;  %v5776_v40 = vunpack.i.l.bf16 %v5775_v35 }
 0x961   : > { %v4005_v27 = vmax.f32 %v3957_v11, %v5777_v33  ;;  %v4004_v58 = vmax.f32 %v3956_v61, %v5776_v40  ;;  %v1570_v61 = vld [vmem:[%s6175_s28 + $0x8] sm:$0xff] }
 0x963   : > { %v5770_v19 = vpop.permute.xlu0 %5769  ;;  %v5833_v5 = vpack.i.bf16 %v4005_v27, %v4004_v58 }
 0x964   : > { %v5772_v7 = vunpack.i.h.bf16 %v5770_v19  ;;  %v5771_v43 = vunpack.i.l.bf16 %v5770_v19  ;;  %v1569_v19 = vld [vmem:[%s6175_s28] sm:$0xff] }
 0x965   : > { %5834 = vrot.lane.b32.xlu1 %v5833_v5, %s6054_s24 }
 0x966   : > { %v2741_v29 = vmax.f32 %v2693_v32, %v5772_v7  ;;  %v2740_v52 = vmax.f32 %v2692_v49, %v5771_v43 }
 0x968   : > { %v5828_v31 = vpack.i.bf16 %v2741_v29, %v2740_v52  ;;  %v11150_v52 = vld [vmem:[#allocation14_spill] sm:$0xff] }
 0x96a   : > { %5829 = vrot.lane.b32.xlu0 %v5828_v31, %s6054_s24 }
 0x977   : > { %v5780_v38 = vpop.permute.xlu0 %5779 }
 0x978   : > { %v5782_v56 = vunpack.i.h.bf16 %v5780_v38  ;;  %v5781_v41 = vunpack.i.l.bf16 %v5780_v38  ;;  %v11151_v38 = vld [vmem:[#allocation13_spill] sm:$0xff] }
 0x97a   : > { %v1513_v55 = vmax.f32 %v9559_v20, %v5782_v56  ;;  %v1512_v47 = vmax.f32 %v9557_v60, %v5781_v41 }
 0x97c   : > { %v1521_v18 = vadd.f32 %v1513_v55, %v9536_v51  ;;  %v1520_v39 = vadd.f32 %v1512_v47, %v9539_v26 }
 0x97e   : > { %v1529_v48 = vsub.f32 6.0, %v1521_v18  ;;  %v1528_v0 = vsub.f32 6.0, %v1520_v39  ;;  %v5785_v14 = vpop.permute.xlu1 %5784 }
 0x97f   : > { %v5787_v8 = vunpack.i.h.bf16 %v5785_v14  ;;  %v5786_v10 = vunpack.i.l.bf16 %v5785_v14 }
 0x980   : > { %v1538_v46 = vmul.f32 0.16666667, %v1529_v48  ;;  %v1537_v62 = vmul.f32 0.16666667, %v1528_v0 }
 0x981   : > { %v1515_v34 = vmax.f32 %v9590_v15, %v5787_v8  ;;  %v1514_v21 = vmax.f32 %v9588_v13, %v5786_v10  ;;  %v1572_v8 = vld [vmem:[%s6175_s28 + $0x18] sm:$0xff] }
 0x982   : > { %v1546_v45 = vmul.f32 5.0, %v1538_v46  ;;  %v1545_v12 = vmul.f32 5.0, %v1537_v62 }
 0x983   : > { %v1523_v20 = vadd.f32 %v1515_v34, %v9566_v59  ;;  %v1522_v60 = vadd.f32 %v1514_v21, %v9569_v1  ;;  %v1571_v21 = vld [vmem:[%s6175_s28 + $0x10] sm:$0xff] }
 0x984   : > { %5838 = vtanh.f32 %v1546_v45 }
 0x985   : > { %5840 = vtanh.f32 %v1545_v12  ;;  %v1531_v51 = vsub.f32 6.0, %v1523_v20  ;;  %v1530_v26 = vsub.f32 6.0, %v1522_v60 }
 0x987   : > { %v1540_v6 = vmul.f32 0.16666667, %v1531_v51  ;;  %v1539_v28 = vmul.f32 0.16666667, %v1530_v26 }
 0x989   : > { %v1548_v63 = vmul.f32 5.0, %v1540_v6  ;;  %v1547_v36 = vmul.f32 5.0, %v1539_v28 }
 0x98b   : > { %5842 = vtanh.f32 %v1548_v63 }
 0x98c   : > { %v5795_v17 = vpop.permute.xlu1 %5794  ;;  %5844 = vtanh.f32 %v1547_v36 }
 0x98d   : > { %v5797_v15 = vunpack.i.h.bf16 %v5795_v17  ;;  %v5796_v13 = vunpack.i.l.bf16 %v5795_v17  ;;  %v11153_v17 = vld [vmem:[#allocation11_spill] sm:$0xff] }
 0x98f   : > { %v2777_v35 = vmax.f32 %v9621_v22, %v5797_v15  ;;  %v2776_v59 = vmax.f32 %v9619_v3, %v5796_v13 }
 0x991   : > { %v2785_v1 = vadd.f32 %v2777_v35, %v9601_v16  ;;  %v2784_v33 = vadd.f32 %v2776_v59, %v9598_v23  ;;  %v5839_v40 = vpop.eup %5838 }
 0x992   : > { %v5841_v58 = vpop.eup %5840  ;;  %v1562_v5 = vsub.f32 1.0, %v5839_v40 }
 0x993   : > { %v2793_v11 = vsub.f32 6.0, %v2785_v1  ;;  %v2792_v27 = vsub.f32 6.0, %v2784_v33  ;;  %v1561_v43 = vsub.f32 1.0, %v5841_v58 }
 0x994   : > { %v5790_v7 = vpop.permute.xlu0 %5789  ;;  %v1578_v22 = vmul.f32 %v1570_v61, %v1562_v5  ;;  %v1637_v3 = vmul.f32 %v11150_v52, %v1562_v5 }
 0x995   : > { %v2801_v49 = vmul.f32 0.16666667, %v2793_v11  ;;  %v2800_v32 = vmul.f32 0.16666667, %v2792_v27  ;;  %v5792_v29 = vunpack.i.h.bf16 %v5790_v7  ;;  %v5791_v31 = vunpack.i.l.bf16 %v5790_v7 }
 0x996   : > { %v1577_v16 = vmul.f32 %v1569_v19, %v1561_v43  ;;  %v1636_v23 = vmul.f32 %v11151_v38, %v1561_v43  ;;  %v1588_v55 = vmul.f32 %v11150_v52, %v1578_v22  ;;  %v1623_v18 = vsel %vm305_vm11, %v1578_v22, 0.0 }
 0x997   : > { %v2809_v56 = vmul.f32 5.0, %v2801_v49  ;;  %v2808_v41 = vmul.f32 5.0, %v2800_v32  ;;  %v2775_v47 = vmax.f32 %v9652_v50, %v5792_v29  ;;  %v1651_v0 = vsel %vm305_vm11, %v1637_v3, 0.0 }
 0x998   : > { %v1587_v39 = vmul.f32 %v11151_v38, %v1577_v16  ;;  %v5843_v48 = vpop.eup %5842  ;;  %v1616_v14 = vsel %vm305_vm11, %v1577_v16, 0.0  ;;  %v2774_v46 = vmax.f32 %v9650_v57, %v5791_v31  ;;  %v1603_v34 = vsel %vm305_vm11, %v1588_v55, 0.0 }
 0x999   : > { %5846 = vtanh.f32 %v2809_v56  ;;  %v2783_v10 = vadd.f32 %v2775_v47, %v9631_v30  ;;  %v5845_v62 = vpop.eup %5844  ;;  %v1644_v50 = vsel %vm305_vm11, %v1636_v23, 0.0  ;;  %v1564_v45 = vsub.f32 1.0, %v5843_v48  ;;  %v11152_v30 = vld [vmem:[#allocation12_spill] sm:$0xff] }
 0x99a   : > { %5848 = vtanh.f32 %v2808_v41  ;;  %v1563_v20 = vsub.f32 1.0, %v5845_v62  ;;  %v2782_v51 = vadd.f32 %v2774_v46, %v9628_v53  ;;  %v1596_v6 = vsel %vm305_vm11, %v1587_v39, 0.0  ;;  %v11154_v62 = vld [vmem:[#allocation78_spill] sm:$0xff] }
 0x99b   : > { %v5800_v12 = vpop.permute.xlu0 %5799  ;;  %v2791_v60 = vsub.f32 6.0, %v2783_v10  ;;  %v1580_v28 = vmul.f32 %v1572_v8, %v1564_v45  ;;  %v1639_v63 = vmul.f32 %v11152_v30, %v1564_v45  ;;  %v4533_v10 = vld [vmem:[%s6175_s28 + $0x50] sm:$0xff]  ;;  %v11156_v45 = vld [vmem:[#allocation18_spill] sm:$0xff] }
 0x99c   : > { %v5802_v26 = vunpack.i.h.bf16 %v5800_v12  ;;  %v5801_v57 = vunpack.i.l.bf16 %v5800_v12  ;;  %v1579_v36 = vmul.f32 %v1571_v21, %v1563_v20  ;;  %v1638_v15 = vmul.f32 %v11153_v17, %v1563_v20 }
 0x99d   : > { %v2799_v13 = vmul.f32 0.16666667, %v2791_v60  ;;  %v2790_v35 = vsub.f32 6.0, %v2782_v51  ;;  %v1590_v59 = vmul.f32 %v11152_v30, %v1580_v28  ;;  %v1624_v1 = vsel %vm305_vm11, %v1580_v28, 0.0  ;;  %v4532_v28 = vld [vmem:[%s6175_s28 + $0x48] sm:$0xff] }
 0x99e   : > { %v1652_v33 = vsel %vm305_vm11, %v1639_v63, 0.0  ;;  %v4039_v53 = vmax.f32 %v9683_v2, %v5802_v26  ;;  %v1589_v40 = vmul.f32 %v11153_v17, %v1579_v36  ;;  %v1617_v61 = vsel %vm305_vm11, %v1579_v36, 0.0  ;;  %v11157_v26 = vld [vmem:[#allocation17_spill] sm:$0xff] }
 0x99f   : > { %v10345_v11 = vadd.f32 %v1624_v1, %v1623_v18  ;;  %v1645_v27 = vsel %vm305_vm11, %v1638_v15, 0.0  ;;  %v1604_v58 = vsel %vm305_vm11, %v1590_v59, 0.0  ;;  %v10349_v19 = vadd.f32 %v1617_v61, %v1616_v14 }
 0x9a0   : > { %v10351_v5 = vadd.f32 %v1645_v27, %v1644_v50  ;;  %v10353_v7 = vadd.f32 %v1652_v33, %v1651_v0  ;;  %v1597_v43 = vsel %vm305_vm11, %v1589_v40, 0.0  ;;  %v10356_v49 = vadd.f32 %v1604_v58, %v1603_v34  ;;  %v4534_v0 = vld [vmem:[%s6175_s28 + $0x58] sm:$0xff]  ;;  %v11155_v50 = vld [vmem:[#allocation56_spill] sm:$0xff] }
 0x9a1   : > { %v2807_v2 = vmul.f32 5.0, %v2799_v13  ;;  %v2798_v32 = vmul.f32 0.16666667, %v2790_v35  ;;  %v10358_v29 = vadd.f32 %v1597_v43, %v1596_v6  ;;  %v4047_v22 = vadd.f32 %v4039_v53, %v9662_v54  ;;  %v4531_v13 = vld [vmem:[%s6175_s28 + $0x40] sm:$0xff]  ;;  %v11158_v53 = vld [vmem:[#allocation16_spill] sm:$0xff] }
 0x9a2   : > { %v4038_v52 = vmax.f32 %v9681_v4, %v5801_v57 }
 0x9a3   : > { %5850 = vtanh.f32 %v2807_v2  ;;  %v2806_v3 = vmul.f32 5.0, %v2798_v32  ;;  %v4055_v31 = vsub.f32 6.0, %v4047_v22 }
 0x9a4   : > { %v4046_v16 = vadd.f32 %v4038_v52, %v9659_v24 }
 0x9a5   : > { %5852 = vtanh.f32 %v2806_v3  ;;  %v4063_v23 = vmul.f32 0.16666667, %v4055_v31 }
 0x9a6   : > { %v5847_v38 = vpop.eup %5846  ;;  %v4054_v56 = vsub.f32 6.0, %v4046_v16  ;;  %v11159_v16 = vld [vmem:[#allocation15_spill] sm:$0xff] }
 0x9a7   : > { %v5849_v55 = vpop.eup %5848  ;;  %v2825_v39 = vsub.f32 1.0, %v5847_v38  ;;  %v4071_v48 = vmul.f32 5.0, %v4063_v23 }
 0x9a8   : > { %v4062_v54 = vmul.f32 0.16666667, %v4054_v56  ;;  %v2824_v24 = vsub.f32 1.0, %v5849_v55 }
 0x9a9   : > { %5854 = vtanh.f32 %v4071_v48  ;;  %v2842_v46 = vmul.f32 %v4534_v0, %v2825_v39  ;;  %v2903_v12 = vmul.f32 %v11156_v45, %v2825_v39 }
 0x9aa   : > { %v4070_v8 = vmul.f32 5.0, %v4062_v54  ;;  %v2841_v51 = vmul.f32 %v4533_v10, %v2824_v24  ;;  %v2902_v6 = vmul.f32 %v11157_v26, %v2824_v24  ;;  %v4556_v54 = vld [vmem:[%s6175_s28 + $0x88] sm:$0xff]  ;;  %v4555_v10 = vld [vmem:[%s6175_s28 + $0x80] sm:$0xff] }
 0x9ab   : > { %v5805_v41 = vpop.permute.xlu1 %5804  ;;  %v2887_v17 = vsel %vm305_vm11, %v2842_v46, 0.0  ;;  %v2916_v15 = vsel %vm305_vm11, %v2903_v12, 0.0 }
 0x9ac   : > { %v5807_v47 = vunpack.i.h.bf16 %v5805_v41  ;;  %v5806_v18 = vunpack.i.l.bf16 %v5805_v41  ;;  %5856 = vtanh.f32 %v4070_v8  ;;  %v2852_v1 = vmul.f32 %v11157_v26, %v2841_v51 }
 0x9ad   : > { %v2880_v58 = vsel %vm305_vm11, %v2841_v51, 0.0  ;;  %v2909_v43 = vsel %vm305_vm11, %v2902_v6, 0.0  ;;  %v11161_v6 = vld [vmem:[#allocation19_spill] sm:$0xff] }
 0x9ae   : > { %v4041_v4 = vmax.f32 %v9714_v42, %v5807_v47  ;;  %v4040_v14 = vmax.f32 %v9712_v9, %v5806_v18  ;;  %v2853_v9 = vmul.f32 %v11156_v45, %v2842_v46  ;;  %v2859_v56 = vsel %vm305_vm11, %v2852_v1, 0.0 }
 0x9b0   : > { %v4049_v34 = vadd.f32 %v4041_v4, %v11154_v62  ;;  %v4048_v21 = vadd.f32 %v4040_v14, %v11155_v50  ;;  %v5851_v42 = vpop.eup %5850  ;;  %v2866_v27 = vsel %vm305_vm11, %v2853_v9, 0.0 }
 0x9b1   : > { %v2823_v57 = vsub.f32 1.0, %v5851_v42 }
 0x9b2   : > { %v4057_v20 = vsub.f32 6.0, %v4049_v34  ;;  %v4056_v60 = vsub.f32 6.0, %v4048_v21  ;;  %v5853_v36 = vpop.eup %5852 }
 0x9b3   : > { %v2840_v33 = vmul.f32 %v4532_v28, %v2823_v57  ;;  %v2901_v40 = vmul.f32 %v11158_v53, %v2823_v57  ;;  %v2822_v61 = vsub.f32 1.0, %v5853_v36  ;;  %v11162_v57 = vld [vmem:[#allocation55_spill] sm:$0xff] }
 0x9b4   : > { %v4065_v30 = vmul.f32 0.16666667, %v4057_v20  ;;  %v4064_v63 = vmul.f32 0.16666667, %v4056_v60  ;;  %v11160_v20 = vld [vmem:[#allocation20_spill] sm:$0xff] }
 0x9b5   : > { %v2851_v2 = vmul.f32 %v11158_v53, %v2840_v33  ;;  %v2886_v32 = vsel %vm305_vm11, %v2840_v33, 0.0  ;;  %v2915_v22 = vsel %vm305_vm11, %v2901_v40, 0.0  ;;  %v2839_v52 = vmul.f32 %v4531_v13, %v2822_v61  ;;  %v11163_v33 = vld [vmem:[#allocation22_spill] sm:$0xff] }
 0x9b6   : > { %v4073_v35 = vmul.f32 5.0, %v4065_v30  ;;  %v4072_v59 = vmul.f32 5.0, %v4064_v63  ;;  %v10384_v3 = vadd.f32 %v2887_v17, %v2886_v32  ;;  %v10386_v31 = vadd.f32 %v2916_v15, %v2915_v22  ;;  %v5855_v23 = vpop.eup %5854  ;;  %v4558_v63 = vld [vmem:[%s6175_s28 + $0x98] sm:$0xff] }
 0x9b7   : > { %v2900_v38 = vmul.f32 %v11159_v16, %v2822_v61  ;;  %v2865_v41 = vsel %vm305_vm11, %v2851_v2, 0.0  ;;  %v2850_v55 = vmul.f32 %v11159_v16, %v2839_v52  ;;  %v2879_v47 = vsel %vm305_vm11, %v2839_v52, 0.0 }
 0x9b8   : > { %5858 = vtanh.f32 %v4073_v35  ;;  %v10393_v18 = vadd.f32 %v2866_v27, %v2865_v41  ;;  %v10395_v39 = vadd.f32 %v2880_v58, %v2879_v47  ;;  %v4087_v0 = vsub.f32 1.0, %v5855_v23 }
 0x9b9   : > { %5860 = vtanh.f32 %v4072_v59  ;;  %v2908_v48 = vsel %vm305_vm11, %v2900_v38, 0.0  ;;  %v2858_v4 = vsel %vm305_vm11, %v2850_v55, 0.0  ;;  %v5857_v24 = vpop.eup %5856 }
 0x9ba   : > { %v10400_v14 = vadd.f32 %v2909_v43, %v2908_v48  ;;  %v10402_v8 = vadd.f32 %v2859_v56, %v2858_v4  ;;  %v4104_v46 = vmul.f32 %v4556_v54, %v4087_v0  ;;  %v4086_v62 = vsub.f32 1.0, %v5857_v24  ;;  %v11164_v56 = vld [vmem:[#allocation21_spill] sm:$0xff] }
 0x9bb   : > { %v4165_v51 = vmul.f32 %v11160_v20, %v4087_v0 }
 0x9bc   : > { %v4103_v21 = vmul.f32 %v4555_v10, %v4086_v62  ;;  %v4115_v60 = vmul.f32 %v11160_v20, %v4104_v46  ;;  %v4164_v30 = vmul.f32 %v11161_v6, %v4086_v62  ;;  %v4150_v35 = vsel %vm305_vm11, %v4104_v46, 0.0 }
 0x9bd   : > { %v4179_v59 = vsel %vm305_vm11, %v4165_v51, 0.0 }
 0x9be   : > { %v4114_v28 = vmul.f32 %v11161_v6, %v4103_v21  ;;  %v4129_v13 = vsel %vm305_vm11, %v4115_v60, 0.0  ;;  %v4143_v58 = vsel %vm305_vm11, %v4103_v21, 0.0  ;;  %v4172_v43 = vsel %vm305_vm11, %v4164_v30, 0.0 }
 0x9c0   : > { %v4122_v27 = vsel %vm305_vm11, %v4114_v28, 0.0  ;;  %v11166_v28 = vld [vmem:[#allocation61_spill] sm:$0xff] }
 0x9c1   : > { %v5810_v34 = vpop.permute.xlu0 %5809 }
 0x9c2   : > { %v5812_v50 = vunpack.i.h.bf16 %v5810_v34  ;;  %v5811_v45 = vunpack.i.l.bf16 %v5810_v34 }
 0x9c4   : > { %v1517_v12 = vmax.f32 %v9766_v44, %v5812_v50  ;;  %v1516_v42 = vmax.f32 %v9763_v25, %v5811_v45  ;;  %v4557_v25 = vld [vmem:[%s6175_s28 + $0x90] sm:$0xff] }
 0x9c5   : > { %v5859_v26 = vpop.eup %5858 }
 0x9c6   : > { %v1525_v9 = vadd.f32 %v1517_v12, %v9861_v37  ;;  %v1524_v36 = vadd.f32 %v1516_v42, %v11162_v57  ;;  %v4089_v17 = vsub.f32 1.0, %v5859_v26  ;;  %v5861_v44 = vpop.eup %5860  ;;  %v11165_v42 = vld [vmem:[#allocation57_spill] sm:$0xff] }
 0x9c7   : > { %v4088_v40 = vsub.f32 1.0, %v5861_v44 }
 0x9c8   : > { %v1533_v15 = vsub.f32 6.0, %v1525_v9  ;;  %v1532_v1 = vsub.f32 6.0, %v1524_v36  ;;  %v4106_v37 = vmul.f32 %v4558_v63, %v4089_v17  ;;  %v4167_v53 = vmul.f32 %v11163_v33, %v4089_v17  ;;  %v11167_v63 = vld [vmem:[#allocation76_spill] sm:$0xff]  ;;  %v11168_v36 = vld [vmem:[#allocation77_spill] sm:$0xff] }
 0x9c9   : > { %v4105_v16 = vmul.f32 %v4557_v25, %v4088_v40  ;;  %v4166_v41 = vmul.f32 %v11164_v56, %v4088_v40  ;;  %v11174_v40 = vld [vmem:[#allocation64_spill] sm:$0xff] }
 0x9ca   : > { %v1542_v61 = vmul.f32 0.16666667, %v1533_v15  ;;  %v1541_v2 = vmul.f32 0.16666667, %v1532_v1  ;;  %v4117_v32 = vmul.f32 %v11163_v33, %v4106_v37  ;;  %v4151_v22 = vsel %vm305_vm11, %v4106_v37, 0.0  ;;  %v11169_v15 = vld [vmem:[#allocation60_spill] sm:$0xff] }
 0x9cb   : > { %v4180_v52 = vsel %vm305_vm11, %v4167_v53, 0.0  ;;  %v10425_v23 = vadd.f32 %v4151_v22, %v4150_v35  ;;  %v4116_v54 = vmul.f32 %v11164_v56, %v4105_v16  ;;  %v4144_v0 = vsel %vm305_vm11, %v4105_v16, 0.0  ;;  %v11172_v1 = vld [vmem:[#allocation63_spill] sm:$0xff] }
 0x9cc   : > { %v5815_v38 = vpop.permute.xlu1 %5814  ;;  %v10428_v55 = vadd.f32 %v4180_v52, %v4179_v59  ;;  %v1550_v47 = vmul.f32 5.0, %v1542_v61  ;;  %v4130_v48 = vsel %vm305_vm11, %v4117_v32, 0.0  ;;  %v1549_v4 = vmul.f32 5.0, %v1541_v2  ;;  %v11171_v59 = vld [vmem:[#allocation62_spill] sm:$0xff]  ;;  %v11173_v33 = vld [vmem:[#allocation59_spill] sm:$0xff]  ;;  %v11176_v2 = vld [vmem:[#allocation85_spill] sm:$0xff] }
 0x9cd   : > { %v10433_v24 = vadd.f32 %v4130_v48, %v4129_v13  ;;  %v10435_v10 = vadd.f32 %v4144_v0, %v4143_v58  ;;  %v4173_v46 = vsel %vm305_vm11, %v4166_v41, 0.0  ;;  %v4123_v34 = vsel %vm305_vm11, %v4116_v54, 0.0  ;;  %v11170_v13 = vld [vmem:[#allocation58_spill] sm:$0xff]  ;;  %v11175_v58 = vld [vmem:[#allocation84_spill] sm:$0xff] }
 0x9ce   : > { %5862 = vtanh.f32 %v1550_v47  ;;  %v10439_v50 = vadd.f32 %v4173_v46, %v4172_v43  ;;  %v5817_v21 = vunpack.i.h.bf16 %v5815_v38  ;;  %v10441_v12 = vadd.f32 %v4123_v34, %v4122_v27 }
 0x9cf   : > { %v5820_v62 = vpop.permute.xlu0 %5819  ;;  %5864 = vtanh.f32 %v1549_v4  ;;  %v5816_v20 = vunpack.i.l.bf16 %v5815_v38 }
 0x9d0   : > { %v5825_v45 = vpop.permute.xlu1 %5824  ;;  %v2779_v9 = vmax.f32 %v11165_v42, %v5817_v21  ;;  %v5822_v26 = vunpack.i.h.bf16 %v5820_v62  ;;  %v5821_v6 = vunpack.i.l.bf16 %v5820_v62 }
 0x9d1   : > { %v5827_v60 = vunpack.i.h.bf16 %v5825_v45  ;;  %v5826_v51 = vunpack.i.l.bf16 %v5825_v45  ;;  %v2778_v30 = vmax.f32 %v11166_v28, %v5816_v20  ;;  %v11177_v45 = vld [vmem:[#allocation80_spill] sm:$0xff] }
 0x9d2   : > { %v2787_v44 = vadd.f32 %v2779_v9, %v11169_v15  ;;  %v4043_v35 = vmax.f32 %v11170_v13, %v5822_v26  ;;  %v4042_v25 = vmax.f32 %v11171_v59, %v5821_v6  ;;  %v11178_v9 = vld [vmem:[#allocation81_spill] sm:$0xff] }
 0x9d3   : > { %v1519_v57 = vmax.f32 %v11167_v63, %v5827_v60  ;;  %v1518_v17 = vmax.f32 %v11168_v36, %v5826_v51  ;;  %v2786_v37 = vadd.f32 %v2778_v30, %v11172_v1  ;;  %v1574_v30 = vld [vmem:[%s6175_s28 + $0x28] sm:$0xff]  ;;  %v11179_v36 = vld [vmem:[#allocation82_spill] sm:$0xff] }
 0x9d4   : > { %v2795_v27 = vsub.f32 6.0, %v2787_v44  ;;  %v4051_v43 = vadd.f32 %v4043_v35, %v11175_v58  ;;  %v4050_v32 = vadd.f32 %v4042_v25, %v11176_v2  ;;  %v1573_v44 = vld [vmem:[%s6175_s28 + $0x20] sm:$0xff] }
 0x9d5   : > { %v1527_v53 = vadd.f32 %v1519_v57, %v11173_v33  ;;  %v1526_v61 = vadd.f32 %v1518_v17, %v11174_v40  ;;  %v2794_v22 = vsub.f32 6.0, %v2786_v37  ;;  %v11180_v35 = vld [vmem:[#allocation83_spill] sm:$0xff]  ;;  %v11181_v40 = vld [vmem:[#allocation24_spill] sm:$0xff] }
 0x9d6   : > { %v2803_v56 = vmul.f32 0.16666667, %v2795_v27  ;;  %v4059_v41 = vsub.f32 6.0, %v4051_v43  ;;  %v4058_v47 = vsub.f32 6.0, %v4050_v32  ;;  %v11182_v43 = vld [vmem:[#allocation23_spill] sm:$0xff] }
 0x9d7   : > { %v1535_v52 = vsub.f32 6.0, %v1527_v53  ;;  %v1534_v16 = vsub.f32 6.0, %v1526_v61  ;;  %v5835_v38 = vpop.permute.xlu1 %5834  ;;  %v2802_v54 = vmul.f32 0.16666667, %v2794_v22 }
 0x9d8   : > { %v5837_v48 = vunpack.i.h.bf16 %v5835_v38  ;;  %v5836_v46 = vunpack.i.l.bf16 %v5835_v38  ;;  %v2811_v62 = vmul.f32 5.0, %v2803_v56  ;;  %v4067_v34 = vmul.f32 0.16666667, %v4059_v41 }
 0x9d9   : > { %v1544_v0 = vmul.f32 0.16666667, %v1535_v52  ;;  %v1543_v4 = vmul.f32 0.16666667, %v1534_v16  ;;  %v4066_v21 = vmul.f32 0.16666667, %v4058_v47 }
 0x9da   : > { %v4045_v20 = vmax.f32 %v11177_v45, %v5837_v48  ;;  %v2810_v60 = vmul.f32 5.0, %v2802_v54  ;;  %v4044_v26 = vmax.f32 %v11178_v9, %v5836_v46  ;;  %5866 = vtanh.f32 %v2811_v62  ;;  %v11186_v9 = vld [vmem:[#allocation86_spill] sm:$0xff] }
 0x9db   : > { %v1552_v51 = vmul.f32 5.0, %v1544_v0  ;;  %v1551_v42 = vmul.f32 5.0, %v1543_v4  ;;  %v5863_v28 = vpop.eup %5862  ;;  %v4075_v63 = vmul.f32 5.0, %v4067_v34  ;;  %v4074_v57 = vmul.f32 5.0, %v4066_v21  ;;  %v11183_v21 = vld [vmem:[#allocation67_spill] sm:$0xff] }
 0x9dc   : > { %v5830_v6 = vpop.permute.xlu0 %5829  ;;  %v4053_v17 = vadd.f32 %v4045_v20, %v11179_v36  ;;  %v5865_v15 = vpop.eup %5864  ;;  %v1566_v13 = vsub.f32 1.0, %v5863_v28  ;;  %5868 = vtanh.f32 %v2810_v60  ;;  %v4052_v59 = vadd.f32 %v4044_v26, %v11180_v35  ;;  %v1576_v36 = vld [vmem:[%s6175_s28 + $0x38] sm:$0xff] }
 0x9dd   : > { %v5832_v25 = vunpack.i.h.bf16 %v5830_v6  ;;  %v1565_v1 = vsub.f32 1.0, %v5865_v15  ;;  %5870 = vtanh.f32 %v1552_v51  ;;  %v5831_v33 = vunpack.i.l.bf16 %v5830_v6  ;;  %v11185_v51 = vld [vmem:[#allocation88_spill] sm:$0xff] }
 0x9de   : > { %v4061_v37 = vsub.f32 6.0, %v4053_v17  ;;  %v1582_v53 = vmul.f32 %v1574_v30, %v1566_v13  ;;  %v1641_v61 = vmul.f32 %v11181_v40, %v1566_v13  ;;  %5872 = vtanh.f32 %v1551_v42  ;;  %v4536_v6 = vld [vmem:[%s6175_s28 + $0x68] sm:$0xff]  ;;  %v4535_v30 = vld [vmem:[%s6175_s28 + $0x60] sm:$0xff]  ;;  %v11187_v13 = vld [vmem:[#allocation26_spill] sm:$0xff] }
 0x9df   : > { %v4060_v27 = vsub.f32 6.0, %v4052_v59  ;;  %v1581_v58 = vmul.f32 %v1573_v44, %v1565_v1  ;;  %v1640_v2 = vmul.f32 %v11182_v43, %v1565_v1  ;;  %5874 = vtanh.f32 %v4075_v63 }
 0x9e0   : > { %v4069_v32 = vmul.f32 0.16666667, %v4061_v37  ;;  %v1592_v22 = vmul.f32 %v11181_v40, %v1582_v53  ;;  %v1626_v52 = vsel %vm305_vm11, %v1582_v53, 0.0  ;;  %v1654_v16 = vsel %vm305_vm11, %v1641_v61, 0.0 }
 0x9e1   : > { %5876 = vtanh.f32 %v4074_v57  ;;  %v1591_v38 = vmul.f32 %v11182_v43, %v1581_v58  ;;  %v1619_v56 = vsel %vm305_vm11, %v1581_v58, 0.0  ;;  %v1627_v41 = vadd.f32 %v1626_v52, %v10345_v11 }
 0x9e2   : > { %v1647_v47 = vsel %vm305_vm11, %v1640_v2, 0.0  ;;  %v1606_v48 = vsel %vm305_vm11, %v1592_v22, 0.0  ;;  %v10472_v54 = vadd.f32 %v1619_v56, %v10349_v19  ;;  %v10478_v4 = vadd.f32 %v1654_v16, %v10353_v7  ;;  %v11184_v19 = vld [vmem:[#allocation87_spill] sm:$0xff]  ;;  %v1575_v56 = vld [vmem:[%s6175_s28 + $0x30] sm:$0xff] }
 0x9e3   : > { %v10475_v0 = vadd.f32 %v1647_v47, %v10351_v5  ;;  %v1599_v46 = vsel %vm305_vm11, %v1591_v38, 0.0  ;;  %v1607_v62 = vadd.f32 %v1606_v48, %v10356_v49  ;;  %v4068_v11 = vmul.f32 0.16666667, %v4060_v27 }
 0x9e4   : > { %v10483_v34 = vadd.f32 %v1599_v46, %v10358_v29  ;;  %v2781_v45 = vmax.f32 %v11183_v21, %v5832_v25  ;;  %v2780_v20 = vmax.f32 %v11184_v19, %v5831_v33  ;;  %v4077_v60 = vmul.f32 5.0, %v4069_v32  ;;  %v11188_v33 = vld [vmem:[#allocation25_spill] sm:$0xff] }
 0x9e5   : > { %v4076_v5 = vmul.f32 5.0, %v4068_v11 }
 0x9e6   : > { %v2789_v42 = vadd.f32 %v2781_v45, %v11185_v51  ;;  %v10489_v7 = vadd.f32 %v2780_v20, %v11186_v9  ;;  %5878 = vtanh.f32 %v4077_v60  ;;  %v11189_v45 = vld [vmem:[#allocation30_spill] sm:$0xff]  ;;  %v11190_v9 = vld [vmem:[#allocation29_spill] sm:$0xff] }
 0x9e7   : > { %v5867_v26 = vpop.eup %5866  ;;  %5880 = vtanh.f32 %v4076_v5 }
 0x9e8   : > { %v2797_v28 = vsub.f32 6.0, %v2789_v42  ;;  %v2827_v63 = vsub.f32 1.0, %v5867_v26  ;;  %v2796_v25 = vsub.f32 6.0, %v10489_v7  ;;  %v1586_v42 = vld [vmem:[#allocation2 + $0x8] sm:$0xff] }
 0x9e9   : > { %v5869_v49 = vpop.eup %5868 }
 0x9ea   : > { %v5871_v29 = vpop.eup %5870  ;;  %v2826_v57 = vsub.f32 1.0, %v5869_v49  ;;  %v2805_v17 = vmul.f32 0.16666667, %v2797_v28  ;;  %v2844_v44 = vmul.f32 %v4536_v6, %v2827_v63  ;;  %v2905_v35 = vmul.f32 %v11187_v13, %v2827_v63  ;;  %v1614_v63 = vld [vmem:[#allocation3] sm:$0xff] }
 0x9eb   : > { %v5873_v15 = vpop.eup %5872  ;;  %v1568_v59 = vsub.f32 1.0, %v5871_v29 }
 0x9ec   : > { %v5875_v1 = vpop.eup %5874  ;;  %v2843_v37 = vmul.f32 %v4535_v30, %v2826_v57  ;;  %v2904_v53 = vmul.f32 %v11188_v33, %v2826_v57  ;;  %v1567_v40 = vsub.f32 1.0, %v5873_v15  ;;  %v10497_v61 = vmul.f32 5.0, %v2805_v17  ;;  %v1635_v57 = vld [vmem:[#allocation4 + $0x8] sm:$0xff]  ;;  %v1634_v17 = vld [vmem:[#allocation4] sm:$0xff] }
 0x9ed   : > { %v2855_v58 = vmul.f32 %v11187_v13, %v2844_v44  ;;  %v2889_v43 = vsel %vm305_vm11, %v2844_v44, 0.0  ;;  %v2918_v2 = vsel %vm305_vm11, %v2905_v35, 0.0  ;;  %v1584_v32 = vmul.f32 %v1576_v36, %v1568_v59  ;;  %v4559_v13 = vld [vmem:[%s6175_s28 + $0xa0] sm:$0xff]  ;;  %v1585_v35 = vld [vmem:[#allocation2] sm:$0xff] }
 0x9ee   : > { %v10499_v27 = vpop.eup %5876  ;;  %v2854_v22 = vmul.f32 %v11188_v33, %v2843_v37  ;;  %v2882_v52 = vsel %vm305_vm11, %v2843_v37, 0.0  ;;  %v10507_v16 = vadd.f32 %v2889_v43, %v10384_v3  ;;  %v2911_v38 = vsel %vm305_vm11, %v2904_v53, 0.0 }
 0x9ef   : > { %v2868_v47 = vsel %vm305_vm11, %v2855_v58, 0.0  ;;  %v10513_v48 = vadd.f32 %v2882_v52, %v10395_v39  ;;  %v10516_v46 = vadd.f32 %v2911_v38, %v10400_v14  ;;  %v10519_v11 = vadd.f32 %v2918_v2, %v10386_v31  ;;  %v1615_v14 = vld [vmem:[#allocation3 + $0x8] sm:$0xff]  ;;  %v11192_v38 = vld [vmem:[#allocation27_spill] sm:$0xff] }
 0x9f0   : > { %v2861_v21 = vsel %vm305_vm11, %v2854_v22, 0.0  ;;  %v10523_v3 = vadd.f32 %v2868_v47, %v10393_v18  ;;  %v1594_v19 = vmul.f32 %v11189_v45, %v1584_v32  ;;  %v1628_v20 = vsel %vm305_vm11, %v1584_v32, 0.0  ;;  %v4560_v18 = vld [vmem:[%s6175_s28 + $0xa8] sm:$0xff] }
 0x9f1   : > { %v10528_v60 = vadd.f32 %v2861_v21, %v10402_v8  ;;  %v1643_v39 = vmul.f32 %v11189_v45, %v1568_v59  ;;  %v1583_v5 = vmul.f32 %v1575_v56, %v1567_v40  ;;  %v1629_v51 = vadd.f32 %v1628_v20, %v1627_v41  ;;  %v4562_v20 = vld [vmem:[%s6175_s28 + $0xb8] sm:$0xff] }
 0x9f2   : > { %v1608_v31 = vsel %vm305_vm11, %v1594_v19, 0.0  ;;  %v1642_v26 = vmul.f32 %v11190_v9, %v1567_v40  ;;  %v4091_v6 = vsub.f32 1.0, %v5875_v1  ;;  %v4090_v28 = vsub.f32 1.0, %v10499_v27  ;;  %v11191_v27 = vld [vmem:[#allocation28_spill] sm:$0xff] }
 0x9f3   : > { %v1656_v49 = vsel %vm305_vm11, %v1643_v39, 0.0  ;;  %v1593_v8 = vmul.f32 %v11190_v9, %v1583_v5  ;;  %v1609_v30 = vadd.f32 %v1608_v31, %v1607_v62  ;;  %v1621_v29 = vsel %vm305_vm11, %v1583_v5, 0.0  ;;  %v5879_v33 = vpop.eup %5878 }
 0x9f4   : > { %v1622_v41 = vadd.f32 %v1621_v29, %v10472_v54  ;;  %v1631_v36 = vadd.f32 %v1629_v51, %v1615_v14  ;;  %v1649_v15 = vsel %vm305_vm11, %v1642_v26, 0.0  ;;  %v1657_v44 = vadd.f32 %v1656_v49, %v10478_v4  ;;  %v5881_v43 = vpop.eup %5880  ;;  %v4561_v14 = vld [vmem:[%s6175_s28 + $0xb0] sm:$0xff] }
 0x9f5   : > { %v1601_v59 = vsel %vm305_vm11, %v1593_v8, 0.0  ;;  %v1611_v1 = vadd.f32 %v1609_v30, %v1586_v42  ;;  %v1650_v37 = vadd.f32 %v1649_v15, %v10475_v0  ;;  %v4108_v62 = vmul.f32 %v4560_v18, %v4091_v6  ;;  %v11193_v18 = vld [vmem:[#allocation34_spill] sm:$0xff]  ;;  %v11194_v8 = vld [vmem:[#allocation33_spill] sm:$0xff] }
 0x9f6   : > { %v1602_v53 = vadd.f32 %v1601_v59, %v10483_v34  ;;  %v1630_v40 = vadd.f32 %v1622_v41, %v1614_v63  ;;  %1633 = vst.msk [vmem:[#allocation3 + $0x8] sm:$0xff] %vm305_vm11, %v1631_v36  ;;  %v1659_v54 = vadd.f32 %v1657_v44, %v1635_v57  ;;  %v4169_v58 = vmul.f32 %v11191_v27, %v4091_v6  ;;  %v4141_v63 = vld [vmem:[#allocation3 + $0x20] sm:$0xff]  ;;  %v4142_v57 = vld [vmem:[#allocation3 + $0x28] sm:$0xff] }
 0x9f7   : > { %1613 = vst.msk [vmem:[#allocation2 + $0x8] sm:$0xff] %vm305_vm11, %v1611_v1  ;;  %v1658_v4 = vadd.f32 %v1650_v37, %v1634_v17  ;;  %v4119_v2 = vmul.f32 %v11191_v27, %v4108_v62  ;;  %v4153_v32 = vsel %vm305_vm11, %v4108_v62, 0.0  ;;  %v4107_v0 = vmul.f32 %v4559_v13, %v4090_v28  ;;  %v4163_v37 = vld [vmem:[#allocation4 + $0x28] sm:$0xff] }
 0x9f8   : > { %v1610_v22 = vadd.f32 %v1602_v53, %v1585_v35  ;;  %1632 = vst.msk [vmem:[#allocation3] sm:$0xff] %vm305_vm11, %v1630_v40  ;;  %1661 = vst.msk [vmem:[#allocation4 + $0x8] sm:$0xff] %vm305_vm11, %v1659_v54  ;;  %v4182_v34 = vsel %vm305_vm11, %v4169_v58, 0.0  ;;  %v4154_v52 = vadd.f32 %v4153_v32, %v10425_v23  ;;  %v4168_v56 = vmul.f32 %v11192_v38, %v4090_v28 }
 0x9f9   : > { %1660 = vst.msk [vmem:[#allocation4] sm:$0xff] %vm305_vm11, %v1658_v4  ;;  %v4132_v47 = vsel %vm305_vm11, %v4119_v2, 0.0  ;;  %v4118_v21 = vmul.f32 %v11192_v38, %v4107_v0  ;;  %v4146_v45 = vsel %vm305_vm11, %v4107_v0, 0.0  ;;  %v4183_v19 = vadd.f32 %v4182_v34, %v10428_v55  ;;  %v4538_v4 = vld [vmem:[%s6175_s28 + $0x78] sm:$0xff]  ;;  %v11195_v0 = vld [vmem:[#allocation32_spill] sm:$0xff] }
 0x9fa   : > { %1612 = vst.msk [vmem:[#allocation2] sm:$0xff] %vm305_vm11, %v1610_v22  ;;  %v4133_v39 = vadd.f32 %v4132_v47, %v10433_v24  ;;  %v4147_v5 = vadd.f32 %v4146_v45, %v10435_v10  ;;  %v4175_v23 = vsel %vm305_vm11, %v4168_v56, 0.0  ;;  %v4093_v51 = vsub.f32 1.0, %v5879_v33  ;;  %v4162_v33 = vld [vmem:[#allocation4 + $0x20] sm:$0xff]  ;;  %v2878_v56 = vld [vmem:[#allocation3 + $0x18] sm:$0xff] }
 0x9fb   : > { %v4125_v31 = vsel %vm305_vm11, %v4118_v21, 0.0  ;;  %v4176_v42 = vadd.f32 %v4175_v23, %v10439_v50  ;;  %v4092_v9 = vsub.f32 1.0, %v5881_v43  ;;  %5882 = vtanh.f32 %v10497_v61  ;;  %v4537_v21 = vld [vmem:[%s6175_s28 + $0x70] sm:$0xff] }
 0x9fc   : > { %v4126_v55 = vadd.f32 %v4125_v31, %v10441_v12  ;;  %v4110_v26 = vmul.f32 %v4562_v20, %v4093_v51  ;;  %v4171_v6 = vmul.f32 %v11193_v18, %v4093_v51  ;;  %v2804_v24 = vmul.f32 0.16666667, %v2796_v25  ;;  %v4113_v12 = vld [vmem:[#allocation2 + $0x28] sm:$0xff]  ;;  %v4112_v25 = vld [vmem:[#allocation2 + $0x20] sm:$0xff] }
 0x9fd   : > { %v4109_v28 = vmul.f32 %v4561_v14, %v4092_v9  ;;  %v4170_v36 = vmul.f32 %v11194_v8, %v4092_v9  ;;  %v4237_v47 = vld [vmem:[#allocation3 + $0x8] sm:$0xff] }
 0x9fe   : > { %v4121_v10 = vmul.f32 %v11193_v18, %v4110_v26  ;;  %v4155_v49 = vsel %vm305_vm11, %v4110_v26, 0.0  ;;  %v4184_v7 = vsel %vm305_vm11, %v4171_v6, 0.0  ;;  %v2812_v44 = vmul.f32 5.0, %v2804_v24 }
 0x9ff   : > { %v4120_v30 = vmul.f32 %v11194_v8, %v4109_v28  ;;  %v4148_v50 = vsel %vm305_vm11, %v4109_v28, 0.0  ;;  %v4156_v29 = vadd.f32 %v4155_v49, %v4154_v52  ;;  %v4177_v53 = vsel %vm305_vm11, %v4170_v36, 0.0  ;;  %v4236_v23 = vld [vmem:[#allocation3] sm:$0xff]  ;;  %v4277_v14 = vld [vmem:[#allocation4 + $0x8] sm:$0xff] }
 0xa00   : > { %v4134_v61 = vsel %vm305_vm11, %v4121_v10, 0.0  ;;  %v4149_v41 = vadd.f32 %v4148_v50, %v4147_v5  ;;  %v4185_v40 = vadd.f32 %v4184_v7, %v4183_v19  ;;  %v4178_v54 = vadd.f32 %v4177_v53, %v4176_v42  ;;  %v2849_v19 = vld [vmem:[#allocation2 + $0x18] sm:$0xff]  ;;  %v4194_v5 = vld [vmem:[#allocation2 + $0x8] sm:$0xff]  ;;  %v4276_v9 = vld [vmem:[#allocation4] sm:$0xff] }
 0xa01   : > { %v4127_v17 = vsel %vm305_vm11, %v4120_v30, 0.0  ;;  %v4135_v15 = vadd.f32 %v4134_v61, %v4133_v39  ;;  %v4158_v1 = vadd.f32 %v4156_v29, %v4142_v57  ;;  %5884 = vtanh.f32 %v2812_v44  ;;  %v2899_v39 = vld [vmem:[#allocation4 + $0x18] sm:$0xff]  ;;  %v4193_v50 = vld [vmem:[#allocation2] sm:$0xff]  ;;  %v11196_v57 = vld [vmem:[#allocation31_spill] sm:$0xff] }
 0xa02   : > { %v4128_v13 = vadd.f32 %v4127_v17, %v4126_v55  ;;  %v4157_v35 = vadd.f32 %v4149_v41, %v4141_v63  ;;  %v4187_v27 = vadd.f32 %v4185_v40, %v4163_v37  ;;  %v4186_v58 = vadd.f32 %v4178_v54, %v4162_v33  ;;  %v2898_v33 = vld [vmem:[#allocation4 + $0x10] sm:$0xff] }
 0xa03   : > { %v4137_v59 = vadd.f32 %v4135_v15, %v4113_v12  ;;  %4160 = vst.msk [vmem:[#allocation3 + $0x28] sm:$0xff] %vm305_vm11, %v4158_v1  ;;  %v4242_v30 = vsel %vm305_vm11, %v4236_v23, 0.0  ;;  %v4243_v63 = vsel %vm305_vm11, %v4237_v47, 0.0  ;;  %v4282_v36 = vsel %vm305_vm11, %v4276_v9, 0.0 }
 0xa04   : > { %v4136_v62 = vadd.f32 %v4128_v13, %v4112_v25  ;;  %4159 = vst.msk [vmem:[#allocation3 + $0x20] sm:$0xff] %vm305_vm11, %v4157_v35  ;;  %4189 = vst.msk [vmem:[#allocation4 + $0x28] sm:$0xff] %vm305_vm11, %v4187_v27  ;;  %v2877_v13 = vld [vmem:[#allocation3 + $0x10] sm:$0xff]  ;;  %v4199_v1 = vsel %vm305_vm11, %v4193_v50, 0.0  ;;  %v4244_v40 = vadd.f32 %v4243_v63, %v4242_v30  ;;  %v2848_v27 = vld [vmem:[#allocation2 + $0x10] sm:$0xff] }
 0xa05   : > { %4139 = vst.msk [vmem:[#allocation2 + $0x28] sm:$0xff] %vm305_vm11, %v4137_v59  ;;  %4188 = vst.msk [vmem:[#allocation4 + $0x20] sm:$0xff] %vm305_vm11, %v4186_v58 }
 0xa06   : > { %4138 = vst.msk [vmem:[#allocation2 + $0x20] sm:$0xff] %vm305_vm11, %v4136_v62 }
 0xa08   : > { %v5883_v43 = vpop.eup %5882 }
 0xa09   : > { %v2829_v2 = vsub.f32 1.0, %v5883_v43 }
 0xa0a   : > { %v4241_v26 = vld [vmem:[#allocation3 + $0x28] sm:$0xff] }
 0xa0b   : > { %v2846_v32 = vmul.f32 %v4538_v4, %v2829_v2  ;;  %v2907_v22 = vmul.f32 %v11195_v0, %v2829_v2  ;;  %v4240_v55 = vld [vmem:[#allocation3 + $0x20] sm:$0xff]  ;;  %v4281_v24 = vld [vmem:[#allocation4 + $0x28] sm:$0xff]  ;;  %v4261_v61 = vsel %vm305_vm11, %v4241_v26, 0.0 }
 0xa0c   : > { %v4198_v6 = vld [vmem:[#allocation2 + $0x28] sm:$0xff]  ;;  %v4280_v28 = vld [vmem:[#allocation4 + $0x20] sm:$0xff]  ;;  %v4260_v29 = vsel %vm305_vm11, %v4240_v55, 0.0  ;;  %v4301_v17 = vsel %vm305_vm11, %v4281_v24, 0.0 }
 0xa0d   : > { %v2857_v34 = vmul.f32 %v11195_v0, %v2846_v32  ;;  %v2891_v52 = vsel %vm305_vm11, %v2846_v32, 0.0  ;;  %v2920_v38 = vsel %vm305_vm11, %v2907_v22, 0.0  ;;  %v4218_v7 = vsel %vm305_vm11, %v4198_v6, 0.0 }
 0xa0e   : > { %v2892_v20 = vadd.f32 %v2891_v52, %v10507_v16  ;;  %v2921_v31 = vadd.f32 %v2920_v38, %v10519_v11  ;;  %v5885_v42 = vpop.eup %5884  ;;  %v4200_v16 = vsel %vm305_vm11, %v4194_v5, 0.0  ;;  %v4197_v11 = vld [vmem:[#allocation2 + $0x20] sm:$0xff]  ;;  %v4300_v25 = vsel %vm305_vm11, %v4280_v28, 0.0 }
 0xa0f   : > { %v2870_v45 = vsel %vm305_vm11, %v2857_v34, 0.0  ;;  %v2828_v10 = vsub.f32 1.0, %v5885_v42  ;;  %v4217_v15 = vsel %vm305_vm11, %v4197_v11, 0.0  ;;  %v4262_v37 = vadd.f32 %v4261_v61, %v4260_v29 }
 0xa10   : > { %v2871_v51 = vadd.f32 %v2870_v45, %v10523_v3  ;;  %v2894_v18 = vadd.f32 %v2892_v20, %v2878_v56  ;;  %v2923_v8 = vadd.f32 %v2921_v31, %v2899_v39  ;;  %v4283_v3 = vsel %vm305_vm11, %v4277_v14, 0.0 }
 0xa11   : > { %v2845_v12 = vmul.f32 %v4537_v21, %v2828_v10  ;;  %v2906_v41 = vmul.f32 %v11196_v57, %v2828_v10  ;;  %v4302_v54 = vadd.f32 %v4301_v17, %v4300_v25  ;;  %v4284_v43 = vadd.f32 %v4283_v3, %v4282_v36 }
 0xa12   : > { %v2873_v49 = vadd.f32 %v2871_v51, %v2849_v19  ;;  %2896 = vst.msk [vmem:[#allocation3 + $0x18] sm:$0xff] %vm305_vm11, %v2894_v18  ;;  %2925 = vst.msk [vmem:[#allocation4 + $0x18] sm:$0xff] %vm305_vm11, %v2923_v8  ;;  %v4219_v4 = vadd.f32 %v4218_v7, %v4217_v15  ;;  %v4201_v0 = vadd.f32 %v4200_v16, %v4199_v1  ;;  %v4263_v34 = vrot.slane %v4262_v37, 4 }
 0xa13   : > { %v2856_v44 = vmul.f32 %v11196_v57, %v2845_v12  ;;  %v2884_v35 = vsel %vm305_vm11, %v2845_v12, 0.0  ;;  %v2913_v59 = vsel %vm305_vm11, %v2906_v41, 0.0  ;;  %v4303_v38 = vrot.slane %v4302_v54, 4 }
 0xa14   : > { %2875 = vst.msk [vmem:[#allocation2 + $0x18] sm:$0xff] %vm305_vm11, %v2873_v49  ;;  %v2885_v62 = vadd.f32 %v2884_v35, %v10513_v48  ;;  %v2914_v53 = vadd.f32 %v2913_v59, %v10516_v46  ;;  %v4245_v48 = vrot.slane %v4244_v40, 4  ;;  %v4285_v46 = vrot.slane %v4284_v43, 4 }
 0xa15   : > { %v2863_v58 = vsel %vm305_vm11, %v2856_v44, 0.0  ;;  %v4220_v56 = vrot.slane %v4219_v4, 4  ;;  %v4202_v47 = vrot.slane %v4201_v0, 4  ;;  %v4264_v45 = vadd.f32 %v4263_v34, %v4262_v37 }
 0xa16   : > { %v2864_v2 = vadd.f32 %v2863_v58, %v10528_v60  ;;  %v2893_v32 = vadd.f32 %v2885_v62, %v2877_v13  ;;  %v2922_v22 = vadd.f32 %v2914_v53, %v2898_v33  ;;  %v4246_v60 = vadd.f32 %v4245_v48, %v4244_v40 }
 0xa17   : > { %v4304_v20 = vadd.f32 %v4303_v38, %v4302_v54  ;;  %v4286_v5 = vadd.f32 %v4285_v46, %v4284_v43  ;;  %v4221_v23 = vadd.f32 %v4220_v56, %v4219_v4  ;;  %v4203_v51 = vadd.f32 %v4202_v47, %v4201_v0 }
 0xa18   : > { %v2872_v52 = vadd.f32 %v2864_v2, %v2848_v27  ;;  %2895 = vst.msk [vmem:[#allocation3 + $0x10] sm:$0xff] %vm305_vm11, %v2893_v32  ;;  %2924 = vst.msk [vmem:[#allocation4 + $0x10] sm:$0xff] %vm305_vm11, %v2922_v22  ;;  %v4265_v9 = vrot.slane %v4264_v45, 2  ;;  %v4247_v6 = vrot.slane %v4246_v60, 2 }
 0xa19   : > { %v4239_v21 = vld [vmem:[#allocation3 + $0x18] sm:$0xff]  ;;  %v4279_v19 = vld [vmem:[#allocation4 + $0x18] sm:$0xff]  ;;  %v4305_v28 = vrot.slane %v4304_v20, 2  ;;  %v4287_v8 = vrot.slane %v4286_v5, 2  ;;  %v4222_v16 = vrot.slane %v4221_v23, 2  ;;  %v4204_v3 = vrot.slane %v4203_v51, 2 }
 0xa1a   : > { %2874 = vst.msk [vmem:[#allocation2 + $0x10] sm:$0xff] %vm305_vm11, %v2872_v52  ;;  %v4252_v14 = vsel %vm305_vm11, %v4239_v21, 0.0  ;;  %v4292_v42 = vsel %vm305_vm11, %v4279_v19, 0.0  ;;  %v4266_v29 = vadd.f32 %v4265_v9, %v4264_v45  ;;  %v4248_v12 = vadd.f32 %v4247_v6, %v4246_v60 }
 0xa1b   : > { %v4196_v39 = vld [vmem:[#allocation2 + $0x18] sm:$0xff]  ;;  %v4306_v57 = vadd.f32 %v4305_v28, %v4304_v20  ;;  %v4288_v7 = vadd.f32 %v4287_v8, %v4286_v5  ;;  %v4223_v25 = vadd.f32 %v4222_v16, %v4221_v23  ;;  %v4205_v15 = vadd.f32 %v4204_v3, %v4203_v51 }
 0xa1c   : > { %v4209_v55 = vsel %vm305_vm11, %v4196_v39, 0.0  ;;  %v4267_v35 = vrot.slane %v4266_v29, 1  ;;  %v4249_v1 = vrot.slane %v4248_v12, 1 }
 0xa1d   : > { %v4307_v37 = vrot.slane %v4306_v57, 1  ;;  %v4289_v53 = vrot.slane %v4288_v7, 1  ;;  %v4224_v40 = vrot.slane %v4223_v25, 1  ;;  %v4206_v27 = vrot.slane %v4205_v15, 1 }
 0xa1e   : > { %v4268_v4 = vadd.f32 %v4267_v35, %v4266_v29  ;;  %v4250_v32 = vadd.f32 %v4249_v1, %v4248_v12 }
 0xa1f   : > { %v4238_v31 = vld [vmem:[#allocation3 + $0x10] sm:$0xff]  ;;  %v4278_v18 = vld [vmem:[#allocation4 + $0x10] sm:$0xff]  ;;  %v4308_v0 = vadd.f32 %v4307_v37, %v4306_v57  ;;  %v4290_v52 = vadd.f32 %v4289_v53, %v4288_v7  ;;  %v4225_v48 = vadd.f32 %v4224_v40, %v4223_v25  ;;  %v4207_v46 = vadd.f32 %v4206_v27, %v4205_v15 }
 0xa20   : > { %v4251_v26 = vsel %vm305_vm11, %v4238_v31, 0.0  ;;  %v4291_v49 = vsel %vm305_vm11, %v4278_v18, 0.0 }
 0xa21   : > { %v4195_v24 = vld [vmem:[#allocation2 + $0x10] sm:$0xff]  ;;  %v4253_v10 = vadd.f32 %v4252_v14, %v4251_v26  ;;  %v4293_v63 = vadd.f32 %v4292_v42, %v4291_v49 }
 0xa22   : > { %v4208_v30 = vsel %vm305_vm11, %v4195_v24, 0.0 }
 0xa23   : > { %v4210_v11 = vadd.f32 %v4209_v55, %v4208_v30  ;;  %v4254_v50 = vrot.slane %v4253_v10, 4  ;;  %v4294_v61 = vrot.slane %v4293_v63, 4 }
 0xa25   : > { %v4211_v41 = vrot.slane %v4210_v11, 4  ;;  %v4255_v36 = vadd.f32 %v4254_v50, %v4253_v10  ;;  %v4295_v17 = vadd.f32 %v4294_v61, %v4293_v63 }
 0xa27   : > { %v4212_v44 = vadd.f32 %v4211_v41, %v4210_v11  ;;  %v4256_v13 = vrot.slane %v4255_v36, 2  ;;  %v4296_v59 = vrot.slane %v4295_v17, 2 }
 0xa29   : > { %v4213_v62 = vrot.slane %v4212_v44, 2  ;;  %v4257_v33 = vadd.f32 %v4256_v13, %v4255_v36  ;;  %v4297_v54 = vadd.f32 %v4296_v59, %v4295_v17 }
 0xa2b   : > { %v4214_v58 = vadd.f32 %v4213_v62, %v4212_v44  ;;  %v4258_v43 = vrot.slane %v4257_v33, 1  ;;  %v4298_v2 = vrot.slane %v4297_v54, 1 }
 0xa2d   : > { %v4215_v22 = vrot.slane %v4214_v58, 1  ;;  %v4259_v34 = vadd.f32 %v4258_v43, %v4257_v33  ;;  %v4299_v38 = vadd.f32 %v4298_v2, %v4297_v54 }
 0xa2f   : > { %v4216_v56 = vadd.f32 %v4215_v22, %v4214_v58  ;;  %v4272_v47 = vsel %vm4229_vm8, %v4259_v34, %v4250_v32  ;;  %v4312_v45 = vsel %vm4229_vm8, %v4299_v38, %v4290_v52 }
 0xa30   : > { %v4273_v21 = vsel %vm4231_vm9, %v4268_v4, %v4272_v47  ;;  %v4313_v60 = vsel %vm4231_vm9, %v4308_v0, %v4312_v45 }
 0xa31   : > { %v4230_v19 = vsel %vm4229_vm8, %v4216_v56, %v4207_v46  ;;  %4275 = vst.msk [vmem:[%s296_s6] sm:$0x7] %vm4234_vm10, %v4273_v21  ;;  %4315 = vst.msk [vmem:[%s300_s10] sm:$0x7] %vm4234_vm10, %v4313_v60 }
 0xa32   : > { %v4232_v20 = vsel %vm4231_vm9, %v4225_v48, %v4230_v19 }
 0xa33   : > { %4235 = vst.msk [vmem:[%s292_s23] sm:$0x7] %vm4234_vm10, %v4232_v20 }
 0xa34 PF: > { %s21_s20 = sadd.s32 1, %s6044_s20   ;;  %s11197_s15 = smov %s6028_s16 }
 0xa35   : > { %p18_p9 = scmp.ge.s32.totalorder %s21_s20, 4   ;;  %s11198_s16 = smov %s6032_s17 }
 0xa36   : > { %s11199_s17 = smov %s6127_s26  ;;  %s11200_s18 = smov %s6040_s19 }
 0xa37   : > { %s11201_s19 = smov %s11203_s22  ;;  %20 = sbr.rel (!%p18_p9) target bundleno = 6 (0x6), region = 121 }
 0xa3c   :  { %4363 = vsyncpa [#allocation6], 1 }
 0xa3d   :  { %4365 = vsyncpa [#allocation6 + $0x1], 1 }
 0xa3e   :  { %4366 = vsyncpa [#allocation8], 1 }
 0xa3f   :  { %4368 = vsyncpa [#allocation8 + $0x1], 1 }

</bundles_post_ra>
